<compile_context>
chip_gen: v6e
topology: v6e:2x2x1
jax: 0.10.0
libtpu: 0.0.40
codegen_flags: <defaults>
</compile_context>

<pallas_src>
import jax
import jax.numpy as jnp
from jax import lax
from jax.experimental import pallas as pl
from jax.experimental.pallas import tpu as pltpu

PI = 3.1415927410125732  # same constant as the PyTorch module


def _round_up(x, m):
    return (x + m - 1) // m * m


# ---------------------------------------------------------------------------
# Fused PositionalMapping + in_net (Linear)
# ---------------------------------------------------------------------------
def _fused_kernel_factory(L, out_dim, k_pad, precision):
    def kernel(x_ref, w_ref, b_ref, ps_ref, o_ref):
        # x_ref : (D, tile_n)   raw features, tokens on the lane axis
        # w_ref : (k_pad, H)    resident weights (1/scale folded, zero-padded)
        # b_ref : (1, H)        resident bias
        # ps_ref: (D, 1)        resident column = pi * scale_d
        x = x_ref[...].astype(jnp.float32)
        xs = x * ps_ref[...]                       # theta base: pi * scale * x

        # h = [x, sin(2^i theta), cos(2^i theta), ...] concatenated along the
        # sublane (feature) axis: each D-row piece is vreg-aligned, so the
        # concat is plain register/VMEM copies (no lane shuffling, no masked
        # stores) and never leaves VMEM.
        parts = [x]
        for i in range(L):
            theta = xs if i == 0 else (2.0 ** i) * xs   # exact, direct sin/cos
            parts.append(jnp.sin(theta))
            parts.append(jnp.cos(theta))
        if k_pad > out_dim:
            parts.append(jnp.zeros((k_pad - out_dim, x.shape[1]), jnp.float32))
        expanded = jnp.concatenate(parts, axis=0)       # (k_pad, tile_n)

        # (tile_n, H) = expanded^T @ W : contraction over dim 0 of both
        # operands, so the lane-dense expanded tile feeds the MXU directly.
        acc = lax.dot_general(
            expanded, w_ref[...],
            dimension_numbers=(((0,), (0,)), ((), ())),
            preferred_element_type=jnp.float32,
            precision=precision)
        o_ref[...] = (acc + b_ref[...]).astype(o_ref.dtype)

    return kernel


def _pick_tile_n(n_tokens, D, H, k_pad, target=8192,
                 budget_bytes=28 * 1024 * 1024):
    """Largest token tile (<= target) whose estimated VMEM footprint fits.

    target=8192 amortizes the ~0.35 us per-grid-step overhead on every
    generation; the 28 MiB budget (under a 48 MiB scoped limit) keeps the
    footprint inside v7x's 64 MiB VMEM.  On v5e/v6e (128 MiB) a larger
    target/budget can be passed if profiling shows step overhead.
    """
    tile = max(128, int(target))
    while tile > 128:
        need = (2 * D * tile * 4          # double-buffered input block
                + 2 * tile * H * 4        # double-buffered output block
                + k_pad * H * 4           # resident (folded) weights
                + k_pad * tile * 6        # expanded tile + matmul staging
                + 6 * D * tile * 4)       # per-octave temporaries
        if need <= budget_bytes:
            break
        tile //= 2
    tile = max(128, tile)
    # small problems: one exact full-array block (no padding, no partial tile)
    return n_tokens if n_tokens <= tile else tile


def posmap_in_net_fused(x, w, b, *, L=5, pos_scale=0.01, heading_scale=1.0,
                        tile_n=8192, precision=None, out_dtype=None):
    """Fused PositionalMapping(L) + nn.Linear(in_net).

    x: (B, S, D) raw features, w: (D*(2L+1), H), b: (H,).
    Returns (B, S, H) == PositionalMapping(x) @ w + b.
    `precision` is passed to the matmul (None -> fast MXU default;
    jax.lax.Precision.HIGHEST for fp32 parity).
    """
    B, S, D = x.shape
    out_dim = D * (2 * L + 1)
    H = w.shape[-1]
    assert w.shape == (out_dim, H), (w.shape, out_dim, H)
    N = B * S
    out_dtype = x.dtype if out_dtype is None else out_dtype

    if L == 0:
        return transformer_in_net(x, w, b, out_dtype=out_dtype)

    # Per-feature scale: first 10 features are positions, the rest headings.
    # TODO(synk): the `< 10` pos/heading split is hardcoded as in the module.
    feat = jnp.arange(D)
    scale = jnp.where(feat < 10, pos_scale, heading_scale).astype(jnp.float32)

    # Fold the post-sin 1/scale into the harmonic weight rows (wrapper-side,
    # tiny), and zero-pad the contraction dim to a lane/MXU-friendly multiple.
    row_scale = jnp.concatenate(
        [jnp.ones((D,), jnp.float32)] + [1.0 / scale] * (2 * L))   # (out_dim,)
    k_pad = _round_up(out_dim, 128)
    wf = w.astype(jnp.float32) * row_scale[:, None]
    wf = jnp.pad(wf, ((0, k_pad - out_dim), (0, 0)))               # (k_pad, H)

    pscale = (PI * scale).reshape(D, 1)                            # tiny column
    b2 = b.astype(jnp.float32).reshape(1, H)

    # Tokens on the lane axis.  This D-wide input transpose is ~1/11 of the
    # expanded tensor the unfused version pushed through HBM multiple times;
    # the big output transpose is gone entirely (output is (N, H) directly).
    x_t = jnp.transpose(x.reshape(N, D))                           # (D, N)

    tile = _pick_tile_n(N, D, H, k_pad, target=tile_n)
    grid = (pl.cdiv(N, tile),)

    kernel = _fused_kernel_factory(L, out_dim, k_pad, precision)
    cost = pl.CostEstimate(
        flops=2 * N * k_pad * H + 8 * L * N * D,
        transcendentals=2 * L * N * D,
        bytes_accessed=(N * D * x.dtype.itemsize + k_pad * H * 4 + H * 4
                        + N * H * jnp.dtype(out_dtype).itemsize),
    )

    out = pl.pallas_call(
        kernel,
        out_shape=jax.ShapeDtypeStruct((N, H), out_dtype),
        grid=grid,
        in_specs=[
            pl.BlockSpec((D, tile), lambda i: (0, i)),      # streamed tokens
            pl.BlockSpec((k_pad, H), lambda i: (0, 0)),     # resident weights
            pl.BlockSpec((1, H), lambda i: (0, 0)),         # resident bias
            pl.BlockSpec((D, 1), lambda i: (0, 0)),         # resident pi*scale
        ],
        out_specs=pl.BlockSpec((tile, H), lambda i: (i, 0)),
        compiler_params=pltpu.CompilerParams(
            dimension_semantics=("parallel",),              # v7x megacore split
            vmem_limit_bytes=48 * 1024 * 1024,              # safe on 64 MiB v7x
        ),
        cost_estimate=cost,
    )(x_t, wf, b2, pscale)
    return out.reshape(B, S, H)


# ---------------------------------------------------------------------------
# Standalone Transformer.in_net (nn.Linear with bias)
# ---------------------------------------------------------------------------
def _linear_kernel(x_ref, w_ref, b_ref, o_ref):
    acc = jnp.dot(x_ref[...], w_ref[...], preferred_element_type=jnp.float32)
    o_ref[...] = (acc + b_ref[...]).astype(o_ref.dtype)


def transformer_in_net(x, w, b, *, tile_m=2048, out_dtype=None):
    """h = x @ w + b over (B, m_tokens, input_dim); w: (input_dim, H)."""
    B, S, F = x.shape
    H = w.shape[-1]
    N = B * S
    out_dtype = x.dtype if out_dtype is None else out_dtype

    if N <= tile_m:
        tile = N                                   # single exact block
    else:
        tile = max(128, (tile_m // 128) * 128)     # 128-aligned MXU-sized tiles
    grid = (pl.cdiv(N, tile),)

    x2 = x.reshape(N, F)
    out = pl.pallas_call(
        _linear_kernel,
        out_shape=jax.ShapeDtypeStruct((N, H), out_dtype),
        grid=grid,
        in_specs=[
            pl.BlockSpec((tile, F), lambda i: (i, 0)),
            pl.BlockSpec((F, H), lambda i: (0, 0)),         # resident weights
            pl.BlockSpec((1, H), lambda i: (0, 0)),          # resident bias
        ],
        out_specs=pl.BlockSpec((tile, H), lambda i: (i, 0)),
        compiler_params=pltpu.CompilerParams(
            dimension_semantics=("parallel",),
            vmem_limit_bytes=48 * 1024 * 1024,
        ),
        cost_estimate=pl.CostEstimate(
            flops=2 * N * F * H,
            transcendentals=0,
            bytes_accessed=(N * F * x.dtype.itemsize + F * H * w.dtype.itemsize
                            + H * 4 + N * H * jnp.dtype(out_dtype).itemsize),
        ),
    )(x2, w, b.reshape(1, H))
    return out.reshape(B, S, H)


# ---------------------------------------------------------------------------
# Pure-JAX reference (reproduces the PyTorch forward exactly)
# ---------------------------------------------------------------------------
def _reference_posmap(x, L=5, pos_scale=0.01, heading_scale=1.0):
    if L == 0:
        return x
    D = x.shape[-1]
    feat = jnp.arange(D)
    scale = jnp.where(feat < 10, pos_scale, heading_scale).astype(x.dtype)
    xs = x * scale
    h = [x]
    for i in range(L):
        h.append(jnp.sin((2.0 ** i) * PI * xs) / scale)
        h.append(jnp.cos((2.0 ** i) * PI * xs) / scale)
    return jnp.concatenate(h, axis=-1)


# ---------------------------------------------------------------------------
if __name__ == "__main__":
    key = jax.random.PRNGKey(0)
    k1, k2, k3, k4, k5 = jax.random.split(key, 5)

    # ---- fused PositionalMapping + in_net: single exact block (grid = 1) ----
    B, S, D, L, H = 2, 200, 16, 5, 128        # D > 10 exercises both scale groups
    out_dim = D * (2 * L + 1)                 # 176
    x = jax.random.normal(k1, (B, S, D), dtype=jnp.float32)
    w = jax.random.normal(k2, (out_dim, H), dtype=jnp.float32) / jnp.sqrt(
        float(out_dim))
    b = jnp.linspace(-0.1, 0.1, H, dtype=jnp.float32)

    h = jax.block_until_ready(posmap_in_net_fused(x, w, b, L=L))
    pm = _reference_posmap(x, L=L).reshape(-1, out_dim)
    h_ref = (jnp.dot(pm, w, precision=jax.lax.Precision.HIGHEST) + b
             ).reshape(B, S, H)
    assert h.shape == (B, S, H), h.shape
    # kernel matmul runs at the MXU's fast default (bf16-class) precision;
    # check against an f32-exact reference relative to the output magnitude.
    err = float(jnp.max(jnp.abs(h - h_ref)))
    ref_scale = float(jnp.max(jnp.abs(h_ref)))
    assert err <= 2.5e-2 * ref_scale + 1e-3, (err, ref_scale)

    # ---- fused kernel: multi-step pipelined grid (small forced tile) ----
    B2, S2 = 2, 192                            # N = 384 -> grid = (3,) @ 128
    x2 = jax.random.normal(k3, (B2, S2, D), dtype=jnp.float32)
    h2 = jax.block_until_ready(posmap_in_net_fused(x2, w, b, L=L, tile_n=128))
    pm2 = _reference_posmap(x2, L=L).reshape(-1, out_dim)
    h2_ref = (jnp.dot(pm2, w, precision=jax.lax.Precision.HIGHEST) + b
              ).reshape(B2, S2, H)
    err2 = float(jnp.max(jnp.abs(h2 - h2_ref)))
    ref2_scale = float(jnp.max(jnp.abs(h2_ref)))
    assert err2 <= 2.5e-2 * ref2_scale + 1e-3, (err2, ref2_scale)

    # ---- standalone Transformer.in_net (Linear) kernel ----
    batch, m_tokens, input_dim, hidden = 2, 8, 32, 128
    xt = jax.random.normal(k4, (batch, m_tokens, input_dim), dtype=jnp.float32)
    wl = jax.random.normal(k5, (input_dim, hidden), dtype=jnp.float32) / jnp.sqrt(
        float(input_dim))
    bl = jnp.linspace(-0.1, 0.1, hidden, dtype=jnp.float32)

    hl = jax.block_until_ready(transformer_in_net(xt, wl, bl))
    hl_ref = (jnp.dot(xt.reshape(-1, input_dim), wl,
                      precision=jax.lax.Precision.HIGHEST) + bl
              ).reshape(batch, m_tokens, hidden)
    assert hl.shape == (batch, m_tokens, hidden), hl.shape
    assert jnp.allclose(hl, hl_ref, atol=2e-2, rtol=2e-2), float(
        jnp.max(jnp.abs(hl - hl_ref)))

    print("KERNEL_OK")
</pallas_src>

<mosaic_0001>
module attributes {stable_mosaic.version = 11 : i64} {
  func.func @kernel(%arg0: i32, %arg1: memref<16x400xf32, #tpu.memory_space<vmem>>, %arg2: memref<256x128xf32, #tpu.memory_space<vmem>>, %arg3: memref<1x128xf32, #tpu.memory_space<vmem>>, %arg4: memref<16x1xf32, #tpu.memory_space<vmem>>, %arg5: memref<400x128xf32, #tpu.memory_space<vmem>>) attributes {dimension_semantics = [#tpu.dimension_semantics<parallel>], iteration_bounds = array<i64: 1>, scalar_prefetch = 0 : i64, scratch_operands = 0 : i64, tpu.core_type = #tpu.core_type<tc>, window_params = [{transform_indices = @transform_0, window_bounds = array<i64: 16, 400>}, {pipeline_mode = #tpu.pipeline_mode<synchronous>, transform_indices = @transform_1, window_bounds = array<i64: 256, 128>}, {pipeline_mode = #tpu.pipeline_mode<synchronous>, transform_indices = @transform_2, window_bounds = array<i64: 1, 128>}, {pipeline_mode = #tpu.pipeline_mode<synchronous>, transform_indices = @transform_3, window_bounds = array<i64: 16, 1>}, {transform_indices = @transform_4, window_bounds = array<i64: 400, 128>}]} {
    %c0 = arith.constant 0 : index
    %c0_0 = arith.constant 0 : index
    %0 = vector.load %arg1[%c0, %c0_0] : memref<16x400xf32, #tpu.memory_space<vmem>>, vector<16x400xf32>
    %c0_1 = arith.constant 0 : index
    %c0_2 = arith.constant 0 : index
    %1 = vector.load %arg4[%c0_1, %c0_2] : memref<16x1xf32, #tpu.memory_space<vmem>>, vector<16x1xf32>
    %2 = vector.broadcast %1 : vector<16x1xf32> to vector<16x400xf32>
    %3 = arith.mulf %0, %2 : vector<16x400xf32>
    %4 = math.sin %3 : vector<16x400xf32>
    %5 = math.cos %3 : vector<16x400xf32>
    %cst = arith.constant 2.000000e+00 : f32
    %6 = vector.broadcast %cst : f32 to vector<16x400xf32>
    %7 = arith.mulf %6, %3 : vector<16x400xf32>
    %8 = math.sin %7 : vector<16x400xf32>
    %9 = math.cos %7 : vector<16x400xf32>
    %cst_3 = arith.constant 4.000000e+00 : f32
    %10 = vector.broadcast %cst_3 : f32 to vector<16x400xf32>
    %11 = arith.mulf %10, %3 : vector<16x400xf32>
    %12 = math.sin %11 : vector<16x400xf32>
    %13 = math.cos %11 : vector<16x400xf32>
    %cst_4 = arith.constant 8.000000e+00 : f32
    %14 = vector.broadcast %cst_4 : f32 to vector<16x400xf32>
    %15 = arith.mulf %14, %3 : vector<16x400xf32>
    %16 = math.sin %15 : vector<16x400xf32>
    %17 = math.cos %15 : vector<16x400xf32>
    %cst_5 = arith.constant 1.600000e+01 : f32
    %18 = vector.broadcast %cst_5 : f32 to vector<16x400xf32>
    %19 = arith.mulf %18, %3 : vector<16x400xf32>
    %20 = math.sin %19 : vector<16x400xf32>
    %21 = math.cos %19 : vector<16x400xf32>
    %cst_6 = arith.constant 0.000000e+00 : f32
    %22 = vector.broadcast %cst_6 : f32 to vector<80x400xf32>
    %23 = tpu.concatenate %0, %4, %5, %8, %9, %12, %13, %16, %17, %20, %21, %22 in 0 : vector<16x400xf32>, vector<16x400xf32>, vector<16x400xf32>, vector<16x400xf32>, vector<16x400xf32>, vector<16x400xf32>, vector<16x400xf32>, vector<16x400xf32>, vector<16x400xf32>, vector<16x400xf32>, vector<16x400xf32>, vector<80x400xf32> -> vector<256x400xf32>
    %c0_7 = arith.constant 0 : index
    %c0_8 = arith.constant 0 : index
    %24 = vector.load %arg2[%c0_7, %c0_8] : memref<256x128xf32, #tpu.memory_space<vmem>>, vector<256x128xf32>
    %cst_9 = arith.constant dense<0.000000e+00> : vector<400x128xf32>
    %25 = tpu.matmul %23, %24, %cst_9 {dimension_numbers = #tpu.dot_dimension_numbers<[0], [0], [1], [1], [0, 1, 1, 1], [], []>} : vector<256x400xf32>, vector<256x128xf32>, vector<400x128xf32> -> vector<400x128xf32>
    %c0_10 = arith.constant 0 : index
    %c0_11 = arith.constant 0 : index
    %26 = vector.load %arg3[%c0_10, %c0_11] : memref<1x128xf32, #tpu.memory_space<vmem>>, vector<1x128xf32>
    %27 = vector.broadcast %26 : vector<1x128xf32> to vector<400x128xf32>
    %28 = arith.addf %25, %27 : vector<400x128xf32>
    %c0_12 = arith.constant 0 : index
    %c0_13 = arith.constant 0 : index
    %29 = vector.load %arg5[%c0_12, %c0_13] : memref<400x128xf32, #tpu.memory_space<vmem>>, vector<400x128xf32>
    tpu.vector_store %arg5[%c0_12, %c0_13], %28 {strides = array<i32>} : memref<400x128xf32, #tpu.memory_space<vmem>>, vector<400x128xf32>,
    return
  }
  func.func @transform_0(%arg0: i32) -> (i32, i32) {
    %c0_i32 = arith.constant 0 : i32
    %c0_i32_0 = arith.constant 0 : i32
    return %c0_i32, %arg0 : i32, i32
  }
  func.func @transform_1(%arg0: i32) -> (i32, i32) {
    %c0_i32 = arith.constant 0 : i32
    %c0_i32_0 = arith.constant 0 : i32
    %c0_i32_1 = arith.constant 0 : i32
    return %c0_i32, %c0_i32_0 : i32, i32
  }
  func.func @transform_2(%arg0: i32) -> (i32, i32) {
    %c0_i32 = arith.constant 0 : i32
    %c0_i32_0 = arith.constant 0 : i32
    %c0_i32_1 = arith.constant 0 : i32
    return %c0_i32, %c0_i32_0 : i32, i32
  }
  func.func @transform_3(%arg0: i32) -> (i32, i32) {
    %c0_i32 = arith.constant 0 : i32
    %c0_i32_0 = arith.constant 0 : i32
    %c0_i32_1 = arith.constant 0 : i32
    return %c0_i32, %c0_i32_0 : i32, i32
  }
  func.func @transform_4(%arg0: i32) -> (i32, i32) {
    %c0_i32 = arith.constant 0 : i32
    %c0_i32_0 = arith.constant 0 : i32
    return %arg0, %c0_i32 : i32, i32
  }
}

</mosaic_0001>

<bundles_post_ra>
// kernel: tpu_custom_call.1
= control target key start
LH: loop header
LB: loop body
LE: loop exit
PB: predicated region body
PF: predicated region fallthrough
CT: control target
= control target key end

     0   :  { %9 = vsyncpa [#allocation3], 0  ;;  %s14703_s0 = inlined_call_operand.hbm [shape: f32[16,400], index: 0, kind: input, shape index: {}]   ;;  %s14704_s1 = inlined_call_operand.hbm [shape: f32[256,128], index: 1, kind: input, shape index: {}]   ;;  %s14705_s2 = inlined_call_operand.vmem [shape: f32[1,128], index: 2, kind: input, shape index: {}]   ;;  %s14706_s3 = inlined_call_operand.vmem [shape: f32[16,1], index: 3, kind: input, shape index: {}]   ;;  %s14707_s4 = inlined_call_operand.hbm [shape: f32[400,128], index: 4, kind: output, shape index: {}]  }
   0x1   :  { %10 = vsyncpa [#allocation6], 0 }
   0x2   :  { %11 = vsyncpa [#allocation4], 0  ;;  %s10059_s15 = smov [#allocation2]  }
   0x3   :  { %s17_s16 = sshll.u32 %s10059_s15, 4  ;;  %s18_s16 = int_to_ptr.vmem [resolvable:$true] %s17_s16 }
   0x4   :  { %s10001_s17 = scalar_lea.vmem %s18_s16, 1024  ;;  %p10006_p1 = scmp.lt.s32.totalorder %s18_s16, %s18_s16 }
   0x5   :  { %p10002_p0 = scmp.ne.s32.totalorder %s18_s16, %s10001_s17  ;;  %p10007_p2 = scmp.lt.s32.totalorder %s10001_s17, %s10001_s17 }
   0x7   :  { %p10008_p3 = por %p10007_p2, %p10006_p1 }
   0x9   :  { %p10009_p4 = pnand %p10008_p3, %p10002_p0 }
   0xb   :  { %10012 = shalt.err (!%p10009_p4)
}
   0xc   :  { %s10060_s18 = smov 512   ;;  %s10061_s19 = smov 32  }
   0xd   :  { %23 = dma.hbm_to_vmem [thread:$0]  %s14703_s0, 1024, %s18_s16, [#allocation3], %s10060_s18, %s10060_s18, %s10061_s19  }
   0xe   :  { %s10062_s22 = smov [#allocation5]  }
   0xf   :  { %s29_s23 = sshll.u32 %s10062_s22, 4  ;;  %s30_s23 = int_to_ptr.vmem [resolvable:$true] %s29_s23 }
  0x10   :  { %s10021_s24 = scalar_lea.vmem %s30_s23, 4096  ;;  %p10026_p6 = scmp.lt.s32.totalorder %s30_s23, %s30_s23 }
  0x11   :  { %p10022_p5 = scmp.ne.s32.totalorder %s30_s23, %s10021_s24  ;;  %p10027_p7 = scmp.lt.s32.totalorder %s10021_s24, %s10021_s24 }
  0x13   :  { %p10028_p8 = por %p10027_p7, %p10026_p6 }
  0x15   :  { %p10029_p9 = pnand %p10028_p8, %p10022_p5 }
  0x17   :  { %10032 = shalt.err (!%p10029_p9)
}
  0x18   :  { %s10063_s25 = smov 128   ;;  %s10064_s26 = smov 8  }
  0x19   :  { %35 = dma.hbm_to_vmem [thread:$0]  %s14704_s1, 4096, %s30_s23, [#allocation6], %s10063_s25, %s10063_s25, %s10064_s26  }
  0x1a   :  { %10053 = dma.done.wait [#allocation3], 1024  }
  0x1b   :  { %10054 = vsyncadd [#allocation3], 4294966272 }
  0x1c   :  { %10055 = dma.done.wait [#allocation6], 4096  }
  0x1d   :  { %10056 = vsyncadd [#allocation6], 4294963200  ;;  %v10065_v0 = vmov 0   ;;  %v54_v1 = vld [vmem:[%s14706_s3] sm:$0xff]  ;;  %v55_v2 = vld [vmem:[%s14706_s3 + $0x8] sm:$0xff] }
  0x1e   :  { %9624 = vset.pattern.permute.xlu0 %v10065_v0  ;;  %v46_v3 = vld [vmem:[#allocation2] sm:$0xff]  ;;  %v47_v4 = vld [vmem:[#allocation2 + $0x8] sm:$0xff]  ;;  %v14749_v38 = vmov 683565275   ;;  %v14735_v42 = vmov 2475754826  }
  0x1f   :  { %58 = vperm.xlu0 %9624, %v54_v1   ;;  %v9717_v5 = vpack.i.bf16 %v46_v3, %v47_v4  ;;  %v10114_v6 = vld [vmem:[#allocation2 + $0x20] sm:$0xff]  ;;  %v10116_v7 = vld [vmem:[#allocation2 + $0x28] sm:$0xff]  ;;  %v14733_v44 = vmov 2131351028   ;;  %v14722_v46 = vmov 2102212464  }
  0x20   :  { %v9719_v8 = vpack.i.bf16 %v10114_v6, %v10116_v7  ;;  %v14751_v48 = vmov 920167782   ;;  %v14724_v55 = vmov 1326507024  }
  0x23   :  { %63 = vperm.xlu0 %9624, %v55_v2  }
  0x41   :  { %9718 = vxpose.xlu0.b32.start [1/16] %v9717_v5, 128 }
  0x45   :  { %9720 = vxpose.xlu0.b32.cont [2/16] %v9719_v8, 128 }
  0x9a   :  { %v10120_v9 = vpop.permute.xlu0 %58 }
  0x9b   :  { %v10123_v10 = vmul.f32 %v10120_v9, %v47_v4  ;;  %v10126_v11 = vmul.f32 %v10120_v9, %v46_v3 }
  0x9d   :  { %v74_v12 = vand.u32 2147483647, %v10126_v11  ;;  %v77_v13 = vand.u32 2139095040, %v10126_v11  ;;  %v178_v14 = vand.u32 2147483647, %v10123_v10  ;;  %v181_v15 = vand.u32 2139095040, %v10123_v10 }
  0x9e   :  { %v10137_v20 = vmul.f32 8.0, %v10126_v11  ;;  %vm76_vm13 = vcmp.lt.s32.totalorder %v10126_v11, 0 }
  0x9f   :  { %v78_v16 = vshrl.u32 %v77_v13, 23  ;;  %v182_v17 = vshrl.u32 %v181_v15, 23  ;;  %v81_v18 = vand.u32 8388607, %v74_v12  ;;  %v185_v19 = vand.u32 8388607, %v178_v14 }
  0xa0   :  { %v5069_v23 = vand.u32 2139095040, %v10137_v20 }
  0xa1   :  { %v9064_v21 = vadd.s32 4294967169, %v78_v16  ;;  %v9068_v22 = vadd.s32 4294967169, %v182_v17  ;;  %v82_v26 = vor.u32 8388608, %v81_v18  ;;  %v186_v27 = vor.u32 8388608, %v185_v19 }
  0xa2   :  { %v5070_v28 = vshrl.u32 %v5069_v23, 23 }
  0xa3   :  { %v84_v24 = vadd.s32 1, %v9064_v21  ;;  %v188_v25 = vadd.s32 1, %v9068_v22  ;;  %v10140_v34 = vshll.u32 %v82_v26, 8  ;;  %v10144_v36 = vshll.u32 %v186_v27, 8 }
  0xa4   :  { %v9256_v31 = vadd.s32 4294967169, %v5070_v28 }
  0xa5   :  { %vm85_vm0 = vcmp.gt.s32.totalorder %v84_v24, 0  ;;  %vm189_vm1 = vcmp.gt.s32.totalorder %v188_v25, 0 }
  0xa6   :  { %v86_v29 = vsel %vm85_vm0, %v84_v24, 0  ;;  %v190_v30 = vsel %vm189_vm1, %v188_v25, 0  ;;  %v10147_v41 = vadd.s32 1, %v9256_v31 }
  0xa7   :  { %v87_v32 = vshrl.u32 %v86_v29, 5  ;;  %v88_v33 = vand.u32 31, %v86_v29  ;;  %v10142_v35 = vshrl.u32 %v190_v30, 5  ;;  %v192_v40 = vand.u32 31, %v190_v30 }
  0xa8   :  { %vm5077_vm11 = vcmp.gt.s32.totalorder %v10147_v41, 0 }
  0xa9   :  { %v89_v37 = vsub.s32 32, %v88_v33  ;;  %v91_v39 = vshll.u32 %v14749_v38, %v88_v33  ;;  %v94_v43 = vshll.u32 %v14735_v42, %v88_v33  ;;  %v97_v45 = vshll.u32 %v14733_v44, %v88_v33 }
  0xaa   :  { %v100_v47 = vshll.u32 %v14722_v46, %v88_v33  ;;  %v103_v49 = vshll.u32 %v14751_v48, %v88_v33  ;;  %vm106_vm2 = vcmp.lt.s32.totalorder %v87_v32, 1  ;;  %vm107_vm3 = vcmp.lt.s32.totalorder %v87_v32, 2 }
  0xab   :  { %v92_v50 = vshrl.u32 %v14735_v42, %v89_v37  ;;  %v95_v51 = vshrl.u32 %v14733_v44, %v89_v37  ;;  %v98_v52 = vshrl.u32 %v14722_v46, %v89_v37  ;;  %v90_v53 = vshrl.u32 %v14749_v38, %v89_v37 }
  0xac   :  { %v101_v54 = vshrl.u32 %v14751_v48, %v89_v37  ;;  %v104_v56 = vshrl.u32 %v14724_v55, %v89_v37  ;;  %v193_v60 = vsub.s32 32, %v192_v40  ;;  %vm108_vm4 = vcmp.lt.s32.totalorder %v87_v32, 3 }
  0xad   :  { %v93_v57 = vor.u32 %v92_v50, %v91_v39  ;;  %v96_v58 = vor.u32 %v95_v51, %v94_v43  ;;  %v99_v59 = vor.u32 %v98_v52, %v97_v45  ;;  %vm109_vm5 = vcmp.lt.s32.totalorder %v87_v32, 4 }
  0xae   :  { %v102_v61 = vor.u32 %v101_v54, %v100_v47  ;;  %v105_v62 = vor.u32 %v104_v56, %v103_v49  ;;  %v195_v8 = vshll.u32 %v14749_v38, %v192_v40  ;;  %v196_v16 = vshrl.u32 %v14735_v42, %v193_v60 }
  0xaf   :  { %v110_v63 = vsel %vm106_vm2, %v90_v53, %v93_v57  ;;  %v111_v0 = vsel %vm109_vm5, %v99_v59, 2102212464  ;;  %v114_v1 = vsel %vm106_vm2, %v93_v57, %v96_v58  ;;  %v118_v2 = vsel %vm106_vm2, %v96_v58, %v99_v59 }
  0xb0   :  { %v112_v3 = vsel %vm108_vm4, %v96_v58, %v111_v0  ;;  %v115_v4 = vsel %vm109_vm5, %v102_v61, 920167782  ;;  %v119_v5 = vsel %vm109_vm5, %v105_v62, 1326507024  ;;  %v198_v17 = vshll.u32 %v14735_v42, %v192_v40 }
  0xb1   :  { %v116_v13 = vsel %vm108_vm4, %v99_v59, %v115_v4  ;;  %v120_v15 = vsel %vm108_vm4, %v102_v61, %v119_v5  ;;  %v113_v18 = vsel %vm107_vm3, %v110_v63, %v112_v3  ;;  %v199_v22 = vshrl.u32 %v14733_v44, %v193_v60 }
  0xb2   :  { %v117_v19 = vsel %vm107_vm3, %v114_v1, %v116_v13  ;;  %v121_v21 = vsel %vm107_vm3, %v118_v2, %v120_v15  ;;  %v197_v27 = vor.u32 %v196_v16, %v195_v8  ;;  %v201_v29 = vshll.u32 %v14733_v44, %v192_v40 }
  0xb3   :  { %v10170_v23 = vmul.u32.u64.low %v10140_v34, %v121_v21  ;;  %v10171_v24 = vmul.u32.u64.high %v10140_v34, %v121_v21, %v10170_v23  ;;  %v10174_v25 = vmul.u32.u64.low %v10140_v34, %v117_v19  ;;  %v10175_v26 = vmul.u32.u64.high %v10140_v34, %v117_v19, %v10174_v25 }
  0xb4   :  { %v200_v28 = vor.u32 %v199_v22, %v198_v17  ;;  %v202_v30 = vshrl.u32 %v14722_v46, %v193_v60  ;;  %v194_v31 = vshrl.u32 %v14749_v38, %v193_v60  ;;  %v204_v32 = vshll.u32 %v14722_v46, %v192_v40 }
  0xb5   :  { %v205_v33 = vshrl.u32 %v14751_v48, %v193_v60  ;;  %v208_v37 = vshrl.u32 %v14724_v55, %v193_v60  ;;  %v129_v39 = vmul.u32 %v10140_v34, %v113_v18  ;;  %v207_v45 = vshll.u32 %v14751_v48, %v192_v40 }
  0xb6   :  { %v203_v43 = vor.u32 %v202_v30, %v201_v29  ;;  %vm210_vm6 = vcmp.lt.s32.totalorder %v10142_v35, 1  ;;  %vm131_vm7 = vc.u32 %v10171_v24, %v10174_v25  ;;  %v132_v47 = vadd.s32 1, %v10175_v26 }
  0xb7   :  { %v206_v49 = vor.u32 %v205_v33, %v204_v32  ;;  %vm211_vm8 = vcmp.lt.s32.totalorder %v10142_v35, 2  ;;  %v209_v50 = vor.u32 %v208_v37, %v207_v45  ;;  %vm212_vm9 = vcmp.lt.s32.totalorder %v10142_v35, 3 }
  0xb8   :  { %vm213_vm10 = vcmp.lt.s32.totalorder %v10142_v35, 4  ;;  %v218_v51 = vsel %vm210_vm6, %v197_v27, %v200_v28  ;;  %v133_v34 = vsel %vm131_vm7, %v132_v47, %v10175_v26  ;;  %v222_v53 = vsel %vm210_vm6, %v200_v28, %v203_v43 }
  0xb9   :  { %v215_v52 = vsel %vm213_vm10, %v203_v43, 2102212464  ;;  %v219_v40 = vsel %vm213_vm10, %v206_v49, 920167782  ;;  %v134_v54 = vadd.s32 %v133_v34, %v129_v39  ;;  %v214_v56 = vsel %vm210_vm6, %v194_v31, %v197_v27 }
  0xba   :  { %v220_v57 = vsel %vm212_vm9, %v203_v43, %v219_v40  ;;  %v223_v58 = vsel %vm213_vm10, %v209_v50, 1326507024  ;;  %v216_v59 = vsel %vm212_vm9, %v200_v28, %v215_v52  ;;  %v5066_v4 = vand.u32 2147483647, %v10137_v20 }
  0xbb   :  { %v221_v60 = vsel %vm211_vm8, %v218_v51, %v220_v57  ;;  %v224_v61 = vsel %vm212_vm9, %v206_v49, %v223_v58  ;;  %v135_v62 = vadd.s32 536870912, %v134_v54  ;;  %v5078_v5 = vsel %vm5077_vm11, %v10147_v41, 0 }
  0xbc   :  { %v225_v63 = vsel %vm211_vm8, %v222_v53, %v224_v61  ;;  %v10200_v0 = vmul.u32.u64.low %v10144_v36, %v221_v60  ;;  %v10201_v1 = vmul.u32.u64.high %v10144_v36, %v221_v60, %v10200_v0  ;;  %v217_v13 = vsel %vm211_vm8, %v214_v56, %v216_v59 }
  0xbd   :  { %v10205_v2 = vmul.u32.u64.low %v10144_v36, %v225_v63  ;;  %v10206_v3 = vmul.u32.u64.high %v10144_v36, %v225_v63, %v10205_v2  ;;  %v10210_v8 = vshrl.u32 %v135_v62, 30  ;;  %v5080_v15 = vand.u32 31, %v5078_v5 }
  0xbe   :  { %v236_v17 = vadd.s32 1, %v10201_v1  ;;  %v233_v18 = vmul.u32 %v10144_v36, %v217_v13  ;;  %v5073_v19 = vand.u32 8388607, %v5066_v4  ;;  %v10223_v35 = vmul.f32 8.0, %v10123_v10 }
  0xbf   :  { %v137_v16 = vshll.u32 %v10210_v8, 30  ;;  %vm235_vm12 = vc.u32 %v10206_v3, %v10200_v0  ;;  %v5081_v21 = vsub.s32 32, %v5080_v15  ;;  %v5079_v39 = vshrl.u32 %v5078_v5, 5 }
  0xc0   :  { %v237_v22 = vsel %vm235_vm12, %v236_v17, %v10201_v1  ;;  %v5074_v28 = vor.u32 8388608, %v5073_v19  ;;  %v5173_v33 = vand.u32 2139095040, %v10223_v35  ;;  %v5083_v43 = vshll.u32 %v14749_v38, %v5080_v15 }
  0xc1   :  { %v138_v41 = vsub.s32 %v134_v54, %v137_v16  ;;  %v238_v23 = vadd.s32 %v237_v22, %v233_v18  ;;  %v5084_v29 = vshrl.u32 %v14735_v42, %v5081_v21  ;;  %v5087_v36 = vshrl.u32 %v14733_v44, %v5081_v21 }
  0xc2   :  { %v5090_v31 = vshrl.u32 %v14722_v46, %v5081_v21  ;;  %v5093_v32 = vshrl.u32 %v14751_v48, %v5081_v21  ;;  %v5086_v45 = vshll.u32 %v14735_v42, %v5080_v15  ;;  %v5089_v49 = vshll.u32 %v14733_v44, %v5080_v15 }
  0xc3   :  { %v140_v26 = vsub.s32 0, %v138_v41  ;;  %v239_v27 = vadd.s32 536870912, %v238_v23  ;;  %v5092_v50 = vshll.u32 %v14722_v46, %v5080_v15  ;;  %v5096_v51 = vshrl.u32 %v14724_v55, %v5081_v21 }
  0xc4   :  { %v130_v34 = vadd.s32 %v10174_v25, %v10171_v24  ;;  %v5085_v40 = vor.u32 %v5084_v29, %v5083_v43  ;;  %v5088_v53 = vor.u32 %v5087_v36, %v5086_v45  ;;  %v5091_v56 = vor.u32 %v5090_v31, %v5089_v49 }
  0xc5   :  { %v9065_v30 = vmin.u32 %v140_v26, %v138_v41  ;;  %v10230_v37 = vshrl.u32 %v239_v27, 30  ;;  %v5094_v57 = vor.u32 %v5093_v32, %v5092_v50  ;;  %v5095_v58 = vshll.u32 %v14751_v48, %v5080_v15 }
  0xc6   :  { %v160_v59 = vsub.s32 4, %v10210_v8  ;;  %v5082_v61 = vshrl.u32 %v14749_v38, %v5081_v21  ;;  %vm5098_vm14 = vcmp.lt.s32.totalorder %v5079_v39, 1  ;;  %vm5099_vm0 = vcmp.lt.s32.totalorder %v5079_v39, 2 }
  0xc7   :  { %v142_v47 = vclz %v9065_v30  ;;  %v241_v52 = vshll.u32 %v10230_v37, 30  ;;  %v5097_v24 = vor.u32 %v5096_v51, %v5095_v58  ;;  %vm5100_vm1 = vcmp.lt.s32.totalorder %v5079_v39, 3 }
  0xc8   :  { %vm5101_vm2 = vcmp.lt.s32.totalorder %v5079_v39, 4  ;;  %v5106_v63 = vsel %vm5098_vm14, %v5085_v40, %v5088_v53  ;;  %v5110_v18 = vsel %vm5098_vm14, %v5088_v53, %v5091_v56  ;;  %v5102_v27 = vsel %vm5098_vm14, %v5082_v61, %v5085_v40  ;;  %v10280_v61 = vpop.permute.xlu0 %63 }
  0xc9   :  { %v9066_v54 = vadd.s32 4294967294, %v142_v47  ;;  %v10243_v60 = vsub.s32 %v238_v23, %v241_v52  ;;  %v5103_v5 = vsel %vm5101_vm2, %v5091_v56, 2102212464  ;;  %v5107_v13 = vsel %vm5101_vm2, %v5094_v57, 920167782 }
  0xca   :  { %v5108_v17 = vsel %vm5100_vm1, %v5091_v56, %v5107_v13  ;;  %v5111_v23 = vsel %vm5101_vm2, %v5097_v24, 1326507024  ;;  %v5114_v29 = vshll.u32 %v5074_v28, 8  ;;  %v5174_v36 = vshrl.u32 %v5173_v33, 23 }
  0xcb   :  { %vm9067_vm15 = vcmp.lt.s32.totalorder %v9066_v54, 0  ;;  %v244_v62 = vsub.s32 0, %v10243_v60  ;;  %v5109_v22 = vsel %vm5099_vm0, %v5106_v63, %v5108_v17  ;;  %v5112_v32 = vsel %vm5100_vm1, %v5094_v57, %v5111_v23 }
  0xcc   :  { %v145_v25 = vsel %vm9067_vm15, 0, %v9066_v54  ;;  %v5113_v45 = vsel %vm5099_vm0, %v5110_v18, %v5112_v32  ;;  %v10256_v47 = vmul.u32.u64.low %v5114_v29, %v5109_v22  ;;  %v10257_v49 = vmul.u32.u64.high %v5114_v29, %v5109_v22, %v10256_v47 }
  0xcd   :  { %v146_v1 = vsub.s32 32, %v145_v25  ;;  %v150_v2 = vsub.s32 4294967266, %v145_v25  ;;  %v147_v15 = vshll.u32 %v138_v41, %v145_v25  ;;  %v9069_v16 = vmin.u32 %v244_v62, %v10243_v60 }
  0xce   :  { %v5104_v41 = vsel %vm5100_vm1, %v5088_v53, %v5103_v5  ;;  %v161_v51 = vsel %vm76_vm13, %v160_v59, %v10210_v8  ;;  %v10263_v28 = vmul.u32.u64.low %v5114_v29, %v5113_v45  ;;  %v10264_v33 = vmul.u32.u64.high %v5114_v29, %v5113_v45, %v10263_v28 }
  0xcf   :  { %v148_v19 = vshrl.u32 %v130_v34, %v146_v1  ;;  %v151_v21 = vadd.s32 127, %v150_v2  ;;  %v246_v26 = vclz %v9069_v16  ;;  %vm10268_vm3 = vcmp.le.f32.partialorder %v74_v12, 0.7853982 }
  0xd0   :  { %v5105_v52 = vsel %vm5099_vm0, %v5102_v27, %v5104_v41  ;;  %v9260_v40 = vadd.s32 4294967169, %v5174_v36  ;;  %v234_v56 = vadd.s32 %v10200_v0, %v10206_v3  ;;  %v10277_v8 = vsel %vm10268_vm3, 0, %v161_v51 }
  0xd1   :  { %v149_v30 = vor.u32 %v148_v19, %v147_v15  ;;  %v152_v31 = vshll.u32 %v151_v21, 23  ;;  %v9070_v43 = vadd.s32 4294967294, %v246_v26  ;;  %v5124_v12 = vadd.s32 1, %v10257_v49 }
  0xd2   :  { %v5121_v39 = vmul.u32 %v5114_v29, %v5105_v52  ;;  %vm5123_vm5 = vc.u32 %v10264_v33, %v10256_v47  ;;  %v5180_v25 = vadd.s32 1, %v9260_v40  ;;  %v264_v2 = vsub.s32 4, %v10230_v37 }
  0xd3   :  { %v153_v50 = vor.u32 4788187, %v152_v31  ;;  %vm9071_vm4 = vcmp.lt.s32.totalorder %v9070_v43, 0  ;;  %v156_v54 = vcvt.s32.f32 %v149_v30  ;;  %v5125_v63 = vsel %vm5123_vm5, %v5124_v12, %v10257_v49 }
  0xd4   :  { %v249_v57 = vsel %vm9071_vm4, 0, %v9070_v43  ;;  %v5126_v5 = vadd.s32 %v5125_v63, %v5121_v39  ;;  %vm5181_vm6 = vcmp.gt.s32.totalorder %v5180_v25, 0  ;;  %v10289_v13 = vmul.f32 %v10280_v61, %v10114_v6 }
  0xd5   :  { %v154_v53 = vand.u32 2147483647, %v153_v50  ;;  %v250_v58 = vsub.s32 32, %v249_v57  ;;  %v254_v59 = vsub.s32 4294967266, %v249_v57  ;;  %v251_v62 = vshll.u32 %v10243_v60, %v249_v57 }
  0xd6   :  { %v5182_v17 = vsel %vm5181_vm6, %v5180_v25, 0  ;;  %v5127_v60 = vadd.s32 536870912, %v5126_v5  ;;  %v5170_v19 = vand.u32 2147483647, %v10223_v35  ;;  %v167_v23 = vadd.s32 3, %v10277_v8 }
  0xd7   :  { %v157_v24 = vmul.f32 %v156_v54, %v154_v53  ;;  %v252_v0 = vshrl.u32 %v234_v56, %v250_v58  ;;  %v255_v3 = vadd.s32 127, %v254_v59  ;;  %v5184_v21 = vand.u32 31, %v5182_v17 }
  0xd8   :  { %vm180_vm7 = vcmp.lt.s32.totalorder %v10123_v10, 0  ;;  %v10302_v27 = vshrl.u32 %v5127_v60, 30  ;;  %vm10306_vm8 = vcmp.le.f32.partialorder %v178_v14, 0.7853982  ;;  %v5177_v32 = vand.u32 8388607, %v5170_v19 }
  0xd9   :  { %v158_v1 = vxor.u32 2147483648, %v157_v24  ;;  %v253_v15 = vor.u32 %v252_v0, %v251_v62  ;;  %v256_v16 = vshll.u32 %v255_v3, 23  ;;  %v265_v26 = vsel %vm180_vm7, %v264_v2, %v10230_v37 }
  0xda   :  { %v5185_v29 = vsub.s32 32, %v5184_v21  ;;  %v5129_v41 = vshll.u32 %v10302_v27, 30  ;;  %v490_v37 = vand.u32 2147483647, %v10289_v13  ;;  %v10315_v45 = vand.u32 3, %v167_v23 }
  0xdb   :  { %v159_v18 = vsel %vm76_vm13, %v158_v1, %v157_v24  ;;  %v257_v6 = vor.u32 4788187, %v256_v16  ;;  %v260_v31 = vcvt.s32.f32 %v253_v15  ;;  %v10319_v14 = vsel %vm10306_vm8, 0, %v265_v26 }
  0xdc   :  { %v162_v22 = vsel %vm10268_vm3, %v10126_v11, %v159_v18  ;;  %v5188_v43 = vshrl.u32 %v14735_v42, %v5185_v29  ;;  %v5187_v50 = vshll.u32 %v14749_v38, %v5184_v21  ;;  %v10322_v51 = vsub.s32 %v5126_v5, %v5129_v41 }
  0xdd   :  { %9829 = vcosq.f32 %v162_v22  ;;  %v258_v30 = vand.u32 2147483647, %v257_v6  ;;  %v5191_v28 = vshrl.u32 %v14733_v44, %v5185_v29  ;;  %v5194_v34 = vshrl.u32 %v14722_v46, %v5185_v29 }
  0xde   :  { %9831 = vsinq.f32 %v162_v22  ;;  %v5197_v52 = vshrl.u32 %v14751_v48, %v5185_v29  ;;  %v10327_v53 = vshrl.u32 %v5182_v17, 5  ;;  %v5196_v54 = vshll.u32 %v14722_v46, %v5184_v21 }
  0xdf   :  { %v261_v49 = vmul.f32 %v260_v31, %v258_v30  ;;  %v493_v56 = vand.u32 2139095040, %v10289_v13  ;;  %v5132_v57 = vsub.s32 0, %v10322_v51  ;;  %v5189_v58 = vor.u32 %v5188_v43, %v5187_v50 }
  0xe0   :  { %v5190_v59 = vshll.u32 %v14735_v42, %v5184_v21  ;;  %v5193_v12 = vshll.u32 %v14733_v44, %v5184_v21  ;;  %v5198_v39 = vor.u32 %v5197_v52, %v5196_v54  ;;  %v5199_v25 = vshll.u32 %v14751_v48, %v5184_v21 }
  0xe1   :  { %v262_v40 = vxor.u32 2147483648, %v261_v49  ;;  %v5200_v62 = vshrl.u32 %v14724_v55, %v5185_v29  ;;  %v9257_v3 = vmin.u32 %v5132_v57, %v10322_v51  ;;  %v5178_v2 = vor.u32 8388608, %v5177_v32 }
  0xe2   :  { %v5192_v63 = vor.u32 %v5191_v28, %v5190_v59  ;;  %v5195_v1 = vor.u32 %v5194_v34, %v5193_v12  ;;  %v494_v15 = vshrl.u32 %v493_v56, 23  ;;  %v271_v16 = vadd.s32 3, %v10319_v14 }
  0xe3   :  { %v263_v24 = vsel %vm180_vm7, %v262_v40, %v261_v49  ;;  %v5201_v5 = vor.u32 %v5200_v62, %v5199_v25  ;;  %vm5068_vm9 = vcmp.lt.s32.totalorder %v10137_v20, 0  ;;  %v5134_v17 = vclz %v9257_v3 }
  0xe4   :  { %v266_v0 = vsel %vm10306_vm8, %v10123_v10, %v263_v24  ;;  %vm5205_vm10 = vcmp.lt.s32.totalorder %v10327_v53, 4  ;;  %vm170_vm11 = vcmp.eq.s32.totalorder %v10315_v45, 0  ;;  %vm173_vm12 = vcmp.eq.s32.totalorder %v10315_v45, 2 }
  0xe5   :  { %9833 = vcosq.f32 %v266_v0  ;;  %v5122_v18 = vadd.s32 %v10256_v47, %v10264_v33  ;;  %vm5202_vm13 = vcmp.lt.s32.totalorder %v10327_v53, 1  ;;  %vm5204_vm14 = vcmp.lt.s32.totalorder %v10327_v53, 3 }
  0xe6   :  { %9835 = vsinq.f32 %v266_v0  ;;  %v5211_v60 = vsel %vm5205_vm10, %v5198_v39, 920167782  ;;  %v9258_v21 = vadd.s32 4294967294, %v5134_v17  ;;  %v5210_v22 = vsel %vm5202_vm13, %v5189_v58, %v5192_v63 }
  0xe7   :  { %v5212_v23 = vsel %vm5204_vm14, %v5195_v1, %v5211_v60  ;;  %v5214_v6 = vsel %vm5202_vm13, %v5192_v63, %v5195_v1  ;;  %vm10363_vm15 = vcmp.le.f32.partialorder %v5066_v4, 0.7853982  ;;  %v5152_v33 = vsub.s32 4, %v10302_v27 }
  0xe8   :  { %v5215_v36 = vsel %vm5205_vm10, %v5201_v5, 1326507024  ;;  %v5218_v30 = vshll.u32 %v5178_v2, 8  ;;  %v9080_v31 = vadd.s32 4294967169, %v494_v15  ;;  %vm169_vm0 = vcmp.lt.s32.totalorder %v10315_v45, 2 }
  0xe9   :  { %vm9259_vm1 = vcmp.lt.s32.totalorder %v9258_v21, 0  ;;  %v5186_v32 = vshrl.u32 %v14749_v38, %v5185_v29  ;;  %vm5203_vm2 = vcmp.lt.s32.totalorder %v10327_v53, 2  ;;  %v5216_v4 = vsel %vm5204_vm14, %v5198_v39, %v5215_v36 }
  0xea   :  { %v10359_v26 = vpop.eup %9829  ;;  %v5137_v43 = vsel %vm9259_vm1, 0, %v9258_v21  ;;  %v5207_v49 = vsel %vm5205_vm10, %v5195_v1, 2102212464  ;;  %v5213_v50 = vsel %vm5203_vm2, %v5210_v22, %v5212_v23  ;;  %v5217_v28 = vsel %vm5203_vm2, %v5214_v6, %v5216_v4 }
  0xeb   :  { %v10370_v41 = vpop.eup %9831  ;;  %v174_v52 = vxor.u32 2147483648, %v10359_v26  ;;  %v5138_v29 = vsub.s32 32, %v5137_v43  ;;  %v5142_v40 = vsub.s32 4294967266, %v5137_v43  ;;  %vm166_vm3 = vweird.f32 %v10126_v11 }
  0xec   :  { %v171_v34 = vxor.u32 2147483648, %v10370_v41  ;;  %v272_v54 = vand.u32 3, %v271_v16  ;;  %v5206_v56 = vsel %vm5202_vm13, %v5186_v32, %v5189_v58  ;;  %v5139_v12 = vshll.u32 %v10322_v51, %v5137_v43 }
  0xed   :  { %v10388_v57 = vmul.u32.u64.low %v5218_v30, %v5217_v28  ;;  %v10389_v59 = vmul.u32.u64.high %v5218_v30, %v5217_v28, %v10388_v57  ;;  %v5140_v24 = vshrl.u32 %v5122_v18, %v5138_v29  ;;  %v5143_v39 = vadd.s32 127, %v5142_v40 }
  0xee   :  { %v5208_v25 = vsel %vm5204_vm14, %v5192_v63, %v5207_v49  ;;  %v5153_v62 = vsel %vm5068_vm9, %v5152_v33, %v10302_v27  ;;  %v10397_v0 = vmul.u32.u64.low %v5218_v30, %v5213_v50  ;;  %v10398_v3 = vmul.u32.u64.high %v5218_v30, %v5213_v50, %v10397_v0 }
  0xef   :  { %v500_v1 = vadd.s32 1, %v9080_v31  ;;  %v172_v51 = vsel %vm170_vm11, %v10359_v26, %v171_v34  ;;  %v175_v58 = vsel %vm173_vm12, %v174_v52, %v10370_v41  ;;  %v5141_v63 = vor.u32 %v5140_v24, %v5139_v12 }
  0xf0   :  { %v5144_v2 = vshll.u32 %v5143_v39, 23  ;;  %vm273_vm4 = vcmp.lt.s32.totalorder %v272_v54, 2  ;;  %vm277_vm5 = vcmp.eq.s32.totalorder %v272_v54, 2  ;;  %v5209_v27 = vsel %vm5203_vm2, %v5206_v56, %v5208_v25 }
  0xf1   :  { %vm501_vm6 = vcmp.gt.s32.totalorder %v500_v1, 0  ;;  %v10417_v16 = vsel %vm10363_vm15, 0, %v5153_v62  ;;  %vm5227_vm7 = vc.u32 %v10389_v59, %v10397_v0  ;;  %v176_v60 = vsel %vm169_vm0, %v172_v51, %v175_v58 }
  0xf2   :  { %v10413_v5 = vpop.eup %9833  ;;  %v5145_v15 = vor.u32 4788187, %v5144_v2  ;;  %v502_v17 = vsel %vm501_vm6, %v500_v1, 0  ;;  %v5228_v21 = vadd.s32 1, %v10398_v3  ;;  %v5148_v33 = vcvt.s32.f32 %v5141_v63 }
  0xf3   :  { %v10421_v18 = vpop.eup %9835  ;;  %v14708_v53 = vxor.u32 2147483648, %v10413_v5  ;;  %v504_v22 = vand.u32 31, %v502_v17  ;;  %v5225_v36 = vmul.u32 %v5218_v30, %v5209_v27  ;;  %vm274_vm8 = vcmp.eq.s32.totalorder %v272_v54, 0 }
  0xf4   :  { %v275_v23 = vxor.u32 2147483648, %v10421_v18  ;;  %v5146_v6 = vand.u32 2147483647, %v5145_v15  ;;  %v5229_v32 = vsel %vm5227_vm7, %v5228_v21, %v10398_v3  ;;  %v177_v4 = vsel %vm166_vm3, nan, %v176_v60 }
  0xf5   :  { %v279_v31 = vsel %vm277_vm5, %v14708_v53, %v10421_v18  ;;  %v505_v45 = vsub.s32 32, %v504_v22  ;;  %v5230_v50 = vadd.s32 %v5229_v32, %v5225_v36  ;;  %vm270_vm10 = vweird.f32 %v10123_v10 }
  0xf6   :  { %v276_v43 = vsel %vm274_vm8, %v10413_v5, %v275_v23  ;;  %v5149_v49 = vmul.f32 %v5148_v33, %v5146_v6  ;;  %v5159_v28 = vadd.s32 3, %v10417_v16  ;;  %v497_v29 = vand.u32 8388607, %v490_v37 }
  0xf7   :  { %v280_v30 = vsel %vm273_vm4, %v276_v43, %v279_v31  ;;  %v5231_v57 = vadd.s32 536870912, %v5230_v50  ;;  %v10445_v12 = vshrl.u32 %v502_v17, 5  ;;  %v507_v39 = vshll.u32 %v14749_v38, %v504_v22 }
  0xf8   :  { %v281_v40 = vsel %vm270_vm10, nan, %v280_v30  ;;  %v5150_v56 = vxor.u32 2147483648, %v5149_v49  ;;  %v508_v25 = vshrl.u32 %v14735_v42, %v505_v45  ;;  %v511_v54 = vshrl.u32 %v14733_v44, %v505_v45 }
  0xf9   :  { %v9721_v24 = vpack.i.bf16 %v177_v4, %v281_v40  ;;  %v10452_v3 = vshrl.u32 %v5231_v57, 30  ;;  %v514_v1 = vshrl.u32 %v14722_v46, %v505_v45  ;;  %v517_v51 = vshrl.u32 %v14751_v48, %v505_v45 }
  0xfa   :  { %v5151_v62 = vsel %vm5068_vm9, %v5150_v56, %v5149_v49  ;;  %v516_v63 = vshll.u32 %v14722_v46, %v504_v22  ;;  %v519_v2 = vshll.u32 %v14751_v48, %v504_v22  ;;  %v520_v27 = vshrl.u32 %v14724_v55, %v505_v45 }
  0xfb   :  { %9722 = vxpose.xlu0.b32.cont [3/16] %v9721_v24, 128  ;;  %v5154_v58 = vsel %vm10363_vm15, %v10137_v20, %v5151_v62  ;;  %v5233_v15 = vshll.u32 %v10452_v3, 30  ;;  %v510_v17 = vshll.u32 %v14735_v42, %v504_v22  ;;  %v513_v60 = vshll.u32 %v14733_v44, %v504_v22 }
  0xfc   :  { %9837 = vcosq.f32 %v5154_v58  ;;  %v10467_v21 = vmul.f32 %v10280_v61, %v10116_v7  ;;  %v518_v47 = vor.u32 %v517_v51, %v516_v63  ;;  %v521_v6 = vor.u32 %v520_v27, %v519_v2 }
  0xfd   :  { %9839 = vsinq.f32 %v5154_v58  ;;  %v10469_v33 = vsub.s32 %v5230_v50, %v5233_v15  ;;  %v509_v36 = vor.u32 %v508_v25, %v507_v39  ;;  %v512_v31 = vor.u32 %v511_v54, %v510_v17 }
  0xfe   :  { %v515_v32 = vor.u32 %v514_v1, %v513_v60  ;;  %v498_v4 = vor.u32 8388608, %v497_v29  ;;  %v10471_v43 = vand.u32 3, %v5159_v28  ;;  %vm525_vm9 = vcmp.lt.s32.totalorder %v10445_v12, 4 }
  0xff   :  { %v5236_v49 = vsub.s32 0, %v10469_v33  ;;  %vm522_vm11 = vcmp.lt.s32.totalorder %v10445_v12, 1  ;;  %v531_v7 = vsel %vm525_vm9, %v518_v47, 920167782  ;;  %v535_v22 = vsel %vm525_vm9, %v521_v6, 1326507024 }
 0x100   :  { %v597_v50 = vand.u32 2139095040, %v10467_v21  ;;  %vm524_vm12 = vcmp.lt.s32.totalorder %v10445_v12, 3  ;;  %v530_v28 = vsel %vm522_vm11, %v509_v36, %v512_v31  ;;  %v534_v29 = vsel %vm522_vm11, %v512_v31, %v515_v32 }
 0x101   :  { %v9261_v30 = vmin.u32 %v5236_v49, %v10469_v33  ;;  %vm5172_vm13 = vcmp.lt.s32.totalorder %v10223_v35, 0  ;;  %v532_v40 = vsel %vm524_vm12, %v515_v32, %v531_v7  ;;  %v536_v56 = vsel %vm524_vm12, %v518_v47, %v535_v22 }
 0x102   :  { %v538_v57 = vshll.u32 %v498_v4, 8  ;;  %v506_v39 = vshrl.u32 %v14749_v38, %v505_v45  ;;  %vm523_vm14 = vcmp.lt.s32.totalorder %v10445_v12, 2  ;;  %v527_v25 = vsel %vm525_vm9, %v515_v32, 2102212464 }
 0x103   :  { %v5238_v24 = vclz %v9261_v30  ;;  %vm5161_vm15 = vcmp.lt.s32.totalorder %v10471_v43, 2  ;;  %v5256_v54 = vsub.s32 4, %v10452_v3  ;;  %v533_v62 = vsel %vm523_vm14, %v530_v28, %v532_v40 }
 0x104   :  { %v537_v1 = vsel %vm523_vm14, %v534_v29, %v536_v56  ;;  %v598_v51 = vshrl.u32 %v597_v50, 23  ;;  %vm5158_vm0 = vweird.f32 %v10137_v20  ;;  %vm10505_vm1 = vcmp.le.f32.partialorder %v5170_v19, 0.7853982 }
 0x105   :  { %v9262_v58 = vadd.s32 4294967294, %v5238_v24  ;;  %v526_v63 = vsel %vm522_vm11, %v506_v39, %v509_v36  ;;  %v10511_v2 = vmul.u32.u64.low %v538_v57, %v537_v1  ;;  %v10512_v27 = vmul.u32.u64.high %v538_v57, %v537_v1, %v10511_v2 }
 0x106   :  { %v528_v15 = vsel %vm524_vm12, %v512_v31, %v527_v25  ;;  %v10516_v17 = vmul.u32.u64.low %v538_v57, %v533_v62  ;;  %v10517_v60 = vmul.u32.u64.high %v538_v57, %v533_v62, %v10516_v17  ;;  %v9084_v47 = vadd.s32 4294967169, %v598_v51 }
 0x107   :  { %vm5162_vm2 = vcmp.eq.s32.totalorder %v10471_v43, 0  ;;  %vm5165_vm4 = vcmp.eq.s32.totalorder %v10471_v43, 2  ;;  %vm9263_vm5 = vcmp.lt.s32.totalorder %v9262_v58, 0  ;;  %v10523_v19 = vand.u32 3, %v10417_v16 }
 0x108   :  { %v5226_v36 = vadd.s32 %v10397_v0, %v10389_v59  ;;  %v5241_v32 = vsel %vm9263_vm5, 0, %v9262_v58  ;;  %v594_v31 = vand.u32 2147483647, %v10467_v21  ;;  %v604_v4 = vadd.s32 1, %v9084_v47 }
 0x109   :  { %v10525_v6 = vpop.eup %9837  ;;  %v5242_v22 = vsub.s32 32, %v5241_v32  ;;  %v5246_v50 = vsub.s32 4294967266, %v5241_v32  ;;  %v529_v30 = vsel %vm523_vm14, %v526_v63, %v528_v15  ;;  %v5257_v28 = vsel %vm5172_vm13, %v5256_v54, %v10452_v3 }
 0x10a   :  { %v10530_v49 = vpop.eup %9839  ;;  %v5166_v7 = vxor.u32 2147483648, %v10525_v6  ;;  %vm547_vm6 = vc.u32 %v10512_v27, %v10516_v17  ;;  %v548_v59 = vadd.s32 1, %v10517_v60  ;;  %v5243_v0 = vshll.u32 %v10469_v33, %v5241_v32 }
 0x10b   :  { %v5163_v16 = vxor.u32 2147483648, %v10530_v49  ;;  %v5244_v29 = vshrl.u32 %v5226_v36, %v5242_v22  ;;  %v5247_v40 = vadd.s32 127, %v5246_v50  ;;  %v545_v56 = vmul.u32 %v538_v57, %v529_v30 }
 0x10c   :  { %v5167_v12 = vsel %vm5165_vm4, %v5166_v7, %v10530_v49  ;;  %v549_v24 = vsel %vm547_vm6, %v548_v59, %v10517_v60  ;;  %vm605_vm7 = vcmp.gt.s32.totalorder %v604_v4, 0  ;;  %v601_v54 = vand.u32 8388607, %v594_v31 }
 0x10d   :  { %v5164_v3 = vsel %vm5162_vm2, %v10525_v6, %v5163_v16  ;;  %v5245_v39 = vor.u32 %v5244_v29, %v5243_v0  ;;  %v5248_v33 = vshll.u32 %v5247_v40, 23  ;;  %v5259_v62 = vsel %vm10505_vm1, 0, %v5257_v28 }
 0x10e   :  { %v5168_v25 = vsel %vm5161_vm15, %v5164_v3, %v5167_v12  ;;  %v550_v51 = vadd.s32 %v549_v24, %v545_v56  ;;  %v606_v57 = vsel %vm605_vm7, %v604_v4, 0  ;;  %vm5996_vm8 = vcmp.eq.s32.totalorder %v10523_v19, 2 }
 0x10f   :  { %v10562_v1 = vsel %vm5158_vm0, nan, %v5168_v25  ;;  %v5249_v58 = vor.u32 4788187, %v5248_v33  ;;  %v608_v63 = vand.u32 31, %v606_v57  ;;  %v5252_v43 = vcvt.s32.f32 %v5245_v39 }
 0x110   :  { %v551_v2 = vadd.s32 536870912, %v550_v51  ;;  %v5263_v60 = vadd.s32 3, %v5259_v62  ;;  %v10565_v36 = vand.u32 3, %v5259_v62  ;;  %v602_v22 = vor.u32 8388608, %v601_v54 }
 0x111   :  { %v5250_v15 = vand.u32 2147483647, %v5249_v58  ;;  %v609_v47 = vsub.s32 32, %v608_v63  ;;  %v607_v50 = vshrl.u32 %v606_v57, 5  ;;  %v611_v28 = vshll.u32 %v14749_v38, %v608_v63 }
 0x112   :  { %v10567_v32 = vshrl.u32 %v551_v2, 30  ;;  %v617_v29 = vshll.u32 %v14733_v44, %v608_v63  ;;  %vm5993_vm9 = vcmp.eq.s32.totalorder %v10523_v19, 0  ;;  %v614_v56 = vshll.u32 %v14735_v42, %v608_v63 }
 0x113   :  { %v5253_v30 = vmul.f32 %v5252_v43, %v5250_v15  ;;  %v612_v4 = vshrl.u32 %v14735_v42, %v609_v47  ;;  %v615_v59 = vshrl.u32 %v14733_v44, %v609_v47  ;;  %v618_v40 = vshrl.u32 %v14722_v46, %v609_v47 }
 0x114   :  { %v553_v0 = vshll.u32 %v10567_v32, 30  ;;  %v621_v12 = vshrl.u32 %v14751_v48, %v609_v47  ;;  %v620_v24 = vshll.u32 %v14722_v46, %v608_v63  ;;  %v624_v39 = vshrl.u32 %v14724_v55, %v609_v47 }
 0x115   :  { %v5254_v3 = vxor.u32 2147483648, %v5253_v30  ;;  %v619_v25 = vor.u32 %v618_v40, %v617_v29  ;;  %v623_v54 = vshll.u32 %v14751_v48, %v608_v63  ;;  %v10584_v62 = vmul.f32 8.0, %v10289_v13 }
 0x116   :  { %v10580_v33 = vsub.s32 %v550_v51, %v553_v0  ;;  %v613_v58 = vor.u32 %v612_v4, %v611_v28  ;;  %v616_v2 = vor.u32 %v615_v59, %v614_v56  ;;  %v622_v15 = vor.u32 %v621_v12, %v620_v24 }
 0x117   :  { %v5255_v57 = vsel %vm5172_vm13, %v5254_v3, %v5253_v30  ;;  %v10591_v53 = vand.u32 3, %v5263_v60  ;;  %v10594_v0 = vshll.u32 %v602_v22, 8  ;;  %vm5992_vm11 = vcmp.lt.s32.totalorder %v10523_v19, 2 }
 0x118   :  { %v5258_v43 = vsel %vm10505_vm1, %v10223_v35, %v5255_v57  ;;  %v556_v51 = vsub.s32 0, %v10580_v33  ;;  %v5998_v63 = vsel %vm5996_vm8, %v5166_v7, %v10530_v49  ;;  %v625_v30 = vor.u32 %v624_v39, %v623_v54 }
 0x119   :  { %9841 = vcosq.f32 %v5258_v43  ;;  %vm629_vm12 = vcmp.lt.s32.totalorder %v607_v50, 4  ;;  %vm626_vm13 = vcmp.lt.s32.totalorder %v607_v50, 1  ;;  %v610_v22 = vshrl.u32 %v14749_v38, %v609_v47 }
 0x11a   :  { %9843 = vsinq.f32 %v5258_v43  ;;  %v9081_v45 = vmin.u32 %v556_v51, %v10580_v33  ;;  %v631_v60 = vsel %vm629_vm12, %v619_v25, 2102212464  ;;  %v634_v28 = vsel %vm626_vm13, %v613_v58, %v616_v2 }
 0x11b   :  { %v635_v4 = vsel %vm629_vm12, %v622_v15, 920167782  ;;  %v5485_v59 = vand.u32 2139095040, %v10584_v62  ;;  %vm627_vm14 = vcmp.lt.s32.totalorder %v607_v50, 2  ;;  %vm628_vm15 = vcmp.lt.s32.totalorder %v607_v50, 3 }
 0x11c   :  { %v558_v29 = vclz %v9081_v45  ;;  %v638_v40 = vsel %vm626_vm13, %v616_v2, %v619_v25  ;;  %v630_v7 = vsel %vm626_vm13, %v610_v22, %v613_v58  ;;  %v632_v12 = vsel %vm628_vm15, %v616_v2, %v631_v60 }
 0x11d   :  { %v636_v3 = vsel %vm628_vm15, %v619_v25, %v635_v4  ;;  %v639_v56 = vsel %vm629_vm12, %v625_v30, 1326507024  ;;  %v5995_v47 = vsel %vm5993_vm9, %v10525_v6, %v5163_v16  ;;  %vm492_vm1 = vcmp.lt.s32.totalorder %v10289_v13, 0 }
 0x11e   :  { %v9082_v24 = vadd.s32 4294967294, %v558_v29  ;;  %v637_v39 = vsel %vm627_vm14, %v634_v28, %v636_v3  ;;  %v640_v54 = vsel %vm628_vm15, %v622_v15, %v639_v56  ;;  %v5486_v25 = vshrl.u32 %v5485_v59, 23 }
 0x11f   :  { %v641_v57 = vsel %vm627_vm14, %v638_v40, %v640_v54  ;;  %v10617_v58 = vmul.u32.u64.low %v10594_v0, %v637_v39  ;;  %v10618_v2 = vmul.u32.u64.high %v10594_v0, %v637_v39, %v10617_v58  ;;  %v633_v49 = vsel %vm627_vm14, %v630_v7, %v632_v12 }
 0x120   :  { %vm9083_vm2 = vcmp.lt.s32.totalorder %v9082_v24, 0  ;;  %v10623_v43 = vmul.u32.u64.low %v10594_v0, %v641_v57  ;;  %v10624_v6 = vmul.u32.u64.high %v10594_v0, %v641_v57, %v10623_v43  ;;  %vm5266_vm4 = vcmp.eq.s32.totalorder %v10591_v53, 0 }
 0x121   :  { %vm6096_vm5 = vcmp.eq.s32.totalorder %v10565_v36, 0  ;;  %vm6099_vm6 = vcmp.eq.s32.totalorder %v10565_v36, 2  ;;  %v561_v16 = vsel %vm9083_vm2, 0, %v9082_v24  ;;  %v9272_v15 = vadd.s32 4294967169, %v5486_v25 }
 0x122   :  { %vm5265_vm7 = vcmp.lt.s32.totalorder %v10591_v53, 2  ;;  %v5999_v51 = vsel %vm5992_vm11, %v5995_v47, %v5998_v63  ;;  %vm6095_vm8 = vcmp.lt.s32.totalorder %v10565_v36, 2  ;;  %v546_v50 = vadd.s32 %v10516_v17, %v10512_v27 }
 0x123   :  { %v562_v30 = vsub.s32 32, %v561_v16  ;;  %v566_v45 = vsub.s32 4294967266, %v561_v16  ;;  %vm5262_vm9 = vweird.f32 %v10223_v35  ;;  %v576_v60 = vsub.s32 4, %v10567_v32 }
 0x124   :  { %v649_v22 = vmul.u32 %v10594_v0, %v633_v49  ;;  %v652_v28 = vadd.s32 1, %v10618_v2  ;;  %v5492_v4 = vadd.s32 1, %v9272_v15  ;;  %vm10641_vm12 = vcmp.le.f32.partialorder %v490_v37, 0.7853982 }
 0x125   :  { %v563_v63 = vshll.u32 %v10580_v33, %v561_v16  ;;  %v564_v27 = vshrl.u32 %v546_v50, %v562_v30  ;;  %v567_v17 = vadd.s32 127, %v566_v45  ;;  %vm651_vm11 = vc.u32 %v10624_v6, %v10617_v58 }
 0x126   :  { %vm5269_vm13 = vcmp.eq.s32.totalorder %v10591_v53, 2  ;;  %v653_v0 = vsel %vm651_vm11, %v652_v28, %v10618_v2  ;;  %v10651_v59 = vmul.f32 8.0, %v10467_v21  ;;  %vm5493_vm14 = vcmp.gt.s32.totalorder %v5492_v4, 0  ;;  %v9842_v29 = vpop.eup %9841 }
 0x127   :  { %v565_v37 = vor.u32 %v564_v27, %v563_v63  ;;  %v568_v40 = vshll.u32 %v567_v17, 23  ;;  %v654_v7 = vadd.s32 %v653_v0, %v649_v22  ;;  %v5494_v12 = vsel %vm5493_vm14, %v5492_v4, 0  ;;  %v9844_v3 = vpop.eup %9843 }
 0x128   :  { %v5270_v33 = vxor.u32 2147483648, %v9842_v29  ;;  %v6000_v56 = vsel %vm5158_vm0, nan, %v5999_v51  ;;  %v5482_v47 = vand.u32 2147483647, %v10584_v62  ;;  %v5496_v24 = vand.u32 31, %v5494_v12 }
 0x129   :  { %v5267_v39 = vxor.u32 2147483648, %v9844_v3  ;;  %v569_v54 = vor.u32 4788187, %v568_v40  ;;  %v577_v57 = vsel %vm492_vm1, %v576_v60, %v10567_v32  ;;  %v655_v2 = vadd.s32 536870912, %v654_v7 }
 0x12a   :  { %v5271_v25 = vsel %vm5269_vm13, %v5270_v33, %v9844_v3  ;;  %v6101_v49 = vsel %vm6099_vm6, %v5270_v33, %v9844_v3  ;;  %v572_v43 = vcvt.s32.f32 %v565_v37  ;;  %v5497_v16 = vsub.s32 32, %v5496_v24 }
 0x12b   :  { %v5268_v20 = vsel %vm5266_vm4, %v9842_v29, %v5267_v39  ;;  %v6098_v15 = vsel %vm6096_vm5, %v9842_v29, %v5267_v39  ;;  %v570_v51 = vand.u32 2147483647, %v569_v54  ;;  %v10667_v50 = vshrl.u32 %v655_v2, 30 }
 0x12c   :  { %v5272_v32 = vsel %vm5265_vm7, %v5268_v20, %v5271_v25  ;;  %v6102_v30 = vsel %vm6095_vm8, %v6098_v15, %v6101_v49  ;;  %v5489_v45 = vand.u32 8388607, %v5482_v47  ;;  %v5500_v60 = vshrl.u32 %v14735_v42, %v5497_v16 }
 0x12d   :  { %v10678_v22 = vsel %vm5262_vm9, nan, %v5272_v32  ;;  %v6103_v28 = vsel %vm5262_vm9, nan, %v6102_v30  ;;  %v573_v4 = vmul.f32 %v572_v43, %v570_v51  ;;  %v657_v63 = vshll.u32 %v10667_v50, 30 }
 0x12e   :  { %v9625_v53 = vpack.i.bf16 %v6000_v56, %v6103_v28  ;;  %v10687_v27 = vsel %vm10641_vm12, 0, %v577_v57  ;;  %v5586_v17 = vand.u32 2147483647, %v10651_v59  ;;  %v5499_v37 = vshll.u32 %v14749_v38, %v5496_v24 }
 0x12f   :  { %v574_v0 = vxor.u32 2147483648, %v573_v4  ;;  %v10690_v29 = vsub.s32 %v654_v7, %v657_v63  ;;  %v5503_v35 = vshrl.u32 %v14733_v44, %v5497_v16  ;;  %v5490_v40 = vor.u32 8388608, %v5489_v45 }
 0x130   :  { %9626 = vxpose.xlu1.b32.start [1/6] (short) %v9625_v53, 128  ;;  %v5495_v3 = vshrl.u32 %v5494_v12, 5  ;;  %v5506_v33 = vshrl.u32 %v14722_v46, %v5497_v16  ;;  %v5589_v56 = vand.u32 2139095040, %v10651_v59  ;;  %v5501_v57 = vor.u32 %v5500_v60, %v5499_v37 }
 0x131   :  { %v575_v39 = vsel %vm492_vm1, %v574_v0, %v573_v4  ;;  %v660_v54 = vsub.s32 0, %v10690_v29  ;;  %v5502_v7 = vshll.u32 %v14735_v42, %v5496_v24  ;;  %v5505_v25 = vshll.u32 %v14733_v44, %v5496_v24 }
 0x132   :  { %v578_v2 = vsel %vm10641_vm12, %v10289_v13, %v575_v39  ;;  %v5508_v12 = vshll.u32 %v14722_v46, %v5496_v24  ;;  %v5509_v49 = vshrl.u32 %v14751_v48, %v5497_v16  ;;  %v5511_v15 = vshll.u32 %v14751_v48, %v5496_v24 }
 0x133   :  { %v9085_v43 = vmin.u32 %v660_v54, %v10690_v29  ;;  %v5504_v20 = vor.u32 %v5503_v35, %v5502_v7  ;;  %v5512_v51 = vshrl.u32 %v14724_v55, %v5497_v16  ;;  %v650_v32 = vadd.s32 %v10617_v58, %v10624_v6 }
 0x134   :  { %v5507_v30 = vor.u32 %v5506_v33, %v5505_v25  ;;  %v5510_v45 = vor.u32 %v5509_v49, %v5508_v12  ;;  %v5530_v19 = vshll.u32 %v5490_v40, 8  ;;  %9845 = vcosq.f32 %v578_v2 }
 0x135   :  { %v662_v60 = vclz %v9085_v43  ;;  %v5513_v28 = vor.u32 %v5512_v51, %v5511_v15  ;;  %v5590_v4 = vshrl.u32 %v5589_v56, 23  ;;  %9847 = vsinq.f32 %v578_v2 }
 0x136   :  { %v680_v63 = vsub.s32 4, %v10667_v50  ;;  %v5498_v53 = vshrl.u32 %v14749_v38, %v5497_v16  ;;  %vm5514_vm0 = vcmp.lt.s32.totalorder %v5495_v3, 1  ;;  %vm5516_vm15 = vcmp.lt.s32.totalorder %v5495_v3, 3 }
 0x137   :  { %v9086_v0 = vadd.s32 4294967294, %v662_v60  ;;  %vm5517_vm1 = vcmp.lt.s32.totalorder %v5495_v3, 4  ;;  %v5522_v24 = vsel %vm5514_vm0, %v5501_v57, %v5504_v20  ;;  %v5526_v58 = vsel %vm5514_vm0, %v5504_v20, %v5507_v30 }
 0x138   :  { %v5519_v37 = vsel %vm5517_vm1, %v5507_v30, 2102212464  ;;  %v5523_v35 = vsel %vm5517_vm1, %v5510_v45, 920167782  ;;  %v5527_v6 = vsel %vm5517_vm1, %v5513_v28, 1326507024  ;;  %v5518_v39 = vsel %vm5514_vm0, %v5498_v53, %v5501_v57 }
 0x139   :  { %vm9087_vm2 = vcmp.lt.s32.totalorder %v9086_v0, 0  ;;  %vm5515_vm4 = vcmp.lt.s32.totalorder %v5495_v3, 2  ;;  %v5524_v40 = vsel %vm5516_vm15, %v5507_v30, %v5523_v35  ;;  %v5528_v33 = vsel %vm5516_vm15, %v5510_v45, %v5527_v6 }
 0x13a   :  { %v665_v56 = vsel %vm9087_vm2, 0, %v9086_v0  ;;  %v5525_v54 = vsel %vm5515_vm4, %v5522_v24, %v5524_v40  ;;  %v5529_v16 = vsel %vm5515_vm4, %v5526_v58, %v5528_v33  ;;  %v5520_v25 = vsel %vm5516_vm15, %v5504_v20, %v5519_v37 }
 0x13b   :  { %v666_v7 = vsub.s32 32, %v665_v56  ;;  %v670_v2 = vsub.s32 4294967266, %v665_v56  ;;  %v9276_v12 = vadd.s32 4294967169, %v5590_v4  ;;  %v667_v30 = vshll.u32 %v10690_v29, %v665_v56 }
 0x13c   :  { %v10718_v49 = vmul.u32.u64.low %v5530_v19, %v5529_v16  ;;  %v10719_v43 = vmul.u32.u64.high %v5530_v19, %v5529_v16, %v10718_v49  ;;  %v10721_v15 = vmul.u32.u64.low %v5530_v19, %v5525_v54  ;;  %v10722_v51 = vmul.u32.u64.high %v5530_v19, %v5525_v54, %v10721_v15 }
 0x13d   :  { %v668_v45 = vshrl.u32 %v650_v32, %v666_v7  ;;  %v671_v57 = vadd.s32 127, %v670_v2  ;;  %v5596_v60 = vadd.s32 1, %v9276_v12  ;;  %vm596_vm5 = vcmp.lt.s32.totalorder %v10467_v21, 0 }
 0x13e   :  { %v5521_v28 = vsel %vm5515_vm4, %v5518_v39, %v5520_v25  ;;  %v681_v20 = vsel %vm596_vm5, %v680_v63, %v10667_v50  ;;  %v583_v4 = vadd.s32 3, %v10687_v27  ;;  %vm5539_vm7 = vc.u32 %v10719_v43, %v10721_v15 }
 0x13f   :  { %v669_v53 = vor.u32 %v668_v45, %v667_v30  ;;  %v672_v0 = vshll.u32 %v671_v57, 23  ;;  %vm5597_vm6 = vcmp.gt.s32.totalorder %v5596_v60, 0  ;;  %v5540_v29 = vadd.s32 1, %v10722_v51 }
 0x140   :  { %v5598_v32 = vsel %vm5597_vm6, %v5596_v60, 0  ;;  %vm10737_vm8 = vcmp.le.f32.partialorder %v594_v31, 0.7853982  ;;  %v5537_v37 = vmul.u32 %v5530_v19, %v5521_v28  ;;  %v5593_v50 = vand.u32 8388607, %v5586_v17 }
 0x141   :  { %v673_v24 = vor.u32 4788187, %v672_v0  ;;  %v10743_v63 = vpop.eup %9845  ;;  %v10747_v35 = vsel %vm10737_vm8, 0, %v681_v20  ;;  %v5541_v58 = vsel %vm5539_vm7, %v5540_v29, %v10722_v51  ;;  %v5600_v6 = vand.u32 31, %v5598_v32 }
 0x142   :  { %v10750_v40 = vpop.eup %9847  ;;  %v676_v33 = vcvt.s32.f32 %v669_v53  ;;  %v5542_v56 = vadd.s32 %v5541_v58, %v5537_v37  ;;  %v10753_v39 = vand.u32 3, %v10277_v8  ;;  %v10755_v19 = vand.u32 3, %v583_v4 }
 0x143   :  { %v674_v31 = vand.u32 2147483647, %v673_v24  ;;  %v5601_v54 = vsub.s32 32, %v5600_v6  ;;  %v10758_v16 = vand.u32 3, %v10319_v14  ;;  %v10761_v7 = vmul.f32 16.0, %v10126_v11 }
 0x144   :  { %v687_v25 = vadd.s32 3, %v10747_v35  ;;  %v5543_v12 = vadd.s32 536870912, %v5542_v56  ;;  %v5594_v49 = vor.u32 8388608, %v5593_v50  ;;  %v5603_v51 = vshll.u32 %v14749_v38, %v5600_v6 }
 0x145   :  { %v677_v2 = vmul.f32 %v676_v33, %v674_v31  ;;  %v5604_v30 = vshrl.u32 %v14735_v42, %v5601_v54  ;;  %v5606_v8 = vshll.u32 %v14735_v42, %v5600_v6  ;;  %v5607_v45 = vshrl.u32 %v14733_v44, %v5601_v54 }
 0x146   :  { %v10768_v60 = vshrl.u32 %v5543_v12, 30  ;;  %v5609_v14 = vshll.u32 %v14733_v44, %v5600_v6  ;;  %v5610_v28 = vshrl.u32 %v14722_v46, %v5601_v54  ;;  %vm589_vm9 = vcmp.eq.s32.totalorder %v10755_v19, 2 }
 0x147   :  { %v678_v57 = vxor.u32 2147483648, %v677_v2  ;;  %v5599_v53 = vshrl.u32 %v5598_v32, 5  ;;  %v5605_v0 = vor.u32 %v5604_v30, %v5603_v51  ;;  %v5612_v20 = vshll.u32 %v14722_v46, %v5600_v6 }
 0x148   :  { %v5613_v4 = vshrl.u32 %v14751_v48, %v5601_v54  ;;  %v5545_v24 = vshll.u32 %v10768_v60, 30  ;;  %v5608_v37 = vor.u32 %v5607_v45, %v5606_v8  ;;  %v5611_v50 = vor.u32 %v5610_v28, %v5609_v14 }
 0x149   :  { %v679_v29 = vsel %vm596_vm5, %v678_v57, %v677_v2  ;;  %v5615_v33 = vshll.u32 %v14751_v48, %v5600_v6  ;;  %v5616_v32 = vshrl.u32 %v14724_v55, %v5601_v54  ;;  %v590_v12 = vxor.u32 2147483648, %v10743_v63 }
 0x14a   :  { %v682_v58 = vsel %vm10737_vm8, %v10467_v21, %v679_v29  ;;  %v5614_v31 = vor.u32 %v5613_v4, %v5612_v20  ;;  %v10784_v51 = vand.u32 3, %v687_v25  ;;  %v10786_v30 = vsub.s32 %v5542_v56, %v5545_v24 }
 0x14b   :  { %9849 = vcosq.f32 %v682_v58  ;;  %v587_v2 = vxor.u32 2147483648, %v10750_v40  ;;  %v5617_v8 = vor.u32 %v5616_v32, %v5615_v33  ;;  %vm5621_vm12 = vcmp.lt.s32.totalorder %v5599_v53, 4 }
 0x14c   :  { %9851 = vsinq.f32 %v682_v58  ;;  %v5548_v3 = vsub.s32 0, %v10786_v30  ;;  %v5602_v45 = vshrl.u32 %v14749_v38, %v5601_v54  ;;  %vm5618_vm11 = vcmp.lt.s32.totalorder %v5599_v53, 1 }
 0x14d   :  { %v5623_v6 = vsel %vm5621_vm12, %v5611_v50, 2102212464  ;;  %vm5620_vm13 = vcmp.lt.s32.totalorder %v5599_v53, 3  ;;  %v5626_v57 = vsel %vm5618_vm11, %v5605_v0, %v5608_v37  ;;  %v5627_v14 = vsel %vm5621_vm12, %v5614_v31, 920167782 }
 0x14e   :  { %v5634_v25 = vshll.u32 %v5594_v49, 8  ;;  %v9273_v56 = vmin.u32 %v5548_v3, %v10786_v30  ;;  %vm5619_vm14 = vcmp.lt.s32.totalorder %v5599_v53, 2  ;;  %v5622_v28 = vsel %vm5618_vm11, %v5602_v45, %v5605_v0 }
 0x14f   :  { %v5628_v20 = vsel %vm5620_vm13, %v5611_v50, %v5627_v14  ;;  %v5624_v4 = vsel %vm5620_vm13, %v5608_v37, %v5623_v6  ;;  %v5630_v24 = vsel %vm5618_vm11, %v5608_v37, %v5611_v50  ;;  %v5631_v54 = vsel %vm5621_vm12, %v5617_v8, 1326507024 }
 0x150   :  { %v5629_v29 = vsel %vm5619_vm14, %v5626_v57, %v5628_v20  ;;  %vm585_vm0 = vcmp.lt.s32.totalorder %v10755_v19, 2  ;;  %vm586_vm15 = vcmp.eq.s32.totalorder %v10755_v19, 0  ;;  %v591_v49 = vsel %vm589_vm9, %v590_v12, %v10750_v40 }
 0x151   :  { %v5550_v0 = vclz %v9273_v56  ;;  %vm582_vm1 = vweird.f32 %v10289_v13  ;;  %v588_v58 = vsel %vm586_vm15, %v10743_v63, %v587_v2  ;;  %v5632_v37 = vsel %vm5620_vm13, %v5614_v31, %v5631_v54 }
 0x152   :  { %v10810_v50 = vmul.u32.u64.low %v5634_v25, %v5629_v29  ;;  %v10811_v33 = vmul.u32.u64.high %v5634_v25, %v5629_v29, %v10810_v50  ;;  %vm690_vm2 = vcmp.eq.s32.totalorder %v10784_v51, 0  ;;  %vm693_vm4 = vcmp.eq.s32.totalorder %v10784_v51, 2 }
 0x153   :  { %v9274_v32 = vadd.s32 4294967294, %v5550_v0  ;;  %v5625_v8 = vsel %vm5619_vm14, %v5622_v28, %v5624_v4  ;;  %v5633_v3 = vsel %vm5619_vm14, %v5630_v24, %v5632_v37  ;;  %vm689_vm5 = vcmp.lt.s32.totalorder %v10784_v51, 2 }
 0x154   :  { %v10819_v45 = vmul.u32.u64.low %v5634_v25, %v5633_v3  ;;  %v10820_v6 = vmul.u32.u64.high %v5634_v25, %v5633_v3, %v10819_v45  ;;  %vm1000_vm6 = vcmp.lt.s32.totalorder %v10753_v39, 2  ;;  %vm1001_vm7 = vcmp.eq.s32.totalorder %v10753_v39, 0 }
 0x155   :  { %v592_v31 = vsel %vm585_vm0, %v588_v58, %v591_v49  ;;  %vm686_vm8 = vweird.f32 %v10467_v21  ;;  %vm5484_vm9 = vcmp.lt.s32.totalorder %v10584_v62, 0  ;;  %v5538_v53 = vadd.s32 %v10721_v15, %v10719_v43 }
 0x156   :  { %vm9275_vm12 = vcmp.lt.s32.totalorder %v9274_v32, 0  ;;  %vm1004_vm11 = vcmp.eq.s32.totalorder %v10753_v39, 2  ;;  %v5568_v14 = vsub.s32 4, %v10768_v60  ;;  %v5641_v56 = vmul.u32 %v5634_v25, %v5625_v8 }
 0x157   :  { %v5553_v57 = vsel %vm9275_vm12, 0, %v9274_v32  ;;  %v5644_v28 = vadd.s32 1, %v10811_v33  ;;  %v1003_v19 = vsel %vm1001_vm7, %v10359_v26, %v171_v34  ;;  %v1006_v29 = vsel %vm1004_vm11, %v174_v52, %v10370_v41 }
 0x158   :  { %v5554_v20 = vsub.s32 32, %v5553_v57  ;;  %v5558_v4 = vsub.s32 4294967266, %v5553_v57  ;;  %v10839_v43 = vpop.eup %9849  ;;  %v5555_v15 = vshll.u32 %v10786_v30, %v5553_v57  ;;  %vm5643_vm13 = vc.u32 %v10820_v6, %v10810_v50 }
 0x159   :  { %vm1104_vm14 = vcmp.eq.s32.totalorder %v10758_v16, 0  ;;  %vm1107_vm0 = vcmp.eq.s32.totalorder %v10758_v16, 2  ;;  %v10846_v25 = vpop.eup %9851  ;;  %v14711_v24 = vxor.u32 2147483648, %v10839_v43  ;;  %v5645_v26 = vsel %vm5643_vm13, %v5644_v28, %v10811_v33 }
 0x15a   :  { %v5556_v34 = vshrl.u32 %v5538_v53, %v5554_v20  ;;  %v5559_v54 = vadd.s32 127, %v5558_v4  ;;  %v691_v41 = vxor.u32 2147483648, %v10846_v25  ;;  %v5646_v52 = vadd.s32 %v5645_v26, %v5641_v56 }
 0x15b   :  { %v1106_v30 = vsel %vm1104_vm14, %v10413_v5, %v275_v23  ;;  %v14787_v49 = vxor.u32 2147483648, %v10413_v5  ;;  %v593_v58 = vsel %vm582_vm1, nan, %v592_v31  ;;  %v695_v37 = vsel %vm693_vm4, %v14711_v24, %v10846_v25 }
 0x15c   :  { %v5557_v33 = vor.u32 %v5556_v34, %v5555_v15  ;;  %v5560_v32 = vshll.u32 %v5559_v54, 23  ;;  %v692_v23 = vsel %vm690_vm2, %v10839_v43, %v691_v41  ;;  %v5647_v8 = vadd.s32 536870912, %v5646_v52 }
 0x15d   :  { %v1109_v0 = vsel %vm1107_vm0, %v14787_v49, %v10421_v18  ;;  %v1007_v5 = vsel %vm1000_vm6, %v1003_v19, %v1006_v29  ;;  %vm1103_vm15 = vcmp.lt.s32.totalorder %v10758_v16, 2  ;;  %v696_v18 = vsel %vm689_vm5, %v692_v23, %v695_v37 }
 0x15e   :  { %v5561_v3 = vor.u32 4788187, %v5560_v32  ;;  %v1110_v45 = vsel %vm1103_vm15, %v1106_v30, %v1109_v0  ;;  %v10875_v31 = vmul.f32 16.0, %v10123_v10  ;;  %v697_v53 = vsel %vm686_vm8, nan, %v696_v18 }
 0x15f   :  { %v5569_v57 = vsel %vm5484_vm9, %v5568_v14, %v10768_v60  ;;  %v5648_v56 = vshrl.u32 %v5647_v8, 30  ;;  %v6733_v39 = vand.u32 2139095040, %v10761_v7  ;;  %v9723_v28 = vpack.i.bf16 %v593_v58, %v697_v53 }
 0x160   :  { %v5562_v16 = vand.u32 2147483647, %v5561_v3  ;;  %v5564_v20 = vcvt.s32.f32 %v5557_v33  ;;  %v14710_v51 = vand.u32 2147483647, %v10761_v7  ;;  %v1008_v19 = vsel %vm166_vm3, nan, %v1007_v5 }
 0x161   :  { %v5649_v4 = vshll.u32 %v5648_v56, 30  ;;  %v1111_v29 = vsel %vm270_vm10, nan, %v1110_v45  ;;  %v6734_v15 = vshrl.u32 %v6733_v39, 23  ;;  %9724 = vxpose.xlu0.b32.cont [4/16] %v9723_v28, 128  ;;  %vm10890_vm2 = vcmp.le.f32.partialorder %v5482_v47, 0.7853982 }
 0x162   :  { %v5565_v14 = vmul.f32 %v5564_v20, %v5562_v16  ;;  %v5672_v34 = vsub.s32 4, %v5648_v56  ;;  %v6837_v54 = vand.u32 2139095040, %v10875_v31  ;;  %v5571_v26 = vsel %vm10890_vm2, 0, %v5569_v57 }
 0x163   :  { %v10897_v30 = vsub.s32 %v5646_v52, %v5649_v4  ;;  %v9320_v49 = vadd.s32 4294967169, %v6734_v15  ;;  %v9725_v58 = vpack.i.bf16 %v1008_v19, %v1111_v29  ;;  %v6737_v37 = vand.u32 8388607, %v14710_v51 }
 0x164   :  { %v5566_v0 = vxor.u32 2147483648, %v5565_v14  ;;  %v14709_v47 = vand.u32 2147483647, %v10875_v31  ;;  %vm5588_vm3 = vcmp.lt.s32.totalorder %v10651_v59, 0  ;;  %v6838_v23 = vshrl.u32 %v6837_v54, 23 }
 0x165   :  { %v5652_v33 = vsub.s32 0, %v10897_v30  ;;  %v6740_v32 = vadd.s32 1, %v9320_v49  ;;  %v5575_v5 = vadd.s32 3, %v5571_v26  ;;  %v5673_v52 = vsel %vm5588_vm3, %v5672_v34, %v5648_v56  ;;  %9726 = vxpose.xlu0.b32.cont [5/16] %v9725_v58, 128 }
 0x166   :  { %v5567_v8 = vsel %vm5484_vm9, %v5566_v0, %v5565_v14  ;;  %vm10913_vm10 = vcmp.le.f32.partialorder %v5586_v17, 0.7853982  ;;  %v6738_v53 = vor.u32 8388608, %v6737_v37  ;;  %v10920_v57 = vand.u32 8388607, %v14709_v47 }
 0x167   :  { %v5570_v18 = vsel %vm10890_vm2, %v10584_v62, %v5567_v8  ;;  %v9277_v45 = vmin.u32 %v5652_v33, %v10897_v30  ;;  %vm6741_vm4 = vcmp.gt.s32.totalorder %v6740_v32, 0  ;;  %v5675_v39 = vsel %vm10913_vm10, 0, %v5673_v52 }
 0x168   :  { %9853 = vcosq.f32 %v5570_v18  ;;  %v9324_v28 = vadd.s32 4294967169, %v6838_v23  ;;  %v10924_v16 = vand.u32 3, %v5575_v5  ;;  %v6742_v17 = vsel %vm6741_vm4, %v6740_v32, 0 }
 0x169   :  { %9855 = vsinq.f32 %v5570_v18  ;;  %v5654_v56 = vclz %v9277_v45  ;;  %v5642_v20 = vadd.s32 %v10810_v50, %v10820_v6  ;;  %v10928_v19 = vand.u32 3, %v5571_v26 }
 0x16a   :  { %v6744_v29 = vand.u32 31, %v6742_v17  ;;  %v5679_v15 = vadd.s32 3, %v5675_v39  ;;  %v10930_v60 = vand.u32 3, %v5675_v39  ;;  %v10932_v14 = vshll.u32 %v6738_v53, 8 }
 0x16b   :  { %v9278_v4 = vadd.s32 4294967294, %v5654_v56  ;;  %v6842_v34 = vor.u32 8388608, %v10920_v57  ;;  %v10935_v54 = vshrl.u32 %v6742_v17, 5  ;;  %v6844_v0 = vadd.s32 1, %v9324_v28 }
 0x16c   :  { %v6745_v49 = vsub.s32 32, %v6744_v29  ;;  %v6747_v37 = vshll.u32 %v14749_v38, %v6744_v29  ;;  %v6750_v50 = vshll.u32 %v14735_v42, %v6744_v29  ;;  %v6753_v6 = vshll.u32 %v14733_v44, %v6744_v29 }
 0x16d   :  { %vm9279_vm5 = vcmp.lt.s32.totalorder %v9278_v4, 0  ;;  %vm5581_vm6 = vcmp.eq.s32.totalorder %v10924_v16, 2  ;;  %v6756_v32 = vshll.u32 %v14722_v46, %v6744_v29  ;;  %v6759_v23 = vshll.u32 %v14751_v48, %v6744_v29 }
 0x16e   :  { %v5657_v58 = vsel %vm9279_vm5, 0, %v9278_v4  ;;  %vm5578_vm7 = vcmp.eq.s32.totalorder %v10924_v16, 0  ;;  %v6748_v8 = vshrl.u32 %v14735_v42, %v6745_v49  ;;  %v6751_v5 = vshrl.u32 %v14733_v44, %v6745_v49 }
 0x16f   :  { %v5658_v26 = vsub.s32 32, %v5657_v58  ;;  %v5662_v33 = vsub.s32 4294967266, %v5657_v58  ;;  %v6754_v52 = vshrl.u32 %v14722_v46, %v6745_v49  ;;  %v6757_v18 = vshrl.u32 %v14751_v48, %v6745_v49 }
 0x170   :  { %vm5577_vm9 = vcmp.lt.s32.totalorder %v10924_v16, 2  ;;  %v5659_v45 = vshll.u32 %v10897_v30, %v5657_v58  ;;  %v6760_v39 = vshrl.u32 %v14724_v55, %v6745_v49  ;;  %vm5574_vm12 = vweird.f32 %v10584_v62 }
 0x171   :  { %v5660_v53 = vshrl.u32 %v5642_v20, %v5658_v26  ;;  %v5663_v56 = vadd.s32 127, %v5662_v33  ;;  %v6749_v28 = vor.u32 %v6748_v8, %v6747_v37  ;;  %v6752_v17 = vor.u32 %v6751_v5, %v6750_v50 }
 0x172   :  { %v6755_v4 = vor.u32 %v6754_v52, %v6753_v6  ;;  %v6758_v29 = vor.u32 %v6757_v18, %v6756_v32  ;;  %v10952_v51 = vand.u32 3, %v5679_v15  ;;  %vm6845_vm11 = vcmp.gt.s32.totalorder %v6844_v0, 0 }
 0x173   :  { %v5661_v36 = vor.u32 %v5660_v53, %v5659_v45  ;;  %v5664_v47 = vshll.u32 %v5663_v56, 23  ;;  %vm6408_vm13 = vcmp.eq.s32.totalorder %v10928_v19, 2  ;;  %v6761_v24 = vor.u32 %v6760_v39, %v6759_v23 }
 0x174   :  { %vm6762_vm14 = vcmp.lt.s32.totalorder %v10935_v54, 1  ;;  %vm6764_vm0 = vcmp.lt.s32.totalorder %v10935_v54, 3  ;;  %vm6765_vm15 = vcmp.lt.s32.totalorder %v10935_v54, 4  ;;  %vm6405_vm2 = vcmp.eq.s32.totalorder %v10928_v19, 0 }
 0x175   :  { %v9854_v30 = vpop.eup %9853  ;;  %v5665_v20 = vor.u32 4788187, %v5664_v47  ;;  %v6746_v58 = vshrl.u32 %v14749_v38, %v6745_v49  ;;  %v6767_v15 = vsel %vm6765_vm15, %v6755_v4, 2102212464  ;;  %v6771_v37 = vsel %vm6765_vm15, %v6758_v29, 920167782 }
 0x176   :  { %v9856_v50 = vpop.eup %9855  ;;  %v5582_v6 = vxor.u32 2147483648, %v9854_v30  ;;  %vm6763_vm4 = vcmp.lt.s32.totalorder %v10935_v54, 2  ;;  %v6770_v26 = vsel %vm6762_vm14, %v6749_v28, %v6752_v17  ;;  %v6772_v47 = vsel %vm6764_vm0, %v6755_v4, %v6771_v37 }
 0x177   :  { %v5579_v33 = vxor.u32 2147483648, %v9856_v50  ;;  %v5666_v32 = vand.u32 2147483647, %v5665_v20  ;;  %v5668_v23 = vcvt.s32.f32 %v5661_v36  ;;  %v6774_v49 = vsel %vm6762_vm14, %v6752_v17, %v6755_v4 }
 0x178   :  { %v5583_v8 = vsel %vm5581_vm6, %v5582_v6, %v9856_v50  ;;  %v6766_v5 = vsel %vm6762_vm14, %v6746_v58, %v6749_v28  ;;  %v6768_v52 = vsel %vm6764_vm0, %v6752_v17, %v6767_v15  ;;  %v6775_v18 = vsel %vm6765_vm15, %v6761_v24, 1326507024 }
 0x179   :  { %v5669_v45 = vmul.f32 %v5668_v23, %v5666_v32  ;;  %v5580_v53 = vsel %vm5578_vm7, %v9854_v30, %v5579_v33  ;;  %v6773_v36 = vsel %vm6763_vm4, %v6770_v26, %v6772_v47  ;;  %v6776_v56 = vsel %vm6764_vm0, %v6758_v29, %v6775_v18 }
 0x17a   :  { %v5584_v39 = vsel %vm5577_vm9, %v5580_v53, %v5583_v8  ;;  %v6777_v28 = vsel %vm6763_vm4, %v6774_v49, %v6776_v56  ;;  %v6846_v17 = vsel %vm6845_vm11, %v6844_v0, 0  ;;  %v10992_v24 = vshll.u32 %v6842_v34, 8 }
 0x17b   :  { %v5670_v4 = vxor.u32 2147483648, %v5669_v45  ;;  %v10996_v20 = vsel %vm5574_vm12, nan, %v5584_v39  ;;  %v6769_v29 = vsel %vm6763_vm4, %v6766_v5, %v6768_v52  ;;  %v11000_v58 = vshrl.u32 %v6846_v17, 5 }
 0x17c   :  { %v11003_v16 = vmul.u32.u64.low %v10932_v14, %v6777_v28  ;;  %v11004_v15 = vmul.u32.u64.high %v10932_v14, %v6777_v28, %v11003_v16  ;;  %v11007_v0 = vmul.u32.u64.low %v10932_v14, %v6773_v36  ;;  %v11008_v37 = vmul.u32.u64.high %v10932_v14, %v6773_v36, %v11007_v0 }
 0x17d   :  { %v5671_v57 = vsel %vm5588_vm3, %v5670_v4, %v5669_v45  ;;  %v6410_v34 = vsel %vm6408_vm13, %v5582_v6, %v9856_v50  ;;  %v6848_v26 = vand.u32 31, %v6846_v17  ;;  %v1411_v54 = vand.u32 3, %v10687_v27 }
 0x17e   :  { %v5674_v47 = vsel %vm10913_vm10, %v10651_v59, %v5671_v57  ;;  %v6407_v32 = vsel %vm6405_vm2, %v9854_v30, %v5579_v33  ;;  %v6785_v23 = vmul.u32 %v10932_v14, %v6769_v29  ;;  %vm6866_vm5 = vcmp.lt.s32.totalorder %v11000_v58, 1 }
 0x17f   :  { %9857 = vcosq.f32 %v5674_v47  ;;  %v6849_v49 = vsub.s32 32, %v6848_v26  ;;  %vm6867_vm3 = vcmp.lt.s32.totalorder %v11000_v58, 2  ;;  %vm6868_vm6 = vcmp.lt.s32.totalorder %v11000_v58, 3 }
 0x180   :  { %9859 = vsinq.f32 %v5674_v47  ;;  %vm6787_vm7 = vc.u32 %v11004_v15, %v11007_v0  ;;  %v6788_v27 = vadd.s32 1, %v11008_v37  ;;  %v6851_v3 = vshll.u32 %v14749_v38, %v6848_v26 }
 0x181   :  { %v6852_v30 = vshrl.u32 %v14735_v42, %v6849_v49  ;;  %v6854_v14 = vshll.u32 %v14735_v42, %v6848_v26  ;;  %v6855_v50 = vshrl.u32 %v14733_v44, %v6849_v49  ;;  %v6857_v6 = vshll.u32 %v14733_v44, %v6848_v26 }
 0x182   :  { %vm6404_vm10 = vcmp.lt.s32.totalorder %v10928_v19, 2  ;;  %v6789_v33 = vsel %vm6787_vm7, %v6788_v27, %v11008_v37  ;;  %v6858_v8 = vshrl.u32 %v14722_v46, %v6849_v49  ;;  %v6860_v5 = vshll.u32 %v14722_v46, %v6848_v26 }
 0x183   :  { %v6861_v52 = vshrl.u32 %v14751_v48, %v6849_v49  ;;  %v6790_v18 = vadd.s32 %v6789_v33, %v6785_v23  ;;  %v6853_v45 = vor.u32 %v6852_v30, %v6851_v3  ;;  %v6856_v53 = vor.u32 %v6855_v50, %v6854_v14 }
 0x184   :  { %vm6869_vm9 = vcmp.lt.s32.totalorder %v11000_v58, 4  ;;  %v6859_v36 = vor.u32 %v6858_v8, %v6857_v6  ;;  %v6863_v39 = vshll.u32 %v14751_v48, %v6848_v26  ;;  %v6864_v28 = vshrl.u32 %v14724_v55, %v6849_v49 }
 0x185   :  { %v6862_v56 = vor.u32 %v6861_v52, %v6860_v5  ;;  %v6791_v17 = vadd.s32 536870912, %v6790_v18  ;;  %v6850_v4 = vshrl.u32 %v14749_v38, %v6849_v49  ;;  %v6874_v29 = vsel %vm6866_vm5, %v6853_v45, %v6856_v53 }
 0x186   :  { %vm1413_vm11 = vcmp.eq.s32.totalorder %v1411_v54, 0  ;;  %v6865_v16 = vor.u32 %v6864_v28, %v6863_v39  ;;  %v6871_v37 = vsel %vm6869_vm9, %v6859_v36, 2102212464  ;;  %vm6508_vm13 = vcmp.eq.s32.totalorder %v10930_v60, 0 }
 0x187   :  { %v6875_v57 = vsel %vm6869_vm9, %v6862_v56, 920167782  ;;  %v1415_v26 = vsel %vm1413_vm11, %v10743_v63, %v587_v2  ;;  %v11052_v47 = vshrl.u32 %v6791_v17, 30  ;;  %v6878_v49 = vsel %vm6866_vm5, %v6856_v53, %v6859_v36 }
 0x188   :  { %v6876_v23 = vsel %vm6868_vm6, %v6859_v36, %v6875_v57  ;;  %vm1416_vm14 = vcmp.eq.s32.totalorder %v1411_v54, 2  ;;  %vm6507_vm0 = vcmp.lt.s32.totalorder %v10930_v60, 2  ;;  %v6879_v3 = vsel %vm6869_vm9, %v6865_v16, 1326507024 }
 0x189   :  { %v6877_v27 = vsel %vm6867_vm3, %v6874_v29, %v6876_v23  ;;  %vm1412_vm15 = vcmp.lt.s32.totalorder %v1411_v54, 2  ;;  %v1418_v2 = vsel %vm1416_vm14, %v590_v12, %v10750_v40  ;;  %vm5678_vm2 = vweird.f32 %v10651_v59 }
 0x18a   :  { %v6793_v30 = vshll.u32 %v11052_v47, 30  ;;  %v6870_v14 = vsel %vm6866_vm5, %v6850_v4, %v6853_v45  ;;  %v6872_v50 = vsel %vm6868_vm6, %v6856_v53, %v6871_v37  ;;  %v6880_v6 = vsel %vm6868_vm6, %v6862_v56, %v6879_v3 }
 0x18b   :  { %v6881_v54 = vsel %vm6867_vm3, %v6878_v49, %v6880_v6  ;;  %v11077_v33 = vmul.u32.u64.low %v10992_v24, %v6877_v27  ;;  %v11078_v63 = vmul.u32.u64.high %v10992_v24, %v6877_v27, %v11077_v33  ;;  %v1419_v40 = vsel %vm1412_vm15, %v1415_v26, %v1418_v2 }
 0x18c   :  { %v6411_v12 = vsel %vm6404_vm10, %v6407_v32, %v6410_v34  ;;  %v11083_v8 = vsub.s32 %v6790_v18, %v6793_v30  ;;  %v11086_v5 = vmul.u32.u64.low %v10992_v24, %v6881_v54  ;;  %v11087_v52 = vmul.u32.u64.high %v10992_v24, %v6881_v54, %v11086_v5  ;;  %v9858_v45 = vpop.eup %9857 }
 0x18d   :  { %vm5681_vm4 = vcmp.lt.s32.totalorder %v10952_v51, 2  ;;  %vm5682_vm5 = vcmp.eq.s32.totalorder %v10952_v51, 0  ;;  %vm5685_vm6 = vcmp.eq.s32.totalorder %v10952_v51, 2  ;;  %vm6511_vm7 = vcmp.eq.s32.totalorder %v10930_v60, 2  ;;  %v9860_v53 = vpop.eup %9859 }
 0x18e   :  { %v5686_v36 = vxor.u32 2147483648, %v9858_v45  ;;  %v6796_v19 = vsub.s32 0, %v11083_v8  ;;  %v6873_v34 = vsel %vm6867_vm3, %v6870_v14, %v6872_v50  ;;  %v1514_v32 = vand.u32 3, %v10747_v35 }
 0x18f   :  { %v5683_v18 = vxor.u32 2147483648, %v9860_v53  ;;  %v6412_v56 = vsel %vm5574_vm12, nan, %v6411_v12  ;;  %v6816_v39 = vsub.s32 4, %v11052_v47  ;;  %v11101_v28 = vmul.f32 16.0, %v10289_v13 }
 0x190   :  { %v5687_v17 = vsel %vm5685_vm6, %v5686_v36, %v9860_v53  ;;  %v6513_v4 = vsel %vm6511_vm7, %v5686_v36, %v9860_v53  ;;  %vm6732_vm10 = vcmp.lt.s32.totalorder %v10761_v7, 0  ;;  %v9321_v29 = vmin.u32 %v6796_v19, %v11083_v8 }
 0x191   :  { %v6892_v58 = vadd.s32 1, %v11078_v63  ;;  %v5684_v35 = vsel %vm5682_vm5, %v9858_v45, %v5683_v18  ;;  %v6510_v62 = vsel %vm6508_vm13, %v9858_v45, %v5683_v18  ;;  %v6889_v16 = vmul.u32 %v10992_v24, %v6873_v34 }
 0x192   :  { %vm6891_vm12 = vc.u32 %v11087_v52, %v11077_v33  ;;  %v5688_v37 = vsel %vm5681_vm4, %v5684_v35, %v5687_v17  ;;  %v6514_v57 = vsel %vm6507_vm0, %v6510_v62, %v6513_v4  ;;  %v6798_v26 = vclz %v9321_v29 }
 0x193   :  { %vm1516_vm3 = vcmp.eq.s32.totalorder %v1514_v32, 0  ;;  %v11119_v23 = vsel %vm5678_vm2, nan, %v5688_v37  ;;  %v6515_v49 = vsel %vm5678_vm2, nan, %v6514_v57  ;;  %vm1519_vm9 = vcmp.eq.s32.totalorder %v1514_v32, 2 }
 0x194   :  { %v1518_v24 = vsel %vm1516_vm3, %v10839_v43, %v691_v41  ;;  %v9627_v27 = vpack.i.bf16 %v6412_v56, %v6515_v49  ;;  %v9322_v60 = vadd.s32 4294967294, %v6798_v26  ;;  %v6893_v3 = vsel %vm6891_vm12, %v6892_v58, %v11078_v63 }
 0x195   :  { %v6894_v2 = vadd.s32 %v6893_v3, %v6889_v16  ;;  %v1420_v30 = vsel %vm582_vm1, nan, %v1419_v40  ;;  %vm1515_vm11 = vcmp.lt.s32.totalorder %v1514_v32, 2  ;;  %v14792_v59 = vxor.u32 2147483648, %v10839_v43 }
 0x196   :  { %9628 = vxpose.xlu1.b32.cont [2/6] (short) %v9627_v27, 128  ;;  %vm9323_vm13 = vcmp.lt.s32.totalorder %v9322_v60, 0  ;;  %v11135_v50 = vmul.f32 16.0, %v10467_v21  ;;  %v7149_v6 = vand.u32 2139095040, %v11101_v28  ;;  %v7146_v40 = vand.u32 2147483647, %v11101_v28 }
 0x197   :  { %v1521_v14 = vsel %vm1519_vm9, %v14792_v59, %v10846_v25  ;;  %v6801_v54 = vsel %vm9323_vm13, 0, %v9322_v60  ;;  %v6895_v12 = vadd.s32 536870912, %v6894_v2  ;;  %v6786_v5 = vadd.s32 %v11007_v0, %v11004_v15 }
 0x198   :  { %v1522_v41 = vsel %vm1515_vm11, %v1518_v24, %v1521_v14  ;;  %v6802_v43 = vsub.s32 32, %v6801_v54  ;;  %v6806_v25 = vsub.s32 4294967266, %v6801_v54  ;;  %v6817_v53 = vsel %vm6732_vm10, %v6816_v39, %v11052_v47 }
 0x199   :  { %v1523_v63 = vsel %vm686_vm8, nan, %v1522_v41  ;;  %v6896_v36 = vshrl.u32 %v6895_v12, 30  ;;  %v7150_v19 = vshrl.u32 %v7149_v6, 23  ;;  %v6803_v34 = vshll.u32 %v11083_v8, %v6801_v54 }
 0x19a   :  { %v9727_v45 = vpack.i.bf16 %v1420_v30, %v1523_v63  ;;  %v6804_v32 = vshrl.u32 %v6786_v5, %v6802_v43  ;;  %v6807_v18 = vadd.s32 127, %v6806_v25  ;;  %v7253_v56 = vand.u32 2139095040, %v11135_v50 }
 0x19b   :  { %v6897_v17 = vshll.u32 %v6896_v36, 30  ;;  %v6920_v4 = vsub.s32 4, %v6896_v36  ;;  %v9336_v29 = vadd.s32 4294967169, %v7150_v19  ;;  %v7153_v15 = vand.u32 8388607, %v7146_v40 }
 0x19c   :  { %9728 = vxpose.xlu0.b32.cont [6/16] %v9727_v45, 128  ;;  %v6805_v0 = vor.u32 %v6804_v32, %v6803_v34  ;;  %v6808_v58 = vshll.u32 %v6807_v18, 23  ;;  %v7254_v35 = vshrl.u32 %v7253_v56, 23  ;;  %v14793_v47 = vand.u32 2147483647, %v10761_v7 }
 0x19d   :  { %vm6836_vm8 = vcmp.lt.s32.totalorder %v10875_v31, 0  ;;  %v6898_v8 = vsub.s32 %v6894_v2, %v6897_v17  ;;  %v7156_v62 = vadd.s32 1, %v9336_v29  ;;  %v7154_v24 = vor.u32 8388608, %v7153_v15 }
 0x19e   :  { %vm11152_vm1 = vcmp.le.f32.partialorder %v14793_v47, 0.7853982  ;;  %v6809_v16 = vor.u32 4788187, %v6808_v58  ;;  %v6921_v57 = vsel %vm6836_vm8, %v6920_v4, %v6896_v36  ;;  %v9340_v26 = vadd.s32 4294967169, %v7254_v35 }
 0x19f   :  { %v11159_v37 = vsel %vm11152_vm1, 0, %v6817_v53  ;;  %v6900_v49 = vsub.s32 0, %v6898_v8  ;;  %vm7157_vm14 = vcmp.gt.s32.totalorder %v7156_v62, 0  ;;  %v7250_v27 = vand.u32 2147483647, %v11135_v50 }
 0x1a0   :  { %v6810_v60 = vand.u32 2147483647, %v6809_v16  ;;  %v6812_v3 = vcvt.s32.f32 %v6805_v0  ;;  %v14796_v30 = vand.u32 2147483647, %v10875_v31  ;;  %v7158_v59 = vsel %vm7157_vm14, %v7156_v62, 0 }
 0x1a1   :  { %v9325_v14 = vmin.u32 %v6900_v49, %v6898_v8  ;;  %v7160_v6 = vand.u32 31, %v7158_v59  ;;  %v11175_v12 = vadd.s32 3, %v11159_v37  ;;  %v7260_v63 = vadd.s32 1, %v9340_v26 }
 0x1a2   :  { %vm11166_vm0 = vcmp.le.f32.partialorder %v14796_v30, 0.7853982  ;;  %v6813_v54 = vmul.f32 %v6812_v3, %v6810_v60  ;;  %v6890_v5 = vadd.s32 %v11077_v33, %v11087_v52  ;;  %v11179_v25 = vshll.u32 %v7154_v24, 8 }
 0x1a3   :  { %v11172_v41 = vsel %vm11166_vm0, 0, %v6921_v57  ;;  %v6902_v43 = vclz %v9325_v14  ;;  %v11183_v45 = vand.u32 8388607, %v7250_v27  ;;  %v7159_v19 = vshrl.u32 %v7158_v59, 5 }
 0x1a4   :  { %v6814_v53 = vxor.u32 2147483648, %v6813_v54  ;;  %v11186_v36 = vadd.s32 3, %v11172_v41  ;;  %v7161_v34 = vsub.s32 32, %v7160_v6  ;;  %v7163_v18 = vshll.u32 %v14749_v38, %v7160_v6 }
 0x1a5   :  { %v9326_v32 = vadd.s32 4294967294, %v6902_v43  ;;  %v7166_v56 = vshll.u32 %v14735_v42, %v7160_v6  ;;  %v7169_v33 = vshll.u32 %v14733_v44, %v7160_v6  ;;  %v7172_v29 = vshll.u32 %v14722_v46, %v7160_v6 }
 0x1a6   :  { %v6815_v52 = vsel %vm6732_vm10, %v6814_v53, %v6813_v54  ;;  %v7164_v17 = vshrl.u32 %v14735_v42, %v7161_v34  ;;  %v7167_v4 = vshrl.u32 %v14733_v44, %v7161_v34  ;;  %vm7261_vm15 = vcmp.gt.s32.totalorder %v7260_v63, 0 }
 0x1a7   :  { %v6818_v15 = vsel %vm11152_vm1, %v10761_v7, %v6815_v52  ;;  %vm9327_vm2 = vcmp.lt.s32.totalorder %v9326_v32, 0  ;;  %v7170_v0 = vshrl.u32 %v14722_v46, %v7161_v34  ;;  %v7173_v58 = vshrl.u32 %v14751_v48, %v7161_v34 }
 0x1a8   :  { %v6905_v35 = vsel %vm9327_vm2, 0, %v9326_v32  ;;  %v7165_v47 = vor.u32 %v7164_v17, %v7163_v18  ;;  %v7168_v62 = vor.u32 %v7167_v4, %v7166_v56  ;;  %v7175_v16 = vshll.u32 %v14751_v48, %v7160_v6 }
 0x1a9   :  { %9861 = vcosq.f32 %v6818_v15  ;;  %v6906_v57 = vsub.s32 32, %v6905_v35  ;;  %v6910_v26 = vsub.s32 4294967266, %v6905_v35  ;;  %v7162_v49 = vshrl.u32 %v14749_v38, %v7161_v34 }
 0x1aa   :  { %9863 = vsinq.f32 %v6818_v15  ;;  %v7171_v24 = vor.u32 %v7170_v0, %v7169_v33  ;;  %v7174_v60 = vor.u32 %v7173_v58, %v7172_v29  ;;  %v7176_v39 = vshrl.u32 %v14724_v55, %v7161_v34 }
 0x1ab   :  { %v6907_v3 = vshll.u32 %v6898_v8, %v6905_v35  ;;  %v6908_v30 = vshrl.u32 %v6890_v5, %v6906_v57  ;;  %v6911_v59 = vadd.s32 127, %v6910_v26  ;;  %vm7178_vm4 = vcmp.lt.s32.totalorder %v7159_v19, 1 }
 0x1ac   :  { %v7177_v14 = vor.u32 %v7176_v39, %v7175_v16  ;;  %vm7180_vm5 = vcmp.lt.s32.totalorder %v7159_v19, 3  ;;  %vm7181_vm6 = vcmp.lt.s32.totalorder %v7159_v19, 4  ;;  %v7186_v54 = vsel %vm7178_vm4, %v7165_v47, %v7168_v62 }
 0x1ad   :  { %v6909_v43 = vor.u32 %v6908_v30, %v6907_v3  ;;  %v6912_v6 = vshll.u32 %v6911_v59, 23  ;;  %v7183_v53 = vsel %vm7181_vm6, %v7171_v24, 2102212464  ;;  %v7187_v32 = vsel %vm7181_vm6, %v7174_v60, 920167782 }
 0x1ae   :  { %vm7179_vm7 = vcmp.lt.s32.totalorder %v7159_v19, 2  ;;  %v7188_v18 = vsel %vm7180_vm5, %v7171_v24, %v7187_v32  ;;  %v7190_v56 = vsel %vm7178_vm4, %v7168_v62, %v7171_v24  ;;  %v7191_v33 = vsel %vm7181_vm6, %v7177_v14, 1326507024 }
 0x1af   :  { %v6913_v52 = vor.u32 4788187, %v6912_v6  ;;  %v7182_v17 = vsel %vm7178_vm4, %v7162_v49, %v7165_v47  ;;  %v7189_v8 = vsel %vm7179_vm7, %v7186_v54, %v7188_v18  ;;  %v7258_v5 = vor.u32 8388608, %v11183_v45 }
 0x1b0   :  { %v7184_v34 = vsel %vm7180_vm5, %v7168_v62, %v7183_v53  ;;  %v7192_v4 = vsel %vm7180_vm5, %v7174_v60, %v7191_v33  ;;  %v11210_v29 = vmul.u32.u64.low %v11179_v25, %v7189_v8  ;;  %v11211_v15 = vmul.u32.u64.high %v11179_v25, %v7189_v8, %v11210_v29 }
 0x1b1   :  { %v6914_v0 = vand.u32 2147483647, %v6913_v52  ;;  %v6916_v58 = vcvt.s32.f32 %v6909_v43  ;;  %v7193_v35 = vsel %vm7179_vm7, %v7190_v56, %v7192_v4  ;;  %v7262_v16 = vsel %vm7261_vm15, %v7260_v63, 0 }
 0x1b2   :  { %v11217_v47 = vmul.u32.u64.low %v11179_v25, %v7193_v35  ;;  %v11218_v57 = vmul.u32.u64.high %v11179_v25, %v7193_v35, %v11217_v47  ;;  %v7264_v45 = vand.u32 31, %v7262_v16  ;;  %v11221_v62 = vand.u32 3, %v11175_v12 }
 0x1b3   :  { %v6917_v26 = vmul.f32 %v6916_v58, %v6914_v0  ;;  %v7185_v49 = vsel %vm7179_vm7, %v7182_v17, %v7184_v34  ;;  %v7204_v24 = vadd.s32 1, %v11211_v15  ;;  %v11226_v3 = vand.u32 3, %v11186_v36 }
 0x1b4   :  { %v7265_v60 = vsub.s32 32, %v7264_v45  ;;  %v11228_v30 = vshll.u32 %v7258_v5, 8  ;;  %v11231_v63 = vmul.f32 2.0, %v10126_v11  ;;  %v7201_v12 = vmul.u32 %v11179_v25, %v7185_v49 }
 0x1b5   :  { %v6918_v39 = vxor.u32 2147483648, %v6917_v26  ;;  %vm7203_vm10 = vc.u32 %v11218_v57, %v11210_v29  ;;  %v11238_v19 = vshrl.u32 %v7262_v16, 5  ;;  %v11241_v14 = vmul.f32 2.0, %v10123_v10 }
 0x1b6   :  { %v11233_v59 = vpop.eup %9861  ;;  %vm6829_vm12 = vcmp.eq.s32.totalorder %v11221_v62, 2  ;;  %v7205_v43 = vsel %vm7203_vm10, %v7204_v24, %v11211_v15  ;;  %v7267_v6 = vshll.u32 %v14749_v38, %v7264_v45  ;;  %v7268_v25 = vshrl.u32 %v14735_v42, %v7265_v60 }
 0x1b7   :  { %v11243_v54 = vpop.eup %9863  ;;  %v6919_v36 = vsel %vm6836_vm8, %v6918_v39, %v6917_v26  ;;  %vm6826_vm3 = vcmp.eq.s32.totalorder %v11221_v62, 0  ;;  %v7206_v32 = vadd.s32 %v7205_v43, %v7201_v12  ;;  %v7270_v18 = vshll.u32 %v14735_v42, %v7264_v45 }
 0x1b8   :  { %v6922_v53 = vsel %vm11166_vm0, %v10875_v31, %v6919_v36  ;;  %v7271_v56 = vshrl.u32 %v14733_v44, %v7265_v60  ;;  %v7273_v33 = vshll.u32 %v14733_v44, %v7264_v45  ;;  %v7274_v52 = vshrl.u32 %v14722_v46, %v7265_v60 }
 0x1b9   :  { %9865 = vcosq.f32 %v6922_v53  ;;  %v7276_v17 = vshll.u32 %v14722_v46, %v7264_v45  ;;  %v7207_v8 = vadd.s32 536870912, %v7206_v32  ;;  %v7269_v5 = vor.u32 %v7268_v25, %v7267_v6 }
 0x1ba   :  { %9867 = vsinq.f32 %v6922_v53  ;;  %v7272_v34 = vor.u32 %v7271_v56, %v7270_v18  ;;  %v7275_v4 = vor.u32 %v7274_v52, %v7273_v33  ;;  %v7277_v2 = vshrl.u32 %v14751_v48, %v7265_v60 }
 0x1bb   :  { %v7279_v15 = vshll.u32 %v14751_v48, %v7264_v45  ;;  %v7280_v0 = vshrl.u32 %v14724_v55, %v7265_v60  ;;  %v14716_v58 = vxor.u32 2147483648, %v11233_v59  ;;  %v7208_v35 = vshrl.u32 %v7207_v8, 30 }
 0x1bc   :  { %v7266_v16 = vshrl.u32 %v14749_v38, %v7265_v60  ;;  %v1741_v47 = vand.u32 2139095040, %v11231_v63  ;;  %vm6825_vm9 = vcmp.lt.s32.totalorder %v11221_v62, 2  ;;  %v14717_v26 = vxor.u32 2147483648, %v11243_v54 }
 0x1bd   :  { %v7278_v49 = vor.u32 %v7277_v2, %v7276_v17  ;;  %v7281_v24 = vor.u32 %v7280_v0, %v7279_v15  ;;  %vm7282_vm11 = vcmp.lt.s32.totalorder %v11238_v19, 1  ;;  %v7209_v39 = vshll.u32 %v7208_v35, 30 }
 0x1be   :  { %vm7284_vm13 = vcmp.lt.s32.totalorder %v11238_v19, 3  ;;  %vm7285_vm1 = vcmp.lt.s32.totalorder %v11238_v19, 4  ;;  %v7290_v45 = vsel %vm7282_vm11, %v7269_v5, %v7272_v34  ;;  %v7294_v43 = vsel %vm7282_vm11, %v7272_v34, %v7275_v4 }
 0x1bf   :  { %v7287_v12 = vsel %vm7285_vm1, %v7275_v4, 2102212464  ;;  %v7291_v36 = vsel %vm7285_vm1, %v7278_v49, 920167782  ;;  %v7295_v60 = vsel %vm7285_vm1, %v7281_v24, 1326507024  ;;  %vm6822_vm8 = vweird.f32 %v10761_v7 }
 0x1c0   :  { %v6831_v6 = vsel %vm6829_vm12, %v14716_v58, %v11243_v54  ;;  %v11277_v25 = vsub.s32 %v7206_v32, %v7209_v39  ;;  %vm7283_vm14 = vcmp.lt.s32.totalorder %v11238_v19, 2  ;;  %v7292_v53 = vsel %vm7284_vm13, %v7275_v4, %v7291_v36 }
 0x1c1   :  { %v6828_v18 = vsel %vm6826_vm3, %v11233_v59, %v14717_v26  ;;  %v7286_v56 = vsel %vm7282_vm11, %v7266_v16, %v7269_v5  ;;  %v7293_v33 = vsel %vm7283_vm14, %v7290_v45, %v7292_v53  ;;  %v7296_v52 = vsel %vm7284_vm13, %v7278_v49, %v7295_v60 }
 0x1c2   :  { %vm11293_vm0 = vcmp.le.f32.partialorder %v7146_v40, 0.7853982  ;;  %v7212_v17 = vsub.s32 0, %v11277_v25  ;;  %v7232_v8 = vsub.s32 4, %v7208_v35  ;;  %v7288_v4 = vsel %vm7284_vm13, %v7272_v34, %v7287_v12 }
 0x1c3   :  { %v7297_v5 = vsel %vm7283_vm14, %v7294_v43, %v7296_v52  ;;  %vm6926_vm15 = vweird.f32 %v10875_v31  ;;  %v11308_v40 = vmul.u32.u64.low %v11228_v30, %v7293_v33  ;;  %v11309_v0 = vmul.u32.u64.high %v11228_v30, %v7293_v33, %v11308_v40 }
 0x1c4   :  { %v11304_v2 = vmul.u32.u64.low %v11228_v30, %v7297_v5  ;;  %v11305_v15 = vmul.u32.u64.high %v11228_v30, %v7297_v5, %v11304_v2  ;;  %vm6929_vm2 = vcmp.lt.s32.totalorder %v11226_v3, 2  ;;  %vm7148_vm4 = vcmp.lt.s32.totalorder %v11101_v28, 0 }
 0x1c5   :  { %v9337_v16 = vmin.u32 %v7212_v17, %v11277_v25  ;;  %v1742_v34 = vshrl.u32 %v1741_v47, 23  ;;  %vm6930_vm5 = vcmp.eq.s32.totalorder %v11226_v3, 0  ;;  %vm6933_vm6 = vcmp.eq.s32.totalorder %v11226_v3, 2 }
 0x1c6   :  { %v7289_v49 = vsel %vm7283_vm14, %v7286_v56, %v7288_v4  ;;  %v14715_v24 = vand.u32 2147483647, %v11231_v63  ;;  %v11319_v39 = vpop.eup %9865  ;;  %v6832_v45 = vsel %vm6825_vm9, %v6828_v18, %v6831_v6  ;;  %v7202_v12 = vadd.s32 %v11210_v29, %v11218_v57 }
 0x1c7   :  { %v7214_v36 = vclz %v9337_v16  ;;  %v7233_v47 = vsel %vm7148_vm4, %v7232_v8, %v7208_v35  ;;  %v11327_v43 = vpop.eup %9867  ;;  %v14713_v60 = vxor.u32 2147483648, %v11319_v39  ;;  %vm7307_vm7 = vc.u32 %v11305_v15, %v11308_v40 }
 0x1c8   :  { %v7308_v19 = vadd.s32 1, %v11309_v0  ;;  %v1845_v53 = vand.u32 2139095040, %v11241_v14  ;;  %v14714_v62 = vxor.u32 2147483648, %v11327_v43  ;;  %v7305_v18 = vmul.u32 %v11228_v30, %v7289_v49 }
 0x1c9   :  { %v9338_v6 = vadd.s32 4294967294, %v7214_v36  ;;  %v9128_v29 = vadd.s32 4294967169, %v1742_v34  ;;  %v6833_v57 = vsel %vm6822_vm8, nan, %v6832_v45  ;;  %v6935_v35 = vsel %vm6933_vm6, %v14713_v60, %v11327_v43 }
 0x1ca   :  { %v7309_v56 = vsel %vm7307_vm7, %v7308_v19, %v11309_v0  ;;  %v1745_v33 = vand.u32 8388607, %v14715_v24  ;;  %v6932_v30 = vsel %vm6930_vm5, %v11319_v39, %v14714_v62  ;;  %v11354_v5 = vsel %vm11293_vm0, 0, %v7233_v47 }
 0x1cb   :  { %vm9339_vm10 = vcmp.lt.s32.totalorder %v9338_v6, 0  ;;  %v7310_v52 = vadd.s32 %v7309_v56, %v7305_v18  ;;  %v1748_v17 = vadd.s32 1, %v9128_v29  ;;  %v6936_v8 = vsel %vm6929_vm2, %v6932_v30, %v6935_v35 }
 0x1cc   :  { %v7217_v4 = vsel %vm9339_vm10, 0, %v9338_v6  ;;  %v1846_v2 = vshrl.u32 %v1845_v53, 23  ;;  %v6937_v0 = vsel %vm6926_vm15, nan, %v6936_v8  ;;  %v14712_v49 = vand.u32 2147483647, %v11241_v14 }
 0x1cd   :  { %v7218_v16 = vsub.s32 32, %v7217_v4  ;;  %v7222_v34 = vsub.s32 4294967266, %v7217_v4  ;;  %v9629_v45 = vpack.i.bf16 %v6833_v57, %v6937_v0  ;;  %v7311_v36 = vadd.s32 536870912, %v7310_v52 }
 0x1ce   :  { %v1746_v19 = vor.u32 8388608, %v1745_v33  ;;  %vm1749_vm12 = vcmp.gt.s32.totalorder %v1748_v17, 0  ;;  %v7219_v3 = vshll.u32 %v11277_v25, %v7217_v4  ;;  %v9132_v53 = vadd.s32 4294967169, %v1846_v2 }
 0x1cf   :  { %v7220_v18 = vshrl.u32 %v7202_v12, %v7218_v16  ;;  %v7223_v6 = vadd.s32 127, %v7222_v34  ;;  %v1750_v29 = vsel %vm1749_vm12, %v1748_v17, 0  ;;  %9630 = vxpose.xlu1.b32.cont [3/6] (short) %v9629_v45, 128  ;;  %v7312_v47 = vshrl.u32 %v7311_v36, 30 }
 0x1d0   :  { %v1752_v35 = vand.u32 31, %v1750_v29  ;;  %vm11362_vm3 = vcmp.le.f32.partialorder %v7250_v27, 0.7853982  ;;  %vm7252_vm9 = vcmp.lt.s32.totalorder %v11135_v50, 0  ;;  %v11368_v57 = vadd.s32 3, %v11354_v5 }
 0x1d1   :  { %v7221_v56 = vor.u32 %v7220_v18, %v7219_v3  ;;  %v7224_v30 = vshll.u32 %v7223_v6, 23  ;;  %v7306_v25 = vadd.s32 %v11308_v40, %v11305_v15  ;;  %v7313_v12 = vshll.u32 %v7312_v47, 30 }
 0x1d2   :  { %v1753_v33 = vsub.s32 32, %v1752_v35  ;;  %v7336_v4 = vsub.s32 4, %v7312_v47  ;;  %v11371_v2 = vshll.u32 %v1746_v19, 8  ;;  %v11375_v0 = vand.u32 8388607, %v14712_v49 }
 0x1d3   :  { %v7225_v17 = vor.u32 4788187, %v7224_v30  ;;  %v7314_v27 = vsub.s32 %v7310_v52, %v7313_v12  ;;  %v1751_v16 = vshrl.u32 %v1750_v29, 5  ;;  %v1852_v45 = vadd.s32 1, %v9132_v53 }
 0x1d4   :  { %v1756_v34 = vshrl.u32 %v14735_v42, %v1753_v33  ;;  %v7228_v3 = vcvt.s32.f32 %v7221_v56  ;;  %v1759_v18 = vshrl.u32 %v14733_v44, %v1753_v33  ;;  %v1762_v15 = vshrl.u32 %v14722_v46, %v1753_v33 }
 0x1d5   :  { %v7226_v36 = vand.u32 2147483647, %v7225_v17  ;;  %v7316_v40 = vsub.s32 0, %v7314_v27  ;;  %v1755_v6 = vshll.u32 %v14749_v38, %v1752_v35  ;;  %v1758_v19 = vshll.u32 %v14735_v42, %v1752_v35 }
 0x1d6   :  { %v1761_v30 = vshll.u32 %v14733_v44, %v1752_v35  ;;  %v7337_v52 = vsel %vm7252_vm9, %v7336_v4, %v7312_v47  ;;  %v1764_v29 = vshll.u32 %v14722_v46, %v1752_v35  ;;  %v1765_v53 = vshrl.u32 %v14751_v48, %v1753_v33 }
 0x1d7   :  { %v7229_v51 = vmul.f32 %v7228_v3, %v7226_v36  ;;  %v9341_v56 = vmin.u32 %v7316_v40, %v7314_v27  ;;  %v1757_v12 = vor.u32 %v1756_v34, %v1755_v6  ;;  %v1768_v49 = vshrl.u32 %v14724_v55, %v1753_v33 }
 0x1d8   :  { %v1763_v17 = vor.u32 %v1762_v15, %v1761_v30  ;;  %v1760_v62 = vor.u32 %v1759_v18, %v1758_v19  ;;  %v1766_v24 = vor.u32 %v1765_v53, %v1764_v29  ;;  %v1767_v58 = vshll.u32 %v14751_v48, %v1752_v35 }
 0x1d9   :  { %v7230_v60 = vxor.u32 2147483648, %v7229_v51  ;;  %v7318_v26 = vclz %v9341_v56  ;;  %v11391_v36 = vsel %vm11362_vm3, 0, %v7337_v52  ;;  %v1754_v47 = vshrl.u32 %v14749_v38, %v1753_v33 }
 0x1da   :  { %vm1853_vm11 = vcmp.gt.s32.totalorder %v1852_v45, 0  ;;  %v1769_v34 = vor.u32 %v1768_v49, %v1767_v58  ;;  %vm1770_vm13 = vcmp.lt.s32.totalorder %v1751_v16, 1  ;;  %vm1773_vm1 = vcmp.lt.s32.totalorder %v1751_v16, 4 }
 0x1db   :  { %v7231_v4 = vsel %vm7148_vm4, %v7230_v60, %v7229_v51  ;;  %v9342_v18 = vadd.s32 4294967294, %v7318_v26  ;;  %vm1771_vm14 = vcmp.lt.s32.totalorder %v1751_v16, 2  ;;  %v1775_v35 = vsel %vm1773_vm1, %v1763_v17, 2102212464 }
 0x1dc   :  { %v7234_v3 = vsel %vm11293_vm0, %v11101_v28, %v7231_v4  ;;  %vm1772_vm2 = vcmp.lt.s32.totalorder %v1751_v16, 3  ;;  %v1778_v15 = vsel %vm1770_vm13, %v1757_v12, %v1760_v62  ;;  %v1779_v33 = vsel %vm1773_vm1, %v1766_v24, 920167782 }
 0x1dd   :  { %9869 = vcosq.f32 %v7234_v3  ;;  %vm9343_vm5 = vcmp.lt.s32.totalorder %v9342_v18, 0  ;;  %v1774_v51 = vsel %vm1770_vm13, %v1754_v47, %v1757_v12  ;;  %v1776_v58 = vsel %vm1772_vm2, %v1760_v62, %v1775_v35 }
 0x1de   :  { %v1780_v60 = vsel %vm1772_vm2, %v1763_v17, %v1779_v33  ;;  %v7321_v49 = vsel %vm9343_vm5, 0, %v9342_v18  ;;  %v1782_v32 = vsel %vm1770_vm13, %v1760_v62, %v1763_v17  ;;  %v1783_v26 = vsel %vm1773_vm1, %v1769_v34, 1326507024 }
 0x1df   :  { %v1781_v40 = vsel %vm1771_vm14, %v1778_v15, %v1780_v60  ;;  %9871 = vsinq.f32 %v7234_v3  ;;  %v7322_v6 = vsub.s32 32, %v7321_v49  ;;  %v7326_v19 = vsub.s32 4294967266, %v7321_v49 }
 0x1e0   :  { %v1784_v30 = vsel %vm1772_vm2, %v1766_v24, %v1783_v26  ;;  %v7323_v52 = vshll.u32 %v7314_v27, %v7321_v49  ;;  %v11408_v53 = vmul.u32.u64.low %v11371_v2, %v1781_v40  ;;  %v11409_v56 = vmul.u32.u64.high %v11371_v2, %v1781_v40, %v11408_v53 }
 0x1e1   :  { %v1785_v29 = vsel %vm1771_vm14, %v1782_v32, %v1784_v30  ;;  %v7324_v12 = vshrl.u32 %v7306_v25, %v7322_v6  ;;  %v7327_v47 = vadd.s32 127, %v7326_v19  ;;  %v1777_v62 = vsel %vm1771_vm14, %v1774_v51, %v1776_v58 }
 0x1e2   :  { %v11412_v4 = vmul.u32.u64.low %v11371_v2, %v1785_v29  ;;  %v11413_v18 = vmul.u32.u64.high %v11371_v2, %v1785_v29, %v11412_v4  ;;  %v1854_v17 = vsel %vm1853_vm11, %v1852_v45, 0  ;;  %v7343_v27 = vadd.s32 3, %v11391_v36 }
 0x1e3   :  { %v7325_v34 = vor.u32 %v7324_v12, %v7323_v52  ;;  %v7328_v3 = vshll.u32 %v7327_v47, 23  ;;  %v1856_v24 = vand.u32 31, %v1854_v17  ;;  %v1796_v35 = vadd.s32 1, %v11409_v56 }
 0x1e4   :  { %v1850_v15 = vor.u32 8388608, %v11375_v0  ;;  %v11421_v25 = vand.u32 3, %v11368_v57  ;;  %v1793_v60 = vmul.u32 %v11371_v2, %v1777_v62  ;;  %vm1795_vm0 = vc.u32 %v11413_v18, %v11408_v53 }
 0x1e5   :  { %v7329_v33 = vor.u32 4788187, %v7328_v3  ;;  %v1797_v16 = vsel %vm1795_vm0, %v1796_v35, %v11409_v56  ;;  %v1857_v45 = vsub.s32 32, %v1856_v24  ;;  %v7332_v58 = vcvt.s32.f32 %v7325_v34 }
 0x1e6   :  { %v1798_v49 = vadd.s32 %v1797_v16, %v1793_v60  ;;  %v11427_v40 = vand.u32 3, %v11159_v37  ;;  %v11429_v32 = vand.u32 3, %v7343_v27  ;;  %v11431_v0 = vshll.u32 %v1850_v15, 8 }
 0x1e7   :  { %v7330_v51 = vand.u32 2147483647, %v7329_v33  ;;  %v11434_v57 = vand.u32 3, %v11172_v41  ;;  %vm7245_vm4 = vcmp.eq.s32.totalorder %v11421_v25, 2  ;;  %v1860_v19 = vshrl.u32 %v14735_v42, %v1857_v45 }
 0x1e8   :  { %v1799_v6 = vadd.s32 536870912, %v1798_v49  ;;  %v1863_v30 = vshrl.u32 %v14733_v44, %v1857_v45  ;;  %v11441_v52 = vshrl.u32 %v1854_v17, 5  ;;  %v1859_v37 = vshll.u32 %v14749_v38, %v1856_v24 }
 0x1e9   :  { %v7333_v2 = vmul.f32 %v7332_v58, %v7330_v51  ;;  %v1866_v29 = vshrl.u32 %v14722_v46, %v1857_v45  ;;  %v1869_v56 = vshrl.u32 %v14751_v48, %v1857_v45  ;;  %vm7242_vm6 = vcmp.eq.s32.totalorder %v11421_v25, 0 }
 0x1ea   :  { %v11436_v26 = vpop.eup %9869  ;;  %v11447_v12 = vshrl.u32 %v1799_v6, 30  ;;  %v1862_v47 = vshll.u32 %v14735_v42, %v1856_v24  ;;  %v1865_v4 = vshll.u32 %v14733_v44, %v1856_v24  ;;  %vm7657_vm7 = vcmp.eq.s32.totalorder %v11427_v40, 0 }
 0x1eb   :  { %v7334_v41 = vxor.u32 2147483648, %v7333_v2  ;;  %v14721_v17 = vxor.u32 2147483648, %v11436_v26  ;;  %v1868_v34 = vshll.u32 %v14722_v46, %v1856_v24  ;;  %v1871_v3 = vshll.u32 %v14751_v48, %v1856_v24 }
 0x1ec   :  { %v11452_v62 = vpop.eup %9871  ;;  %v1872_v27 = vshrl.u32 %v14724_v55, %v1857_v45  ;;  %v1801_v15 = vshll.u32 %v11447_v12, 30  ;;  %v1861_v33 = vor.u32 %v1860_v19, %v1859_v37  ;;  %v1864_v60 = vor.u32 %v1863_v30, %v1862_v47 }
 0x1ed   :  { %v7335_v35 = vsel %vm7252_vm9, %v7334_v41, %v7333_v2  ;;  %v1867_v51 = vor.u32 %v1866_v29, %v1865_v4  ;;  %v1870_v58 = vor.u32 %v1869_v56, %v1868_v34  ;;  %vm7656_vm10 = vcmp.lt.s32.totalorder %v11427_v40, 2 }
 0x1ee   :  { %v7338_v16 = vsel %vm11362_vm3, %v11135_v50, %v7335_v35  ;;  %v1873_v6 = vor.u32 %v1872_v27, %v1871_v3  ;;  %vm7241_vm12 = vcmp.lt.s32.totalorder %v11421_v25, 2  ;;  %v11467_v24 = vadd.s32 %v11408_v53, %v11413_v18 }
 0x1ef   :  { %9873 = vcosq.f32 %v7338_v16  ;;  %v11469_v2 = vsub.s32 %v1798_v49, %v1801_v15  ;;  %vm7660_vm9 = vcmp.eq.s32.totalorder %v11427_v40, 2  ;;  %v7243_v19 = vxor.u32 2147483648, %v11452_v62 }
 0x1f0   :  { %9875 = vsinq.f32 %v7338_v16  ;;  %v1858_v8 = vshrl.u32 %v14749_v38, %v1857_v45  ;;  %vm1874_vm3 = vcmp.lt.s32.totalorder %v11441_v52, 1  ;;  %vm1876_vm11 = vcmp.lt.s32.totalorder %v11441_v52, 3 }
 0x1f1   :  { %v1804_v30 = vsub.s32 0, %v11469_v2  ;;  %vm1877_vm13 = vcmp.lt.s32.totalorder %v11441_v52, 4  ;;  %v1882_v53 = vsel %vm1874_vm3, %v1861_v33, %v1864_v60  ;;  %v7247_v18 = vsel %vm7245_vm4, %v14721_v17, %v11452_v62 }
 0x1f2   :  { %vm1740_vm1 = vcmp.lt.s32.totalorder %v11231_v63, 0  ;;  %v1879_v45 = vsel %vm1877_vm13, %v1867_v51, 2102212464  ;;  %v1883_v49 = vsel %vm1877_vm13, %v1870_v58, 920167782  ;;  %vm1875_vm14 = vcmp.lt.s32.totalorder %v11441_v52, 2 }
 0x1f3   :  { %v1887_v37 = vsel %vm1877_vm13, %v1873_v6, 1326507024  ;;  %v9129_v29 = vmin.u32 %v1804_v30, %v11469_v2  ;;  %v1884_v56 = vsel %vm1876_vm11, %v1867_v51, %v1883_v49  ;;  %v1886_v41 = vsel %vm1874_vm3, %v1864_v60, %v1867_v51 }
 0x1f4   :  { %v7244_v47 = vsel %vm7242_vm6, %v11436_v26, %v7243_v19  ;;  %v1885_v4 = vsel %vm1875_vm14, %v1882_v53, %v1884_v56  ;;  %v1888_v34 = vsel %vm1876_vm11, %v1870_v58, %v1887_v37  ;;  %v14803_v3 = vxor.u32 2147483648, %v11243_v54 }
 0x1f5   :  { %v1806_v35 = vclz %v9129_v29  ;;  %v1824_v15 = vsub.s32 4, %v11447_v12  ;;  %v1878_v16 = vsel %vm1874_vm3, %v1858_v8, %v1861_v33  ;;  %v1880_v51 = vsel %vm1876_vm11, %v1864_v60, %v1879_v45 }
 0x1f6   :  { %v7659_v27 = vsel %vm7657_vm7, %v11233_v59, %v14803_v3  ;;  %vm7349_vm2 = vcmp.eq.s32.totalorder %v11429_v32, 2  ;;  %v1889_v58 = vsel %vm1875_vm14, %v1886_v41, %v1888_v34  ;;  %v14804_v53 = vxor.u32 2147483648, %v11233_v59 }
 0x1f7   :  { %v11515_v6 = vmul.u32.u64.low %v11431_v0, %v1885_v4  ;;  %v11516_v30 = vmul.u32.u64.high %v11431_v0, %v1885_v4, %v11515_v6  ;;  %vm7238_vm5 = vweird.f32 %v11101_v28  ;;  %vm7346_vm0 = vcmp.eq.s32.totalorder %v11429_v32, 0 }
 0x1f8   :  { %v7662_v49 = vsel %vm7660_vm9, %v14804_v53, %v11243_v54  ;;  %v9130_v33 = vadd.s32 4294967294, %v1806_v35  ;;  %v11527_v60 = vmul.u32.u64.low %v11431_v0, %v1889_v58  ;;  %v11528_v8 = vmul.u32.u64.high %v11431_v0, %v1889_v58, %v11527_v60 }
 0x1f9   :  { %v7663_v45 = vsel %vm7656_vm10, %v7659_v27, %v7662_v49  ;;  %v7248_v37 = vsel %vm7241_vm12, %v7244_v47, %v7247_v18  ;;  %v1881_v59 = vsel %vm1875_vm14, %v1878_v16, %v1880_v51  ;;  %vm7760_vm4 = vcmp.eq.s32.totalorder %v11434_v57, 0 }
 0x1fa   :  { %vm7763_vm6 = vcmp.eq.s32.totalorder %v11434_v57, 2  ;;  %vm7342_vm7 = vweird.f32 %v11135_v50  ;;  %v14805_v54 = vand.u32 2147483647, %v11231_v63  ;;  %vm9131_vm3 = vcmp.lt.s32.totalorder %v9130_v33, 0 }
 0x1fb   :  { %vm7759_vm10 = vcmp.lt.s32.totalorder %v11434_v57, 2  ;;  %v14808_v25 = vxor.u32 2147483648, %v11327_v43  ;;  %v14809_v52 = vxor.u32 2147483648, %v11319_v39  ;;  %v1809_v56 = vsel %vm9131_vm3, 0, %v9130_v33 }
 0x1fc   :  { %vm11541_vm9 = vcmp.le.f32.partialorder %v14805_v54, 0.7853982  ;;  %v1900_v41 = vadd.s32 1, %v11516_v30  ;;  %v11554_v4 = vmul.f32 2.0, %v10289_v13  ;;  %v1810_v34 = vsub.s32 32, %v1809_v56  ;;  %v11561_v35 = vpop.eup %9873 }
 0x1fd   :  { %v7762_v40 = vsel %vm7760_vm4, %v11319_v39, %v14808_v25  ;;  %v7765_v18 = vsel %vm7763_vm6, %v14809_v52, %v11327_v43  ;;  %v1814_v3 = vsub.s32 4294967266, %v1809_v56  ;;  %v1825_v57 = vsel %vm1740_vm1, %v1824_v15, %v11447_v12  ;;  %v11569_v51 = vpop.eup %9875 }
 0x1fe   :  { %v7766_v47 = vsel %vm7759_vm10, %v7762_v40, %v7765_v18  ;;  %v7664_v27 = vsel %vm6822_vm8, nan, %v7663_v45  ;;  %v1811_v39 = vshll.u32 %v11469_v2, %v1809_v56  ;;  %v1897_v43 = vmul.u32 %v11431_v0, %v1881_v59 }
 0x1ff   :  { %vm1899_vm12 = vc.u32 %v11528_v8, %v11515_v6  ;;  %v7767_v16 = vsel %vm6926_vm15, nan, %v7766_v47  ;;  %v14719_v58 = vxor.u32 2147483648, %v11561_v35  ;;  %v1812_v12 = vshrl.u32 %v11467_v24, %v1810_v34 }
 0x200   :  { %v1815_v7 = vadd.s32 127, %v1814_v3  ;;  %v1901_v15 = vsel %vm1899_vm12, %v1900_v41, %v11516_v30  ;;  %v14720_v53 = vxor.u32 2147483648, %v11569_v51  ;;  %v9633_v49 = vpack.i.bf16 %v7664_v27, %v7767_v16 }
 0x201   :  { %v1902_v2 = vadd.s32 %v1901_v15, %v1897_v43  ;;  %v14718_v0 = vand.u32 2147483647, %v11554_v4  ;;  %v7351_v31 = vsel %vm7349_vm2, %v14719_v58, %v11569_v51  ;;  %v1813_v33 = vor.u32 %v1812_v12, %v1811_v39 }
 0x202   :  { %v1816_v60 = vshll.u32 %v1815_v7, 23  ;;  %v2157_v45 = vand.u32 2139095040, %v11554_v4  ;;  %v7249_v24 = vsel %vm7238_vm5, nan, %v7248_v37  ;;  %vm7345_vm8 = vcmp.lt.s32.totalorder %v11429_v32, 2 }
 0x203   :  { %v7348_v30 = vsel %vm7346_vm0, %v11561_v35, %v14720_v53  ;;  %v1903_v59 = vadd.s32 536870912, %v1902_v2  ;;  %v11591_v40 = vmul.f32 2.0, %v10467_v21  ;;  %v11597_v37 = vsel %vm11541_vm9, 0, %v1825_v57 }
 0x204   :  { %v7352_v54 = vsel %vm7345_vm8, %v7348_v30, %v7351_v31  ;;  %v1817_v25 = vor.u32 4788187, %v1816_v60  ;;  %v2158_v52 = vshrl.u32 %v2157_v45, 23  ;;  %v2161_v41 = vand.u32 8388607, %v14718_v0 }
 0x205   :  { %v7353_v18 = vsel %vm7342_vm7, nan, %v7352_v54  ;;  %v1904_v56 = vshrl.u32 %v1903_v59, 30  ;;  %v1820_v34 = vcvt.s32.f32 %v1813_v33  ;;  %v1831_v16 = vadd.s32 3, %v11597_v37 }
 0x206   :  { %v9631_v32 = vpack.i.bf16 %v7249_v24, %v7353_v18  ;;  %v1818_v47 = vand.u32 2147483647, %v1817_v25  ;;  %v9144_v3 = vadd.s32 4294967169, %v2158_v52  ;;  %v2261_v7 = vand.u32 2139095040, %v11591_v40 }
 0x207   :  { %v1905_v27 = vshll.u32 %v1904_v56, 30  ;;  %v1928_v39 = vsub.s32 4, %v1904_v56  ;;  %vm1844_vm15 = vcmp.lt.s32.totalorder %v11241_v14, 0  ;;  %v2162_v31 = vor.u32 8388608, %v2161_v41 }
 0x208   :  { %9632 = vxpose.xlu1.b32.cont [4/6] (short) %v9631_v32, 128  ;;  %v1821_v43 = vmul.f32 %v1820_v34, %v1818_v47  ;;  %v2164_v12 = vadd.s32 1, %v9144_v3  ;;  %v2262_v24 = vshrl.u32 %v2261_v7, 23  ;;  %v11611_v59 = vand.u32 3, %v1831_v16 }
 0x209   :  { %v11603_v15 = vsub.s32 %v1902_v2, %v1905_v27  ;;  %v1929_v33 = vsel %vm1844_vm15, %v1928_v39, %v1904_v56  ;;  %v14810_v2 = vand.u32 2147483647, %v11241_v14  ;;  %v1898_v18 = vadd.s32 %v11515_v6, %v11528_v8 }
 0x20a   :  { %v1822_v57 = vxor.u32 2147483648, %v1821_v43  ;;  %vm2165_vm11 = vcmp.gt.s32.totalorder %v2164_v12, 0  ;;  %v2258_v41 = vand.u32 2147483647, %v11591_v40  ;;  %v11630_v3 = vshll.u32 %v2162_v31, 8 }
 0x20b   :  { %v1908_v60 = vsub.s32 0, %v11603_v15  ;;  %v2166_v45 = vsel %vm2165_vm11, %v2164_v12, 0  ;;  %vm11615_vm13 = vcmp.le.f32.partialorder %v14810_v2, 0.7853982  ;;  %v9148_v27 = vadd.s32 4294967169, %v2262_v24 }
 0x20c   :  { %v1823_v30 = vsel %vm1740_vm1, %v1822_v57, %v1821_v43  ;;  %9634 = vxpose.xlu1.b32.cont [5/6] (short) %v9633_v49, 128  ;;  %v2168_v25 = vand.u32 31, %v2166_v45  ;;  %v11628_v32 = vsel %vm11615_vm13, 0, %v1929_v33  ;;  %v2167_v47 = vshrl.u32 %v2166_v45, 5 }
 0x20d   :  { %v1826_v52 = vsel %vm11541_vm9, %v11231_v63, %v1823_v30  ;;  %v9133_v56 = vmin.u32 %v1908_v60, %v11603_v15  ;;  %vm1834_vm9 = vcmp.eq.s32.totalorder %v11611_v59, 0  ;;  %vm1837_vm3 = vcmp.eq.s32.totalorder %v11611_v59, 2 }
 0x20e   :  { %v2169_v34 = vsub.s32 32, %v2168_v25  ;;  %9877 = vcosq.f32 %v1826_v52  ;;  %v2171_v29 = vshll.u32 %v14749_v38, %v2168_v25  ;;  %v2174_v8 = vshll.u32 %v14735_v42, %v2168_v25 }
 0x20f   :  { %v1910_v49 = vclz %v9133_v56  ;;  %9879 = vsinq.f32 %v1826_v52  ;;  %v2177_v12 = vshll.u32 %v14733_v44, %v2168_v25  ;;  %v2180_v60 = vshll.u32 %v14722_v46, %v2168_v25 }
 0x210   :  { %v2172_v6 = vshrl.u32 %v14735_v42, %v2169_v34  ;;  %v2175_v39 = vshrl.u32 %v14733_v44, %v2169_v34  ;;  %v2170_v16 = vshrl.u32 %v14749_v38, %v2169_v34  ;;  %v2178_v7 = vshrl.u32 %v14722_v46, %v2169_v34 }
 0x211   :  { %v9134_v43 = vadd.s32 4294967294, %v1910_v49  ;;  %v2181_v33 = vshrl.u32 %v14751_v48, %v2169_v34  ;;  %v2183_v24 = vshll.u32 %v14751_v48, %v2168_v25  ;;  %v2184_v30 = vshrl.u32 %v14724_v55, %v2169_v34 }
 0x212   :  { %v2173_v57 = vor.u32 %v2172_v6, %v2171_v29  ;;  %v2176_v31 = vor.u32 %v2175_v39, %v2174_v8  ;;  %v2179_v45 = vor.u32 %v2178_v7, %v2177_v12  ;;  %vm2186_vm14 = vcmp.lt.s32.totalorder %v2167_v47, 1 }
 0x213   :  { %vm9135_vm1 = vcmp.lt.s32.totalorder %v9134_v43, 0  ;;  %v2182_v52 = vor.u32 %v2181_v33, %v2180_v60  ;;  %vm2187_vm2 = vcmp.lt.s32.totalorder %v2167_v47, 2  ;;  %v2185_v0 = vor.u32 %v2184_v30, %v2183_v24 }
 0x214   :  { %v1913_v2 = vsel %vm9135_vm1, 0, %v9134_v43  ;;  %vm2188_vm0 = vcmp.lt.s32.totalorder %v2167_v47, 3  ;;  %vm2189_vm4 = vcmp.lt.s32.totalorder %v2167_v47, 4  ;;  %v2190_v6 = vsel %vm2186_vm14, %v2170_v16, %v2173_v57 }
 0x215   :  { %v1914_v56 = vsub.s32 32, %v1913_v2  ;;  %v1918_v49 = vsub.s32 4294967266, %v1913_v2  ;;  %v1915_v29 = vshll.u32 %v11603_v15, %v1913_v2  ;;  %v2194_v8 = vsel %vm2186_vm14, %v2173_v57, %v2176_v31 }
 0x216   :  { %v2191_v12 = vsel %vm2189_vm4, %v2179_v45, 2102212464  ;;  %v2195_v7 = vsel %vm2189_vm4, %v2182_v52, 920167782  ;;  %v2198_v34 = vsel %vm2186_vm14, %v2176_v31, %v2179_v45  ;;  %v2199_v43 = vsel %vm2189_vm4, %v2185_v0, 1326507024 }
 0x217   :  { %v1916_v39 = vshrl.u32 %v1898_v18, %v1914_v56  ;;  %v1919_v58 = vadd.s32 127, %v1918_v49  ;;  %v2196_v25 = vsel %vm2188_vm0, %v2179_v45, %v2195_v7  ;;  %v2268_v60 = vadd.s32 1, %v9148_v27 }
 0x218   :  { %v2192_v17 = vsel %vm2188_vm0, %v2176_v31, %v2191_v12  ;;  %v2197_v24 = vsel %vm2187_vm2, %v2194_v8, %v2196_v25  ;;  %v2200_v15 = vsel %vm2188_vm0, %v2182_v52, %v2199_v43  ;;  %v11655_v18 = vand.u32 8388607, %v2258_v41 }
 0x219   :  { %v1917_v33 = vor.u32 %v1916_v39, %v1915_v29  ;;  %v1920_v53 = vshll.u32 %v1919_v58, 23  ;;  %v11649_v16 = vmul.u32.u64.low %v11630_v3, %v2197_v24  ;;  %v11650_v57 = vmul.u32.u64.high %v11630_v3, %v2197_v24, %v11649_v16 }
 0x21a   :  { %v1935_v0 = vadd.s32 3, %v11628_v32  ;;  %v2201_v58 = vsel %vm2187_vm2, %v2198_v34, %v2200_v15  ;;  %vm2269_vm6 = vcmp.gt.s32.totalorder %v2268_v60, 0  ;;  %v2193_v31 = vsel %vm2187_vm2, %v2190_v6, %v2192_v17 }
 0x21b   :  { %v1921_v45 = vor.u32 4788187, %v1920_v53  ;;  %v11659_v27 = vpop.eup %9877  ;;  %v11663_v30 = vmul.u32.u64.low %v11630_v3, %v2201_v58  ;;  %v11664_v2 = vmul.u32.u64.high %v11630_v3, %v2201_v58, %v11663_v30  ;;  %v2270_v52 = vsel %vm2269_vm6, %v2268_v60, 0 }
 0x21c   :  { %v11666_v56 = vpop.eup %9879  ;;  %v1924_v29 = vcvt.s32.f32 %v1917_v33  ;;  %v2272_v8 = vand.u32 31, %v2270_v52  ;;  %v2212_v53 = vadd.s32 1, %v11650_v57  ;;  %v2266_v39 = vor.u32 8388608, %v11655_v18 }
 0x21d   :  { %v1922_v49 = vand.u32 2147483647, %v1921_v45  ;;  %v11673_v17 = vand.u32 3, %v11354_v5  ;;  %v11675_v6 = vand.u32 3, %v1935_v0  ;;  %v2209_v12 = vmul.u32 %v11630_v3, %v2193_v31 }
 0x21e   :  { %v2273_v7 = vsub.s32 32, %v2272_v8  ;;  %v1835_v25 = vxor.u32 2147483648, %v11666_v56  ;;  %v1838_v34 = vxor.u32 2147483648, %v11659_v27  ;;  %vm2211_vm10 = vc.u32 %v11664_v2, %v11649_v16 }
 0x21f   :  { %v1925_v47 = vmul.f32 %v1924_v29, %v1922_v49  ;;  %v2271_v43 = vshrl.u32 %v2270_v52, 5  ;;  %v2213_v33 = vsel %vm2211_vm10, %v2212_v53, %v11650_v57  ;;  %v2275_v5 = vshll.u32 %v14749_v38, %v2272_v8 }
 0x220   :  { %v2278_v24 = vshll.u32 %v14735_v42, %v2272_v8  ;;  %v2214_v15 = vadd.s32 %v2213_v33, %v2209_v12  ;;  %v2276_v18 = vshrl.u32 %v14735_v42, %v2273_v7  ;;  %v2279_v3 = vshrl.u32 %v14733_v44, %v2273_v7 }
 0x221   :  { %v1926_v60 = vxor.u32 2147483648, %v1925_v47  ;;  %v2281_v45 = vshll.u32 %v14733_v44, %v2272_v8  ;;  %vm1833_vm12 = vcmp.lt.s32.totalorder %v11611_v59, 2  ;;  %v2282_v58 = vshrl.u32 %v14722_v46, %v2273_v7 }
 0x222   :  { %v2284_v57 = vshll.u32 %v14722_v46, %v2272_v8  ;;  %v2285_v31 = vshrl.u32 %v14751_v48, %v2273_v7  ;;  %v1839_v30 = vsel %vm1837_vm3, %v1838_v34, %v11666_v56  ;;  %v2215_v49 = vadd.s32 536870912, %v2214_v15 }
 0x223   :  { %v1927_v0 = vsel %vm1844_vm15, %v1926_v60, %v1925_v47  ;;  %v2277_v29 = vor.u32 %v2276_v18, %v2275_v5  ;;  %v2280_v53 = vor.u32 %v2279_v3, %v2278_v24  ;;  %v2283_v47 = vor.u32 %v2282_v58, %v2281_v45 }
 0x224   :  { %v1930_v52 = vsel %vm11615_vm13, %v11241_v14, %v1927_v0  ;;  %v2286_v12 = vor.u32 %v2285_v31, %v2284_v57  ;;  %v11702_v60 = vshrl.u32 %v2215_v49, 30  ;;  %v2287_v33 = vshll.u32 %v14751_v48, %v2272_v8 }
 0x225   :  { %9881 = vcosq.f32 %v1930_v52  ;;  %v2288_v46 = vshrl.u32 %v14724_v55, %v2273_v7  ;;  %vm1830_vm8 = vweird.f32 %v11231_v63  ;;  %v1836_v54 = vsel %vm1834_vm9, %v11659_v27, %v1835_v25 }
 0x226   :  { %9883 = vsinq.f32 %v1930_v52  ;;  %v2274_v5 = vshrl.u32 %v14749_v38, %v2273_v7  ;;  %vm2290_vm15 = vcmp.lt.s32.totalorder %v2271_v43, 1  ;;  %vm2293_vm11 = vcmp.lt.s32.totalorder %v2271_v43, 4 }
 0x227   :  { %v2217_v24 = vshll.u32 %v11702_v60, 30  ;;  %v2289_v18 = vor.u32 %v2288_v46, %v2287_v33  ;;  %vm2292_vm13 = vcmp.lt.s32.totalorder %v2271_v43, 3  ;;  %v2295_v3 = vsel %vm2293_vm11, %v2283_v47, 2102212464 }
 0x228   :  { %v2294_v8 = vsel %vm2290_vm15, %v2274_v5, %v2277_v29  ;;  %v2296_v45 = vsel %vm2292_vm13, %v2280_v53, %v2295_v3  ;;  %v2298_v0 = vsel %vm2290_vm15, %v2277_v29, %v2280_v53  ;;  %v2299_v58 = vsel %vm2293_vm11, %v2286_v12, 920167782 }
 0x229   :  { %v11715_v57 = vsub.s32 %v2214_v15, %v2217_v24  ;;  %vm2291_vm1 = vcmp.lt.s32.totalorder %v2271_v43, 2  ;;  %v2300_v31 = vsel %vm2292_vm13, %v2283_v47, %v2299_v58  ;;  %v2302_v52 = vsel %vm2290_vm15, %v2280_v53, %v2283_v47 }
 0x22a   :  { %v2301_v49 = vsel %vm2291_vm1, %v2298_v0, %v2300_v31  ;;  %v2303_v7 = vsel %vm2293_vm11, %v2289_v18, 1326507024  ;;  %v2306_v55 = vshll.u32 %v2266_v39, 8  ;;  %vm8069_vm14 = vcmp.eq.s32.totalorder %v11673_v17, 0 }
 0x22b   :  { %v1840_v46 = vsel %vm1833_vm12, %v1836_v54, %v1839_v30  ;;  %v2220_v33 = vsub.s32 0, %v11715_v57  ;;  %v2297_v5 = vsel %vm2291_vm1, %v2294_v8, %v2296_v45  ;;  %v2304_v29 = vsel %vm2292_vm13, %v2286_v12, %v2303_v7 }
 0x22c   :  { %vm1938_vm2 = vcmp.eq.s32.totalorder %v11675_v6, 0  ;;  %v2305_v15 = vsel %vm2291_vm1, %v2302_v52, %v2304_v29  ;;  %v11724_v24 = vmul.u32.u64.low %v2306_v55, %v2301_v49  ;;  %v11725_v3 = vmul.u32.u64.high %v2306_v55, %v2301_v49, %v11724_v24 }
 0x22d   :  { %v8071_v39 = vsel %vm8069_vm14, %v11436_v26, %v7243_v19  ;;  %vm1937_vm0 = vcmp.lt.s32.totalorder %v11675_v6, 2  ;;  %v9145_v59 = vmin.u32 %v2220_v33, %v11715_v57  ;;  %vm8072_vm4 = vcmp.eq.s32.totalorder %v11673_v17, 2 }
 0x22e   :  { %v11733_v30 = vmul.u32.u64.low %v2306_v55, %v2305_v15  ;;  %v11734_v53 = vmul.u32.u64.high %v2306_v55, %v2305_v15, %v11733_v30  ;;  %vm1934_vm6 = vweird.f32 %v11241_v14  ;;  %vm1941_vm9 = vcmp.eq.s32.totalorder %v11675_v6, 2 }
 0x22f   :  { %vm8068_vm3 = vcmp.lt.s32.totalorder %v11673_v17, 2  ;;  %v14813_v43 = vxor.u32 2147483648, %v11436_v26  ;;  %v8170_v19 = vand.u32 3, %v11391_v36  ;;  %v1841_v12 = vsel %vm1830_vm8, nan, %v1840_v46 }
 0x230   :  { %v2210_v54 = vadd.s32 %v11649_v16, %v11664_v2  ;;  %v2222_v18 = vclz %v9145_v59  ;;  %v2313_v8 = vmul.u32 %v2306_v55, %v2297_v5  ;;  %v2316_v45 = vadd.s32 1, %v11725_v3 }
 0x231   :  { %v8074_v47 = vsel %vm8072_vm4, %v14813_v43, %v11452_v62  ;;  %v2663_v58 = vand.u32 3, %v11597_v37  ;;  %v2766_v17 = vand.u32 3, %v11628_v32  ;;  %vm2315_vm10 = vc.u32 %v11734_v53, %v11724_v24 }
 0x232   :  { %v8075_v0 = vsel %vm8068_vm3, %v8071_v39, %v8074_v47  ;;  %v9882_v31 = vpop.eup %9881  ;;  %v9146_v26 = vadd.s32 4294967294, %v2222_v18  ;;  %vm8171_vm12 = vcmp.lt.s32.totalorder %v8170_v19, 2  ;;  %vm8172_vm15 = vcmp.eq.s32.totalorder %v8170_v19, 0 }
 0x233   :  { %v9884_v36 = vpop.eup %9883  ;;  %v1942_v62 = vxor.u32 2147483648, %v9882_v31  ;;  %v2317_v16 = vsel %vm2315_vm10, %v2316_v45, %v11725_v3  ;;  %v14814_v55 = vxor.u32 2147483648, %v11569_v51  ;;  %vm8175_vm11 = vcmp.eq.s32.totalorder %v8170_v19, 2 }
 0x234   :  { %v1939_v52 = vxor.u32 2147483648, %v9884_v36  ;;  %vm9147_vm13 = vcmp.lt.s32.totalorder %v9146_v26, 0  ;;  %v2318_v37 = vadd.s32 %v2317_v16, %v2313_v8  ;;  %v14815_v32 = vxor.u32 2147483648, %v11561_v35 }
 0x235   :  { %v8174_v2 = vsel %vm8172_vm15, %v11561_v35, %v14814_v55  ;;  %v1943_v7 = vsel %vm1941_vm9, %v1942_v62, %v9884_v36  ;;  %v2225_v46 = vsel %vm9147_vm13, 0, %v9146_v26  ;;  %v8076_v33 = vsel %vm7238_vm5, nan, %v8075_v0 }
 0x236   :  { %v8177_v49 = vsel %vm8175_vm11, %v14815_v32, %v11569_v51  ;;  %v1940_v29 = vsel %vm1938_vm2, %v9882_v31, %v1939_v52  ;;  %v2226_v15 = vsub.s32 32, %v2225_v46  ;;  %v2227_v3 = vshll.u32 %v11715_v57, %v2225_v46 }
 0x237   :  { %v8178_v5 = vsel %vm8171_vm12, %v8174_v2, %v8177_v49  ;;  %v2230_v39 = vsub.s32 4294967266, %v2225_v46  ;;  %v1944_v59 = vsel %vm1937_vm0, %v1940_v29, %v1943_v7  ;;  %v2319_v35 = vadd.s32 536870912, %v2318_v37 }
 0x238   :  { %v8179_v51 = vsel %vm7342_vm7, nan, %v8178_v5  ;;  %vm2665_vm1 = vcmp.eq.s32.totalorder %v2663_v58, 0  ;;  %v1945_v28 = vsel %vm1934_vm6, nan, %v1944_v59  ;;  %v2228_v30 = vshrl.u32 %v2210_v54, %v2226_v15 }
 0x239   :  { %v2231_v43 = vadd.s32 127, %v2230_v39  ;;  %v9635_v47 = vpack.i.bf16 %v8076_v33, %v8179_v51  ;;  %v9729_v19 = vpack.i.bf16 %v1841_v12, %v1945_v28  ;;  %v2320_v18 = vshrl.u32 %v2319_v35, 30 }
 0x23a   :  { %v2667_v57 = vsel %vm2665_vm1, %v11659_v27, %v1835_v25  ;;  %vm2668_vm5 = vcmp.eq.s32.totalorder %v2663_v58, 2  ;;  %v2229_v6 = vor.u32 %v2228_v30, %v2227_v3  ;;  %vm2664_vm14 = vcmp.lt.s32.totalorder %v2663_v58, 2 }
 0x23b   :  { %v2232_v8 = vshll.u32 %v2231_v43, 23  ;;  %9636 = vxpose.xlu1.b32.end [6/6] (short) %v9635_v47, 128  ;;  %v2670_v50 = vsel %vm2668_vm5, %v1838_v34, %v11666_v56  ;;  %9730 = vxpose.xlu0.b32.cont [7/16] %v9729_v19, 128  ;;  %v2240_v54 = vsub.s32 4, %v11702_v60  ;;  %v2321_v45 = vshll.u32 %v2320_v18, 30 }
 0x23c   :  { %v2671_v0 = vsel %vm2664_vm14, %v2667_v57, %v2670_v50  ;;  %vm2768_vm7 = vcmp.eq.s32.totalorder %v2766_v17, 0  ;;  %vm2156_vm2 = vcmp.lt.s32.totalorder %v11554_v4, 0  ;;  %vm2767_vm0 = vcmp.lt.s32.totalorder %v2766_v17, 2 }
 0x23d   :  { %v2233_v12 = vor.u32 4788187, %v2232_v8  ;;  %v2770_v26 = vsel %vm2768_vm7, %v9882_v31, %v1939_v52  ;;  %v2322_v25 = vsub.s32 %v2318_v37, %v2321_v45  ;;  %vm2771_vm4 = vcmp.eq.s32.totalorder %v2766_v17, 2 }
 0x23e   :  { %v2236_v55 = vcvt.s32.f32 %v2229_v6  ;;  %v11783_v58 = vsel %vm1830_vm8, nan, %v2671_v0  ;;  %v2773_v27 = vsel %vm2771_vm4, %v1942_v62, %v9884_v36  ;;  %v2241_v56 = vsel %vm2156_vm2, %v2240_v54, %v11702_v60 }
 0x23f   :  { %v2234_v16 = vand.u32 2147483647, %v2233_v12  ;;  %v2324_v34 = vsub.s32 0, %v2322_v25  ;;  %v2774_v2 = vsel %vm2767_vm0, %v2770_v26, %v2773_v27  ;;  %v2344_v31 = vsub.s32 4, %v2320_v18 }
 0x240   :  { %v11790_v52 = vsel %vm1934_vm6, nan, %v2774_v2  ;;  %v11793_v17 = vmul.f32 4.0, %v10126_v11  ;;  %v14816_v36 = vand.u32 2147483647, %v11554_v4  ;;  %vm2260_vm9 = vcmp.lt.s32.totalorder %v11591_v40, 0 }
 0x241   :  { %v2237_v32 = vmul.f32 %v2236_v55, %v2234_v16  ;;  %v9149_v37 = vmin.u32 %v2324_v34, %v2322_v25  ;;  %v9733_v63 = vpack.i.bf16 %v11783_v58, %v11790_v52  ;;  %v2345_v7 = vsel %vm2260_vm9, %v2344_v31, %v2320_v18 }
 0x242   :  { %vm2155_vm8 = vcmp.le.f32.partialorder %v14816_v36, 0.7853982  ;;  %v11805_v11 = vmul.f32 4.0, %v10123_v10  ;;  %v3402_v46 = vand.u32 2147483647, %v11793_v17  ;;  %v3405_v29 = vand.u32 2139095040, %v11793_v17 }
 0x243   :  { %v2238_v62 = vxor.u32 2147483648, %v2237_v32  ;;  %v2243_v60 = vsel %vm2155_vm8, 0, %v2241_v56  ;;  %v2326_v49 = vclz %v9149_v37  ;;  %vm11812_vm6 = vcmp.le.f32.partialorder %v2258_v41, 0.7853982 }
 0x244   :  { %v2247_v15 = vadd.s32 3, %v2243_v60  ;;  %v2347_v10 = vsel %vm11812_vm6, 0, %v2345_v7  ;;  %v3406_v39 = vshrl.u32 %v3405_v29, 23  ;;  %v3409_v35 = vand.u32 8388607, %v3402_v46 }
 0x245   :  { %v2239_v14 = vsel %vm2156_vm2, %v2238_v62, %v2237_v32  ;;  %v9150_v5 = vadd.s32 4294967294, %v2326_v49  ;;  %v3506_v51 = vand.u32 2147483647, %v11805_v11  ;;  %v3509_v28 = vand.u32 2139095040, %v11805_v11 }
 0x246   :  { %v2242_v33 = vsel %vm2155_vm8, %v11554_v4, %v2239_v14  ;;  %v2314_v41 = vadd.s32 %v11724_v24, %v11734_v53  ;;  %v9192_v47 = vadd.s32 4294967169, %v3406_v39  ;;  %v11824_v19 = vand.u32 3, %v2247_v15 }
 0x247   :  { %9885 = vcosq.f32 %v2242_v33  ;;  %vm9151_vm3 = vcmp.lt.s32.totalorder %v9150_v5, 0  ;;  %v2351_v18 = vadd.s32 3, %v2347_v10  ;;  %v11826_v57 = vand.u32 3, %v2243_v60 }
 0x248   :  { %9887 = vsinq.f32 %v2242_v33  ;;  %v2329_v59 = vsel %vm9151_vm3, 0, %v9150_v5  ;;  %v3510_v6 = vshrl.u32 %v3509_v28, 23  ;;  %v3412_v45 = vadd.s32 1, %v9192_v47 }
 0x249   :  { %v2330_v30 = vsub.s32 32, %v2329_v59  ;;  %v2334_v43 = vsub.s32 4294967266, %v2329_v59  ;;  %v2331_v8 = vshll.u32 %v2322_v25, %v2329_v59  ;;  %v3410_v0 = vor.u32 8388608, %v3409_v35 }
 0x24a   :  { %v9196_v12 = vadd.s32 4294967169, %v3510_v6  ;;  %v11830_v26 = vand.u32 8388607, %v3506_v51  ;;  %vm3413_vm10 = vcmp.gt.s32.totalorder %v3412_v45, 0  ;;  %vm2250_vm12 = vcmp.eq.s32.totalorder %v11824_v19, 0 }
 0x24b   :  { %v2332_v50 = vshrl.u32 %v2314_v41, %v2330_v30  ;;  %v2335_v54 = vadd.s32 127, %v2334_v43  ;;  %vm2253_vm15 = vcmp.eq.s32.totalorder %v11824_v19, 2  ;;  %v3414_v16 = vsel %vm3413_vm10, %v3412_v45, 0 }
 0x24c   :  { %v3516_v55 = vadd.s32 1, %v9196_v12  ;;  %v11834_v25 = vand.u32 3, %v2351_v18  ;;  %vm3077_vm11 = vcmp.eq.s32.totalorder %v11826_v57, 0  ;;  %vm3080_vm13 = vcmp.eq.s32.totalorder %v11826_v57, 2 }
 0x24d   :  { %v2333_v24 = vor.u32 %v2332_v50, %v2331_v8  ;;  %v2336_v53 = vshll.u32 %v2335_v54, 23  ;;  %v3416_v56 = vand.u32 31, %v3414_v16  ;;  %vm2249_vm1 = vcmp.lt.s32.totalorder %v11824_v19, 2 }
 0x24e   :  { %v11839_v34 = vand.u32 3, %v2347_v10  ;;  %v11841_v2 = vshll.u32 %v3410_v0, 8  ;;  %v3514_v32 = vor.u32 8388608, %v11830_v26  ;;  %v11845_v31 = vmul.f32 4.0, %v10289_v13 }
 0x24f   :  { %v2337_v27 = vor.u32 4788187, %v2336_v53  ;;  %v2340_v36 = vcvt.s32.f32 %v2333_v24  ;;  %v3415_v62 = vshrl.u32 %v3414_v16, 5  ;;  %v3417_v60 = vsub.s32 32, %v3416_v56 }
 0x250   :  { %v3419_v49 = vshll.u32 %v14749_v38, %v3416_v56  ;;  %v3422_v14 = vshll.u32 %v14735_v42, %v3416_v56  ;;  %v3425_v7 = vshll.u32 %v14733_v44, %v3416_v56  ;;  %vm3517_vm5 = vcmp.gt.s32.totalorder %v3516_v55, 0 }
 0x251   :  { %v2338_v37 = vand.u32 2147483647, %v2337_v27  ;;  %v3420_v29 = vshrl.u32 %v14735_v42, %v3417_v60  ;;  %v3423_v15 = vshrl.u32 %v14733_v44, %v3417_v60  ;;  %v14819_v10 = vmov 2102212464  }
 0x252   :  { %v3428_v13 = vshll.u32 %v14819_v10, %v3416_v56  ;;  %v3426_v35 = vshrl.u32 %v14819_v10, %v3417_v60  ;;  %v3429_v28 = vshrl.u32 %v14751_v48, %v3417_v60  ;;  %v14820_v41 = vmov 1326507024  }
 0x253   :  { %v2341_v5 = vmul.f32 %v2340_v36, %v2338_v37  ;;  %v3432_v30 = vshrl.u32 %v14820_v41, %v3417_v60  ;;  %v3431_v18 = vshll.u32 %v14751_v48, %v3416_v56  ;;  %vm3434_vm14 = vcmp.lt.s32.totalorder %v3415_v62, 1 }
 0x254   :  { %v9886_v33 = vpop.eup %9885  ;;  %v3421_v8 = vor.u32 %v3420_v29, %v3419_v49  ;;  %v3424_v50 = vor.u32 %v3423_v15, %v3422_v14  ;;  %v3427_v54 = vor.u32 %v3426_v35, %v3425_v7  ;;  %v3430_v12 = vor.u32 %v3429_v28, %v3428_v13 }
 0x255   :  { %v9888_v39 = vpop.eup %9887  ;;  %v2254_v59 = vxor.u32 2147483648, %v9886_v33  ;;  %v2342_v47 = vxor.u32 2147483648, %v2341_v5  ;;  %v3433_v24 = vor.u32 %v3432_v30, %v3431_v18  ;;  %v3418_v56 = vshrl.u32 %v14749_v38, %v3417_v60 }
 0x256   :  { %v2251_v43 = vxor.u32 2147483648, %v9888_v39  ;;  %vm3435_vm7 = vcmp.lt.s32.totalorder %v3415_v62, 2  ;;  %vm3436_vm2 = vcmp.lt.s32.totalorder %v3415_v62, 3  ;;  %vm3437_vm0 = vcmp.lt.s32.totalorder %v3415_v62, 4 }
 0x257   :  { %v2255_v6 = vsel %vm2253_vm15, %v2254_v59, %v9888_v39  ;;  %v2343_v0 = vsel %vm2260_vm9, %v2342_v47, %v2341_v5  ;;  %v3082_v27 = vsel %vm3080_vm13, %v2254_v59, %v9888_v39  ;;  %v3438_v36 = vsel %vm3434_vm14, %v3418_v56, %v3421_v8 }
 0x258   :  { %v2252_v45 = vsel %vm2250_vm12, %v9886_v33, %v2251_v43  ;;  %v2346_v53 = vsel %vm11812_vm6, %v11591_v40, %v2343_v0  ;;  %v3079_v16 = vsel %vm3077_vm11, %v9886_v33, %v2251_v43  ;;  %v3442_v3 = vsel %vm3434_vm14, %v3421_v8, %v3424_v50 }
 0x259   :  { %v2256_v37 = vsel %vm2249_vm1, %v2252_v45, %v2255_v6  ;;  %9889 = vcosq.f32 %v2346_v53  ;;  %v3439_v49 = vsel %vm3437_vm0, %v3427_v54, 2102212464  ;;  %v3443_v14 = vsel %vm3437_vm0, %v3430_v12, 920167782 }
 0x25a   :  { %9891 = vsinq.f32 %v2346_v53  ;;  %v3446_v7 = vsel %vm3434_vm14, %v3424_v50, %v3427_v54  ;;  %v3447_v33 = vsel %vm3437_vm0, %v3433_v24, 1326507024  ;;  %v3440_v5 = vsel %vm3436_vm2, %v3424_v50, %v3439_v49 }
 0x25b   :  { %v3444_v29 = vsel %vm3436_vm2, %v3427_v54, %v3443_v14  ;;  %v3448_v60 = vsel %vm3436_vm2, %v3430_v12, %v3447_v33  ;;  %v3518_v19 = vsel %vm3517_vm5, %v3516_v55, 0  ;;  %v3441_v15 = vsel %vm3435_vm7, %v3438_v36, %v3440_v5 }
 0x25c   :  { %v3445_v13 = vsel %vm3435_vm7, %v3442_v3, %v3444_v29  ;;  %v3449_v39 = vsel %vm3435_vm7, %v3446_v7, %v3448_v60  ;;  %v11880_v59 = vshrl.u32 %v3518_v19, 5  ;;  %vm2246_vm4 = vweird.f32 %v11554_v4 }
 0x25d   :  { %v11883_v35 = vmul.u32.u64.low %v11841_v2, %v3449_v39  ;;  %v11884_v28 = vmul.u32.u64.high %v11841_v2, %v3449_v39, %v11883_v35  ;;  %v11887_v30 = vmul.u32.u64.low %v11841_v2, %v3445_v13  ;;  %v11888_v43 = vmul.u32.u64.high %v11841_v2, %v3445_v13, %v11887_v30 }
 0x25e   :  { %vm3076_vm8 = vcmp.lt.s32.totalorder %v11826_v57, 2  ;;  %v3520_v55 = vand.u32 31, %v3518_v19  ;;  %vm2357_vm9 = vcmp.eq.s32.totalorder %v11834_v25, 2  ;;  %v11898_v47 = vshll.u32 %v3514_v32, 8 }
 0x25f   :  { %v11894_v62 = vsel %vm3076_vm8, %v3079_v16, %v3082_v27  ;;  %v3818_v18 = vand.u32 2147483647, %v11845_v31  ;;  %v3821_v6 = vand.u32 2139095040, %v11845_v31  ;;  %v11904_v8 = vsel %vm2246_vm4, nan, %v2256_v37 }
 0x260   :  { %vm2354_vm6 = vcmp.eq.s32.totalorder %v11834_v25, 0  ;;  %vm3180_vm3 = vcmp.eq.s32.totalorder %v11839_v34, 0  ;;  %vm3183_vm10 = vcmp.eq.s32.totalorder %v11839_v34, 2  ;;  %v3457_v57 = vmul.u32 %v11841_v2, %v3441_v15 }
 0x261   :  { %v3521_v50 = vsub.s32 32, %v3520_v55  ;;  %vm3538_vm12 = vcmp.lt.s32.totalorder %v11880_v59, 1  ;;  %vm2353_vm15 = vcmp.lt.s32.totalorder %v11834_v25, 2  ;;  %vm3459_vm11 = vc.u32 %v11884_v28, %v11887_v30 }
 0x262   :  { %v3460_v26 = vadd.s32 1, %v11888_v43  ;;  %v3523_v32 = vshll.u32 %v14749_v38, %v3520_v55  ;;  %v3526_v54 = vshll.u32 %v14735_v42, %v3520_v55  ;;  %vm2350_vm13 = vweird.f32 %v11591_v40 }
 0x263   :  { %v3524_v45 = vshrl.u32 %v14735_v42, %v3521_v50  ;;  %v3527_v2 = vshrl.u32 %v14733_v44, %v3521_v50  ;;  %v3529_v0 = vshll.u32 %v14733_v44, %v3520_v55  ;;  %v3530_v12 = vshrl.u32 %v14819_v10, %v3521_v50 }
 0x264   :  { %vm3179_vm1 = vcmp.lt.s32.totalorder %v11839_v34, 2  ;;  %v3461_v24 = vsel %vm3459_vm11, %v3460_v26, %v11888_v43  ;;  %v3532_v53 = vshll.u32 %v14819_v10, %v3520_v55  ;;  %v3533_v16 = vshrl.u32 %v14751_v48, %v3521_v50 }
 0x265   :  { %v3536_v27 = vshrl.u32 %v14820_v41, %v3521_v50  ;;  %v3462_v56 = vadd.s32 %v3461_v24, %v3457_v57  ;;  %v3525_v37 = vor.u32 %v3524_v45, %v3523_v32  ;;  %v3528_v36 = vor.u32 %v3527_v2, %v3526_v54 }
 0x266   :  { %v3531_v3 = vor.u32 %v3530_v12, %v3529_v0  ;;  %v9890_v49 = vpop.eup %9889  ;;  %v3534_v14 = vor.u32 %v3533_v16, %v3532_v53  ;;  %v3535_v7 = vshll.u32 %v14751_v48, %v3520_v55  ;;  %vm3539_vm5 = vcmp.lt.s32.totalorder %v11880_v59, 2 }
 0x267   :  { %vm3540_vm14 = vcmp.lt.s32.totalorder %v11880_v59, 3  ;;  %v9892_v33 = vpop.eup %9891  ;;  %v2358_v5 = vxor.u32 2147483648, %v9890_v49  ;;  %v3463_v29 = vadd.s32 536870912, %v3462_v56  ;;  %vm3541_vm7 = vcmp.lt.s32.totalorder %v11880_v59, 4 }
 0x268   :  { %v3822_v60 = vshrl.u32 %v3821_v6, 23  ;;  %v2355_v19 = vxor.u32 2147483648, %v9892_v33  ;;  %v3522_v15 = vshrl.u32 %v14749_v38, %v3521_v50  ;;  %v3537_v13 = vor.u32 %v3536_v27, %v3535_v7 }
 0x269   :  { %v3547_v39 = vsel %vm3541_vm7, %v3534_v14, 920167782  ;;  %v2359_v35 = vsel %vm2357_vm9, %v2358_v5, %v9892_v33  ;;  %v3464_v43 = vshrl.u32 %v3463_v29, 30  ;;  %v3543_v55 = vsel %vm3541_vm7, %v3531_v3, 2102212464 }
 0x26a   :  { %v3546_v57 = vsel %vm3538_vm12, %v3525_v37, %v3528_v36  ;;  %v2356_v6 = vsel %vm2354_vm6, %v9890_v49, %v2355_v19  ;;  %v3182_v50 = vsel %vm3180_vm3, %v9890_v49, %v2355_v19  ;;  %v3185_v26 = vsel %vm3183_vm10, %v2358_v5, %v9892_v33 }
 0x26b   :  { %v3548_v32 = vsel %vm3540_vm14, %v3531_v3, %v3547_v39  ;;  %v2360_v54 = vsel %vm2353_vm15, %v2356_v6, %v2359_v35  ;;  %v3465_v45 = vshll.u32 %v3464_v43, 30  ;;  %v3542_v2 = vsel %vm3538_vm12, %v3522_v15, %v3525_v37 }
 0x26c   :  { %v9208_v0 = vadd.s32 4294967169, %v3822_v60  ;;  %v2361_v12 = vsel %vm2350_vm13, nan, %v2360_v54  ;;  %v3549_v24 = vsel %vm3539_vm5, %v3546_v57, %v3548_v32  ;;  %v3550_v53 = vsel %vm3538_vm12, %v3528_v36, %v3531_v3 }
 0x26d   :  { %v3551_v16 = vsel %vm3541_vm7, %v3537_v13, 1326507024  ;;  %v9731_v25 = vpack.i.bf16 %v11904_v8, %v2361_v12  ;;  %v3186_v27 = vsel %vm3179_vm1, %v3182_v50, %v3185_v26  ;;  %v3466_v49 = vsub.s32 %v3462_v56, %v3465_v45 }
 0x26e   :  { %v3544_v37 = vsel %vm3540_vm14, %v3528_v36, %v3543_v55  ;;  %v3488_v7 = vsub.s32 4, %v3464_v43  ;;  %v3552_v33 = vsel %vm3540_vm14, %v3534_v14, %v3551_v16  ;;  %v3825_v34 = vand.u32 8388607, %v3818_v18 }
 0x26f   :  { %v11968_v5 = vmul.u32.u64.low %v11898_v47, %v3549_v24  ;;  %v11969_v29 = vmul.u32.u64.high %v11898_v47, %v3549_v24, %v11968_v5  ;;  %9732 = vxpose.xlu0.b32.cont [8/16] %v9731_v25, 128  ;;  %v3468_v3 = vsub.s32 0, %v3466_v49  ;;  %v3553_v8 = vsel %vm3539_vm5, %v3550_v53, %v3552_v33 }
 0x270   :  { %vm3404_vm2 = vcmp.lt.s32.totalorder %v11793_v17, 0  ;;  %v11978_v56 = vmul.u32.u64.low %v11898_v47, %v3553_v8  ;;  %v11979_v36 = vmul.u32.u64.high %v11898_v47, %v3553_v8, %v11978_v56  ;;  %v3828_v14 = vadd.s32 1, %v9208_v0 }
 0x271   :  { %v3084_v60 = vsel %vm2246_vm4, nan, %v11894_v62  ;;  %v3187_v19 = vsel %vm2350_vm13, nan, %v3186_v27  ;;  %v9193_v15 = vmin.u32 %v3468_v3, %v3466_v49  ;;  %v3545_v13 = vsel %vm3539_vm5, %v3542_v2, %v3544_v37 }
 0x272   :  { %v3489_v39 = vsel %vm3404_vm2, %v3488_v7, %v3464_v43  ;;  %v3564_v35 = vadd.s32 1, %v11969_v29  ;;  %vm3829_vm0 = vcmp.gt.s32.totalorder %v3828_v14, 0  ;;  %vm11996_vm4 = vcmp.le.f32.partialorder %v3402_v46, 0.7853982 }
 0x273   :  { %9734 = vxpose.xlu0.b32.cont [9/16] %v9733_v63, 128  ;;  %v3470_v40 = vclz %v9193_v15  ;;  %v12001_v59 = vmul.f32 4.0, %v10467_v21  ;;  %v3826_v62 = vor.u32 8388608, %v3825_v34  ;;  %v9735_v55 = vpack.i.bf16 %v3084_v60, %v3187_v19 }
 0x274   :  { %v3561_v43 = vmul.u32 %v11898_v47, %v3545_v13  ;;  %vm3563_vm8 = vc.u32 %v11979_v36, %v11968_v5  ;;  %v3830_v57 = vsel %vm3829_vm0, %v3828_v14, 0  ;;  %v12008_v52 = vsel %vm11996_vm4, 0, %v3489_v39 }
 0x275   :  { %v9194_v58 = vadd.s32 4294967294, %v3470_v40  ;;  %v3565_v63 = vsel %vm3563_vm8, %v3564_v35, %v11969_v29  ;;  %v3832_v46 = vand.u32 31, %v3830_v57  ;;  %v3458_v21 = vadd.s32 %v11887_v30, %v11884_v28 }
 0x276   :  { %v3566_v6 = vadd.s32 %v3565_v63, %v3561_v43  ;;  %v12013_v47 = vshll.u32 %v3826_v62, 8  ;;  %v12016_v32 = vadd.s32 3, %v12008_v52  ;;  %v3922_v45 = vand.u32 2147483647, %v12001_v59 }
 0x277   :  { %9736 = vxpose.xlu0.b32.cont [10/16] %v9735_v55, 128  ;;  %vm9195_vm9 = vcmp.lt.s32.totalorder %v9194_v58, 0  ;;  %v3833_v50 = vsub.s32 32, %v3832_v46  ;;  %v3835_v12 = vshll.u32 %v14749_v38, %v3832_v46  ;;  %v3838_v24 = vshll.u32 %v14735_v42, %v3832_v46 }
 0x278   :  { %v3473_v26 = vsel %vm9195_vm9, 0, %v9194_v58  ;;  %v3567_v54 = vadd.s32 536870912, %v3566_v6  ;;  %vm3508_vm6 = vcmp.lt.s32.totalorder %v11805_v11, 0  ;;  %v3831_v29 = vshrl.u32 %v3830_v57, 5 }
 0x279   :  { %v3474_v2 = vsub.s32 32, %v3473_v26  ;;  %v3478_v0 = vsub.s32 4294967266, %v3473_v26  ;;  %v3836_v28 = vshrl.u32 %v14735_v42, %v3833_v50  ;;  %v3839_v30 = vshrl.u32 %v14733_v44, %v3833_v50 }
 0x27a   :  { %v3568_v53 = vshrl.u32 %v3567_v54, 30  ;;  %v3842_v16 = vshrl.u32 %v14819_v10, %v3833_v50  ;;  %v3475_v25 = vshll.u32 %v3466_v49, %v3473_v26  ;;  %v3845_v7 = vshrl.u32 %v14751_v48, %v3833_v50 }
 0x27b   :  { %v3476_v27 = vshrl.u32 %v3458_v21, %v3474_v2  ;;  %v3479_v37 = vadd.s32 127, %v3478_v0  ;;  %v3841_v3 = vshll.u32 %v14733_v44, %v3832_v46  ;;  %v3844_v8 = vshll.u32 %v14819_v10, %v3832_v46 }
 0x27c   :  { %v3569_v33 = vshll.u32 %v3568_v53, 30  ;;  %v3837_v14 = vor.u32 %v3836_v28, %v3835_v12  ;;  %v3840_v60 = vor.u32 %v3839_v30, %v3838_v24  ;;  %v3848_v13 = vshrl.u32 %v14820_v41, %v3833_v50 }
 0x27d   :  { %v3477_v34 = vor.u32 %v3476_v27, %v3475_v25  ;;  %v3480_v56 = vshll.u32 %v3479_v37, 23  ;;  %v3843_v15 = vor.u32 %v3842_v16, %v3841_v3  ;;  %v3846_v49 = vor.u32 %v3845_v7, %v3844_v8 }
 0x27e   :  { %v12028_v19 = vsub.s32 %v3566_v6, %v3569_v33  ;;  %v3834_v35 = vshrl.u32 %v14749_v38, %v3833_v50  ;;  %v3847_v40 = vshll.u32 %v14751_v48, %v3832_v46  ;;  %v3925_v62 = vand.u32 2139095040, %v12001_v59 }
 0x27f   :  { %v3481_v39 = vor.u32 4788187, %v3480_v56  ;;  %v3484_v55 = vcvt.s32.f32 %v3477_v34  ;;  %v3592_v57 = vsub.s32 4, %v3568_v53  ;;  %vm3850_vm3 = vcmp.lt.s32.totalorder %v3831_v29, 1 }
 0x280   :  { %v3572_v43 = vsub.s32 0, %v12028_v19  ;;  %v3849_v63 = vor.u32 %v3848_v13, %v3847_v40  ;;  %vm3852_vm10 = vcmp.lt.s32.totalorder %v3831_v29, 3  ;;  %vm3853_vm12 = vcmp.lt.s32.totalorder %v3831_v29, 4 }
 0x281   :  { %v3482_v58 = vand.u32 2147483647, %v3481_v39  ;;  %vm12037_vm15 = vcmp.le.f32.partialorder %v3506_v51, 0.7853982  ;;  %v3855_v46 = vsel %vm3853_vm12, %v3843_v15, 2102212464  ;;  %v3858_v50 = vsel %vm3850_vm3, %v3837_v14, %v3840_v60 }
 0x282   :  { %v9197_v21 = vmin.u32 %v3572_v43, %v12028_v19  ;;  %v3859_v26 = vsel %vm3853_vm12, %v3846_v49, 920167782  ;;  %vm3851_vm11 = vcmp.lt.s32.totalorder %v3831_v29, 2  ;;  %v3926_v0 = vshrl.u32 %v3925_v62, 23  ;;  %v49_v43 = vld [vmem:[#allocation2 + $0x18] sm:$0xff] }
 0x283   :  { %v3485_v54 = vmul.f32 %v3484_v55, %v3482_v58  ;;  %v3860_v2 = vsel %vm3852_vm10, %v3843_v15, %v3859_v26  ;;  %v3854_v24 = vsel %vm3850_vm3, %v3834_v35, %v3837_v14  ;;  %v3856_v51 = vsel %vm3852_vm10, %v3840_v60, %v3855_v46 }
 0x284   :  { %v3574_v12 = vclz %v9197_v21  ;;  %v3862_v28 = vsel %vm3850_vm3, %v3840_v60, %v3843_v15  ;;  %v3593_v16 = vsel %vm3508_vm6, %v3592_v57, %v3568_v53  ;;  %v3861_v25 = vsel %vm3851_vm11, %v3858_v50, %v3860_v2  ;;  %v53_v21 = vld [vmem:[#allocation2 + $0x38] sm:$0xff] }
 0x285   :  { %v3486_v30 = vxor.u32 2147483648, %v3485_v54  ;;  %v3863_v27 = vsel %vm3853_vm12, %v3849_v63, 1326507024  ;;  %v12055_v33 = vmul.u32.u64.low %v12013_v47, %v3861_v25  ;;  %v12056_v3 = vmul.u32.u64.high %v12013_v47, %v3861_v25, %v12055_v33 }
 0x286   :  { %v9198_v37 = vadd.s32 4294967294, %v3574_v12  ;;  %v3864_v7 = vsel %vm3852_vm10, %v3846_v49, %v3863_v27  ;;  %v3857_v34 = vsel %vm3851_vm11, %v3854_v24, %v3856_v51  ;;  %v9212_v53 = vadd.s32 4294967169, %v3926_v0 }
 0x287   :  { %v3487_v8 = vsel %vm3404_vm2, %v3486_v30, %v3485_v54  ;;  %v3865_v56 = vsel %vm3851_vm11, %v3862_v28, %v3864_v7  ;;  %v3562_v49 = vadd.s32 %v11968_v5, %v11979_v36  ;;  %v3929_v40 = vand.u32 8388607, %v3922_v45 }
 0x288   :  { %v3490_v14 = vsel %vm11996_vm4, %v11793_v17, %v3487_v8  ;;  %vm9199_vm13 = vcmp.lt.s32.totalorder %v9198_v37, 0  ;;  %v12067_v60 = vmul.u32.u64.low %v12013_v47, %v3865_v56  ;;  %v12068_v15 = vmul.u32.u64.high %v12013_v47, %v3865_v56, %v12067_v60 }
 0x289   :  { %9893 = vcosq.f32 %v3490_v14  ;;  %v3577_v13 = vsel %vm9199_vm13, 0, %v9198_v37  ;;  %v3932_v39 = vadd.s32 1, %v9212_v53  ;;  %v12076_v4 = vsel %vm12037_vm15, 0, %v3593_v16 }
 0x28a   :  { %9895 = vsinq.f32 %v3490_v14  ;;  %v3578_v35 = vsub.s32 32, %v3577_v13  ;;  %v3582_v29 = vsub.s32 4294967266, %v3577_v13  ;;  %v3873_v62 = vmul.u32 %v12013_v47, %v3857_v34 }
 0x28b   :  { %v3876_v55 = vadd.s32 1, %v12056_v3  ;;  %vm3933_vm1 = vcmp.gt.s32.totalorder %v3932_v39, 0  ;;  %v3579_v5 = vshll.u32 %v12028_v19, %v3577_v13  ;;  %vm3875_vm5 = vc.u32 %v12068_v15, %v12055_v33 }
 0x28c   :  { %v3580_v36 = vshrl.u32 %v3562_v49, %v3578_v35  ;;  %v3583_v57 = vadd.s32 127, %v3582_v29  ;;  %v3934_v63 = vsel %vm3933_vm1, %v3932_v39, 0  ;;  %v12085_v47 = vmul.f32 %v10120_v9, %v49_v43 }
 0x28d   :  { %v3877_v58 = vsel %vm3875_vm5, %v3876_v55, %v12056_v3  ;;  %v12088_v54 = vand.u32 3, %v12016_v32  ;;  %v3599_v19 = vadd.s32 3, %v12076_v4  ;;  %v3936_v2 = vand.u32 31, %v3934_v63 }
 0x28e   :  { %v3581_v46 = vor.u32 %v3580_v36, %v3579_v5  ;;  %v3584_v50 = vshll.u32 %v3583_v57, 23  ;;  %v3878_v26 = vadd.s32 %v3877_v58, %v3873_v62  ;;  %v3930_v24 = vor.u32 8388608, %v3929_v40 }
 0x28f   :  { %v12092_v51 = vmul.f32 %v10280_v61, %v53_v21  ;;  %v3937_v28 = vsub.s32 32, %v3936_v2  ;;  %v12097_v27 = vand.u32 3, %v12008_v52  ;;  %vm3501_vm14 = vcmp.eq.s32.totalorder %v12088_v54, 2 }
 0x290   :  { %v3585_v0 = vor.u32 4788187, %v3584_v50  ;;  %v3879_v12 = vadd.s32 536870912, %v3878_v26  ;;  %v3588_v16 = vcvt.s32.f32 %v3581_v46  ;;  %v12100_v32 = vand.u32 3, %v3599_v19 }
 0x291   :  { %v3940_v37 = vshrl.u32 %v14735_v42, %v3937_v28  ;;  %v12104_v7 = vmul.f32 8.0, %v12085_v47  ;;  %vm3498_vm7 = vcmp.eq.s32.totalorder %v12088_v54, 0  ;;  %v3946_v34 = vshrl.u32 %v14819_v10, %v3937_v28 }
 0x292   :  { %v3586_v30 = vand.u32 2147483647, %v3585_v0  ;;  %v12094_v25 = vshrl.u32 %v3879_v12, 30  ;;  %v12109_v56 = vshll.u32 %v3930_v24, 8  ;;  %v12111_v52 = vshrl.u32 %v3934_v63, 5 }
 0x293   :  { %v3939_v53 = vshll.u32 %v14749_v38, %v3936_v2  ;;  %v3943_v14 = vshrl.u32 %v14733_v44, %v3937_v28  ;;  %v3949_v60 = vshrl.u32 %v14751_v48, %v3937_v28  ;;  %v3942_v35 = vshll.u32 %v14735_v42, %v3936_v2 }
 0x294   :  { %v3589_v3 = vmul.f32 %v3588_v16, %v3586_v30  ;;  %v3881_v8 = vshll.u32 %v12094_v25, 30  ;;  %v3945_v29 = vshll.u32 %v14733_v44, %v3936_v2  ;;  %vm4329_vm2 = vcmp.eq.s32.totalorder %v12097_v27, 0 }
 0x295   :  { %v3941_v62 = vor.u32 %v3940_v37, %v3939_v53  ;;  %v3948_v55 = vshll.u32 %v14819_v10, %v3936_v2  ;;  %v3951_v43 = vshll.u32 %v14751_v48, %v3936_v2  ;;  %v3952_v5 = vshrl.u32 %v14820_v41, %v3937_v28 }
 0x296   :  { %v9894_v49 = vpop.eup %9893  ;;  %v3590_v13 = vxor.u32 2147483648, %v3589_v3  ;;  %v12116_v39 = vsub.s32 %v3878_v26, %v3881_v8  ;;  %v3947_v63 = vor.u32 %v3946_v34, %v3945_v29  ;;  %v3944_v50 = vor.u32 %v3943_v14, %v3942_v35 }
 0x297   :  { %v9896_v40 = vpop.eup %9895  ;;  %v3502_v36 = vxor.u32 2147483648, %v9894_v49  ;;  %v3950_v26 = vor.u32 %v3949_v60, %v3948_v55  ;;  %vm4328_vm0 = vcmp.lt.s32.totalorder %v12097_v27, 2  ;;  %vm3497_vm4 = vcmp.lt.s32.totalorder %v12088_v54, 2 }
 0x298   :  { %v3591_v57 = vsel %vm3508_vm6, %v3590_v13, %v3589_v3  ;;  %v3884_v58 = vsub.s32 0, %v12116_v39  ;;  %v3499_v21 = vxor.u32 2147483648, %v9896_v40  ;;  %vm3954_vm8 = vcmp.lt.s32.totalorder %v12111_v52, 1 }
 0x299   :  { %v3594_v46 = vsel %vm12037_vm15, %v11805_v11, %v3591_v57  ;;  %vm4332_vm9 = vcmp.eq.s32.totalorder %v12097_v27, 2  ;;  %v3938_v2 = vshrl.u32 %v14749_v38, %v3937_v28  ;;  %v3953_v0 = vor.u32 %v3952_v5, %v3951_v43 }
 0x29a   :  { %9897 = vcosq.f32 %v3594_v46  ;;  %v9209_v19 = vmin.u32 %v3884_v58, %v12116_v39  ;;  %vm3957_vm6 = vcmp.lt.s32.totalorder %v12111_v52, 4  ;;  %v3503_v6 = vsel %vm3501_vm14, %v3502_v36, %v9896_v40 }
 0x29b   :  { %9899 = vsinq.f32 %v3594_v46  ;;  %vm3955_vm3 = vcmp.lt.s32.totalorder %v12111_v52, 2  ;;  %v3959_v24 = vsel %vm3957_vm6, %v3947_v63, 2102212464  ;;  %vm3494_vm10 = vweird.f32 %v11793_v17 }
 0x29c   :  { %v3886_v12 = vclz %v9209_v19  ;;  %v3500_v30 = vsel %vm3498_vm7, %v9894_v49, %v3499_v21  ;;  %vm3956_vm12 = vcmp.lt.s32.totalorder %v12111_v52, 3  ;;  %v3962_v28 = vsel %vm3954_vm8, %v3941_v62, %v3944_v50 }
 0x29d   :  { %v3963_v16 = vsel %vm3957_vm6, %v3950_v26, 920167782  ;;  %v3958_v3 = vsel %vm3954_vm8, %v3938_v2, %v3941_v62  ;;  %v3966_v34 = vsel %vm3954_vm8, %v3944_v50, %v3947_v63  ;;  %v3960_v53 = vsel %vm3956_vm12, %v3944_v50, %v3959_v24 }
 0x29e   :  { %v9210_v37 = vadd.s32 4294967294, %v3886_v12  ;;  %v3964_v8 = vsel %vm3956_vm12, %v3947_v63, %v3963_v16  ;;  %v3967_v60 = vsel %vm3957_vm6, %v3953_v0, 1326507024  ;;  %v4331_v13 = vsel %vm4329_vm2, %v9894_v49, %v3499_v21 }
 0x29f   :  { %v3965_v14 = vsel %vm3955_vm3, %v3962_v28, %v3964_v8  ;;  %v3968_v35 = vsel %vm3956_vm12, %v3950_v26, %v3967_v60  ;;  %v3874_v62 = vadd.s32 %v12055_v33, %v12068_v15  ;;  %v4334_v57 = vsel %vm4332_vm9, %v3502_v36, %v9896_v40 }
 0x2a0   :  { %vm9211_vm15 = vcmp.lt.s32.totalorder %v9210_v37, 0  ;;  %v12161_v29 = vmul.u32.u64.low %v12109_v56, %v3965_v14  ;;  %v12162_v55 = vmul.u32.u64.high %v12109_v56, %v3965_v14, %v12161_v29  ;;  %v3969_v5 = vsel %vm3955_vm3, %v3966_v34, %v3968_v35 }
 0x2a1   :  { %v3889_v43 = vsel %vm9211_vm15, 0, %v9210_v37  ;;  %v4335_v49 = vsel %vm4328_vm0, %v4331_v13, %v4334_v57  ;;  %v4430_v21 = vand.u32 3, %v12076_v4  ;;  %v3504_v46 = vsel %vm3497_vm4, %v3500_v30, %v3503_v6 }
 0x2a2   :  { %v3890_v58 = vsub.s32 32, %v3889_v43  ;;  %v3894_v63 = vsub.s32 4294967266, %v3889_v43  ;;  %v3961_v33 = vsel %vm3955_vm3, %v3958_v3, %v3960_v53  ;;  %vm3598_vm11 = vweird.f32 %v11805_v11 }
 0x2a3   :  { %v12179_v15 = vmul.u32.u64.low %v12109_v56, %v3969_v5  ;;  %v12180_v50 = vmul.u32.u64.high %v12109_v56, %v3969_v5, %v12179_v15  ;;  %v3891_v40 = vshll.u32 %v12116_v39, %v3889_v43  ;;  %v3980_v27 = vadd.s32 1, %v12162_v55 }
 0x2a4   :  { %v3892_v36 = vshrl.u32 %v3874_v62, %v3890_v58  ;;  %v3895_v26 = vadd.s32 127, %v3894_v63  ;;  %vm3601_vm13 = vcmp.lt.s32.totalorder %v12100_v32, 2  ;;  %vm3602_vm1 = vcmp.eq.s32.totalorder %v12100_v32, 0 }
 0x2a5   :  { %vm3605_vm5 = vcmp.eq.s32.totalorder %v12100_v32, 2  ;;  %v5381_v4 = vand.u32 2139095040, %v12104_v7  ;;  %v3505_v54 = vsel %vm3494_vm10, nan, %v3504_v46  ;;  %v3904_v2 = vsub.s32 4, %v12094_v25 }
 0x2a6   :  { %v3893_v52 = vor.u32 %v3892_v36, %v3891_v40  ;;  %v3896_v19 = vshll.u32 %v3895_v26, 23  ;;  %v3977_v0 = vmul.u32 %v12109_v56, %v3961_v33  ;;  %vm3979_vm14 = vc.u32 %v12180_v50, %v12161_v29 }
 0x2a7   :  { %v9898_v39 = vpop.eup %9897  ;;  %v12197_v6 = vsel %vm3494_vm10, nan, %v4335_v49  ;;  %vm4431_vm7 = vcmp.lt.s32.totalorder %v4430_v21, 2  ;;  %v3981_v28 = vsel %vm3979_vm14, %v3980_v27, %v12162_v55  ;;  %vm4432_vm2 = vcmp.eq.s32.totalorder %v4430_v21, 0 }
 0x2a8   :  { %v9900_v12 = vpop.eup %9899  ;;  %v3606_v24 = vxor.u32 2147483648, %v9898_v39  ;;  %v3897_v30 = vor.u32 4788187, %v3896_v19  ;;  %v3982_v37 = vadd.s32 %v3981_v28, %v3977_v0  ;;  %vm4435_vm0 = vcmp.eq.s32.totalorder %v4430_v21, 2 }
 0x2a9   :  { %v3603_v16 = vxor.u32 2147483648, %v9900_v12  ;;  %v5382_v3 = vshrl.u32 %v5381_v4, 23  ;;  %v3900_v34 = vcvt.s32.f32 %v3893_v52  ;;  %vm3820_vm4 = vcmp.lt.s32.totalorder %v11845_v31, 0 }
 0x2aa   :  { %v3607_v56 = vsel %vm3605_vm5, %v3606_v24, %v9900_v12  ;;  %v3898_v8 = vand.u32 2147483647, %v3897_v30  ;;  %v4437_v53 = vsel %vm4435_vm0, %v3606_v24, %v9900_v12  ;;  %v3983_v14 = vadd.s32 536870912, %v3982_v37 }
 0x2ab   :  { %v3604_v17 = vsel %vm3602_vm1, %v9898_v39, %v3603_v16  ;;  %v4434_v60 = vsel %vm4432_vm2, %v9898_v39, %v3603_v16  ;;  %v9268_v13 = vadd.s32 4294967169, %v5382_v3  ;;  %v3905_v32 = vsel %vm3820_vm4, %v3904_v2, %v12094_v25 }
 0x2ac   :  { %v3608_v35 = vsel %vm3601_vm13, %v3604_v17, %v3607_v56  ;;  %v3901_v55 = vmul.f32 %v3900_v34, %v3898_v8  ;;  %v4438_v62 = vsel %vm4431_vm7, %v4434_v60, %v4437_v53  ;;  %v12210_v5 = vshrl.u32 %v3983_v14, 30 }
 0x2ad   :  { %v3609_v43 = vsel %vm3598_vm11, nan, %v3608_v35  ;;  %v12214_v57 = vsel %vm3598_vm11, nan, %v4438_v62  ;;  %v5388_v58 = vadd.s32 1, %v9268_v13  ;;  %vm3819_vm9 = vcmp.le.f32.partialorder %v3818_v18, 0.7853982 }
 0x2ae   :  { %v9737_v63 = vpack.i.bf16 %v3505_v54, %v3609_v43  ;;  %v3902_v49 = vxor.u32 2147483648, %v3901_v55  ;;  %v9741_v46 = vpack.i.bf16 %v12197_v6, %v12214_v57  ;;  %v3985_v21 = vshll.u32 %v12210_v5, 30 }
 0x2af   :  { %vm5389_vm8 = vcmp.gt.s32.totalorder %v5388_v58, 0  ;;  %v12222_v11 = vsel %vm3819_vm9, 0, %v3905_v32  ;;  %v5378_v36 = vand.u32 2147483647, %v12104_v7  ;;  %v12226_v26 = vmul.f32 8.0, %v12092_v51 }
 0x2b0   :  { %9738 = vxpose.xlu0.b32.cont [11/16] %v9737_v63, 128  ;;  %v3903_v33 = vsel %vm3820_vm4, %v3902_v49, %v3901_v55  ;;  %v5390_v15 = vsel %vm5389_vm8, %v5388_v58, 0  ;;  %v3986_v40 = vsub.s32 %v3982_v37, %v3985_v21  ;;  %v3911_v54 = vadd.s32 3, %v12222_v11 }
 0x2b1   :  { %v3906_v25 = vsel %vm3819_vm9, %v11845_v31, %v3903_v33  ;;  %v5392_v27 = vand.u32 31, %v5390_v15  ;;  %v5385_v18 = vand.u32 8388607, %v5378_v36  ;;  %v5797_v2 = vand.u32 2139095040, %v12226_v26 }
 0x2b2   :  { %v3988_v4 = vsub.s32 0, %v3986_v40  ;;  %9901 = vcosq.f32 %v3906_v25  ;;  %vm3924_vm6 = vcmp.lt.s32.totalorder %v12001_v59, 0  ;;  %v12238_v28 = vshrl.u32 %v5390_v15, 5 }
 0x2b3   :  { %v5393_v52 = vsub.s32 32, %v5392_v27  ;;  %v5395_v39 = vshll.u32 %v14749_v38, %v5392_v27  ;;  %v5398_v12 = vshll.u32 %v14735_v42, %v5392_v27  ;;  %9903 = vsinq.f32 %v3906_v25 }
 0x2b4   :  { %v9213_v19 = vmin.u32 %v3988_v4, %v3986_v40  ;;  %v5401_v16 = vshll.u32 %v14733_v44, %v5392_v27  ;;  %v5404_v8 = vshll.u32 %v14819_v10, %v5392_v27  ;;  %v5407_v17 = vshll.u32 %v14751_v48, %v5392_v27 }
 0x2b5   :  { %v5396_v0 = vshrl.u32 %v14735_v42, %v5393_v52  ;;  %v5399_v24 = vshrl.u32 %v14733_v44, %v5393_v52  ;;  %v5402_v56 = vshrl.u32 %v14819_v10, %v5393_v52  ;;  %v5405_v53 = vshrl.u32 %v14751_v48, %v5393_v52 }
 0x2b6   :  { %v3990_v30 = vclz %v9213_v19  ;;  %v5408_v14 = vshrl.u32 %v14820_v41, %v5393_v52  ;;  %vm12248_vm3 = vcmp.le.f32.partialorder %v3922_v45, 0.7853982  ;;  %v3978_v13 = vadd.s32 %v12161_v29, %v12180_v50 }
 0x2b7   :  { %v5397_v37 = vor.u32 %v5396_v0, %v5395_v39  ;;  %v5400_v3 = vor.u32 %v5399_v24, %v5398_v12  ;;  %v4008_v35 = vsub.s32 4, %v12210_v5  ;;  %v5386_v55 = vor.u32 8388608, %v5385_v18 }
 0x2b8   :  { %v9214_v34 = vadd.s32 4294967294, %v3990_v30  ;;  %v5403_v62 = vor.u32 %v5402_v56, %v5401_v16  ;;  %v5406_v43 = vor.u32 %v5405_v53, %v5404_v8  ;;  %v5409_v58 = vor.u32 %v5408_v14, %v5407_v17  ;;  %v48_v56 = vld [vmem:[#allocation2 + $0x10] sm:$0xff] }
 0x2b9   :  { %v5798_v63 = vshrl.u32 %v5797_v2, 23  ;;  %vm5410_vm12 = vcmp.lt.s32.totalorder %v12238_v28, 1  ;;  %vm5411_vm15 = vcmp.lt.s32.totalorder %v12238_v28, 2  ;;  %vm5412_vm11 = vcmp.lt.s32.totalorder %v12238_v28, 3 }
 0x2ba   :  { %vm9215_vm10 = vcmp.lt.s32.totalorder %v9214_v34, 0  ;;  %vm5413_vm13 = vcmp.lt.s32.totalorder %v12238_v28, 4  ;;  %v5418_v29 = vsel %vm5410_vm12, %v5397_v37, %v5400_v3  ;;  %v5422_v33 = vsel %vm5410_vm12, %v5400_v3, %v5403_v62 }
 0x2bb   :  { %v3993_v49 = vsel %vm9215_vm10, 0, %v9214_v34  ;;  %v5419_v21 = vsel %vm5413_vm13, %v5406_v43, 920167782  ;;  %v5423_v15 = vsel %vm5413_vm13, %v5409_v58, 1326507024  ;;  %v4009_v18 = vsel %vm3924_vm6, %v4008_v35, %v12210_v5 }
 0x2bc   :  { %v3994_v45 = vsub.s32 32, %v3993_v49  ;;  %v3998_v32 = vsub.s32 4294967266, %v3993_v49  ;;  %v3995_v50 = vshll.u32 %v3986_v40, %v3993_v49  ;;  %v5420_v4 = vsel %vm5412_vm11, %v5403_v62, %v5419_v21 }
 0x2bd   :  { %v5424_v19 = vsel %vm5412_vm11, %v5406_v43, %v5423_v15  ;;  %v5415_v2 = vsel %vm5413_vm13, %v5403_v62, 2102212464  ;;  %v5426_v39 = vshll.u32 %v5386_v55, 8  ;;  %v5394_v24 = vshrl.u32 %v14749_v38, %v5393_v52 }
 0x2be   :  { %v3996_v25 = vshrl.u32 %v3978_v13, %v3994_v45  ;;  %v3999_v27 = vadd.s32 127, %v3998_v32  ;;  %v5425_v40 = vsel %vm5411_vm15, %v5422_v33, %v5424_v19  ;;  %v5421_v30 = vsel %vm5411_vm15, %v5418_v29, %v5420_v4 }
 0x2bf   :  { %v12275_v16 = vpop.eup %9901  ;;  %v12277_v8 = vand.u32 3, %v3911_v54  ;;  %v12279_v34 = vmul.u32.u64.low %v5426_v39, %v5425_v40  ;;  %v12280_v53 = vmul.u32.u64.high %v5426_v39, %v5425_v40, %v12279_v34  ;;  %v9284_v5 = vadd.s32 4294967169, %v5798_v63 }
 0x2c0   :  { %v3997_v0 = vor.u32 %v3996_v25, %v3995_v50  ;;  %v4000_v12 = vshll.u32 %v3999_v27, 23  ;;  %v4011_v14 = vsel %vm12248_vm3, 0, %v4009_v18  ;;  %v5414_v13 = vsel %vm5410_vm12, %v5394_v24, %v5397_v37  ;;  %v9904_v35 = vpop.eup %9903 }
 0x2c1   :  { %v5416_v52 = vsel %vm5412_vm11, %v5400_v3, %v5415_v2  ;;  %v12288_v55 = vmul.u32.u64.low %v5426_v39, %v5421_v30  ;;  %v12289_v62 = vmul.u32.u64.high %v5426_v39, %v5421_v30, %v12288_v55  ;;  %v12293_v54 = vmul.f32 %v10120_v9, %v48_v56 }
 0x2c2   :  { %v4001_v17 = vor.u32 4788187, %v4000_v12  ;;  %v4004_v58 = vcvt.s32.f32 %v3997_v0  ;;  %v12296_v63 = vand.u32 3, %v12222_v11  ;;  %vm3914_vm1 = vcmp.eq.s32.totalorder %v12277_v8, 0 }
 0x2c3   :  { %v4015_v49 = vadd.s32 3, %v4011_v14  ;;  %v5417_v37 = vsel %vm5411_vm15, %v5414_v13, %v5416_v52  ;;  %v5804_v3 = vadd.s32 1, %v9284_v5  ;;  %v3915_v45 = vxor.u32 2147483648, %v9904_v35 }
 0x2c4   :  { %v4002_v43 = vand.u32 2147483647, %v4001_v17  ;;  %v3918_v32 = vxor.u32 2147483648, %v12275_v16  ;;  %vm5435_vm5 = vc.u32 %v12280_v53, %v12288_v55  ;;  %vm3917_vm14 = vcmp.eq.s32.totalorder %v12277_v8, 2 }
 0x2c5   :  { %v5436_v9 = vadd.s32 1, %v12289_v62  ;;  %v5794_v11 = vand.u32 2147483647, %v12226_v26  ;;  %vm5805_vm7 = vcmp.gt.s32.totalorder %v5804_v3, 0  ;;  %vm4741_vm2 = vcmp.eq.s32.totalorder %v12296_v63, 0 }
 0x2c6   :  { %v4005_v29 = vmul.f32 %v4004_v58, %v4002_v43  ;;  %vm4744_vm0 = vcmp.eq.s32.totalorder %v12296_v63, 2  ;;  %v5433_v28 = vmul.u32 %v5426_v39, %v5417_v37  ;;  %v5806_v21 = vsel %vm5805_vm7, %v5804_v3, 0 }
 0x2c7   :  { %vm3913_vm4 = vcmp.lt.s32.totalorder %v12277_v8, 2  ;;  %v12310_v33 = vand.u32 3, %v4015_v49  ;;  %v12312_v15 = vand.u32 3, %v4011_v14  ;;  %v5437_v25 = vsel %vm5435_vm5, %v5436_v9, %v12289_v62 }
 0x2c8   :  { %v4006_v50 = vxor.u32 2147483648, %v4005_v29  ;;  %v5808_v27 = vand.u32 31, %v5806_v21  ;;  %v3916_v4 = vsel %vm3914_vm1, %v12275_v16, %v3915_v45  ;;  %v3919_v19 = vsel %vm3917_vm14, %v3918_v32, %v9904_v35 }
 0x2c9   :  { %v5438_v2 = vadd.s32 %v5437_v25, %v5433_v28  ;;  %v5801_v39 = vand.u32 8388607, %v5794_v11  ;;  %v12325_v0 = vshrl.u32 %v5806_v21, 5  ;;  %v12340_v49 = vmul.f32 8.0, %v12293_v54 }
 0x2ca   :  { %v4007_v18 = vsel %vm3924_vm6, %v4006_v50, %v4005_v29  ;;  %v5809_v12 = vsub.s32 32, %v5808_v27  ;;  %v5811_v30 = vshll.u32 %v14749_v38, %v5808_v27  ;;  %v5814_v56 = vshll.u32 %v14735_v42, %v5808_v27 }
 0x2cb   :  { %v4010_v40 = vsel %vm12248_vm3, %v12001_v59, %v4007_v18  ;;  %v5439_v24 = vadd.s32 536870912, %v5438_v2  ;;  %v5817_v60 = vshll.u32 %v14733_v44, %v5808_v27  ;;  %v5820_v13 = vshll.u32 %v14819_v10, %v5808_v27  ;;  %14827 = vst [vmem:[#allocation11_spill] sm:$0xff] %v12340_v49 }
 0x2cc   :  { %9905 = vcosq.f32 %v4010_v40  ;;  %v5812_v34 = vshrl.u32 %v14735_v42, %v5809_v12  ;;  %v5815_v5 = vshrl.u32 %v14733_v44, %v5809_v12  ;;  %v5818_v14 = vshrl.u32 %v14819_v10, %v5809_v12 }
 0x2cd   :  { %9907 = vsinq.f32 %v4010_v40  ;;  %v12332_v17 = vshrl.u32 %v5439_v24, 30  ;;  %v5821_v52 = vshrl.u32 %v14751_v48, %v5809_v12  ;;  %v5823_v43 = vshll.u32 %v14751_v48, %v5808_v27 }
 0x2ce   :  { %v5813_v62 = vor.u32 %v5812_v34, %v5811_v30  ;;  %v5824_v58 = vshrl.u32 %v14820_v41, %v5809_v12  ;;  %vm3910_vm8 = vweird.f32 %v11845_v31  ;;  %v5816_v3 = vor.u32 %v5815_v5, %v5814_v56 }
 0x2cf   :  { %v5441_v37 = vshll.u32 %v12332_v17, 30  ;;  %v5819_v29 = vor.u32 %v5818_v14, %v5817_v60  ;;  %v5822_v9 = vor.u32 %v5821_v52, %v5820_v13  ;;  %vm4740_vm9 = vcmp.lt.s32.totalorder %v12296_v63, 2 }
 0x2d0   :  { %v4743_v50 = vsel %vm4741_vm2, %v12275_v16, %v3915_v45  ;;  %v4746_v28 = vsel %vm4744_vm0, %v3918_v32, %v9904_v35  ;;  %v5825_v21 = vor.u32 %v5824_v58, %v5823_v43  ;;  %v3920_v25 = vsel %vm3913_vm4, %v3916_v4, %v3919_v19 }
 0x2d1   :  { %v12352_v27 = vsub.s32 %v5438_v2, %v5441_v37  ;;  %v5802_v18 = vor.u32 8388608, %v5801_v39  ;;  %vm5829_vm6 = vcmp.lt.s32.totalorder %v12325_v0, 4  ;;  %vm4021_vm3 = vcmp.eq.s32.totalorder %v12310_v33, 2 }
 0x2d2   :  { %vm4847_vm10 = vcmp.eq.s32.totalorder %v12312_v15, 2  ;;  %v5810_v40 = vshrl.u32 %v14749_v38, %v5809_v12  ;;  %vm5826_vm12 = vcmp.lt.s32.totalorder %v12325_v0, 1  ;;  %v5835_v16 = vsel %vm5829_vm6, %v5822_v9, 920167782 }
 0x2d3   :  { %v5277_v35 = vand.u32 2139095040, %v12340_v49  ;;  %vm4018_vm15 = vcmp.eq.s32.totalorder %v12310_v33, 0  ;;  %vm4844_vm11 = vcmp.eq.s32.totalorder %v12312_v15, 0  ;;  %v5444_v8 = vsub.s32 0, %v12352_v27 }
 0x2d4   :  { %vm5828_vm13 = vcmp.lt.s32.totalorder %v12325_v0, 3  ;;  %v5831_v45 = vsel %vm5829_vm6, %v5819_v29, 2102212464  ;;  %v5834_v32 = vsel %vm5826_vm12, %v5813_v62, %v5816_v3  ;;  %vm4017_vm1 = vcmp.lt.s32.totalorder %v12310_v33, 2 }
 0x2d5   :  { %v4747_v4 = vsel %vm4740_vm9, %v4743_v50, %v4746_v28  ;;  %vm5380_vm5 = vcmp.lt.s32.totalorder %v12104_v7, 0  ;;  %v5836_v19 = vsel %vm5828_vm13, %v5819_v29, %v5835_v16  ;;  %v5838_v2 = vsel %vm5826_vm12, %v5816_v3, %v5819_v29 }
 0x2d6   :  { %v5839_v39 = vsel %vm5829_vm6, %v5825_v21, 1326507024  ;;  %vm4014_vm14 = vweird.f32 %v12001_v59  ;;  %vm4843_vm7 = vcmp.lt.s32.totalorder %v12312_v15, 2  ;;  %v9269_v12 = vmin.u32 %v5444_v8, %v12352_v27 }
 0x2d7   :  { %vm5827_vm2 = vcmp.lt.s32.totalorder %v12325_v0, 2  ;;  %v5830_v63 = vsel %vm5826_vm12, %v5810_v40, %v5813_v62  ;;  %v5842_v24 = vshll.u32 %v5802_v18, 8  ;;  %v5832_v30 = vsel %vm5828_vm13, %v5816_v3, %v5831_v45 }
 0x2d8   :  { %v5837_v56 = vsel %vm5827_vm2, %v5834_v32, %v5836_v19  ;;  %v5840_v34 = vsel %vm5828_vm13, %v5822_v9, %v5839_v39  ;;  %v5278_v5 = vshrl.u32 %v5277_v35, 23  ;;  %v5446_v60 = vclz %v9269_v12 }
 0x2d9   :  { %v5841_v14 = vsel %vm5827_vm2, %v5838_v2, %v5840_v34  ;;  %v12394_v13 = vmul.u32.u64.low %v5842_v24, %v5837_v56  ;;  %v12395_v52 = vmul.u32.u64.high %v5842_v24, %v5837_v56, %v12394_v13  ;;  %v9906_v62 = vpop.eup %9905  ;;  %v3921_v43 = vsel %vm3910_vm8, nan, %v3920_v25 }
 0x2da   :  { %vm12402_vm0 = vcmp.le.f32.partialorder %v5378_v36, 0.7853982  ;;  %v12406_v37 = vmul.u32.u64.low %v5842_v24, %v5841_v14  ;;  %v12407_v3 = vmul.u32.u64.high %v5842_v24, %v5841_v14, %v12406_v37  ;;  %v9264_v29 = vadd.s32 4294967169, %v5278_v5  ;;  %v9908_v9 = vpop.eup %9907 }
 0x2db   :  { %v4022_v50 = vxor.u32 2147483648, %v9906_v62  ;;  %v12411_v28 = vsel %vm3910_vm8, nan, %v4747_v4  ;;  %v9270_v21 = vadd.s32 4294967294, %v5446_v60  ;;  %v5464_v18 = vsub.s32 4, %v12332_v17 }
 0x2dc   :  { %v4019_v25 = vxor.u32 2147483648, %v9908_v9  ;;  %v5434_v36 = vadd.s32 %v12288_v55, %v12280_v53  ;;  %v5833_v40 = vsel %vm5827_vm2, %v5830_v63, %v5832_v30  ;;  %v5274_v16 = vand.u32 2147483647, %v12340_v49 }
 0x2dd   :  { %v4023_v35 = vsel %vm4021_vm3, %v4022_v50, %v9908_v9  ;;  %v4849_v31 = vsel %vm4847_vm10, %v4022_v50, %v9908_v9  ;;  %vm9271_vm4 = vcmp.lt.s32.totalorder %v9270_v21, 0  ;;  %v5852_v8 = vadd.s32 1, %v12395_v52 }
 0x2de   :  { %v4020_v45 = vsel %vm4018_vm15, %v9906_v62, %v4019_v25  ;;  %v4846_v53 = vsel %vm4844_vm11, %v9906_v62, %v4019_v25  ;;  %v5449_v55 = vsel %vm9271_vm4, 0, %v9270_v21  ;;  %v5284_v0 = vadd.s32 1, %v9264_v29 }
 0x2df   :  { %v4024_v32 = vsel %vm4017_vm1, %v4020_v45, %v4023_v35  ;;  %v5450_v4 = vsub.s32 32, %v5449_v55  ;;  %v5465_v19 = vsel %vm5380_vm5, %v5464_v18, %v12332_v17  ;;  %v5849_v2 = vmul.u32 %v5842_v24, %v5833_v40 }
 0x2e0   :  { %v4025_v39 = vsel %vm4014_vm14, nan, %v4024_v32  ;;  %v4850_v12 = vsel %vm4843_vm7, %v4846_v53, %v4849_v31  ;;  %v5454_v63 = vsub.s32 4294967266, %v5449_v55  ;;  %vm5851_vm8 = vc.u32 %v12407_v3, %v12394_v13 }
 0x2e1   :  { %v9739_v30 = vpack.i.bf16 %v3921_v43, %v4025_v39  ;;  %v5451_v33 = vshll.u32 %v12352_v27, %v5449_v55  ;;  %v5452_v56 = vshrl.u32 %v5434_v36, %v5450_v4  ;;  %v5853_v34 = vsel %vm5851_vm8, %v5852_v8, %v12395_v52 }
 0x2e2   :  { %v5455_v5 = vadd.s32 127, %v5454_v63  ;;  %v5854_v60 = vadd.s32 %v5853_v34, %v5849_v2  ;;  %vm5285_vm9 = vcmp.gt.s32.totalorder %v5284_v0, 0  ;;  %v12442_v17 = vmul.f32 16.0, %v12085_v47 }
 0x2e3   :  { %9740 = vxpose.xlu0.b32.cont [12/16] %v9739_v30, 128  ;;  %v5453_v24 = vor.u32 %v5452_v56, %v5451_v33  ;;  %v12446_v15 = vsel %vm12402_vm0, 0, %v5465_v19  ;;  %v5281_v14 = vand.u32 8388607, %v5274_v16  ;;  %v5286_v62 = vsel %vm5285_vm9, %v5284_v0, 0 }
 0x2e4   :  { %v4851_v27 = vsel %vm4014_vm14, nan, %v4850_v12  ;;  %v5456_v52 = vshll.u32 %v5455_v5, 23  ;;  %v5855_v43 = vadd.s32 536870912, %v5854_v60  ;;  %v5288_v37 = vand.u32 31, %v5286_v62 }
 0x2e5   :  { %v12453_v9 = vand.u32 3, %v12446_v15  ;;  %v9743_v18 = vpack.i.bf16 %v12411_v28, %v4851_v27  ;;  %v5460_v25 = vcvt.s32.f32 %v5453_v24  ;;  %v5282_v36 = vor.u32 8388608, %v5281_v14 }
 0x2e6   :  { %v5457_v29 = vor.u32 4788187, %v5456_v52  ;;  %v12455_v50 = vshrl.u32 %v5855_v43, 30  ;;  %v5289_v21 = vsub.s32 32, %v5288_v37  ;;  %v7045_v59 = vand.u32 2139095040, %v12442_v17 }
 0x2e7   :  { %9742 = vxpose.xlu0.b32.cont [13/16] %v9741_v46, 128  ;;  %v5291_v31 = vshll.u32 %v14749_v38, %v5288_v37  ;;  %v5294_v8 = vshll.u32 %v14735_v42, %v5288_v37  ;;  %v5297_v55 = vshll.u32 %v14733_v44, %v5288_v37  ;;  %v5287_v32 = vshrl.u32 %v5286_v62, 5 }
 0x2e8   :  { %v5458_v40 = vand.u32 2147483647, %v5457_v29  ;;  %v5857_v35 = vshll.u32 %v12455_v50, 30  ;;  %v5292_v45 = vshrl.u32 %v14735_v42, %v5289_v21  ;;  %v5295_v53 = vshrl.u32 %v14733_v44, %v5289_v21 }
 0x2e9   :  { %v5298_v6 = vshrl.u32 %v14819_v10, %v5289_v21  ;;  %v5301_v57 = vshrl.u32 %v14751_v48, %v5289_v21  ;;  %v5304_v0 = vshrl.u32 %v14820_v41, %v5289_v21  ;;  %v5300_v19 = vshll.u32 %v14819_v10, %v5288_v37 }
 0x2ea   :  { %v5461_v46 = vmul.f32 %v5460_v25, %v5458_v40  ;;  %v12469_v28 = vsub.s32 %v5854_v60, %v5857_v35  ;;  %v5293_v4 = vor.u32 %v5292_v45, %v5291_v31  ;;  %v5303_v2 = vshll.u32 %v14751_v48, %v5288_v37 }
 0x2eb   :  { %9744 = vxpose.xlu0.b32.cont [14/16] %v9743_v18, 128  ;;  %v5296_v63 = vor.u32 %v5295_v53, %v5294_v8  ;;  %v5299_v30 = vor.u32 %v5298_v6, %v5297_v55  ;;  %v5302_v33 = vor.u32 %v5301_v57, %v5300_v19  ;;  %v12476_v56 = vshll.u32 %v5282_v36, 8 }
 0x2ec   :  { %v5462_v39 = vxor.u32 2147483648, %v5461_v46  ;;  %v5860_v12 = vsub.s32 0, %v12469_v28  ;;  %v7042_v34 = vand.u32 2147483647, %v12442_v17  ;;  %v7046_v5 = vshrl.u32 %v7045_v59, 23 }
 0x2ed   :  { %v5290_v14 = vshrl.u32 %v14749_v38, %v5289_v21  ;;  %v5305_v62 = vor.u32 %v5304_v0, %v5303_v2  ;;  %v14830_v27 = vpack.i.bf16 %v10562_v1, %v10678_v22  ;;  %vm5306_vm6 = vcmp.lt.s32.totalorder %v5287_v32, 1  ;;  %v8401_v2 = vld [vmem:[#allocation5 + $0x78] sm:$0xff] }
 0x2ee   :  { %v5463_v60 = vsel %vm5380_vm5, %v5462_v39, %v5461_v46  ;;  %v9285_v24 = vmin.u32 %v5860_v12, %v12469_v28  ;;  %vm5307_vm3 = vcmp.lt.s32.totalorder %v5287_v32, 2  ;;  %vm5309_vm10 = vcmp.lt.s32.totalorder %v5287_v32, 4 }
 0x2ef   :  { %9746 = vxpose.xlu0.b32.cont [15/16] %v14830_v27, 128  ;;  %v5466_v52 = vsel %vm12402_vm0, %v12104_v7, %v5463_v60  ;;  %v5311_v37 = vsel %vm5309_vm10, %v5299_v30, 2102212464  ;;  %v5314_v29 = vsel %vm5306_vm6, %v5293_v4, %v5296_v63  ;;  %vm5308_vm12 = vcmp.lt.s32.totalorder %v5287_v32, 3 }
 0x2f0   :  { %9909 = vcosq.f32 %v5466_v52  ;;  %v5862_v43 = vclz %v9285_v24  ;;  %v5315_v18 = vsel %vm5309_vm10, %v5302_v33, 920167782  ;;  %v5318_v21 = vsel %vm5306_vm6, %v5296_v63, %v5299_v30 }
 0x2f1   :  { %9911 = vsinq.f32 %v5466_v52  ;;  %v5310_v36 = vsel %vm5306_vm6, %v5290_v14, %v5293_v4  ;;  %v5316_v59 = vsel %vm5308_vm12, %v5299_v30, %v5315_v18  ;;  %v5319_v1 = vsel %vm5309_vm10, %v5305_v62, 1326507024 }
 0x2f2   :  { %v9286_v25 = vadd.s32 4294967294, %v5862_v43  ;;  %v14831_v22 = vpack.i.bf16 %v10996_v20, %v11119_v23  ;;  %v5312_v58 = vsel %vm5308_vm12, %v5296_v63, %v5311_v37  ;;  %v5317_v40 = vsel %vm5307_vm3, %v5314_v29, %v5316_v59  ;;  %v52_v23 = vld [vmem:[#allocation2 + $0x30] sm:$0xff]  ;;  %v8399_v29 = vld [vmem:[#allocation5 + $0x68] sm:$0xff] }
 0x2f3   :  { %v5320_v35 = vsel %vm5308_vm12, %v5302_v33, %v5319_v1  ;;  %v9332_v31 = vadd.s32 4294967169, %v7046_v5  ;;  %v12495_v45 = vmul.u32.u64.low %v12476_v56, %v5317_v40  ;;  %v12496_v53 = vmul.u32.u64.high %v12476_v56, %v5317_v40, %v12495_v45  ;;  %v8400_v37 = vld [vmem:[#allocation5 + $0x70] sm:$0xff] }
 0x2f4   :  { %9748 = vxpose.xlu0.b32.end [16/16] %v14831_v22, 128  ;;  %vm9287_vm15 = vcmp.lt.s32.totalorder %v9286_v25, 0  ;;  %v5321_v8 = vsel %vm5307_vm3, %v5318_v21, %v5320_v35  ;;  %v5850_v55 = vadd.s32 %v12394_v13, %v12407_v3  ;;  %v5313_v19 = vsel %vm5307_vm3, %v5310_v36, %v5312_v58 }
 0x2f5   :  { %v5865_v6 = vsel %vm9287_vm15, 0, %v9286_v25  ;;  %v12500_v57 = vmul.u32.u64.low %v12476_v56, %v5321_v8  ;;  %v12501_v46 = vmul.u32.u64.high %v12476_v56, %v5321_v8, %v12500_v57  ;;  %v7052_v20 = vadd.s32 1, %v9332_v31 }
 0x2f6   :  { %v5866_v0 = vsub.s32 32, %v5865_v6  ;;  %v5870_v4 = vsub.s32 4294967266, %v5865_v6  ;;  %v5867_v39 = vshll.u32 %v12469_v28, %v5865_v6  ;;  %v12509_v12 = vand.u32 8388607, %v7042_v34 }
 0x2f7   :  { %vm7053_vm11 = vcmp.gt.s32.totalorder %v7052_v20, 0  ;;  %v5332_v33 = vadd.s32 1, %v12496_v53  ;;  %v10072_v60 = vmov 0.0   ;;  %v12515_v13 = vmul.f32 %v10280_v61, %v52_v23 }
 0x2f8   :  { %v5868_v63 = vshrl.u32 %v5850_v55, %v5866_v0  ;;  %v5871_v30 = vadd.s32 127, %v5870_v4  ;;  %v7054_v5 = vsel %vm7053_vm11, %v7052_v20, 0  ;;  %8681 = vmatprep.subr.mxu0 %v10072_v60  ;;  %9385 = vmatprep.subr.mxu1 %v10072_v60  ;;  %v5329_v3 = vmul.u32 %v12476_v56, %v5313_v19 }
 0x2f9   :  { %vm5331_vm13 = vc.u32 %v12501_v46, %v12495_v45  ;;  %v7056_v28 = vand.u32 31, %v7054_v5  ;;  %8682 = vmatpush1.msra.mxu0 %v8401_v2  ;;  %9417 = vmatpush1.msra.mxu1 %v8401_v2  ;;  %vm6301_vm1 = vcmp.lt.s32.totalorder %v12453_v9, 2  ;;  %vm6302_vm5 = vcmp.eq.s32.totalorder %v12453_v9, 0 }
 0x2fa   :  { %v5869_v32 = vor.u32 %v5868_v63, %v5867_v39  ;;  %v5872_v24 = vshll.u32 %v5871_v30, 23  ;;  %v5333_v14 = vsel %vm5331_vm13, %v5332_v33, %v12496_v53  ;;  %8683 = vmatprep.subr.mxu0 %v10072_v60  ;;  %9386 = vmatprep.subr.mxu1 %v10072_v60  ;;  %vm6305_vm14 = vcmp.eq.s32.totalorder %v12453_v9, 2 }
 0x2fb   :  { %vm5796_vm7 = vcmp.lt.s32.totalorder %v12226_v26, 0  ;;  %v5334_v61 = vadd.s32 %v5333_v14, %v5329_v3  ;;  %v7057_v56 = vsub.s32 32, %v7056_v28  ;;  %vm14758_vm2 = vweird.f32 %v12104_v7  ;;  %8684 = vmatpush1.msra.mxu0 %v8400_v37  ;;  %9418 = vmatpush1.msra.mxu1 %v8400_v37 }
 0x2fc   :  { %vm12530_vm0 = vcmp.le.f32.partialorder %v5794_v11, 0.7853982  ;;  %v5873_v27 = vor.u32 4788187, %v5872_v24  ;;  %v5880_v52 = vsub.s32 4, %v12455_v50  ;;  %v7050_v43 = vor.u32 8388608, %v12509_v12  ;;  %8685 = vmatprep.subr.mxu0 %v10072_v60  ;;  %9387 = vmatprep.subr.mxu1 %v10072_v60 }
 0x2fd   :  { %v12536_v18 = vpop.eup %9909  ;;  %v5335_v21 = vadd.s32 536870912, %v5334_v61  ;;  %v12538_v25 = vshrl.u32 %v7054_v5, 5  ;;  %v7059_v36 = vshll.u32 %v14749_v38, %v7056_v28  ;;  %v7060_v59 = vshrl.u32 %v14735_v42, %v7057_v56  ;;  %8686 = vmatpush1.msra.mxu0 %v8399_v29  ;;  %9419 = vmatpush1.msra.mxu1 %v8399_v29 }
 0x2fe   :  { %v12542_v11 = vpop.eup %9911  ;;  %v14730_v1 = vxor.u32 2147483648, %v12536_v18  ;;  %v5874_v22 = vand.u32 2147483647, %v5873_v27  ;;  %v5876_v58 = vcvt.s32.f32 %v5869_v32  ;;  %v7063_v40 = vshrl.u32 %v14733_v44, %v7057_v56  ;;  %8687 = vmatprep.subr.mxu0 %v10072_v60  ;;  %9388 = vmatprep.subr.mxu1 %v10072_v60 }
 0x2ff   :  { %v14731_v35 = vxor.u32 2147483648, %v12542_v11  ;;  %v12549_v31 = vshrl.u32 %v5335_v21, 30  ;;  %v7062_v8 = vshll.u32 %v14735_v42, %v7056_v28  ;;  %v7066_v53 = vshrl.u32 %v14819_v10, %v7057_v56 }
 0x300   :  { %v6307_v6 = vsel %vm6305_vm14, %v14730_v1, %v12542_v11  ;;  %v5877_v57 = vmul.f32 %v5876_v58, %v5874_v22  ;;  %v7065_v20 = vshll.u32 %v14733_v44, %v7056_v28  ;;  %v7069_v23 = vshrl.u32 %v14751_v48, %v7057_v56 }
 0x301   :  { %v6304_v55 = vsel %vm6302_vm5, %v12536_v18, %v14731_v35  ;;  %v5337_v0 = vshll.u32 %v12549_v31, 30  ;;  %v7061_v4 = vor.u32 %v7060_v59, %v7059_v36  ;;  %v7068_v19 = vshll.u32 %v14819_v10, %v7056_v28 }
 0x302   :  { %v6308_v2 = vsel %vm6301_vm1, %v6304_v55, %v6307_v6  ;;  %v5878_v39 = vxor.u32 2147483648, %v5877_v57  ;;  %v7064_v12 = vor.u32 %v7063_v40, %v7062_v8  ;;  %v7072_v63 = vshrl.u32 %v14820_v41, %v7057_v56 }
 0x303   :  { %v6309_v30 = vsel %vm14758_vm2, nan, %v6308_v2  ;;  %v12574_v33 = vsub.s32 %v5334_v61, %v5337_v0  ;;  %v7067_v5 = vor.u32 %v7066_v53, %v7065_v20  ;;  %v7071_v3 = vshll.u32 %v14751_v48, %v7056_v28 }
 0x304   :  { %8649 = vxpose.xlu0.b32.start [1/6] (short) (narrow) %v6309_v30, 16  ;;  %v5879_v32 = vsel %vm5796_vm7, %v5878_v39, %v5877_v57  ;;  %v5881_v9 = vsel %vm5796_vm7, %v5880_v52, %v12455_v50  ;;  %v7070_v24 = vor.u32 %v7069_v23, %v7068_v19  ;;  %v12583_v14 = vmul.f32 8.0, %v12515_v13 }
 0x305   :  { %v5882_v61 = vsel %vm12530_vm0, %v12226_v26, %v5879_v32  ;;  %v5340_v27 = vsub.s32 0, %v12574_v33  ;;  %v7073_v37 = vor.u32 %v7072_v63, %v7071_v3  ;;  %v7090_v28 = vshll.u32 %v7050_v43, 8 }
 0x306   :  { %14834 = vst [vmem:[#allocation12_spill] sm:$0xff] %v12583_v14  ;;  %9913 = vcosq.f32 %v5882_v61  ;;  %v7058_v29 = vshrl.u32 %v14749_v38, %v7057_v56  ;;  %vm7074_vm4 = vcmp.lt.s32.totalorder %v12538_v25, 1  ;;  %vm7077_vm8 = vcmp.lt.s32.totalorder %v12538_v25, 4 }
 0x307   :  { %9915 = vsinq.f32 %v5882_v61  ;;  %v9265_v50 = vmin.u32 %v5340_v27, %v12574_v33  ;;  %v7079_v52 = vsel %vm7077_vm8, %v7067_v5, 2102212464  ;;  %v7082_v21 = vsel %vm7074_vm4, %v7061_v4, %v7064_v12 }
 0x308   :  { %vm7075_vm9 = vcmp.lt.s32.totalorder %v12538_v25, 2  ;;  %vm7076_vm6 = vcmp.lt.s32.totalorder %v12538_v25, 3  ;;  %v7083_v36 = vsel %vm7077_vm8, %v7070_v24, 920167782  ;;  %v7086_v59 = vsel %vm7074_vm4, %v7064_v12, %v7067_v5 }
 0x309   :  { %v5342_v22 = vclz %v9265_v50  ;;  %v7078_v43 = vsel %vm7074_vm4, %v7058_v29, %v7061_v4  ;;  %v7084_v58 = vsel %vm7076_vm6, %v7067_v5, %v7083_v36  ;;  %v7087_v40 = vsel %vm7077_vm8, %v7073_v37, 1326507024 }
 0x30a   :  { %v7080_v56 = vsel %vm7076_vm6, %v7064_v12, %v7079_v52  ;;  %v7085_v8 = vsel %vm7075_vm9, %v7082_v21, %v7084_v58  ;;  %v7088_v53 = vsel %vm7076_vm6, %v7070_v24, %v7087_v40  ;;  %v5693_v6 = vand.u32 2139095040, %v12583_v14 }
 0x30b   :  { %v9266_v57 = vadd.s32 4294967294, %v5342_v22  ;;  %v7089_v20 = vsel %vm7075_vm9, %v7086_v59, %v7088_v53  ;;  %v12600_v23 = vmul.u32.u64.low %v7090_v28, %v7085_v8  ;;  %v12601_v55 = vmul.u32.u64.high %v7090_v28, %v7085_v8, %v12600_v23 }
 0x30c   :  { %v12604_v0 = vmul.u32.u64.low %v7090_v28, %v7089_v20  ;;  %v12605_v19 = vmul.u32.u64.high %v7090_v28, %v7089_v20, %v12604_v0  ;;  %v5694_v4 = vshrl.u32 %v5693_v6, 23  ;;  %v12609_v2 = vsel %vm12530_vm0, 0, %v5881_v9 }
 0x30d   :  { %vm9267_vm3 = vcmp.lt.s32.totalorder %v9266_v57, 0  ;;  %v7081_v39 = vsel %vm7075_vm9, %v7078_v43, %v7080_v56  ;;  %v5690_v63 = vand.u32 2147483647, %v12583_v14  ;;  %v12615_v5 = vmul.f32 16.0, %v12092_v51 }
 0x30e   :  { %v5345_v12 = vsel %vm9267_vm3, 0, %v9266_v57  ;;  %v9280_v30 = vadd.s32 4294967169, %v5694_v4  ;;  %v5330_v3 = vadd.s32 %v12495_v45, %v12501_v46  ;;  %v7100_v62 = vadd.s32 1, %v12601_v55 }
 0x30f   :  { %v5346_v32 = vsub.s32 32, %v5345_v12  ;;  %v5350_v24 = vsub.s32 4294967266, %v5345_v12  ;;  %vm14743_vm10 = vweird.f32 %v12226_v26  ;;  %v6712_v9 = vand.u32 3, %v12609_v2 }
 0x310   :  { %v7097_v25 = vmul.u32 %v7090_v28, %v7081_v39  ;;  %vm7099_vm12 = vc.u32 %v12605_v19, %v12600_v23  ;;  %v5700_v61 = vadd.s32 1, %v9280_v30  ;;  %v5347_v27 = vshll.u32 %v12574_v33, %v5345_v12 }
 0x311   :  { %v5348_v37 = vshrl.u32 %v5330_v3, %v5346_v32  ;;  %v5351_v29 = vadd.s32 127, %v5350_v24  ;;  %v7101_v50 = vsel %vm7099_vm12, %v7100_v62, %v12601_v55  ;;  %vm5276_vm15 = vcmp.lt.s32.totalorder %v12340_v49, 0  ;;  %v8398_v32 = vld [vmem:[#allocation5 + $0x60] sm:$0xff] }
 0x312   :  { %v5360_v45 = vsub.s32 4, %v12549_v31  ;;  %v7102_v46 = vadd.s32 %v7101_v50, %v7097_v25  ;;  %vm5701_vm11 = vcmp.gt.s32.totalorder %v5700_v61, 0  ;;  %v5697_v36 = vand.u32 8388607, %v5690_v63  ;;  %8688 = vmatpush1.msra.mxu0 %v8398_v32  ;;  %9420 = vmatpush1.msra.mxu1 %v8398_v32 }
 0x313   :  { %v12628_v52 = vpop.eup %9913  ;;  %v5349_v21 = vor.u32 %v5348_v37, %v5347_v27  ;;  %v5352_v28 = vshll.u32 %v5351_v29, 23  ;;  %v5702_v59 = vsel %vm5701_vm11, %v5700_v61, 0  ;;  %vm12637_vm13 = vcmp.le.f32.partialorder %v5274_v16, 0.7853982  ;;  %v8397_v61 = vld [vmem:[#allocation5 + $0x58] sm:$0xff]  ;;  %8689 = vmatprep.subr.mxu0 %v10072_v60  ;;  %9389 = vmatprep.subr.mxu1 %v10072_v60 }
 0x314   :  { %v12632_v22 = vpop.eup %9915  ;;  %v14728_v33 = vxor.u32 2147483648, %v12628_v52  ;;  %v7103_v58 = vadd.s32 536870912, %v7102_v46  ;;  %v5704_v40 = vand.u32 31, %v5702_v59  ;;  %v7461_v56 = vand.u32 2139095040, %v12615_v5  ;;  %8690 = vmatpush1.msra.mxu0 %v8397_v61  ;;  %9421 = vmatpush1.msra.mxu1 %v8397_v61 }
 0x315   :  { %v14729_v8 = vxor.u32 2147483648, %v12632_v22  ;;  %vm6713_vm1 = vcmp.lt.s32.totalorder %v6712_v9, 2  ;;  %vm6717_vm5 = vcmp.eq.s32.totalorder %v6712_v9, 2  ;;  %v5353_v53 = vor.u32 4788187, %v5352_v28  ;;  %8691 = vmatprep.subr.mxu0 %v10072_v60  ;;  %9390 = vmatprep.subr.mxu1 %v10072_v60 }
 0x316   :  { %vm6714_vm14 = vcmp.eq.s32.totalorder %v6712_v9, 0  ;;  %v6719_v6 = vsel %vm6717_vm5, %v14728_v33, %v12632_v22  ;;  %v12646_v57 = vshrl.u32 %v7103_v58, 30  ;;  %v5705_v16 = vsub.s32 32, %v5704_v40  ;;  %v8389_v33 = vld [vmem:[#allocation5 + $0x18] sm:$0xff] }
 0x317   :  { %v6716_v20 = vsel %vm6714_vm14, %v12628_v52, %v14729_v8  ;;  %v5354_v55 = vand.u32 2147483647, %v5353_v53  ;;  %v5356_v0 = vcvt.s32.f32 %v5349_v21  ;;  %v5361_v4 = vsel %vm5276_vm15, %v5360_v45, %v12549_v31 }
 0x318   :  { %v6720_v39 = vsel %vm6713_vm1, %v6716_v20, %v6719_v6  ;;  %v7105_v12 = vshll.u32 %v12646_v57, 30  ;;  %v5698_v30 = vor.u32 8388608, %v5697_v36  ;;  %v7462_v3 = vshrl.u32 %v7461_v56, 23 }
 0x319   :  { %v6721_v24 = vsel %vm14743_vm10, nan, %v6720_v39  ;;  %v5357_v62 = vmul.f32 %v5356_v0, %v5354_v55  ;;  %v5708_v9 = vshrl.u32 %v14735_v42, %v5705_v16  ;;  %v5711_v25 = vshrl.u32 %v14733_v44, %v5705_v16 }
 0x31a   :  { %8650 = vxpose.xlu0.b32.cont [2/6] (short) (narrow) %v6721_v24, 16  ;;  %v12659_v27 = vsub.s32 %v7102_v46, %v7105_v12  ;;  %v5707_v31 = vshll.u32 %v14749_v38, %v5704_v40  ;;  %v5710_v37 = vshll.u32 %v14735_v42, %v5704_v40  ;;  %v5714_v29 = vshrl.u32 %v14819_v10, %v5705_v16 }
 0x31b   :  { %v5358_v50 = vxor.u32 2147483648, %v5357_v62  ;;  %v5703_v45 = vshrl.u32 %v5702_v59, 5  ;;  %v5713_v21 = vshll.u32 %v14733_v44, %v5704_v40  ;;  %v5716_v28 = vshll.u32 %v14819_v10, %v5704_v40 }
 0x31c   :  { %v7108_v36 = vsub.s32 0, %v12659_v27  ;;  %v5709_v46 = vor.u32 %v5708_v9, %v5707_v31  ;;  %v5712_v58 = vor.u32 %v5711_v25, %v5710_v37  ;;  %v5717_v56 = vshrl.u32 %v14751_v48, %v5705_v16 }
 0x31d   :  { %v5359_v53 = vsel %vm5276_vm15, %v5358_v50, %v5357_v62  ;;  %v12674_v59 = vsel %vm12637_vm13, 0, %v5361_v4  ;;  %v5719_v6 = vshll.u32 %v14751_v48, %v5704_v40  ;;  %v5720_v20 = vshrl.u32 %v14820_v41, %v5705_v16 }
 0x31e   :  { %v5362_v55 = vsel %vm12637_vm13, %v12340_v49, %v5359_v53  ;;  %vm7044_vm7 = vcmp.lt.s32.totalorder %v12442_v17, 0  ;;  %v9333_v0 = vmin.u32 %v7108_v36, %v12659_v27  ;;  %v5715_v39 = vor.u32 %v5714_v29, %v5713_v21 }
 0x31f   :  { %v5718_v12 = vor.u32 %v5717_v56, %v5716_v28  ;;  %9917 = vcosq.f32 %v5362_v55  ;;  %v5721_v4 = vor.u32 %v5720_v20, %v5719_v6  ;;  %v5738_v32 = vshll.u32 %v5698_v30, 8 }
 0x320   :  { %v9348_v40 = vadd.s32 4294967169, %v7462_v3  ;;  %9919 = vsinq.f32 %v5362_v55  ;;  %v7110_v24 = vclz %v9333_v0  ;;  %v7128_v62 = vsub.s32 4, %v12646_v57 }
 0x321   :  { %vm5722_vm0 = vcmp.lt.s32.totalorder %v5703_v45, 1  ;;  %v5706_v9 = vshrl.u32 %v14749_v38, %v5705_v16  ;;  %vm5724_vm4 = vcmp.lt.s32.totalorder %v5703_v45, 3  ;;  %vm5725_vm8 = vcmp.lt.s32.totalorder %v5703_v45, 4 }
 0x322   :  { %v5730_v43 = vsel %vm5722_vm0, %v5709_v46, %v5712_v58  ;;  %v9334_v25 = vadd.s32 4294967294, %v7110_v24  ;;  %v5727_v61 = vsel %vm5725_vm8, %v5715_v39, 2102212464  ;;  %v5731_v31 = vsel %vm5725_vm8, %v5718_v12, 920167782 }
 0x323   :  { %v5734_v37 = vsel %vm5722_vm0, %v5712_v58, %v5715_v39  ;;  %vm5723_vm9 = vcmp.lt.s32.totalorder %v5703_v45, 2  ;;  %v5726_v29 = vsel %vm5722_vm0, %v5706_v9, %v5709_v46  ;;  %v5732_v50 = vsel %vm5724_vm4, %v5715_v39, %v5731_v31 }
 0x324   :  { %v5735_v21 = vsel %vm5725_vm8, %v5721_v4, 1326507024  ;;  %vm9335_vm6 = vcmp.lt.s32.totalorder %v9334_v25, 0  ;;  %v5728_v30 = vsel %vm5724_vm4, %v5712_v58, %v5727_v61  ;;  %v5733_v3 = vsel %vm5723_vm9, %v5730_v43, %v5732_v50 }
 0x325   :  { %v5736_v28 = vsel %vm5724_vm4, %v5718_v12, %v5735_v21  ;;  %v7113_v36 = vsel %vm9335_vm6, 0, %v9334_v25  ;;  %v12689_v16 = vmul.u32.u64.low %v5738_v32, %v5733_v3  ;;  %v12690_v53 = vmul.u32.u64.high %v5738_v32, %v5733_v3, %v12689_v16 }
 0x326   :  { %v5737_v56 = vsel %vm5723_vm9, %v5734_v37, %v5736_v28  ;;  %v6197_v6 = vand.u32 3, %v12674_v59  ;;  %v7098_v20 = vadd.s32 %v12600_v23, %v12605_v19  ;;  %v7114_v46 = vsub.s32 32, %v7113_v36 }
 0x327   :  { %v7118_v55 = vsub.s32 4294967266, %v7113_v36  ;;  %v7129_v58 = vsel %vm7044_vm7, %v7128_v62, %v12646_v57  ;;  %v12699_v0 = vmul.u32.u64.low %v5738_v32, %v5737_v56  ;;  %v12700_v39 = vmul.u32.u64.high %v5738_v32, %v5737_v56, %v12699_v0 }
 0x328   :  { %v7468_v12 = vadd.s32 1, %v9348_v40  ;;  %v7115_v4 = vshll.u32 %v12659_v27, %v7113_v36  ;;  %v7116_v24 = vshrl.u32 %v7098_v20, %v7114_v46  ;;  %v5729_v43 = vsel %vm5723_vm9, %v5726_v29, %v5728_v30 }
 0x329   :  { %v7119_v9 = vadd.s32 127, %v7118_v55  ;;  %vm14742_vm3 = vweird.f32 %v12340_v49  ;;  %vm12707_vm12 = vcmp.le.f32.partialorder %v7042_v34, 0.7853982  ;;  %v5748_v19 = vadd.s32 1, %v12690_v53 }
 0x32a   :  { %v7458_v57 = vand.u32 2147483647, %v12615_v5  ;;  %vm7469_vm15 = vcmp.gt.s32.totalorder %v7468_v12, 0  ;;  %vm6198_vm11 = vcmp.lt.s32.totalorder %v6197_v6, 2  ;;  %v7117_v40 = vor.u32 %v7116_v24, %v7115_v4  ;;  %v8396_v24 = vld [vmem:[#allocation5 + $0x50] sm:$0xff] }
 0x32b   :  { %v7120_v27 = vshll.u32 %v7119_v9, 23  ;;  %v7470_v62 = vsel %vm7469_vm15, %v7468_v12, 0  ;;  %v12715_v45 = vsel %vm12707_vm12, 0, %v7129_v58  ;;  %v5745_v25 = vmul.u32 %v5738_v32, %v5729_v43  ;;  %v8395_v9 = vld [vmem:[#allocation5 + $0x48] sm:$0xff]  ;;  %8692 = vmatpush1.msra.mxu0 %v8396_v24  ;;  %9422 = vmatpush1.msra.mxu1 %v8396_v24  ;;  %v8394_v24 = vld [vmem:[#allocation5 + $0x40] sm:$0xff] }
 0x32c   :  { %vm5747_vm13 = vc.u32 %v12700_v39, %v12689_v16  ;;  %v7472_v34 = vand.u32 31, %v7470_v62  ;;  %v12719_v61 = vpop.eup %9917  ;;  %vm6199_vm1 = vcmp.eq.s32.totalorder %v6197_v6, 0  ;;  %vm6202_vm5 = vcmp.eq.s32.totalorder %v6197_v6, 2  ;;  %8693 = vmatprep.subr.mxu0 %v10072_v60  ;;  %9391 = vmatprep.subr.mxu1 %v10072_v60 }
 0x32d   :  { %14839 = vst [vmem:[#allocation13_spill] sm:$0xff] %v12719_v61  ;;  %v7121_v31 = vor.u32 4788187, %v7120_v27  ;;  %v5749_v37 = vsel %vm5747_vm13, %v5748_v19, %v12690_v53  ;;  %v12722_v29 = vpop.eup %9919  ;;  %v14726_v50 = vxor.u32 2147483648, %v12719_v61  ;;  %v7465_v30 = vand.u32 8388607, %v7458_v57  ;;  %8694 = vmatpush1.msra.mxu0 %v8395_v9  ;;  %9423 = vmatpush1.msra.mxu1 %v8395_v9 }
 0x32e   :  { %14840 = vst [vmem:[#allocation14_spill] sm:$0xff] %v12722_v29  ;;  %v5750_v21 = vadd.s32 %v5749_v37, %v5745_v25  ;;  %v12727_v32 = vsub.s32 32, %v7472_v34  ;;  %v14727_v3 = vxor.u32 2147483648, %v12722_v29  ;;  %v7124_v36 = vcvt.s32.f32 %v7117_v40  ;;  %8695 = vmatprep.subr.mxu0 %v10072_v60  ;;  %9392 = vmatprep.subr.mxu1 %v10072_v60 }
 0x32f   :  { %v7122_v28 = vand.u32 2147483647, %v7121_v31  ;;  %v7135_v56 = vadd.s32 3, %v12715_v45  ;;  %v6204_v53 = vsel %vm6202_vm5, %v14726_v50, %v12722_v29  ;;  %v12734_v46 = vshrl.u32 %v7470_v62, 5  ;;  %8696 = vmatpush1.msra.mxu0 %v8394_v24  ;;  %9424 = vmatpush1.msra.mxu1 %v8394_v24 }
 0x330   :  { %v5751_v20 = vadd.s32 536870912, %v5750_v21  ;;  %v7476_v55 = vshrl.u32 %v14735_v42, %v12727_v32  ;;  %v6201_v58 = vsel %vm6199_vm1, %v12719_v61, %v14727_v3  ;;  %v7475_v12 = vshll.u32 %v14749_v38, %v7472_v34  ;;  %8697 = vmatprep.subr.mxu0 %v10072_v60  ;;  %9393 = vmatprep.subr.mxu1 %v10072_v60 }
 0x331   :  { %v7125_v0 = vmul.f32 %v7124_v36, %v7122_v28  ;;  %v7479_v4 = vshrl.u32 %v14733_v44, %v12727_v32  ;;  %v6205_v43 = vsel %vm6198_vm11, %v6201_v58, %v6204_v53  ;;  %v7478_v40 = vshll.u32 %v14735_v42, %v7472_v34 }
 0x332   :  { %v12746_v19 = vshrl.u32 %v5751_v20, 30  ;;  %v7482_v27 = vshrl.u32 %v14819_v10, %v12727_v32  ;;  %v6206_v62 = vsel %vm14742_vm3, nan, %v6205_v43  ;;  %v7477_v31 = vor.u32 %v7476_v55, %v7475_v12  ;;  %v8393_v43 = vld [vmem:[#allocation5 + $0x38] sm:$0xff] }
 0x333   :  { %v7126_v25 = vxor.u32 2147483648, %v7125_v0  ;;  %v7481_v37 = vshll.u32 %v14733_v44, %v7472_v34  ;;  %8617 = vxpose.xlu1.b32.start [1/6] (short) %v6206_v62, 128  ;;  %v7480_v28 = vor.u32 %v7479_v4, %v7478_v40  ;;  %v7484_v36 = vshll.u32 %v14819_v10, %v7472_v34  ;;  %8698 = vmatpush1.msra.mxu0 %v8393_v43 }
 0x334   :  { %v5753_v6 = vshll.u32 %v12746_v19, 30  ;;  %v7485_v53 = vshrl.u32 %v14751_v48, %v12727_v32  ;;  %v7466_v55 = vor.u32 8388608, %v7465_v30  ;;  %v7487_v58 = vshll.u32 %v14751_v48, %v7472_v34  ;;  %8699 = vmatprep.subr.mxu0 %v10072_v60  ;;  %9425 = vmatpush1.msra.mxu1 %v8393_v43 }
 0x335   :  { %v7127_v20 = vsel %vm7044_vm7, %v7126_v25, %v7125_v0  ;;  %v7488_v12 = vshrl.u32 %v14820_v41, %v12727_v32  ;;  %v7483_v62 = vor.u32 %v7482_v27, %v7481_v37  ;;  %v12771_v30 = vand.u32 3, %v7135_v56  ;;  %v8392_v27 = vld [vmem:[#allocation5 + $0x30] sm:$0xff]  ;;  %v8391_v25 = vld [vmem:[#allocation5 + $0x28] sm:$0xff]  ;;  %9394 = vmatprep.subr.mxu1 %v10072_v60 }
 0x336   :  { %v7130_v4 = vsel %vm12707_vm12, %v12442_v17, %v7127_v20  ;;  %v12769_v40 = vsub.s32 %v5750_v21, %v5753_v6  ;;  %v7486_v50 = vor.u32 %v7485_v53, %v7484_v36  ;;  %vm7490_vm14 = vcmp.lt.s32.totalorder %v12734_v46, 1  ;;  %8700 = vmatpush1.msra.mxu0 %v8392_v27  ;;  %9426 = vmatpush1.msra.mxu1 %v8392_v27 }
 0x337   :  { %9921 = vcosq.f32 %v7130_v4  ;;  %v7489_v34 = vor.u32 %v7488_v12, %v7487_v58  ;;  %vm7493_vm7 = vcmp.lt.s32.totalorder %v12734_v46, 4  ;;  %v7498_v23 = vsel %vm7490_vm14, %v7477_v31, %v7480_v28  ;;  %8701 = vmatprep.subr.mxu0 %v10072_v60  ;;  %9395 = vmatprep.subr.mxu1 %v10072_v60 }
 0x338   :  { %9923 = vsinq.f32 %v7130_v4  ;;  %v5756_v0 = vsub.s32 0, %v12769_v40  ;;  %v7499_v21 = vsel %vm7493_vm7, %v7486_v50, 920167782  ;;  %v12782_v56 = vshll.u32 %v7466_v55, 8  ;;  %8702 = vmatpush1.msra.mxu0 %v8391_v25  ;;  %9427 = vmatpush1.msra.mxu1 %v8391_v25 }
 0x339   :  { %v12785_v9 = vmul.f32 16.0, %v12293_v54  ;;  %v7474_v6 = vshrl.u32 %v14749_v38, %v12727_v32  ;;  %vm7492_vm0 = vcmp.lt.s32.totalorder %v12734_v46, 3  ;;  %v7495_v36 = vsel %vm7493_vm7, %v7483_v62, 2102212464  ;;  %8703 = vmatprep.subr.mxu0 %v10072_v60  ;;  %9396 = vmatprep.subr.mxu1 %v10072_v60 }
 0x33a   :  { %v9281_v37 = vmin.u32 %v5756_v0, %v12769_v40  ;;  %vm7491_vm4 = vcmp.lt.s32.totalorder %v12734_v46, 2  ;;  %v7500_v53 = vsel %vm7492_vm0, %v7483_v62, %v7499_v21  ;;  %v7502_v20 = vsel %vm7490_vm14, %v7480_v28, %v7483_v62 }
 0x33b   :  { %v7503_v55 = vsel %vm7493_vm7, %v7489_v34, 1326507024  ;;  %v7494_v58 = vsel %vm7490_vm14, %v7474_v6, %v7477_v31  ;;  %v7501_v12 = vsel %vm7491_vm4, %v7498_v23, %v7500_v53  ;;  %v7496_v43 = vsel %vm7492_vm0, %v7480_v28, %v7495_v36 }
 0x33c   :  { %v5758_v32 = vclz %v9281_v37  ;;  %v7504_v24 = vsel %vm7492_vm0, %v7486_v50, %v7503_v55  ;;  %v12815_v62 = vmul.u32.u64.low %v12782_v56, %v7501_v12  ;;  %v12816_v34 = vmul.u32.u64.high %v12782_v56, %v7501_v12, %v12815_v62 }
 0x33d   :  { %v7505_v4 = vsel %vm7491_vm4, %v7502_v20, %v7504_v24  ;;  %vm12827_vm8 = vcmp.le.f32.partialorder %v5690_v63, 0.7853982  ;;  %vm5692_vm9 = vcmp.lt.s32.totalorder %v12583_v14, 0  ;;  %v5776_v23 = vsub.s32 4, %v12746_v19 }
 0x33e   :  { %v9282_v31 = vadd.s32 4294967294, %v5758_v32  ;;  %v12822_v50 = vmul.u32.u64.low %v12782_v56, %v7505_v4  ;;  %v12823_v0 = vmul.u32.u64.high %v12782_v56, %v7505_v4, %v12822_v50  ;;  %v6941_v21 = vand.u32 2139095040, %v12785_v9 }
 0x33f   :  { %vm7137_vm6 = vcmp.lt.s32.totalorder %v12771_v30, 2  ;;  %vm7138_vm12 = vcmp.eq.s32.totalorder %v12771_v30, 0  ;;  %v7497_v27 = vsel %vm7491_vm4, %v7494_v58, %v7496_v43  ;;  %vm7134_vm11 = vweird.f32 %v12442_v17 }
 0x340   :  { %vm9283_vm15 = vcmp.lt.s32.totalorder %v9282_v31, 0  ;;  %vm7141_vm13 = vcmp.eq.s32.totalorder %v12771_v30, 2  ;;  %v7516_v25 = vadd.s32 1, %v12816_v34  ;;  %v6942_v37 = vshrl.u32 %v6941_v21, 23 }
 0x341   :  { %v5761_v63 = vsel %vm9283_vm15, 0, %v9282_v31  ;;  %v5746_v6 = vadd.s32 %v12689_v16, %v12700_v39  ;;  %v14732_v20 = vand.u32 2147483647, %v12785_v9  ;;  %v5777_v46 = vsel %vm5692_vm9, %v5776_v23, %v12746_v19 }
 0x342   :  { %v5762_v36 = vsub.s32 32, %v5761_v63  ;;  %v5766_v53 = vsub.s32 4294967266, %v5761_v63  ;;  %v7513_v55 = vmul.u32 %v12782_v56, %v7497_v27  ;;  %vm7515_vm1 = vc.u32 %v12823_v0, %v12815_v62 }
 0x343   :  { %v9328_v32 = vadd.s32 4294967169, %v6942_v37  ;;  %v5763_v12 = vshll.u32 %v12769_v40, %v5761_v63  ;;  %v7517_v39 = vsel %vm7515_vm1, %v7516_v25, %v12816_v34  ;;  %v12859_v56 = vand.u32 3, %v12715_v45 }
 0x344   :  { %v12851_v58 = vpop.eup %9921  ;;  %v5764_v24 = vshrl.u32 %v5746_v6, %v5762_v36  ;;  %v5767_v16 = vadd.s32 127, %v5766_v53  ;;  %v7518_v31 = vadd.s32 %v7517_v39, %v7513_v55  ;;  %v12864_v40 = vsel %vm12827_vm8, 0, %v5777_v46 }
 0x345   :  { %v12855_v43 = vpop.eup %9923  ;;  %v7142_v4 = vxor.u32 2147483648, %v12851_v58  ;;  %v6948_v19 = vadd.s32 1, %v9328_v32  ;;  %14843 = vst [vmem:[#allocation15_spill] sm:$0xff] %v12864_v40  ;;  %v12870_v63 = vmul.f32 16.0, %v12515_v13  ;;  %v6945_v37 = vand.u32 8388607, %v14732_v20 }
 0x346   :  { %v7139_v50 = vxor.u32 2147483648, %v12855_v43  ;;  %v5765_v23 = vor.u32 %v5764_v24, %v5763_v12  ;;  %v5768_v21 = vshll.u32 %v5767_v16, 23  ;;  %v7519_v27 = vadd.s32 536870912, %v7518_v31 }
 0x347   :  { %v7143_v34 = vsel %vm7141_vm13, %v7142_v4, %v12855_v43  ;;  %vm6949_vm5 = vcmp.gt.s32.totalorder %v6948_v19, 0  ;;  %v12882_v53 = vand.u32 3, %v12864_v40  ;;  %vm7966_vm14 = vcmp.eq.s32.totalorder %v12859_v56, 0 }
 0x348   :  { %v7140_v45 = vsel %vm7138_vm12, %v12851_v58, %v7139_v50  ;;  %v5769_v25 = vor.u32 4788187, %v5768_v21  ;;  %v6950_v6 = vsel %vm6949_vm5, %v6948_v19, 0  ;;  %v12884_v46 = vshrl.u32 %v7519_v27, 30 }
 0x349   :  { %v7144_v36 = vsel %vm7137_vm6, %v7140_v45, %v7143_v34  ;;  %v6952_v55 = vand.u32 31, %v6950_v6  ;;  %v5772_v24 = vcvt.s32.f32 %v5765_v23  ;;  %vm7969_vm7 = vcmp.eq.s32.totalorder %v12859_v56, 2 }
 0x34a   :  { %v7145_v32 = vsel %vm7134_vm11, nan, %v7144_v36  ;;  %v5770_v12 = vand.u32 2147483647, %v5769_v25  ;;  %v7521_v16 = vshll.u32 %v12884_v46, 30  ;;  %v14739_v30 = vand.u32 2147483647, %v12870_v63 }
 0x34b   :  { %8651 = vxpose.xlu0.b32.cont [3/6] (short) (narrow) %v7145_v32, 16  ;;  %v6953_v39 = vsub.s32 32, %v6952_v55  ;;  %v12894_v21 = vadd.s32 %v12815_v62, %v12823_v0  ;;  %v6946_v34 = vor.u32 8388608, %v6945_v37  ;;  %v7357_v27 = vand.u32 2139095040, %v12870_v63 }
 0x34c   :  { %v5773_v19 = vmul.f32 %v5772_v24, %v5770_v12  ;;  %v12897_v45 = vsub.s32 %v7518_v31, %v7521_v16  ;;  %v6955_v23 = vshll.u32 %v14749_v38, %v6952_v55  ;;  %v7971_v36 = vsel %vm7969_vm7, %v7142_v4, %v12855_v43  ;;  %v8390_v16 = vld [vmem:[#allocation5 + $0x20] sm:$0xff] }
 0x34d   :  { %v6956_v25 = vshrl.u32 %v14735_v42, %v6953_v39  ;;  %v6958_v3 = vshll.u32 %v14735_v42, %v6952_v55  ;;  %v6959_v12 = vshrl.u32 %v14733_v44, %v6953_v39  ;;  %v6962_v24 = vshrl.u32 %v14819_v10, %v6953_v39  ;;  %8704 = vmatpush1.msra.mxu0 %v8390_v16 }
 0x34e   :  { %v5774_v32 = vxor.u32 2147483648, %v5773_v19  ;;  %v7524_v62 = vsub.s32 0, %v12897_v45  ;;  %v12906_v0 = vshrl.u32 %v6950_v6, 5  ;;  %v6961_v31 = vshll.u32 %v14733_v44, %v6952_v55  ;;  %8705 = vmatprep.subr.mxu0 %v10072_v60  ;;  %9428 = vmatpush1.msra.mxu1 %v8390_v16 }
 0x34f   :  { %v6965_v37 = vshrl.u32 %v14751_v48, %v6953_v39  ;;  %v6957_v8 = vor.u32 %v6956_v25, %v6955_v23  ;;  %v6960_v1 = vor.u32 %v6959_v12, %v6958_v3  ;;  %v6964_v35 = vshll.u32 %v14819_v10, %v6952_v55  ;;  %8706 = vmatpush1.msra.mxu0 %v8389_v33 }
 0x350   :  { %v5775_v4 = vsel %vm5692_vm9, %v5774_v32, %v5773_v19  ;;  %vm7965_vm0 = vcmp.lt.s32.totalorder %v12859_v56, 2  ;;  %v9349_v20 = vmin.u32 %v7524_v62, %v12897_v45  ;;  %v6963_v44 = vor.u32 %v6962_v24, %v6961_v31  ;;  %9397 = vmatprep.subr.mxu1 %v10072_v60  ;;  %8707 = vmatprep.subr.mxu0 %v10072_v60 }
 0x351   :  { %v5778_v6 = vsel %vm12827_vm8, %v12583_v14, %v5775_v4  ;;  %v12918_v42 = vshll.u32 %v6946_v34, 8  ;;  %v6966_v19 = vor.u32 %v6965_v37, %v6964_v35  ;;  %v6967_v3 = vshll.u32 %v14751_v48, %v6952_v55  ;;  %9429 = vmatpush1.msra.mxu1 %v8389_v33 }
 0x352   :  { %9925 = vcosq.f32 %v5778_v6  ;;  %v6968_v23 = vshrl.u32 %v14820_v41, %v6953_v39  ;;  %v7526_v28 = vclz %v9349_v20  ;;  %v7968_v34 = vsel %vm7966_vm14, %v12851_v58, %v7139_v50  ;;  %9398 = vmatprep.subr.mxu1 %v10072_v60 }
 0x353   :  { %9927 = vsinq.f32 %v5778_v6  ;;  %v7358_v25 = vshrl.u32 %v7357_v27, 23  ;;  %v7544_v35 = vsub.s32 4, %v12884_v46  ;;  %v6954_v55 = vshrl.u32 %v14749_v38, %v6953_v39 }
 0x354   :  { %v6969_v32 = vor.u32 %v6968_v23, %v6967_v3  ;;  %vm6970_vm4 = vcmp.lt.s32.totalorder %v12906_v0, 1  ;;  %v9350_v20 = vadd.s32 4294967294, %v7526_v28  ;;  %vm6972_vm8 = vcmp.lt.s32.totalorder %v12906_v0, 3 }
 0x355   :  { %vm6973_vm9 = vcmp.lt.s32.totalorder %v12906_v0, 4  ;;  %v6978_v43 = vsel %vm6970_vm4, %v6957_v8, %v6960_v1  ;;  %v6982_v27 = vsel %vm6970_vm4, %v6960_v1, %v6963_v44  ;;  %vm6971_vm12 = vcmp.lt.s32.totalorder %v12906_v0, 2 }
 0x356   :  { %v6975_v58 = vsel %vm6973_vm9, %v6963_v44, 2102212464  ;;  %v6979_v50 = vsel %vm6973_vm9, %v6966_v19, 920167782  ;;  %v6983_v12 = vsel %vm6973_vm9, %v6969_v32, 1326507024  ;;  %v6974_v62 = vsel %vm6970_vm4, %v6954_v55, %v6957_v8 }
 0x357   :  { %vm9351_vm6 = vcmp.lt.s32.totalorder %v9350_v20, 0  ;;  %v6980_v33 = vsel %vm6972_vm8, %v6963_v44, %v6979_v50  ;;  %v6984_v39 = vsel %vm6972_vm8, %v6966_v19, %v6983_v12  ;;  %v6976_v6 = vsel %vm6972_vm8, %v6960_v1, %v6975_v58 }
 0x358   :  { %v7529_v24 = vsel %vm9351_vm6, 0, %v9350_v20  ;;  %v6981_v31 = vsel %vm6971_vm12, %v6978_v43, %v6980_v33  ;;  %v6985_v37 = vsel %vm6971_vm12, %v6982_v27, %v6984_v39  ;;  %v12949_v3 = vsel %vm7965_vm0, %v7968_v34, %v7971_v36 }
 0x359   :  { %v7530_v16 = vsub.s32 32, %v7529_v24  ;;  %v7534_v4 = vsub.s32 4294967266, %v7529_v24  ;;  %v12952_v44 = vmul.u32.u64.low %v12918_v42, %v6985_v37  ;;  %v12953_v19 = vmul.u32.u64.high %v12918_v42, %v6985_v37, %v12952_v44 }
 0x35a   :  { %v12956_v8 = vmul.u32.u64.low %v12918_v42, %v6981_v31  ;;  %v12957_v23 = vmul.u32.u64.high %v12918_v42, %v6981_v31, %v12956_v8  ;;  %v7531_v28 = vshll.u32 %v12897_v45, %v7529_v24  ;;  %v9344_v20 = vadd.s32 4294967169, %v7358_v25 }
 0x35b   :  { %v7532_v55 = vshrl.u32 %v12894_v21, %v7530_v16  ;;  %v7535_v32 = vadd.s32 127, %v7534_v4  ;;  %vm7460_vm15 = vcmp.lt.s32.totalorder %v12615_v5, 0  ;;  %v6977_v1 = vsel %vm6971_vm12, %v6974_v62, %v6976_v6 }
 0x35c   :  { %v7545_v34 = vsel %vm7460_vm15, %v7544_v35, %v12884_v46  ;;  %v7364_v43 = vadd.s32 1, %v9344_v20  ;;  %vm6614_vm13 = vcmp.eq.s32.totalorder %v12882_v53, 2  ;;  %vm12971_vm1 = vcmp.le.f32.partialorder %v7458_v57, 0.7853982 }
 0x35d   :  { %v7533_v56 = vor.u32 %v7532_v55, %v7531_v28  ;;  %v7536_v36 = vshll.u32 %v7535_v32, 23  ;;  %vm6995_vm5 = vc.u32 %v12953_v19, %v12956_v8  ;;  %v6996_v45 = vadd.s32 1, %v12957_v23 }
 0x35e   :  { %v6993_v58 = vmul.u32 %v12918_v42, %v6977_v1  ;;  %v7361_v46 = vand.u32 8388607, %v14739_v30  ;;  %vm7365_vm14 = vcmp.gt.s32.totalorder %v7364_v43, 0  ;;  %v12988_v50 = vsel %vm12971_vm1, 0, %v7545_v34 }
 0x35f   :  { %v12978_v0 = vpop.eup %9925  ;;  %v7537_v25 = vor.u32 4788187, %v7536_v36  ;;  %v6997_v27 = vsel %vm6995_vm5, %v6996_v45, %v12957_v23  ;;  %v7366_v12 = vsel %vm7365_vm14, %v7364_v43, 0  ;;  %v7540_v24 = vcvt.s32.f32 %v7533_v56 }
 0x360   :  { %14846 = vst [vmem:[#allocation16_spill] sm:$0xff] %v12978_v0  ;;  %v12983_v35 = vpop.eup %9927  ;;  %v14737_v57 = vxor.u32 2147483648, %v12978_v0  ;;  %v6998_v42 = vadd.s32 %v6997_v27, %v6993_v58  ;;  %vm6611_vm7 = vcmp.eq.s32.totalorder %v12882_v53, 0  ;;  %v7368_v31 = vand.u32 31, %v7366_v12 }
 0x361   :  { %14847 = vst [vmem:[#allocation17_spill] sm:$0xff] %v12983_v35  ;;  %v14738_v33 = vxor.u32 2147483648, %v12983_v35  ;;  %v7538_v39 = vand.u32 2147483647, %v7537_v25  ;;  %vm6610_vm0 = vcmp.lt.s32.totalorder %v12882_v53, 2  ;;  %vm14741_vm4 = vweird.f32 %v12583_v14 }
 0x362   :  { %v6616_v62 = vsel %vm6614_vm13, %v14737_v57, %v12983_v35  ;;  %v6999_v4 = vadd.s32 536870912, %v6998_v42  ;;  %v7551_v44 = vadd.s32 3, %v12988_v50  ;;  %v7369_v23 = vsub.s32 32, %v7368_v31 }
 0x363   :  { %v6613_v37 = vsel %vm6611_vm7, %v12978_v0, %v14738_v33  ;;  %v7541_v16 = vmul.f32 %v7540_v24, %v7538_v39  ;;  %v7362_v20 = vor.u32 8388608, %v7361_v46  ;;  %v7371_v53 = vshll.u32 %v14749_v38, %v7368_v31 }
 0x364   :  { %v6617_v6 = vsel %vm6610_vm0, %v6613_v37, %v6616_v62  ;;  %v13006_v32 = vshrl.u32 %v6999_v4, 30  ;;  %v14848_v1 = vmov 2475754826   ;;  %v14849_v36 = vmov 2131351028   ;;  %v8388_v37 = vld [vmem:[#allocation5 + $0x10] sm:$0xff] }
 0x365   :  { %v6618_v28 = vsel %vm14741_vm4, nan, %v6617_v6  ;;  %v7542_v55 = vxor.u32 2147483648, %v7541_v16  ;;  %v7372_v56 = vshrl.u32 %v14848_v1, %v7369_v23  ;;  %v7375_v34 = vshrl.u32 %v14849_v36, %v7369_v23  ;;  %v8387_v4 = vld [vmem:[#allocation5 + $0x8] sm:$0xff]  ;;  %8708 = vmatpush1.msra.mxu0 %v8388_v37  ;;  %9430 = vmatpush1.msra.mxu1 %v8388_v37 }
 0x366   :  { %8618 = vxpose.xlu1.b32.cont [2/6] (short) %v6618_v28, 128  ;;  %v7378_v43 = vshrl.u32 %v14819_v10, %v7369_v23  ;;  %v7001_v25 = vshll.u32 %v13006_v32, 30  ;;  %v13015_v58 = vshrl.u32 %v7366_v12, 5  ;;  %v7377_v27 = vshll.u32 %v14849_v36, %v7368_v31  ;;  %8709 = vmatprep.subr.mxu0 %v10072_v60 }
 0x367   :  { %v7543_v45 = vsel %vm7460_vm15, %v7542_v55, %v7541_v16  ;;  %v7373_v39 = vor.u32 %v7372_v56, %v7371_v53  ;;  %v7374_v24 = vshll.u32 %v14848_v1, %v7368_v31  ;;  %v7380_v62 = vshll.u32 %v14819_v10, %v7368_v31  ;;  %9399 = vmatprep.subr.mxu1 %v10072_v60 }
 0x368   :  { %v7546_v46 = vsel %vm12971_vm1, %v12615_v5, %v7543_v45  ;;  %v13023_v6 = vsub.s32 %v6998_v42, %v7001_v25  ;;  %v7379_v16 = vor.u32 %v7378_v43, %v7377_v27  ;;  %v7381_v12 = vshrl.u32 %v14751_v48, %v7369_v23  ;;  %8710 = vmatpush1.msra.mxu0 %v8387_v4  ;;  %v8417_v25 = vld [vmem:[#allocation5 + $0xf8] sm:$0xff] }
 0x369   :  { %9929 = vcosq.f32 %v7546_v46  ;;  %v7376_v28 = vor.u32 %v7375_v34, %v7374_v24  ;;  %v7383_v21 = vshll.u32 %v14751_v48, %v7368_v31  ;;  %v7384_v55 = vshrl.u32 %v14820_v41, %v7369_v23  ;;  %9431 = vmatpush1.msra.mxu1 %v8387_v4  ;;  %8711 = vmatprep.subr.mxu0 %v10072_v60  ;;  %v8386_v31 = vld [vmem:[#allocation5] sm:$0xff] }
 0x36a   :  { %9931 = vsinq.f32 %v7546_v46  ;;  %v7004_v53 = vsub.s32 0, %v13023_v6  ;;  %v7382_v56 = vor.u32 %v7381_v12, %v7380_v62  ;;  %v386_v42 = vand.u32 2147483647, %v12085_v47  ;;  %9400 = vmatprep.subr.mxu1 %v10072_v60  ;;  %8712 = vmatpush1.msra.mxu0 %v8386_v31 }
 0x36b   :  { %v13032_v43 = vand.u32 3, %v7551_v44  ;;  %v7385_v45 = vor.u32 %v7384_v55, %v7383_v21  ;;  %vm7389_vm8 = vcmp.lt.s32.totalorder %v13015_v58, 4  ;;  %v13035_v34 = vshll.u32 %v7362_v20, 8  ;;  %9432 = vmatpush1.msra.mxu1 %v8386_v31  ;;  %8713 = vmatprep.subr.mxu0 %v10072_v60  ;;  %v8415_v31 = vld [vmem:[#allocation5 + $0xe8] sm:$0xff] }
 0x36c   :  { %v9329_v27 = vmin.u32 %v7004_v53, %v13023_v6  ;;  %v7370_v46 = vshrl.u32 %v14749_v38, %v7369_v23  ;;  %vm7386_vm9 = vcmp.lt.s32.totalorder %v13015_v58, 1  ;;  %v7391_v24 = vsel %vm7389_vm8, %v7379_v16, 2102212464  ;;  %9401 = vmatprep.subr.mxu1 %v10072_v60  ;;  %8714 = vmatpush2.msra.mxu0 %v8417_v25 }
 0x36d   :  { %v7394_v44 = vsel %vm7386_vm9, %v7373_v39, %v7376_v28  ;;  %v7395_v62 = vsel %vm7389_vm8, %v7382_v56, 920167782  ;;  %v7398_v37 = vsel %vm7386_vm9, %v7376_v28, %v7379_v16  ;;  %v7399_v20 = vsel %vm7389_vm8, %v7385_v45, 1326507024  ;;  %9433 = vmatpush2.msra.mxu1 %v8417_v25  ;;  %8715 = vmatprep.subr.mxu0 %v10072_v60  ;;  %v8416_v45 = vld [vmem:[#allocation5 + $0xf0] sm:$0xff] }
 0x36e   :  { %v7006_v4 = vclz %v9329_v27  ;;  %vm7388_vm6 = vcmp.lt.s32.totalorder %v13015_v58, 3  ;;  %v7390_v12 = vsel %vm7386_vm9, %v7370_v46, %v7373_v39  ;;  %v389_v21 = vand.u32 2139095040, %v12085_v47  ;;  %9402 = vmatprep.subr.mxu1 %v10072_v60  ;;  %8716 = vmatpush2.msra.mxu0 %v8416_v45 }
 0x36f   :  { %vm7387_vm12 = vcmp.lt.s32.totalorder %v13015_v58, 2  ;;  %v7392_v23 = vsel %vm7388_vm6, %v7376_v28, %v7391_v24  ;;  %v7396_v55 = vsel %vm7388_vm6, %v7379_v16, %v7395_v62  ;;  %v7400_v53 = vsel %vm7388_vm6, %v7382_v56, %v7399_v20  ;;  %9434 = vmatpush2.msra.mxu1 %v8416_v45  ;;  %8717 = vmatprep.subr.mxu0 %v10072_v60 }
 0x370   :  { %vm6940_vm15 = vcmp.lt.s32.totalorder %v12785_v9, 0  ;;  %v9330_v27 = vadd.s32 4294967294, %v7006_v4  ;;  %v7397_v39 = vsel %vm7387_vm12, %v7394_v44, %v7396_v55  ;;  %v7401_v25 = vsel %vm7387_vm12, %v7398_v37, %v7400_v53  ;;  %9403 = vmatprep.subr.mxu1 %v10072_v60  ;;  %8718 = vmatpush2.msra.mxu0 %v8415_v31 }
 0x371   :  { %v14850_v16 = vand.u32 2147483647, %v12785_v9  ;;  %v13061_v56 = vmul.u32.u64.low %v13035_v34, %v7401_v25  ;;  %v13062_v46 = vmul.u32.u64.high %v13035_v34, %v7401_v25, %v13061_v56  ;;  %vm7550_vm1 = vweird.f32 %v12615_v5  ;;  %9435 = vmatpush2.msra.mxu1 %v8415_v31  ;;  %8719 = vmatprep.subr.mxu0 %v10072_v60 }
 0x372   :  { %v13065_v24 = vmul.u32.u64.low %v13035_v34, %v7397_v39  ;;  %v13066_v62 = vmul.u32.u64.high %v13035_v34, %v7397_v39, %v13065_v24  ;;  %vm7553_vm5 = vcmp.lt.s32.totalorder %v13032_v43, 2  ;;  %vm7554_vm14 = vcmp.eq.s32.totalorder %v13032_v43, 0  ;;  %9404 = vmatprep.subr.mxu1 %v10072_v60 }
 0x373   :  { %vm13056_vm13 = vcmp.le.f32.partialorder %v14850_v16, 0.7853982  ;;  %vm9331_vm7 = vcmp.lt.s32.totalorder %v9330_v27, 0  ;;  %v7393_v44 = vsel %vm7387_vm12, %v7390_v12, %v7392_v23  ;;  %vm7557_vm0 = vcmp.eq.s32.totalorder %v13032_v43, 2 }
 0x374   :  { %v7009_v37 = vsel %vm9331_vm7, 0, %v9330_v27  ;;  %v7024_v20 = vsub.s32 4, %v13006_v32  ;;  %v390_v4 = vshrl.u32 %v389_v21, 23  ;;  %v6994_v55 = vadd.s32 %v12956_v8, %v12953_v19 }
 0x375   :  { %v7010_v53 = vsub.s32 32, %v7009_v37  ;;  %v7014_v45 = vsub.s32 4294967266, %v7009_v37  ;;  %v8376_v58 = vand.u32 3, %v12988_v50  ;;  %v7409_v23 = vmul.u32 %v13035_v34, %v7393_v44 }
 0x376   :  { %v9930_v12 = vpop.eup %9929  ;;  %vm7411_vm8 = vc.u32 %v13062_v46, %v13065_v24  ;;  %v7412_v31 = vadd.s32 1, %v13066_v62  ;;  %v9076_v21 = vadd.s32 4294967169, %v390_v4  ;;  %v7011_v25 = vshll.u32 %v13023_v6, %v7009_v37 }
 0x377   :  { %v9932_v27 = vpop.eup %9931  ;;  %v7558_v39 = vxor.u32 2147483648, %v9930_v12  ;;  %v7012_v16 = vshrl.u32 %v6994_v55, %v7010_v53  ;;  %v7015_v56 = vadd.s32 127, %v7014_v45  ;;  %v7025_v8 = vsel %vm6940_vm15, %v7024_v20, %v13006_v32 }
 0x378   :  { %v7555_v19 = vxor.u32 2147483648, %v9932_v27  ;;  %v7413_v50 = vsel %vm7411_vm8, %v7412_v31, %v13066_v62  ;;  %v396_v34 = vadd.s32 1, %v9076_v21  ;;  %vm8378_vm9 = vcmp.eq.s32.totalorder %v8376_v58, 0 }
 0x379   :  { %v7559_v44 = vsel %vm7557_vm0, %v7558_v39, %v9932_v27  ;;  %v7013_v57 = vor.u32 %v7012_v16, %v7011_v25  ;;  %v7016_v33 = vshll.u32 %v7015_v56, 23  ;;  %v7414_v4 = vadd.s32 %v7413_v50, %v7409_v23 }
 0x37a   :  { %v7556_v30 = vsel %vm7554_vm14, %v9930_v12, %v7555_v19  ;;  %vm8381_vm6 = vcmp.eq.s32.totalorder %v8376_v58, 2  ;;  %vm397_vm12 = vcmp.gt.s32.totalorder %v396_v34, 0  ;;  %v13100_v32 = vsel %vm13056_vm13, 0, %v7025_v8 }
 0x37b   :  { %v7560_v6 = vsel %vm7553_vm5, %v7556_v30, %v7559_v44  ;;  %v7017_v37 = vor.u32 4788187, %v7016_v33  ;;  %v7415_v62 = vadd.s32 536870912, %v7414_v4  ;;  %v8380_v55 = vsel %vm8378_vm9, %v9930_v12, %v7555_v19 }
 0x37c   :  { %v7561_v20 = vsel %vm7550_vm1, nan, %v7560_v6  ;;  %v8383_v53 = vsel %vm8381_vm6, %v7558_v39, %v9932_v27  ;;  %v398_v45 = vsel %vm397_vm12, %v396_v34, 0  ;;  %v7020_v31 = vcvt.s32.f32 %v7013_v57 }
 0x37d   :  { %8652 = vxpose.xlu0.b32.cont [4/6] (short) (narrow) %v7561_v20, 16  ;;  %v7018_v23 = vand.u32 2147483647, %v7017_v37  ;;  %v13104_v21 = vshrl.u32 %v7415_v62, 30  ;;  %v7031_v43 = vadd.s32 3, %v13100_v32  ;;  %vm8377_vm5 = vcmp.lt.s32.totalorder %v8376_v58, 2 }
 0x37e   :  { %v393_v30 = vand.u32 8388607, %v386_v42  ;;  %v400_v33 = vand.u32 31, %v398_v45  ;;  %v8384_v56 = vsel %vm8377_vm5, %v8380_v55, %v8383_v53  ;;  %v7973_v12 = vsel %vm7134_vm11, nan, %v12949_v3 }
 0x37f   :  { %v7021_v25 = vmul.f32 %v7020_v31, %v7018_v23  ;;  %v7417_v16 = vshll.u32 %v13104_v21, 30  ;;  %v13115_v19 = vand.u32 3, %v7031_v43  ;;  %v13119_v58 = vadd.s32 %v13065_v24, %v13062_v46  ;;  %v8414_v43 = vld [vmem:[#allocation5 + $0xe0] sm:$0xff] }
 0x380   :  { %v401_v27 = vsub.s32 32, %v400_v33  ;;  %v8385_v8 = vsel %vm7550_vm1, nan, %v8384_v56  ;;  %v394_v50 = vor.u32 8388608, %v393_v30  ;;  %v13131_v6 = vshrl.u32 %v398_v45, 5  ;;  %v8413_v30 = vld [vmem:[#allocation5 + $0xd8] sm:$0xff]  ;;  %8720 = vmatpush2.msra.mxu0 %v8414_v43  ;;  %9436 = vmatpush2.msra.mxu1 %v8414_v43 }
 0x381   :  { %v7022_v39 = vxor.u32 2147483648, %v7021_v25  ;;  %8653 = vxpose.xlu0.b32.cont [5/6] (short) (narrow) %v7973_v12, 16  ;;  %v13113_v57 = vsub.s32 %v7414_v4, %v7417_v16  ;;  %v403_v46 = vshll.u32 %v14749_v38, %v400_v33  ;;  %v406_v37 = vshll.u32 %v14848_v1, %v400_v33  ;;  %8721 = vmatprep.subr.mxu0 %v10072_v60 }
 0x382   :  { %v404_v3 = vshrl.u32 %v14848_v1, %v401_v27  ;;  %v407_v44 = vshrl.u32 %v14849_v36, %v401_v27  ;;  %v410_v5 = vshrl.u32 %v14819_v10, %v401_v27  ;;  %v409_v62 = vshll.u32 %v14849_v36, %v400_v33  ;;  %8722 = vmatpush2.msra.mxu0 %v8413_v30 }
 0x383   :  { %v7023_v34 = vsel %vm6940_vm15, %v7022_v39, %v7021_v25  ;;  %v7420_v17 = vsub.s32 0, %v13113_v57  ;;  %v412_v20 = vshll.u32 %v14819_v10, %v400_v33  ;;  %v13139_v55 = vshll.u32 %v394_v50, 8  ;;  %9405 = vmatprep.subr.mxu1 %v10072_v60  ;;  %8723 = vmatprep.subr.mxu0 %v10072_v60 }
 0x384   :  { %v7026_v4 = vsel %vm13056_vm13, %v12785_v9, %v7023_v34  ;;  %v805_v28 = vand.u32 2139095040, %v12092_v51  ;;  %v405_v45 = vor.u32 %v404_v3, %v403_v46  ;;  %v408_v23 = vor.u32 %v407_v44, %v406_v37  ;;  %9437 = vmatpush2.msra.mxu1 %v8413_v30 }
 0x385   :  { %9933 = vcosq.f32 %v7026_v4  ;;  %v9345_v24 = vmin.u32 %v7420_v17, %v13113_v57  ;;  %8654 = vxpose.xlu0.b32.end [6/6] (short) (narrow) %v8385_v8, 16  ;;  %v411_v31 = vor.u32 %v410_v5, %v409_v62  ;;  %v7440_v25 = vsub.s32 4, %v13104_v21  ;;  %v9989_v8 = vld [vmem:[#allocation2 + $0x18] sm:$0xff]  ;;  %9406 = vmatprep.subr.mxu1 %v10072_v60 }
 0x386   :  { %9935 = vsinq.f32 %v7026_v4  ;;  %v413_v16 = vshrl.u32 %v14751_v48, %v401_v27  ;;  %v415_v56 = vshll.u32 %v14751_v48, %v400_v33  ;;  %v416_v12 = vshrl.u32 %v14820_v41, %v401_v27  ;;  %v9990_v62 = vld [vmem:[#allocation2 + $0x38] sm:$0xff] }
 0x387   :  { %v7422_v53 = vclz %v9345_v24  ;;  %v402_v50 = vshrl.u32 %v14749_v38, %v401_v27  ;;  %vm418_vm11 = vcmp.lt.s32.totalorder %v13131_v6, 1  ;;  %vm419_vm15 = vcmp.lt.s32.totalorder %v13131_v6, 2 }
 0x388   :  { %v414_v34 = vor.u32 %v413_v16, %v412_v20  ;;  %v417_v17 = vor.u32 %v416_v12, %v415_v56  ;;  %vm420_vm13 = vcmp.lt.s32.totalorder %v13131_v6, 3  ;;  %vm421_vm1 = vcmp.lt.s32.totalorder %v13131_v6, 4 }
 0x389   :  { %v9346_v39 = vadd.s32 4294967294, %v7422_v53  ;;  %8521 = vxpose.xlu0.b32.start [1/16] (narrow) %v9989_v8, 16  ;;  %v423_v33 = vsel %vm421_vm1, %v411_v31, 2102212464  ;;  %v426_v27 = vsel %vm418_vm11, %v405_v45, %v408_v23  ;;  %v806_v3 = vshrl.u32 %v805_v28, 23 }
 0x38a   :  { %v427_v4 = vsel %vm421_vm1, %v414_v34, 920167782  ;;  %v430_v46 = vsel %vm418_vm11, %v408_v23, %v411_v31  ;;  %v431_v5 = vsel %vm421_vm1, %v417_v17, 1326507024  ;;  %v422_v20 = vsel %vm418_vm11, %v402_v50, %v405_v45 }
 0x38b   :  { %vm9347_vm14 = vcmp.lt.s32.totalorder %v9346_v39, 0  ;;  %v428_v28 = vsel %vm420_vm13, %v411_v31, %v427_v4  ;;  %v424_v53 = vsel %vm420_vm13, %v408_v23, %v423_v33  ;;  %v432_v30 = vsel %vm420_vm13, %v414_v34, %v431_v5 }
 0x38c   :  { %v7425_v44 = vsel %vm9347_vm14, 0, %v9346_v39  ;;  %v429_v43 = vsel %vm419_vm15, %v426_v27, %v428_v28  ;;  %v9092_v16 = vadd.s32 4294967169, %v806_v3  ;;  %vm7030_vm7 = vweird.f32 %v12785_v9 }
 0x38d   :  { %v7426_v24 = vsub.s32 32, %v7425_v44  ;;  %v7430_v37 = vsub.s32 4294967266, %v7425_v44  ;;  %8522 = vxpose.xlu0.b32.cont [2/16] (narrow) %v9990_v62, 16  ;;  %v7427_v56 = vshll.u32 %v13113_v57, %v7425_v44  ;;  %v433_v31 = vsel %vm419_vm15, %v430_v46, %v432_v30 }
 0x38e   :  { %v13175_v39 = vmul.u32.u64.low %v13139_v55, %v433_v31  ;;  %v13176_v23 = vmul.u32.u64.high %v13139_v55, %v433_v31, %v13175_v39  ;;  %v13179_v8 = vmul.u32.u64.low %v13139_v55, %v429_v43  ;;  %v13180_v50 = vmul.u32.u64.high %v13139_v55, %v429_v43, %v13179_v8 }
 0x38f   :  { %v7428_v12 = vshrl.u32 %v13119_v58, %v7426_v24  ;;  %v7431_v45 = vadd.s32 127, %v7430_v37  ;;  %v425_v57 = vsel %vm419_vm15, %v422_v20, %v424_v53  ;;  %v812_v33 = vadd.s32 1, %v9092_v16 }
 0x390   :  { %vm7034_vm0 = vcmp.eq.s32.totalorder %v13115_v19, 0  ;;  %vm7037_vm8 = vcmp.eq.s32.totalorder %v13115_v19, 2  ;;  %v14853_v27 = vand.u32 2147483647, %v12870_v63  ;;  %vm7356_vm6 = vcmp.lt.s32.totalorder %v12870_v63, 0 }
 0x391   :  { %v7429_v34 = vor.u32 %v7428_v12, %v7427_v56  ;;  %v7432_v17 = vshll.u32 %v7431_v45, 23  ;;  %v7441_v46 = vsel %vm7356_vm6, %v7440_v25, %v13104_v21  ;;  %vm813_vm12 = vcmp.gt.s32.totalorder %v812_v33, 0 }
 0x392   :  { %v13185_v58 = vpop.eup %9933  ;;  %vm13191_vm9 = vcmp.le.f32.partialorder %v14853_v27, 0.7853982  ;;  %v441_v24 = vmul.u32 %v13139_v55, %v425_v57  ;;  %vm443_vm5 = vc.u32 %v13176_v23, %v13179_v8  ;;  %v444_v37 = vadd.s32 1, %v13180_v50 }
 0x393   :  { %v13196_v44 = vpop.eup %9935  ;;  %v7038_v6 = vxor.u32 2147483648, %v13185_v58  ;;  %v7433_v4 = vor.u32 4788187, %v7432_v17  ;;  %v7436_v28 = vcvt.s32.f32 %v7429_v34  ;;  %v814_v53 = vsel %vm813_vm12, %v812_v33, 0 }
 0x394   :  { %v7035_v5 = vxor.u32 2147483648, %v13196_v44  ;;  %vm7033_vm11 = vcmp.lt.s32.totalorder %v13115_v19, 2  ;;  %v445_v55 = vsel %vm443_vm5, %v444_v37, %v13180_v50  ;;  %v14740_v25 = vand.u32 2147483647, %v12092_v51 }
 0x395   :  { %v7039_v62 = vsel %vm7037_vm8, %v7038_v6, %v13196_v44  ;;  %v7434_v20 = vand.u32 2147483647, %v7433_v4  ;;  %v13220_v16 = vsel %vm13191_vm9, 0, %v7441_v46  ;;  %v446_v56 = vadd.s32 %v445_v55, %v441_v24 }
 0x396   :  { %v7036_v21 = vsel %vm7034_vm0, %v13185_v58, %v7035_v5  ;;  %v816_v45 = vand.u32 31, %v814_v53  ;;  %v13225_v19 = vand.u32 3, %v13100_v32  ;;  %v7447_v50 = vadd.s32 3, %v13220_v16 }
 0x397   :  { %v7040_v43 = vsel %vm7033_vm11, %v7036_v21, %v7039_v62  ;;  %v7437_v30 = vmul.f32 %v7436_v28, %v7434_v20  ;;  %v447_v39 = vadd.s32 536870912, %v446_v56  ;;  %v809_v34 = vand.u32 8388607, %v14740_v25 }
 0x398   :  { %v7041_v12 = vsel %vm7030_vm7, nan, %v7040_v43  ;;  %v13230_v17 = vshrl.u32 %v814_v53, 5  ;;  %v13232_v57 = vsub.s32 32, %v816_v45  ;;  %v819_v4 = vshll.u32 %v14749_v38, %v816_v45  ;;  %v8412_v43 = vld [vmem:[#allocation5 + $0xd0] sm:$0xff] }
 0x399   :  { %8619 = vxpose.xlu1.b32.cont [3/6] (short) %v7041_v12, 128  ;;  %v7438_v31 = vxor.u32 2147483648, %v7437_v30  ;;  %v13236_v27 = vshrl.u32 %v447_v39, 30  ;;  %v822_v32 = vshll.u32 %v14848_v1, %v816_v45  ;;  %v825_v62 = vshll.u32 %v14849_v36, %v816_v45  ;;  %8724 = vmatpush2.msra.mxu0 %v8412_v43 }
 0x39a   :  { %v820_v24 = vshrl.u32 %v14848_v1, %v13232_v57  ;;  %v823_v37 = vshrl.u32 %v14849_v36, %v13232_v57  ;;  %v826_v28 = vshrl.u32 %v14819_v10, %v13232_v57  ;;  %v828_v53 = vshll.u32 %v14819_v10, %v816_v45  ;;  %8725 = vmatprep.subr.mxu0 %v10072_v60 }
 0x39b   :  { %v7439_v33 = vsel %vm7356_vm6, %v7438_v31, %v7437_v30  ;;  %v449_v20 = vshll.u32 %v13236_v27, 30  ;;  %v829_v55 = vshrl.u32 %v14751_v48, %v13232_v57  ;;  %v8411_v30 = vld [vmem:[#allocation5 + $0xc8] sm:$0xff]  ;;  %v831_v39 = vshll.u32 %v14751_v48, %v816_v45  ;;  %9438 = vmatpush2.msra.mxu1 %v8412_v43 }
 0x39c   :  { %v7442_v46 = vsel %vm13191_vm9, %v12870_v63, %v7439_v33  ;;  %v13252_v21 = vor.u32 %v820_v24, %v819_v4  ;;  %v13254_v3 = vor.u32 %v823_v37, %v822_v32  ;;  %v827_v31 = vor.u32 %v826_v28, %v825_v62  ;;  %8726 = vmatpush2.msra.mxu0 %v8411_v30  ;;  %v8410_v24 = vld [vmem:[#allocation5 + $0xc0] sm:$0xff]  ;;  %v8409_v37 = vld [vmem:[#allocation5 + $0xb8] sm:$0xff] }
 0x39d   :  { %9937 = vcosq.f32 %v7442_v46  ;;  %v13258_v12 = vsub.s32 %v446_v56, %v449_v20  ;;  %v832_v33 = vshrl.u32 %v14820_v41, %v13232_v57  ;;  %v810_v25 = vor.u32 8388608, %v809_v34  ;;  %9407 = vmatprep.subr.mxu1 %v10072_v60  ;;  %8727 = vmatprep.subr.mxu0 %v10072_v60 }
 0x39e   :  { %9939 = vsinq.f32 %v7442_v46  ;;  %v830_v46 = vor.u32 %v829_v55, %v828_v53  ;;  %vm7863_vm15 = vcmp.eq.s32.totalorder %v13225_v19, 0  ;;  %vm834_vm13 = vcmp.lt.s32.totalorder %v13230_v17, 1  ;;  %9439 = vmatpush2.msra.mxu1 %v8411_v30  ;;  %8728 = vmatpush2.msra.mxu0 %v8410_v24 }
 0x39f   :  { %v452_v4 = vsub.s32 0, %v13258_v12  ;;  %v833_v32 = vor.u32 %v832_v33, %v831_v39  ;;  %vm837_vm1 = vcmp.lt.s32.totalorder %v13230_v17, 4  ;;  %v13269_v56 = vand.u32 3, %v7447_v50  ;;  %9408 = vmatprep.subr.mxu1 %v10072_v60  ;;  %8729 = vmatprep.subr.mxu0 %v10072_v60 }
 0x3a0   :  { %vm836_vm14 = vcmp.lt.s32.totalorder %v13230_v17, 3  ;;  %v842_v45 = vsel %vm834_vm13, %v13252_v21, %v13254_v3  ;;  %v843_v34 = vsel %vm837_vm1, %v830_v46, 920167782  ;;  %vm7866_vm0 = vcmp.eq.s32.totalorder %v13225_v19, 2  ;;  %9440 = vmatpush2.msra.mxu1 %v8410_v24  ;;  %8730 = vmatpush2.msra.mxu0 %v8409_v37 }
 0x3a1   :  { %vm388_vm8 = vcmp.lt.s32.totalorder %v12085_v47, 0  ;;  %v9077_v50 = vmin.u32 %v452_v4, %v13258_v12  ;;  %vm835_vm9 = vcmp.lt.s32.totalorder %v13230_v17, 2  ;;  %v844_v62 = vsel %vm836_vm14, %v827_v31, %v843_v34  ;;  %9409 = vmatprep.subr.mxu1 %v10072_v60  ;;  %8731 = vmatprep.subr.mxu0 %v10072_v60 }
 0x3a2   :  { %v845_v20 = vsel %vm835_vm9, %v842_v45, %v844_v62  ;;  %v846_v28 = vsel %vm834_vm13, %v13254_v3, %v827_v31  ;;  %v847_v53 = vsel %vm837_vm1, %v833_v32, 1326507024  ;;  %v13293_v55 = vshll.u32 %v810_v25, 8  ;;  %v8407_v45 = vld [vmem:[#allocation5 + $0xa8] sm:$0xff]  ;;  %9441 = vmatpush2.msra.mxu1 %v8409_v37 }
 0x3a3   :  { %v13297_v43 = vand.u32 3, %v13220_v16  ;;  %v454_v30 = vclz %v9077_v50  ;;  %v839_v39 = vsel %vm837_vm1, %v827_v31, 2102212464  ;;  %v13302_v33 = vmul.f32 2.0, %v12085_v47  ;;  %v8408_v31 = vld [vmem:[#allocation5 + $0xb0] sm:$0xff]  ;;  %9410 = vmatprep.subr.mxu1 %v10072_v60 }
 0x3a4   :  { %vm7449_vm6 = vcmp.lt.s32.totalorder %v13269_v56, 2  ;;  %v818_v25 = vshrl.u32 %v14749_v38, %v13232_v57  ;;  %v848_v4 = vsel %vm836_vm14, %v830_v46, %v847_v53  ;;  %vm7446_vm12 = vweird.f32 %v12870_v63  ;;  %8732 = vmatpush2.msra.mxu0 %v8408_v31  ;;  %9442 = vmatpush2.msra.mxu1 %v8408_v31 }
 0x3a5   :  { %v13311_v16 = vmul.u32.u64.low %v13293_v55, %v845_v20  ;;  %v13312_v32 = vmul.u32.u64.high %v13293_v55, %v845_v20, %v13311_v16  ;;  %vm7450_vm5 = vcmp.eq.s32.totalorder %v13269_v56, 0  ;;  %vm7862_vm11 = vcmp.lt.s32.totalorder %v13225_v19, 2  ;;  %8733 = vmatprep.subr.mxu0 %v10072_v60  ;;  %9411 = vmatprep.subr.mxu1 %v10072_v60 }
 0x3a6   :  { %v9078_v57 = vadd.s32 4294967294, %v454_v30  ;;  %v472_v34 = vsub.s32 4, %v13236_v27  ;;  %v849_v46 = vsel %vm835_vm9, %v846_v28, %v848_v4  ;;  %vm13325_vm1 = vcmp.le.f32.partialorder %v386_v42, 0.7853982  ;;  %8734 = vmatpush2.msra.mxu0 %v8407_v45  ;;  %9443 = vmatpush2.msra.mxu1 %v8407_v45 }
 0x3a7   :  { %v838_v37 = vsel %vm834_vm13, %v818_v25, %v13252_v21  ;;  %v840_v50 = vsel %vm836_vm14, %v13254_v3, %v839_v39  ;;  %v13336_v62 = vmul.u32.u64.low %v13293_v55, %v849_v46  ;;  %v13337_v20 = vmul.u32.u64.high %v13293_v55, %v849_v46, %v13336_v62  ;;  %8735 = vmatprep.subr.mxu0 %v10072_v60  ;;  %9412 = vmatprep.subr.mxu1 %v10072_v60 }
 0x3a8   :  { %vm7453_vm4 = vcmp.eq.s32.totalorder %v13269_v56, 2  ;;  %vm8275_vm3 = vcmp.eq.s32.totalorder %v13297_v43, 0  ;;  %v442_v42 = vadd.s32 %v13179_v8, %v13176_v23  ;;  %vm9079_vm10 = vcmp.lt.s32.totalorder %v9078_v57, 0 }
 0x3a9   :  { %v2053_v21 = vand.u32 2139095040, %v13302_v33  ;;  %v7865_v28 = vsel %vm7863_vm15, %v13185_v58, %v7035_v5  ;;  %v7868_v53 = vsel %vm7866_vm0, %v7038_v6, %v13196_v44  ;;  %v457_v23 = vsel %vm9079_vm10, 0, %v9078_v57 }
 0x3aa   :  { %v9938_v3 = vpop.eup %9937  ;;  %v860_v8 = vadd.s32 1, %v13312_v32  ;;  %v458_v25 = vsub.s32 32, %v457_v23  ;;  %v462_v4 = vsub.s32 4294967266, %v457_v23  ;;  %v841_v31 = vsel %vm835_vm9, %v838_v37, %v840_v50 }
 0x3ab   :  { %v9940_v30 = vpop.eup %9939  ;;  %v7454_v39 = vxor.u32 2147483648, %v9938_v3  ;;  %v473_v58 = vsel %vm388_vm8, %v472_v34, %v13236_v27  ;;  %vm859_vm10 = vc.u32 %v13337_v20, %v13311_v16  ;;  %v2054_v44 = vshrl.u32 %v2053_v21, 23 }
 0x3ac   :  { %v7451_v5 = vxor.u32 2147483648, %v9940_v30  ;;  %v459_v45 = vshll.u32 %v13258_v12, %v457_v23  ;;  %v460_v57 = vshrl.u32 %v442_v42, %v458_v25  ;;  %v463_v46 = vadd.s32 127, %v462_v4 }
 0x3ad   :  { %v7455_v6 = vsel %vm7453_vm4, %v7454_v39, %v9940_v30  ;;  %v857_v37 = vmul.u32 %v13293_v55, %v841_v31  ;;  %v861_v50 = vsel %vm859_vm10, %v860_v8, %v13312_v32  ;;  %v9140_v62 = vadd.s32 4294967169, %v2054_v44 }
 0x3ae   :  { %v7452_v17 = vsel %vm7450_vm5, %v9938_v3, %v7451_v5  ;;  %vm8278_vm15 = vcmp.eq.s32.totalorder %v13297_v43, 2  ;;  %v461_v34 = vor.u32 %v460_v57, %v459_v45  ;;  %v464_v21 = vshll.u32 %v463_v46, 23 }
 0x3af   :  { %v7456_v27 = vsel %vm7449_vm6, %v7452_v17, %v7455_v6  ;;  %v7869_v42 = vsel %vm7862_vm11, %v7865_v28, %v7868_v53  ;;  %v862_v23 = vadd.s32 %v861_v50, %v857_v37  ;;  %v14746_v25 = vand.u32 2147483647, %v13302_v33 }
 0x3b0   :  { %v7457_v12 = vsel %vm7446_vm12, nan, %v7456_v27  ;;  %v465_v55 = vor.u32 4788187, %v464_v21  ;;  %v13383_v32 = vsel %vm13325_vm1, 0, %v473_v58  ;;  %v2060_v56 = vadd.s32 1, %v9140_v62  ;;  %v8406_v21 = vld [vmem:[#allocation5 + $0xa0] sm:$0xff] }
 0x3b1   :  { %8620 = vxpose.xlu1.b32.cont [4/6] (short) %v7457_v12, 128  ;;  %v13386_v8 = vmul.f32 2.0, %v12092_v51  ;;  %vm8274_vm4 = vcmp.lt.s32.totalorder %v13297_v43, 2  ;;  %v8277_v4 = vsel %vm8275_vm3, %v9938_v3, %v7451_v5  ;;  %v8280_v19 = vsel %vm8278_vm15, %v7454_v39, %v9940_v30  ;;  %v8405_v12 = vld [vmem:[#allocation5 + $0x98] sm:$0xff]  ;;  %8736 = vmatpush2.msra.mxu0 %v8406_v21 }
 0x3b2   :  { %v863_v28 = vadd.s32 536870912, %v862_v23  ;;  %v7870_v53 = vsel %vm7030_vm7, nan, %v7869_v42  ;;  %v466_v31 = vand.u32 2147483647, %v465_v55  ;;  %v468_v44 = vcvt.s32.f32 %v461_v34  ;;  %9444 = vmatpush2.msra.mxu1 %v8406_v21  ;;  %8737 = vmatprep.subr.mxu0 %v10072_v60 }
 0x3b3   :  { %vm2061_vm13 = vcmp.gt.s32.totalorder %v2060_v56, 0  ;;  %v479_v58 = vadd.s32 3, %v13383_v32  ;;  %v2057_v45 = vand.u32 8388607, %v14746_v25  ;;  %v8281_v46 = vsel %vm8274_vm4, %v8277_v4, %v8280_v19  ;;  %9413 = vmatprep.subr.mxu1 %v10072_v60  ;;  %8738 = vmatpush2.msra.mxu0 %v8405_v12  ;;  %v8404_v25 = vld [vmem:[#allocation5 + $0x90] sm:$0xff] }
 0x3b4   :  { %v13394_v6 = vshrl.u32 %v863_v28, 30  ;;  %v2062_v57 = vsel %vm2061_vm13, %v2060_v56, 0  ;;  %v469_v43 = vmul.f32 %v468_v44, %v466_v31  ;;  %v2469_v30 = vand.u32 2139095040, %v13386_v8  ;;  %9445 = vmatpush2.msra.mxu1 %v8405_v12  ;;  %8739 = vmatprep.subr.mxu0 %v10072_v60 }
 0x3b5   :  { %8621 = vxpose.xlu1.b32.cont [5/6] (short) %v7870_v53, 128  ;;  %v2064_v3 = vand.u32 31, %v2062_v57  ;;  %v8282_v17 = vsel %vm7446_vm12, nan, %v8281_v46  ;;  %v13406_v62 = vand.u32 3, %v479_v58  ;;  %v2058_v27 = vor.u32 8388608, %v2057_v45  ;;  %9414 = vmatprep.subr.mxu1 %v10072_v60 }
 0x3b6   :  { %v865_v9 = vshll.u32 %v13394_v6, 30  ;;  %v470_v39 = vxor.u32 2147483648, %v469_v43  ;;  %v2470_v34 = vshrl.u32 %v2469_v30, 23  ;;  %v13412_v63 = vshrl.u32 %v2062_v57, 5  ;;  %8740 = vmatpush2.msra.mxu0 %v8404_v25  ;;  %9446 = vmatpush2.msra.mxu1 %v8404_v25 }
 0x3b7   :  { %v2065_v5 = vsub.s32 32, %v2064_v3  ;;  %v2067_v56 = vshll.u32 %v14749_v38, %v2064_v3  ;;  %v2070_v28 = vshll.u32 %v14848_v1, %v2064_v3  ;;  %v2073_v53 = vshll.u32 %v14849_v36, %v2064_v3  ;;  %8741 = vmatprep.subr.mxu0 %v10072_v60  ;;  %9415 = vmatprep.subr.mxu1 %v10072_v60 }
 0x3b8   :  { %v13402_v37 = vsub.s32 %v862_v23, %v865_v9  ;;  %v471_v50 = vsel %vm388_vm8, %v470_v39, %v469_v43  ;;  %v858_v31 = vadd.s32 %v13311_v16, %v13337_v20  ;;  %v888_v44 = vsub.s32 4, %v13394_v6 }
 0x3b9   :  { %8622 = vxpose.xlu1.b32.end [6/6] (short) %v8282_v17, 128  ;;  %v474_v42 = vsel %vm13325_vm1, %v12085_v47, %v471_v50  ;;  %v2068_v23 = vshrl.u32 %v14848_v1, %v2065_v5  ;;  %v2071_v4 = vshrl.u32 %v14849_v36, %v2065_v5  ;;  %v2074_v19 = vshrl.u32 %v14819_v10, %v2065_v5 }
 0x3ba   :  { %v868_v55 = vsub.s32 0, %v13402_v37  ;;  %9941 = vcosq.f32 %v474_v42  ;;  %v13426_v58 = vshll.u32 %v2058_v27, 8  ;;  %v14744_v45 = vand.u32 2147483647, %v13386_v8 }
 0x3bb   :  { %9943 = vsinq.f32 %v474_v42  ;;  %v2069_v46 = vor.u32 %v2068_v23, %v2067_v56  ;;  %v2072_v43 = vor.u32 %v2071_v4, %v2070_v28  ;;  %v2075_v30 = vor.u32 %v2074_v19, %v2073_v53 }
 0x3bc   :  { %v9093_v24 = vmin.u32 %v868_v55, %v13402_v37  ;;  %v2076_v9 = vshll.u32 %v14819_v10, %v2064_v3  ;;  %v2077_v39 = vshrl.u32 %v14751_v48, %v2065_v5  ;;  %v2079_v16 = vshll.u32 %v14751_v48, %v2064_v3 }
 0x3bd   :  { %v2080_v20 = vshrl.u32 %v14820_v41, %v2065_v5  ;;  %v2066_v50 = vshrl.u32 %v14749_v38, %v2065_v5  ;;  %vm2082_vm3 = vcmp.lt.s32.totalorder %v13412_v63, 1  ;;  %v9156_v27 = vadd.s32 4294967169, %v2470_v34 }
 0x3be   :  { %v870_v57 = vclz %v9093_v24  ;;  %v2078_v21 = vor.u32 %v2077_v39, %v2076_v9  ;;  %vm2083_vm7 = vcmp.lt.s32.totalorder %v13412_v63, 2  ;;  %vm2085_vm14 = vcmp.lt.s32.totalorder %v13412_v63, 4 }
 0x3bf   :  { %v2081_v12 = vor.u32 %v2080_v20, %v2079_v16  ;;  %vm2084_vm8 = vcmp.lt.s32.totalorder %v13412_v63, 3  ;;  %v2087_v42 = vsel %vm2085_vm14, %v2075_v30, 2102212464  ;;  %v2090_v3 = vsel %vm2082_vm3, %v2069_v46, %v2072_v43 }
 0x3c0   :  { %v9094_v17 = vadd.s32 4294967294, %v870_v57  ;;  %v2091_v23 = vsel %vm2085_vm14, %v2078_v21, 920167782  ;;  %v2094_v5 = vsel %vm2082_vm3, %v2072_v43, %v2075_v30  ;;  %v2086_v19 = vsel %vm2082_vm3, %v2066_v50, %v2069_v46 }
 0x3c1   :  { %v2095_v56 = vsel %vm2085_vm14, %v2081_v12, 1326507024  ;;  %v2092_v24 = vsel %vm2084_vm8, %v2075_v30, %v2091_v23  ;;  %vm478_vm9 = vweird.f32 %v12085_v47  ;;  %v2088_v28 = vsel %vm2084_vm8, %v2072_v43, %v2087_v42 }
 0x3c2   :  { %vm9095_vm0 = vcmp.lt.s32.totalorder %v9094_v17, 0  ;;  %v2093_v53 = vsel %vm2083_vm7, %v2090_v3, %v2092_v24  ;;  %v2096_v57 = vsel %vm2084_vm8, %v2078_v21, %v2095_v56  ;;  %v2476_v9 = vadd.s32 1, %v9156_v27 }
 0x3c3   :  { %v873_v55 = vsel %vm9095_vm0, 0, %v9094_v17  ;;  %v14858_v39 = vand.u32 2147483647, %v12092_v51  ;;  %v2097_v46 = vsel %vm2083_vm7, %v2094_v5, %v2096_v57  ;;  %vm804_vm12 = vcmp.lt.s32.totalorder %v12092_v51, 0 }
 0x3c4   :  { %v874_v34 = vsub.s32 32, %v873_v55  ;;  %v878_v4 = vsub.s32 4294967266, %v873_v55  ;;  %v875_v20 = vshll.u32 %v13402_v37, %v873_v55  ;;  %vm2477_vm5 = vcmp.gt.s32.totalorder %v2476_v9, 0 }
 0x3c5   :  { %vm13451_vm6 = vcmp.le.f32.partialorder %v14858_v39, 0.7853982  ;;  %v13459_v43 = vmul.u32.u64.low %v13426_v58, %v2097_v46  ;;  %v13460_v30 = vmul.u32.u64.high %v13426_v58, %v2097_v46, %v13459_v43  ;;  %vm481_vm11 = vcmp.lt.s32.totalorder %v13406_v62, 2 }
 0x3c6   :  { %v876_v17 = vshrl.u32 %v858_v31, %v874_v34  ;;  %v879_v12 = vadd.s32 127, %v878_v4  ;;  %v13463_v50 = vmul.u32.u64.low %v13426_v58, %v2093_v53  ;;  %v13464_v27 = vmul.u32.u64.high %v13426_v58, %v2093_v53, %v13463_v50 }
 0x3c7   :  { %v13467_v21 = vpop.eup %9941  ;;  %vm485_vm1 = vcmp.eq.s32.totalorder %v13406_v62, 2  ;;  %v13477_v55 = vand.u32 8388607, %v14744_v45  ;;  %v2089_v56 = vsel %vm2083_vm7, %v2086_v19, %v2088_v28  ;;  %v2478_v34 = vsel %vm2477_vm5, %v2476_v9, 0 }
 0x3c8   :  { %v877_v42 = vor.u32 %v876_v17, %v875_v20  ;;  %v880_v37 = vshll.u32 %v879_v12, 23  ;;  %v13470_v31 = vpop.eup %9943  ;;  %v14747_v3 = vxor.u32 2147483648, %v13467_v21  ;;  %vm482_vm10 = vcmp.eq.s32.totalorder %v13406_v62, 0 }
 0x3c9   :  { %v14745_v23 = vxor.u32 2147483648, %v13470_v31  ;;  %v889_v24 = vsel %vm804_vm12, %v888_v44, %v13394_v6  ;;  %vm2107_vm15 = vc.u32 %v13460_v30, %v13463_v50  ;;  %v2108_v53 = vadd.s32 1, %v13464_v27 }
 0x3ca   :  { %v881_v5 = vor.u32 4788187, %v880_v37  ;;  %v487_v4 = vsel %vm485_vm1, %v14747_v3, %v13470_v31  ;;  %v884_v28 = vcvt.s32.f32 %v877_v42  ;;  %v2105_v9 = vmul.u32 %v13426_v58, %v2089_v56  ;;  %v8403_v3 = vld [vmem:[#allocation5 + $0x88] sm:$0xff] }
 0x3cb   :  { %v484_v63 = vsel %vm482_vm10, %v13467_v21, %v14745_v23  ;;  %v2480_v39 = vand.u32 31, %v2478_v34  ;;  %v13501_v20 = vmul.f32 4.0, %v12085_v47  ;;  %v2109_v17 = vsel %vm2107_vm15, %v2108_v53, %v13464_v27  ;;  %8742 = vmatpush2.msra.mxu0 %v8403_v3  ;;  %9447 = vmatpush2.msra.mxu1 %v8403_v3 }
 0x3cc   :  { %v882_v19 = vand.u32 2147483647, %v881_v5  ;;  %v488_v57 = vsel %vm481_vm11, %v484_v63, %v487_v4  ;;  %v2474_v12 = vor.u32 8388608, %v13477_v55  ;;  %v891_v46 = vsel %vm13451_vm6, 0, %v889_v24  ;;  %8743 = vmatprep.subr.mxu0 %v10072_v60  ;;  %9416 = vmatprep.subr.mxu1 %v10072_v60 }
 0x3cd   :  { %v489_v6 = vsel %vm478_vm9, nan, %v488_v57  ;;  %v2110_v62 = vadd.s32 %v2109_v17, %v2105_v9  ;;  %v13509_v43 = vshrl.u32 %v2478_v34, 5  ;;  %v2481_v58 = vsub.s32 32, %v2480_v39 }
 0x3ce   :  { %v885_v44 = vmul.f32 %v884_v28, %v882_v19  ;;  %8523 = vxpose.xlu0.b32.cont [3/16] (narrow) %v489_v6, 16  ;;  %v2483_v37 = vshll.u32 %v14749_v38, %v2480_v39  ;;  %v2486_v5 = vshll.u32 %v14848_v1, %v2480_v39  ;;  %v2489_v56 = vshll.u32 %v14849_v36, %v2480_v39 }
 0x3cf   :  { %v2111_v4 = vadd.s32 536870912, %v2110_v62  ;;  %v2484_v27 = vshrl.u32 %v14848_v1, %v2481_v58  ;;  %v2487_v55 = vshrl.u32 %v14849_v36, %v2481_v58  ;;  %v2492_v63 = vshll.u32 %v14819_v10, %v2480_v39 }
 0x3d0   :  { %v886_v42 = vxor.u32 2147483648, %v885_v44  ;;  %v2490_v34 = vshrl.u32 %v14819_v10, %v2481_v58  ;;  %v2493_v19 = vshrl.u32 %v14751_v48, %v2481_v58  ;;  %v2496_v28 = vshrl.u32 %v14820_v41, %v2481_v58 }
 0x3d1   :  { %v13525_v57 = vshrl.u32 %v2111_v4, 30  ;;  %v2485_v9 = vor.u32 %v2484_v27, %v2483_v37  ;;  %v2488_v6 = vor.u32 %v2487_v55, %v2486_v5  ;;  %v2495_v23 = vshll.u32 %v14751_v48, %v2480_v39 }
 0x3d2   :  { %v887_v24 = vsel %vm804_vm12, %v886_v42, %v885_v44  ;;  %v2491_v17 = vor.u32 %v2490_v34, %v2489_v56  ;;  %v2494_v45 = vor.u32 %v2493_v19, %v2492_v63  ;;  %v895_v44 = vadd.s32 3, %v891_v46 }
 0x3d3   :  { %v890_v53 = vsel %vm13451_vm6, %v12092_v51, %v887_v24  ;;  %v2113_v42 = vshll.u32 %v13525_v57, 30  ;;  %vm2498_vm4 = vcmp.lt.s32.totalorder %v13509_v43, 1  ;;  %v13531_v16 = vand.u32 3, %v13383_v32  ;;  %v8402_v24 = vld [vmem:[#allocation5 + $0x80] sm:$0xff] }
 0x3d4   :  { %9945 = vcosq.f32 %v890_v53  ;;  %v2497_v4 = vor.u32 %v2496_v28, %v2495_v23  ;;  %vm2501_vm13 = vcmp.lt.s32.totalorder %v13509_v43, 4  ;;  %v2506_v37 = vsel %vm2498_vm4, %v2485_v9, %v2488_v6  ;;  %8744 = vmatpush2.msra.mxu0 %v8402_v24  ;;  %9448 = vmatpush2.msra.mxu1 %v8402_v24 }
 0x3d5   :  { %9947 = vsinq.f32 %v890_v53  ;;  %v13536_v39 = vsub.s32 %v2110_v62, %v2113_v42  ;;  %vm2500_vm3 = vcmp.lt.s32.totalorder %v13509_v43, 3  ;;  %v2507_v5 = vsel %vm2501_vm13, %v2494_v45, 920167782 }
 0x3d6   :  { %v14748_v56 = vand.u32 2147483647, %v13501_v20  ;;  %vm2499_vm7 = vcmp.lt.s32.totalorder %v13509_v43, 2  ;;  %v2508_v32 = vsel %vm2500_vm3, %v2491_v17, %v2507_v5  ;;  %v13547_v23 = vshll.u32 %v2474_v12, 8 }
 0x3d7   :  { %v3717_v25 = vand.u32 2139095040, %v13501_v20  ;;  %v13550_v62 = vand.u32 3, %v895_v44  ;;  %v2116_v27 = vsub.s32 0, %v13536_v39  ;;  %v2509_v55 = vsel %vm2499_vm7, %v2506_v37, %v2508_v32 }
 0x3d8   :  { %v2510_v63 = vsel %vm2498_vm4, %v2488_v6, %v2491_v17  ;;  %v2503_v12 = vsel %vm2501_vm13, %v2491_v17, 2102212464  ;;  %v2511_v3 = vsel %vm2501_vm13, %v2497_v4, 1326507024  ;;  %v13568_v28 = vand.u32 3, %v891_v46  ;;  %v13585_v4 = vpop.trf.xlu1 }
 0x3d9   :  { %v13564_v34 = vmul.u32.u64.low %v13547_v23, %v2509_v55  ;;  %v13565_v19 = vmul.u32.u64.high %v13547_v23, %v2509_v55, %v13564_v34  ;;  %v9141_v53 = vmin.u32 %v2116_v27, %v13536_v39  ;;  %v2482_v44 = vshrl.u32 %v14749_v38, %v2481_v58 }
 0x3da   :  { %v2512_v60 = vsel %vm2500_vm3, %v2494_v45, %v2511_v3  ;;  %vm1310_vm14 = vcmp.eq.s32.totalorder %v13531_v16, 0  ;;  %vm1313_vm0 = vcmp.eq.s32.totalorder %v13531_v16, 2  ;;  %v3718_v42 = vshrl.u32 %v3717_v25, 23 }
 0x3db   :  { %v2513_v17 = vsel %vm2499_vm7, %v2510_v63, %v2512_v60  ;;  %vm897_vm8 = vcmp.lt.s32.totalorder %v13550_v62, 2  ;;  %vm898_vm6 = vcmp.eq.s32.totalorder %v13550_v62, 0  ;;  %vm2052_vm12 = vcmp.lt.s32.totalorder %v13302_v33, 0 }
 0x3dc   :  { %v2118_v46 = vclz %v9141_v53  ;;  %v2502_v58 = vsel %vm2498_vm4, %v2482_v44, %v2485_v9  ;;  %v2504_v45 = vsel %vm2500_vm3, %v2488_v6, %v2503_v12  ;;  %vm894_vm5 = vweird.f32 %v12092_v51  ;;  %v13616_v53 = vpop.trf.xlu0 }
 0x3dd   :  { %vm901_vm11 = vcmp.eq.s32.totalorder %v13550_v62, 2  ;;  %vm1309_vm1 = vcmp.lt.s32.totalorder %v13531_v16, 2  ;;  %v13591_v37 = vmul.u32.u64.low %v13547_v23, %v2513_v17  ;;  %v13592_v5 = vmul.u32.u64.high %v13547_v23, %v2513_v17, %v13591_v37 }
 0x3de   :  { %v13596_v32 = vand.u32 8388607, %v14748_v56  ;;  %v14861_v9 = vxor.u32 2147483648, %v13467_v21  ;;  %vm1722_vm10 = vcmp.eq.s32.totalorder %v13568_v28, 0  ;;  %vm1725_vm15 = vcmp.eq.s32.totalorder %v13568_v28, 2 }
 0x3df   :  { %v2106_v25 = vadd.s32 %v13463_v50, %v13460_v30  ;;  %v9142_v27 = vadd.s32 4294967294, %v2118_v46  ;;  %v9204_v55 = vadd.s32 4294967169, %v3718_v42  ;;  %v14862_v63 = vand.u32 2147483647, %v13302_v33  ;;  %v9991_v46 = vld [vmem:[#allocation2 + $0x10] sm:$0xff] }
 0x3e0   :  { %v1315_v6 = vsel %vm1313_vm0, %v14861_v9, %v13470_v31  ;;  %v2505_v12 = vsel %vm2499_vm7, %v2502_v58, %v2504_v45  ;;  %v2524_v3 = vadd.s32 1, %v13565_v19  ;;  %v2136_v42 = vsub.s32 4, %v13525_v57 }
 0x3e1   :  { %vm13609_vm4 = vcmp.le.f32.partialorder %v14862_v63, 0.7853982  ;;  %v9946_v44 = vpop.eup %9945  ;;  %vm9143_vm13 = vcmp.lt.s32.totalorder %v9142_v27, 0  ;;  %v3724_v60 = vadd.s32 1, %v9204_v55  ;;  %vm2523_vm3 = vc.u32 %v13592_v5, %v13564_v34 }
 0x3e2   :  { %v9948_v17 = vpop.eup %9947  ;;  %v902_v30 = vxor.u32 2147483648, %v9946_v44  ;;  %v2121_v50 = vsel %vm9143_vm13, 0, %v9142_v27  ;;  %8489 = vxpose.xlu1.b32.start [1/16] %v9991_v46, 128  ;;  %v14865_v43 = vxor.u32 2147483648, %v13470_v31  ;;  %v2521_v27 = vmul.u32 %v13547_v23, %v2505_v12  ;;  %v9992_v23 = vld [vmem:[#allocation2 + $0x30] sm:$0xff] }
 0x3e3   :  { %v899_v37 = vxor.u32 2147483648, %v9948_v17  ;;  %v2122_v45 = vsub.s32 32, %v2121_v50  ;;  %v2126_v9 = vsub.s32 4294967266, %v2121_v50  ;;  %v2525_v63 = vsel %vm2523_vm3, %v2524_v3, %v13565_v19 }
 0x3e4   :  { %v1312_v58 = vsel %vm1310_vm14, %v13467_v21, %v14865_v43  ;;  %v903_v55 = vsel %vm901_vm11, %v902_v30, %v9948_v17  ;;  %vm3725_vm7 = vcmp.gt.s32.totalorder %v3724_v60, 0  ;;  %v2123_v56 = vshll.u32 %v13536_v39, %v2121_v50 }
 0x3e5   :  { %v900_v46 = vsel %vm898_vm6, %v9946_v44, %v899_v37  ;;  %v2124_v31 = vshrl.u32 %v2106_v25, %v2122_v45  ;;  %v2127_v38 = vadd.s32 127, %v2126_v9  ;;  %v2137_v43 = vsel %vm2052_vm12, %v2136_v42, %v13525_v57 }
 0x3e6   :  { %v904_v21 = vsel %vm897_vm8, %v900_v46, %v903_v55  ;;  %v2526_v48 = vadd.s32 %v2525_v63, %v2521_v27  ;;  %v3726_v14 = vsel %vm3725_vm7, %v3724_v60, 0  ;;  %8490 = vxpose.xlu1.b32.cont [2/16] %v9992_v23, 128  ;;  %v1316_v12 = vsel %vm1309_vm1, %v1312_v58, %v1315_v6 }
 0x3e7   :  { %v905_v19 = vsel %vm894_vm5, nan, %v904_v21  ;;  %v2125_v39 = vor.u32 %v2124_v31, %v2123_v56  ;;  %v2128_v25 = vshll.u32 %v2127_v38, 23  ;;  %v1724_v62 = vsel %vm1722_vm10, %v9946_v44, %v899_v37 }
 0x3e8   :  { %8524 = vxpose.xlu0.b32.cont [4/16] (narrow) %v905_v19, 16  ;;  %v1727_v3 = vsel %vm1725_vm15, %v902_v30, %v9948_v17  ;;  %v2527_v57 = vadd.s32 536870912, %v2526_v48  ;;  %v3728_v50 = vand.u32 31, %v3726_v14  ;;  %v13648_v42 = vsel %vm13609_vm4, 0, %v2137_v43 }
 0x3e9   :  { %v2129_v60 = vor.u32 4788187, %v2128_v25  ;;  %vm1721_vm14 = vcmp.lt.s32.totalorder %v13568_v28, 2  ;;  %v1317_v38 = vsel %vm478_vm9, nan, %v1316_v12  ;;  %v2132_v37 = vcvt.s32.f32 %v2125_v39 }
 0x3ea   :  { %v13651_v16 = vshrl.u32 %v2527_v57, 30  ;;  %v3729_v56 = vsub.s32 32, %v3728_v50  ;;  %v1728_v6 = vsel %vm1721_vm14, %v1724_v62, %v1727_v3  ;;  %v2143_v17 = vadd.s32 3, %v13648_v42 }
 0x3eb   :  { %v2130_v44 = vand.u32 2147483647, %v2129_v60  ;;  %v3722_v58 = vor.u32 8388608, %v13596_v32  ;;  %v13661_v55 = vmul.f32 4.0, %v12092_v51  ;;  %v1729_v47 = vsel %vm894_vm5, nan, %v1728_v6 }
 0x3ec   :  { %8525 = vxpose.xlu0.b32.cont [5/16] (narrow) %v1317_v38, 16  ;;  %v2529_v30 = vshll.u32 %v13651_v16, 30  ;;  %v3732_v9 = vshrl.u32 %v14848_v1, %v3729_v56  ;;  %v3735_v28 = vshrl.u32 %v14849_v36, %v3729_v56  ;;  %v3738_v63 = vshrl.u32 %v14819_v10, %v3729_v56 }
 0x3ed   :  { %v2133_v45 = vmul.f32 %v2132_v37, %v2130_v44  ;;  %v14866_v46 = vmov 920167782   ;;  %v14867_v43 = vmov 683565275   ;;  %v3734_v23 = vshll.u32 %v14848_v1, %v3728_v50 }
 0x3ee   :  { %v13665_v27 = vsub.s32 %v2526_v48, %v2529_v30  ;;  %v3741_v31 = vshrl.u32 %v14866_v46, %v3729_v56  ;;  %v3731_v32 = vshll.u32 %v14867_v43, %v3728_v50  ;;  %v3744_v19 = vshrl.u32 %v14820_v41, %v3729_v56 }
 0x3ef   :  { %v2134_v21 = vxor.u32 2147483648, %v2133_v45  ;;  %v3727_v39 = vshrl.u32 %v3726_v14, 5  ;;  %v3737_v51 = vshll.u32 %v14849_v36, %v3728_v50  ;;  %v3740_v48 = vshll.u32 %v14819_v10, %v3728_v50 }
 0x3f0   :  { %8526 = vxpose.xlu0.b32.cont [6/16] (narrow) %v1729_v47, 16  ;;  %v2532_v12 = vsub.s32 0, %v13665_v27  ;;  %v3733_v62 = vor.u32 %v3732_v9, %v3731_v32  ;;  %v3736_v3 = vor.u32 %v3735_v28, %v3734_v23  ;;  %v3743_v57 = vshll.u32 %v14866_v46, %v3728_v50 }
 0x3f1   :  { %v2135_v25 = vsel %vm2052_vm12, %v2134_v21, %v2133_v45  ;;  %v3739_v6 = vor.u32 %v3738_v63, %v3737_v51  ;;  %v3742_v44 = vor.u32 %v3741_v31, %v3740_v48  ;;  %v13682_v14 = vand.u32 3, %v2143_v17 }
 0x3f2   :  { %v2138_v60 = vsel %vm13609_vm4, %v13302_v33, %v2135_v25  ;;  %v9157_v38 = vmin.u32 %v2532_v12, %v13665_v27  ;;  %v3745_v37 = vor.u32 %v3744_v19, %v3743_v57  ;;  %v3762_v30 = vshll.u32 %v3722_v58, 8 }
 0x3f3   :  { %9949 = vcosq.f32 %v2138_v60  ;;  %vm3746_vm9 = vcmp.lt.s32.totalorder %v3727_v39, 1  ;;  %v4133_v45 = vand.u32 2139095040, %v13661_v55  ;;  %v3730_v50 = vshrl.u32 %v14867_v43, %v3729_v56 }
 0x3f4   :  { %9951 = vsinq.f32 %v2138_v60  ;;  %v2534_v47 = vclz %v9157_v38  ;;  %vm3748_vm0 = vcmp.lt.s32.totalorder %v3727_v39, 3  ;;  %vm3749_vm8 = vcmp.lt.s32.totalorder %v3727_v39, 4  ;;  %v13696_v38 = vpop.trf.xlu1 }
 0x3f5   :  { %v3754_v24 = vsel %vm3746_vm9, %v3733_v62, %v3736_v3  ;;  %v3751_v28 = vsel %vm3749_vm8, %v3739_v6, 2102212464  ;;  %v3755_v21 = vsel %vm3749_vm8, %v3742_v44, 920167782  ;;  %v3758_v63 = vsel %vm3746_vm9, %v3736_v3, %v3739_v6 }
 0x3f6   :  { %v9158_v9 = vadd.s32 4294967294, %v2534_v47  ;;  %vm2468_vm6 = vcmp.lt.s32.totalorder %v13386_v8, 0  ;;  %vm3747_vm12 = vcmp.lt.s32.totalorder %v3727_v39, 2  ;;  %v3750_v17 = vsel %vm3746_vm9, %v3730_v50, %v3733_v62 }
 0x3f7   :  { %v3756_v31 = vsel %vm3748_vm0, %v3739_v6, %v3755_v21  ;;  %v3759_v58 = vsel %vm3749_vm8, %v3745_v37, 1326507024  ;;  %v3752_v32 = vsel %vm3748_vm0, %v3736_v3, %v3751_v28  ;;  %v2522_v25 = vadd.s32 %v13564_v34, %v13592_v5 }
 0x3f8   :  { %vm9159_vm5 = vcmp.lt.s32.totalorder %v9158_v9, 0  ;;  %v3757_v23 = vsel %vm3747_vm12, %v3754_v24, %v3756_v31  ;;  %v3760_v19 = vsel %vm3748_vm0, %v3742_v44, %v3759_v58  ;;  %v2552_v62 = vsub.s32 4, %v13651_v16  ;;  %v13716_v58 = vpop.trf.xlu0 }
 0x3f9   :  { %v2537_v12 = vsel %vm9159_vm5, 0, %v9158_v9  ;;  %v3761_v56 = vsel %vm3747_vm12, %v3758_v63, %v3760_v19  ;;  %v13689_v51 = vmul.u32.u64.low %v3762_v30, %v3757_v23  ;;  %v13690_v48 = vmul.u32.u64.high %v3762_v30, %v3757_v23, %v13689_v51 }
 0x3fa   :  { %v2538_v57 = vsub.s32 32, %v2537_v12  ;;  %v2542_v60 = vsub.s32 4294967266, %v2537_v12  ;;  %v14868_v3 = vand.u32 2147483647, %v13386_v8  ;;  %v3753_v44 = vsel %vm3747_vm12, %v3750_v17, %v3752_v32 }
 0x3fb   :  { %v13705_v37 = vmul.u32.u64.low %v3762_v30, %v3761_v56  ;;  %v13706_v47 = vmul.u32.u64.high %v3762_v30, %v3761_v56, %v13705_v37  ;;  %v4134_v50 = vshrl.u32 %v4133_v45, 23  ;;  %v2539_v34 = vshll.u32 %v13665_v27, %v2537_v12 }
 0x3fc   :  { %vm13700_vm11 = vcmp.le.f32.partialorder %v14868_v3, 0.7853982  ;;  %v2540_v5 = vshrl.u32 %v2522_v25, %v2538_v57  ;;  %v2543_v24 = vadd.s32 127, %v2542_v60  ;;  %v9641_v9 = vunpack.i.h.bf16 %v13585_v4 }
 0x3fd   :  { %vm2149_vm1 = vcmp.eq.s32.totalorder %v13682_v14, 2  ;;  %v3772_v28 = vadd.s32 1, %v13690_v48  ;;  %v9220_v21 = vadd.s32 4294967169, %v4134_v50  ;;  %v9753_v39 = vunpack.i.h.bf16 %v13616_v53 }
 0x3fe   :  { %v2541_v63 = vor.u32 %v2540_v5, %v2539_v34  ;;  %v2544_v31 = vshll.u32 %v2543_v24, 23  ;;  %8745 = vmatprep.mubr.f32.mxu0 %v9641_v9  ;;  %v3769_v17 = vmul.u32 %v3762_v30, %v3753_v44  ;;  %vm3771_vm10 = vc.u32 %v13706_v47, %v13689_v51 }
 0x3ff   :  { %v14754_v27 = vand.u32 2147483647, %v13661_v55  ;;  %v4140_v45 = vadd.s32 1, %v9220_v21  ;;  %v2553_v19 = vsel %vm2468_vm6, %v2552_v62, %v13651_v16  ;;  %v3773_v12 = vsel %vm3771_vm10, %v3772_v28, %v13690_v48  ;;  %8746 = vmatmul.mubr.f32.vlgmr.msra.gmra.mxu0 %v9753_v39 }
 0x400   :  { %v13718_v32 = vpop.eup %9949  ;;  %v2545_v23 = vor.u32 4788187, %v2544_v31  ;;  %v3774_v25 = vadd.s32 %v3773_v12, %v3769_v17  ;;  %v2548_v3 = vcvt.s32.f32 %v2541_v63  ;;  %vm2145_vm4 = vcmp.lt.s32.totalorder %v13682_v14, 2 }
 0x401   :  { %v13724_v56 = vpop.eup %9951  ;;  %v2150_v30 = vxor.u32 2147483648, %v13718_v32  ;;  %vm4141_vm15 = vcmp.gt.s32.totalorder %v4140_v45, 0  ;;  %vm2146_vm13 = vcmp.eq.s32.totalorder %v13682_v14, 0  ;;  %v2555_v50 = vsel %vm13700_vm11, 0, %v2553_v19 }
 0x402   :  { %v2147_v57 = vxor.u32 2147483648, %v13724_v56  ;;  %v2546_v60 = vand.u32 2147483647, %v2545_v23  ;;  %v4142_v44 = vsel %vm4141_vm15, %v4140_v45, 0  ;;  %v3775_v48 = vadd.s32 536870912, %v3774_v25 }
 0x403   :  { %v2151_v16 = vsel %vm2149_vm1, %v2150_v30, %v13724_v56  ;;  %v4144_v34 = vand.u32 31, %v4142_v44  ;;  %vm2142_vm3 = vweird.f32 %v13302_v33  ;;  %v4137_v9 = vand.u32 8388607, %v14754_v27 }
 0x404   :  { %v2148_v62 = vsel %vm2146_vm13, %v13718_v32, %v2147_v57  ;;  %v2549_v37 = vmul.f32 %v2548_v3, %v2546_v60  ;;  %v13741_v24 = vshrl.u32 %v3775_v48, 30  ;;  %v2559_v63 = vadd.s32 3, %v2555_v50 }
 0x405   :  { %v2152_v5 = vsel %vm2145_vm4, %v2148_v62, %v2151_v16  ;;  %v4145_v21 = vsub.s32 32, %v4144_v34  ;;  %v13748_v31 = vand.u32 3, %v13648_v42  ;;  %v4147_v45 = vshll.u32 %v14867_v43, %v4144_v34 }
 0x406   :  { %v2153_v14 = vsel %vm2142_vm3, nan, %v2152_v5  ;;  %v2550_v28 = vxor.u32 2147483648, %v2549_v37  ;;  %v3777_v39 = vshll.u32 %v13741_v24, 30  ;;  %v4138_v3 = vor.u32 8388608, %v4137_v9 }
 0x407   :  { %8527 = vxpose.xlu0.b32.cont [7/16] (narrow) %v2153_v14, 16  ;;  %v4148_v23 = vshrl.u32 %v14848_v1, %v4145_v21  ;;  %v4151_v19 = vshrl.u32 %v14849_v36, %v4145_v21  ;;  %v4150_v42 = vshll.u32 %v14848_v1, %v4144_v34  ;;  %v13762_v16 = vshrl.u32 %v4142_v44, 5 }
 0x408   :  { %v2551_v17 = vsel %vm2468_vm6, %v2550_v28, %v2549_v37  ;;  %v13759_v60 = vsub.s32 %v3774_v25, %v3777_v39  ;;  %v4153_v62 = vshll.u32 %v14849_v36, %v4144_v34  ;;  %v4154_v14 = vshrl.u32 %v14819_v10, %v4145_v21 }
 0x409   :  { %v2554_v12 = vsel %vm13700_vm11, %v13386_v8, %v2551_v17  ;;  %v4149_v48 = vor.u32 %v4148_v23, %v4147_v45  ;;  %v4152_v5 = vor.u32 %v4151_v19, %v4150_v42  ;;  %v4156_v6 = vshll.u32 %v14819_v10, %v4144_v34 }
 0x40a   :  { %9953 = vcosq.f32 %v2554_v12  ;;  %v3780_v37 = vsub.s32 0, %v13759_v60  ;;  %v4157_v25 = vshrl.u32 %v14866_v46, %v4145_v21  ;;  %v4159_v9 = vshll.u32 %v14866_v46, %v4144_v34 }
 0x40b   :  { %9955 = vsinq.f32 %v2554_v12  ;;  %v4160_v28 = vshrl.u32 %v14820_v41, %v4145_v21  ;;  %vm2974_vm7 = vcmp.eq.s32.totalorder %v13748_v31, 0  ;;  %v4155_v39 = vor.u32 %v4154_v14, %v4153_v62 }
 0x40c   :  { %v9205_v44 = vmin.u32 %v3780_v37, %v13759_v60  ;;  %v13773_v17 = vand.u32 3, %v2559_v63  ;;  %vm2977_vm14 = vcmp.eq.s32.totalorder %v13748_v31, 2  ;;  %v4158_v45 = vor.u32 %v4157_v25, %v4156_v6 }
 0x40d   :  { %v4161_v23 = vor.u32 %v4160_v28, %v4159_v9  ;;  %v13776_v19 = vand.u32 3, %v2555_v50  ;;  %vm4162_vm9 = vcmp.lt.s32.totalorder %v13762_v16, 1  ;;  %vm4165_vm0 = vcmp.lt.s32.totalorder %v13762_v16, 4 }
 0x40e   :  { %v3782_v12 = vclz %v9205_v44  ;;  %vm4164_vm8 = vcmp.lt.s32.totalorder %v13762_v16, 3  ;;  %v4170_v34 = vsel %vm4162_vm9, %v4149_v48, %v4152_v5  ;;  %v4171_v42 = vsel %vm4165_vm0, %v4158_v45, 920167782 }
 0x40f   :  { %v13783_v62 = vshll.u32 %v4138_v3, 8  ;;  %vm2973_vm6 = vcmp.lt.s32.totalorder %v13748_v31, 2  ;;  %vm4163_vm12 = vcmp.lt.s32.totalorder %v13762_v16, 2  ;;  %v4172_v50 = vsel %vm4164_vm8, %v4155_v39, %v4171_v42 }
 0x410   :  { %v9206_v63 = vadd.s32 4294967294, %v3782_v12  ;;  %v4174_v37 = vsel %vm4162_vm9, %v4152_v5, %v4155_v39  ;;  %vm2562_vm5 = vcmp.eq.s32.totalorder %v13773_v17, 0  ;;  %vm3716_vm11 = vcmp.lt.s32.totalorder %v13501_v20, 0 }
 0x411   :  { %v4146_v14 = vshrl.u32 %v14867_v43, %v4145_v21  ;;  %v4167_v6 = vsel %vm4165_vm0, %v4155_v39, 2102212464  ;;  %v4173_v3 = vsel %vm4163_vm12, %v4170_v34, %v4172_v50  ;;  %v4175_v25 = vsel %vm4165_vm0, %v4161_v23, 1326507024 }
 0x412   :  { %vm2561_vm1 = vcmp.lt.s32.totalorder %v13773_v17, 2  ;;  %vm3389_vm10 = vcmp.eq.s32.totalorder %v13776_v19, 2  ;;  %vm9207_vm15 = vcmp.lt.s32.totalorder %v9206_v63, 0  ;;  %v4176_v9 = vsel %vm4164_vm8, %v4158_v45, %v4175_v25 }
 0x413   :  { %v13801_v28 = vmul.u32.u64.low %v13783_v62, %v4173_v3  ;;  %v13802_v44 = vmul.u32.u64.high %v13783_v62, %v4173_v3, %v13801_v28  ;;  %vm2558_vm4 = vweird.f32 %v13386_v8  ;;  %vm2565_vm13 = vcmp.eq.s32.totalorder %v13773_v17, 2 }
 0x414   :  { %v3770_v21 = vadd.s32 %v13689_v51, %v13706_v47  ;;  %v3785_v39 = vsel %vm9207_vm15, 0, %v9206_v63  ;;  %v4177_v23 = vsel %vm4163_vm12, %v4174_v37, %v4176_v9  ;;  %vm3386_vm0 = vcmp.eq.s32.totalorder %v13776_v19, 0 }
 0x415   :  { %v3786_v12 = vsub.s32 32, %v3785_v39  ;;  %v3790_v45 = vsub.s32 4294967266, %v3785_v39  ;;  %v4166_v34 = vsel %vm4162_vm9, %v4146_v14, %v4149_v48  ;;  %v4168_v42 = vsel %vm4164_vm8, %v4152_v5, %v4167_v6 }
 0x416   :  { %v2976_v51 = vsel %vm2974_vm7, %v13718_v32, %v2147_v57  ;;  %v2979_v47 = vsel %vm2977_vm14, %v2150_v30, %v13724_v56  ;;  %v13827_v63 = vmul.u32.u64.low %v13783_v62, %v4177_v23  ;;  %v13828_v50 = vmul.u32.u64.high %v13783_v62, %v4177_v23, %v13827_v63 }
 0x417   :  { %v9954_v48 = vpop.eup %9953  ;;  %v14871_v37 = vand.u32 2147483647, %v13501_v20  ;;  %v3787_v14 = vshll.u32 %v13759_v60, %v3785_v39  ;;  %v3788_v57 = vshrl.u32 %v3770_v21, %v3786_v12  ;;  %v3791_v6 = vadd.s32 127, %v3790_v45 }
 0x418   :  { %v3800_v32 = vsub.s32 4, %v13741_v24  ;;  %v9956_v3 = vpop.eup %9955  ;;  %v2566_v25 = vxor.u32 2147483648, %v9954_v48  ;;  %v4169_v56 = vsel %vm4163_vm12, %v4166_v34, %v4168_v42  ;;  %v4188_v30 = vadd.s32 1, %v13802_v44  ;;  %v13856_v42 = vpop.trf.xlu1 }
 0x419   :  { %vm13832_vm9 = vcmp.le.f32.partialorder %v14871_v37, 0.7853982  ;;  %v285_v9 = vand.u32 2139095040, %v12293_v54  ;;  %v2563_v23 = vxor.u32 2147483648, %v9956_v3  ;;  %v3789_v63 = vor.u32 %v3788_v57, %v3787_v14 }
 0x41a   :  { %v3792_v37 = vshll.u32 %v3791_v6, 23  ;;  %v9646_v27 = vunpack.i.h.bf16 %v13696_v38  ;;  %v2567_v60 = vsel %vm2565_vm13, %v2566_v25, %v9956_v3  ;;  %v2980_v21 = vsel %vm2973_vm6, %v2976_v51, %v2979_v47 }
 0x41b   :  { %vm4187_vm7 = vc.u32 %v13828_v50, %v13801_v28  ;;  %v14756_v16 = vand.u32 2147483647, %v12293_v54  ;;  %v2564_v39 = vsel %vm2562_vm5, %v9954_v48, %v2563_v23  ;;  %v3801_v45 = vsel %vm3716_vm11, %v3800_v32, %v13741_v24  ;;  %v13867_v32 = vpop.trf.xlu0 }
 0x41c   :  { %v3793_v12 = vor.u32 4788187, %v3792_v37  ;;  %v4185_v34 = vmul.u32 %v13783_v62, %v4169_v56  ;;  %8750 = vmatprep.mubr.f32.mxu0 %v9646_v27  ;;  %v2568_v31 = vsel %vm2561_vm1, %v2564_v39, %v2567_v60  ;;  %v3391_v51 = vsel %vm3389_vm10, %v2566_v25, %v9956_v3 }
 0x41d   :  { %v4189_v47 = vsel %vm4187_vm7, %v4188_v30, %v13802_v44  ;;  %v286_v14 = vshrl.u32 %v285_v9, 23  ;;  %v2569_v57 = vsel %vm2558_vm4, nan, %v2568_v31  ;;  %v3796_v37 = vcvt.s32.f32 %v3789_v63 }
 0x41e   :  { %v3794_v6 = vand.u32 2147483647, %v3793_v12  ;;  %v4190_v24 = vadd.s32 %v4189_v47, %v4185_v34  ;;  %8528 = vxpose.xlu0.b32.cont [8/16] (narrow) %v2569_v57, 16  ;;  %v3388_v27 = vsel %vm3386_vm0, %v9954_v48, %v2563_v23  ;;  %v9758_v3 = vunpack.i.h.bf16 %v13716_v58 }
 0x41f   :  { %v9072_v62 = vadd.s32 4294967169, %v286_v14  ;;  %v13872_v44 = vsel %vm13832_vm9, 0, %v3801_v45  ;;  %v2981_v30 = vsel %vm2142_vm3, nan, %v2980_v21  ;;  %vm3385_vm14 = vcmp.lt.s32.totalorder %v13776_v19, 2 }
 0x420   :  { %v3797_v17 = vmul.f32 %v3796_v37, %v3794_v6  ;;  %v4191_v56 = vadd.s32 536870912, %v4190_v24  ;;  %8751 = vmatmul.mubr.f32.gmra.mxu0 %v9758_v3  ;;  %v3392_v48 = vsel %vm3385_vm14, %v3388_v27, %v3391_v51  ;;  %v289_v23 = vand.u32 8388607, %v14756_v16 }
 0x421   :  { %v292_v25 = vadd.s32 1, %v9072_v62  ;;  %v3807_v39 = vadd.s32 3, %v13872_v44  ;;  %v3393_v45 = vsel %vm2558_vm4, nan, %v3392_v48  ;;  %v4186_v14 = vadd.s32 %v13801_v28, %v13828_v50 }
 0x422   :  { %v3798_v9 = vxor.u32 2147483648, %v3797_v17  ;;  %v13877_v63 = vshrl.u32 %v4191_v56, 30  ;;  %8529 = vxpose.xlu0.b32.cont [9/16] (narrow) %v2981_v30, 16  ;;  %v290_v31 = vor.u32 8388608, %v289_v23  ;;  %v701_v23 = vand.u32 2139095040, %v12515_v13 }
 0x423   :  { %vm293_vm8 = vcmp.gt.s32.totalorder %v292_v25, 0  ;;  %v13892_v47 = vand.u32 3, %v3807_v39  ;;  %vm4132_vm12 = vcmp.lt.s32.totalorder %v13661_v55, 0  ;;  %vm3806_vm13 = vweird.f32 %v13501_v20 }
 0x424   :  { %v3799_v60 = vsel %vm3716_vm11, %v3798_v9, %v3797_v17  ;;  %v4193_v33 = vshll.u32 %v13877_v63, 30  ;;  %v294_v21 = vsel %vm293_vm8, %v292_v25, 0  ;;  %v13906_v25 = vshll.u32 %v290_v31, 8 }
 0x425   :  { %v3802_v19 = vsel %vm13832_vm9, %v13501_v20, %v3799_v60  ;;  %v296_v12 = vand.u32 31, %v294_v21  ;;  %v295_v62 = vshrl.u32 %v294_v21, 5  ;;  %v4216_v9 = vsub.s32 4, %v13877_v63 }
 0x426   :  { %9957 = vcosq.f32 %v3802_v19  ;;  %v13890_v34 = vsub.s32 %v4190_v24, %v4193_v33  ;;  %8530 = vxpose.xlu0.b32.cont [10/16] (narrow) %v3393_v45, 16  ;;  %vm3813_vm3 = vcmp.eq.s32.totalorder %v13892_v47, 2  ;;  %vm3810_vm6 = vcmp.eq.s32.totalorder %v13892_v47, 0 }
 0x427   :  { %9959 = vsinq.f32 %v3802_v19  ;;  %v297_v51 = vsub.s32 32, %v296_v12  ;;  %v299_v5 = vshll.u32 %v14867_v43, %v296_v12  ;;  %v302_v8 = vshll.u32 %v14848_v1, %v296_v12 }
 0x428   :  { %v4196_v57 = vsub.s32 0, %v13890_v34  ;;  %v305_v17 = vshll.u32 %v14849_v36, %v296_v12  ;;  %v308_v3 = vshll.u32 %v14819_v10, %v296_v12  ;;  %v311_v33 = vshll.u32 %v14866_v46, %v296_v12 }
 0x429   :  { %v300_v6 = vshrl.u32 %v14848_v1, %v297_v51  ;;  %v303_v37 = vshrl.u32 %v14849_v36, %v297_v51  ;;  %v306_v24 = vshrl.u32 %v14819_v10, %v297_v51  ;;  %v309_v56 = vshrl.u32 %v14866_v46, %v297_v51 }
 0x42a   :  { %v9221_v27 = vmin.u32 %v4196_v57, %v13890_v34  ;;  %v298_v60 = vshrl.u32 %v14867_v43, %v297_v51  ;;  %v312_v21 = vshrl.u32 %v14820_v41, %v297_v51  ;;  %vm314_vm5 = vcmp.lt.s32.totalorder %v295_v62, 1 }
 0x42b   :  { %v301_v28 = vor.u32 %v300_v6, %v299_v5  ;;  %v304_v50 = vor.u32 %v303_v37, %v302_v8  ;;  %v307_v48 = vor.u32 %v306_v24, %v305_v17  ;;  %v310_v39 = vor.u32 %v309_v56, %v308_v3 }
 0x42c   :  { %v4198_v30 = vclz %v9221_v27  ;;  %vm315_vm11 = vcmp.lt.s32.totalorder %v295_v62, 2  ;;  %vm317_vm1 = vcmp.lt.s32.totalorder %v295_v62, 4  ;;  %vm3809_vm10 = vcmp.lt.s32.totalorder %v13892_v47, 2 }
 0x42d   :  { %v313_v45 = vor.u32 %v312_v21, %v311_v33  ;;  %vm316_vm15 = vcmp.lt.s32.totalorder %v295_v62, 3  ;;  %v322_v31 = vsel %vm314_vm5, %v301_v28, %v304_v50  ;;  %v323_v57 = vsel %vm317_vm1, %v310_v39, 920167782 }
 0x42e   :  { %v9222_v19 = vadd.s32 4294967294, %v4198_v30  ;;  %v319_v5 = vsel %vm317_vm1, %v307_v48, 2102212464  ;;  %v324_v12 = vsel %vm316_vm15, %v307_v48, %v323_v57  ;;  %v326_v51 = vsel %vm314_vm5, %v304_v50, %v307_v48 }
 0x42f   :  { %v325_v8 = vsel %vm315_vm11, %v322_v31, %v324_v12  ;;  %v327_v37 = vsel %vm317_vm1, %v313_v45, 1326507024  ;;  %v702_v24 = vshrl.u32 %v701_v23, 23  ;;  %v318_v56 = vsel %vm314_vm5, %v298_v60, %v301_v28 }
 0x430   :  { %vm9223_vm4 = vcmp.lt.s32.totalorder %v9222_v19, 0  ;;  %v328_v3 = vsel %vm316_vm15, %v310_v39, %v327_v37  ;;  %v320_v33 = vsel %vm316_vm15, %v304_v50, %v319_v5  ;;  %v14755_v50 = vand.u32 2147483647, %v12515_v13 }
 0x431   :  { %v4201_v6 = vsel %vm9223_vm4, 0, %v9222_v19  ;;  %v329_v21 = vsel %vm315_vm11, %v326_v51, %v328_v3  ;;  %v13928_v57 = vmul.u32.u64.low %v13906_v25, %v325_v8  ;;  %v13929_v48 = vmul.u32.u64.high %v13906_v25, %v325_v8, %v13928_v57 }
 0x432   :  { %v4202_v27 = vsub.s32 32, %v4201_v6  ;;  %v4206_v17 = vsub.s32 4294967266, %v4201_v6  ;;  %v4203_v45 = vshll.u32 %v13890_v34, %v4201_v6  ;;  %v321_v37 = vsel %vm315_vm11, %v318_v56, %v320_v33 }
 0x433   :  { %v13923_v30 = vpop.eup %9957  ;;  %v13935_v39 = vmul.u32.u64.low %v13906_v25, %v329_v21  ;;  %v13936_v12 = vmul.u32.u64.high %v13906_v25, %v329_v21, %v13935_v39  ;;  %v340_v6 = vadd.s32 1, %v13929_v48  ;;  %v14874_v56 = vand.u32 2147483647, %v13661_v55 }
 0x434   :  { %v9960_v19 = vpop.eup %9959  ;;  %v3814_v23 = vxor.u32 2147483648, %v13923_v30  ;;  %v4204_v31 = vshrl.u32 %v4186_v14, %v4202_v27  ;;  %v4207_v28 = vadd.s32 127, %v4206_v17  ;;  %v4217_v14 = vsel %vm4132_vm12, %v4216_v9, %v13877_v63  ;;  %v13963_v9 = vpop.trf.xlu1 }
 0x435   :  { %v3811_v60 = vxor.u32 2147483648, %v9960_v19  ;;  %v9088_v27 = vadd.s32 4294967169, %v702_v24  ;;  %vm13956_vm0 = vcmp.le.f32.partialorder %v14874_v56, 0.7853982  ;;  %v337_v63 = vmul.u32 %v13906_v25, %v321_v37 }
 0x436   :  { %v3815_v5 = vsel %vm3813_vm3, %v3814_v23, %v9960_v19  ;;  %v4205_v51 = vor.u32 %v4204_v31, %v4203_v45  ;;  %v4208_v8 = vshll.u32 %v4207_v28, 23  ;;  %vm339_vm9 = vc.u32 %v13936_v12, %v13928_v57 }
 0x437   :  { %v3812_v34 = vsel %vm3810_vm6, %v13923_v30, %v3811_v60  ;;  %v4219_v21 = vsel %vm13956_vm0, 0, %v4217_v14  ;;  %v341_v45 = vsel %vm339_vm9, %v340_v6, %v13929_v48  ;;  %v4636_v31 = vand.u32 3, %v13872_v44  ;;  %v13975_v14 = vpop.trf.xlu0 }
 0x438   :  { %v3816_v17 = vsel %vm3809_vm10, %v3812_v34, %v3815_v5  ;;  %v4209_v3 = vor.u32 4788187, %v4208_v8  ;;  %v4212_v24 = vcvt.s32.f32 %v4205_v51  ;;  %v342_v28 = vadd.s32 %v341_v45, %v337_v63 }
 0x439   :  { %v3817_v62 = vsel %vm3806_vm13, nan, %v3816_v17  ;;  %v705_v39 = vand.u32 8388607, %v14755_v50  ;;  %v708_v25 = vadd.s32 1, %v9088_v27  ;;  %v9651_v8 = vunpack.i.h.bf16 %v13856_v42 }
 0x43a   :  { %8531 = vxpose.xlu0.b32.cont [11/16] (narrow) %v3817_v62, 16  ;;  %v4210_v47 = vand.u32 2147483647, %v4209_v3  ;;  %v4223_v37 = vadd.s32 3, %v4219_v21  ;;  %v343_v34 = vadd.s32 536870912, %v342_v28  ;;  %v5471_v51 = vadd.s32 3, %v12446_v15 }
 0x43b   :  { %vm709_vm7 = vcmp.gt.s32.totalorder %v708_v25, 0  ;;  %8755 = vmatprep.mubr.f32.mxu0 %v9651_v8  ;;  %vm4638_vm14 = vcmp.eq.s32.totalorder %v4636_v31, 0  ;;  %vm4641_vm8 = vcmp.eq.s32.totalorder %v4636_v31, 2  ;;  %v706_v27 = vor.u32 8388608, %v705_v39 }
 0x43c   :  { %v4213_v5 = vmul.f32 %v4212_v24, %v4210_v47  ;;  %v710_v3 = vsel %vm709_vm7, %v708_v25, 0  ;;  %v13973_v48 = vshrl.u32 %v343_v34, 30  ;;  %v9763_v62 = vunpack.i.h.bf16 %v13867_v32 }
 0x43d   :  { %v712_v44 = vand.u32 31, %v710_v3  ;;  %v13983_v56 = vand.u32 3, %v4223_v37  ;;  %v4640_v24 = vsel %vm4638_vm14, %v13923_v30, %v3811_v60  ;;  %v4643_v45 = vsel %vm4641_vm8, %v3814_v23, %v9960_v19 }
 0x43e   :  { %v4214_v17 = vxor.u32 2147483648, %v4213_v5  ;;  %v345_v63 = vshll.u32 %v13973_v48, 30  ;;  %v13987_v25 = vand.u32 3, %v4219_v21  ;;  %8756 = vmatmul.mubr.f32.gmra.mxu0 %v9763_v62  ;;  %v711_v19 = vshrl.u32 %v710_v3, 5 }
 0x43f   :  { %v713_v47 = vsub.s32 32, %v712_v44  ;;  %v718_v33 = vshll.u32 %v14848_v1, %v712_v44  ;;  %v721_v34 = vshll.u32 %v14849_v36, %v712_v44  ;;  %v724_v23 = vshll.u32 %v14819_v10, %v712_v44 }
 0x440   :  { %v4215_v6 = vsel %vm4132_vm12, %v4214_v17, %v4213_v5  ;;  %v13989_v39 = vsub.s32 %v342_v28, %v345_v63  ;;  %v715_v5 = vshll.u32 %v14867_v43, %v712_v44  ;;  %vm4637_vm3 = vcmp.lt.s32.totalorder %v4636_v31, 2 }
 0x441   :  { %v4218_v15 = vsel %vm13956_vm0, %v13661_v55, %v4215_v6  ;;  %v716_v8 = vshrl.u32 %v14848_v1, %v713_v47  ;;  %v719_v37 = vshrl.u32 %v14849_v36, %v713_v47  ;;  %v722_v17 = vshrl.u32 %v14819_v10, %v713_v47 }
 0x442   :  { %9961 = vcosq.f32 %v4218_v15  ;;  %v348_v30 = vsub.s32 0, %v13989_v39  ;;  %v725_v60 = vshrl.u32 %v14866_v46, %v713_v47  ;;  %v728_v63 = vshrl.u32 %v14820_v41, %v713_v47 }
 0x443   :  { %9963 = vsinq.f32 %v4218_v15  ;;  %v717_v21 = vor.u32 %v716_v8, %v715_v5  ;;  %v720_v28 = vor.u32 %v719_v37, %v718_v33  ;;  %v723_v6 = vor.u32 %v722_v17, %v721_v34 }
 0x444   :  { %v9073_v62 = vmin.u32 %v348_v30, %v13989_v39  ;;  %v726_v15 = vor.u32 %v725_v60, %v724_v23  ;;  %v14002_v50 = vand.u32 3, %v5471_v51  ;;  %v14004_v16 = vsel %vm4637_vm3, %v4640_v24, %v4643_v45 }
 0x445   :  { %v338_v3 = vadd.s32 %v13928_v57, %v13936_v12  ;;  %v727_v49 = vshll.u32 %v14866_v46, %v712_v44  ;;  %vm4229_vm6 = vcmp.eq.s32.totalorder %v13983_v56, 2  ;;  %vm5053_vm12 = vcmp.eq.s32.totalorder %v13987_v25, 2 }
 0x446   :  { %v350_v31 = vclz %v9073_v62  ;;  %vm730_vm5 = vcmp.lt.s32.totalorder %v711_v19, 1  ;;  %vm733_vm11 = vcmp.lt.s32.totalorder %v711_v19, 4  ;;  %v14011_v5 = vshll.u32 %v706_v27, 8 }
 0x447   :  { %vm4226_vm1 = vcmp.eq.s32.totalorder %v13983_v56, 0  ;;  %vm5050_vm10 = vcmp.eq.s32.totalorder %v13987_v25, 0  ;;  %v714_v51 = vshrl.u32 %v14867_v43, %v713_v47  ;;  %v729_v24 = vor.u32 %v728_v63, %v727_v49 }
 0x448   :  { %v735_v57 = vsel %vm733_vm11, %v723_v6, 2102212464  ;;  %v738_v12 = vsel %vm730_vm5, %v717_v21, %v720_v28  ;;  %vm4225_vm15 = vcmp.lt.s32.totalorder %v13983_v56, 2  ;;  %v9074_v44 = vadd.s32 4294967294, %v350_v31 }
 0x449   :  { %vm732_vm4 = vcmp.lt.s32.totalorder %v711_v19, 3  ;;  %v739_v45 = vsel %vm733_vm11, %v726_v15, 920167782  ;;  %v742_v27 = vsel %vm730_vm5, %v720_v28, %v723_v6  ;;  %vm5474_vm0 = vcmp.eq.s32.totalorder %v14002_v50, 0 }
 0x44a   :  { %vm5477_vm9 = vcmp.eq.s32.totalorder %v14002_v50, 2  ;;  %vm4222_vm7 = vweird.f32 %v13661_v55  ;;  %vm284_vm14 = vcmp.lt.s32.totalorder %v12293_v54, 0  ;;  %vm731_vm8 = vcmp.lt.s32.totalorder %v711_v19, 2 }
 0x44b   :  { %v734_v49 = vsel %vm730_vm5, %v714_v51, %v717_v21  ;;  %v740_v47 = vsel %vm732_vm4, %v723_v6, %v739_v45  ;;  %v743_v33 = vsel %vm733_vm11, %v729_v24, 1326507024  ;;  %vm9075_vm3 = vcmp.lt.s32.totalorder %v9074_v44, 0 }
 0x44c   :  { %vm5049_vm2 = vcmp.lt.s32.totalorder %v13987_v25, 2  ;;  %v736_v8 = vsel %vm732_vm4, %v720_v28, %v735_v57  ;;  %v741_v37 = vsel %vm731_vm8, %v738_v12, %v740_v47  ;;  %v744_v34 = vsel %vm732_vm4, %v726_v15, %v743_v33  ;;  %v14043_v15 = vpop.trf.xlu1 }
 0x44d   :  { %v353_v17 = vsel %vm9075_vm3, 0, %v9074_v44  ;;  %v745_v30 = vsel %vm731_vm8, %v742_v27, %v744_v34  ;;  %v14031_v23 = vmul.u32.u64.low %v14011_v5, %v741_v37  ;;  %v14032_v60 = vmul.u32.u64.high %v14011_v5, %v741_v37, %v14031_v23 }
 0x44e   :  { %v14877_v21 = vand.u32 2147483647, %v12293_v54  ;;  %v354_v63 = vsub.s32 32, %v353_v17  ;;  %v358_v28 = vsub.s32 4294967266, %v353_v17  ;;  %v368_v31 = vsub.s32 4, %v13973_v48 }
 0x44f   :  { %v9962_v62 = vpop.eup %9961  ;;  %vm5473_vm11 = vcmp.lt.s32.totalorder %v14002_v50, 2  ;;  %v737_v57 = vsel %vm731_vm8, %v734_v49, %v736_v8  ;;  %v14047_v12 = vmul.u32.u64.low %v14011_v5, %v745_v30  ;;  %v14048_v44 = vmul.u32.u64.high %v14011_v5, %v745_v30, %v14047_v12 }
 0x450   :  { %vm14037_vm5 = vcmp.le.f32.partialorder %v14877_v21, 0.7853982  ;;  %v9964_v51 = vpop.eup %9963  ;;  %v4230_v24 = vxor.u32 2147483648, %v9962_v62  ;;  %v355_v27 = vshll.u32 %v13989_v39, %v353_v17  ;;  %v356_v47 = vshrl.u32 %v338_v3, %v354_v63  ;;  %v14081_v12 = vpop.trf.xlu0 }
 0x451   :  { %v4227_v45 = vxor.u32 2147483648, %v9964_v51  ;;  %v359_v33 = vadd.s32 127, %v358_v28  ;;  %v756_v21 = vadd.s32 1, %v14032_v60  ;;  %v5887_v19 = vadd.s32 3, %v12609_v2 }
 0x452   :  { %v4231_v37 = vsel %vm4229_vm6, %v4230_v24, %v9964_v51  ;;  %v5055_v34 = vsel %vm5053_vm12, %v4230_v24, %v9964_v51  ;;  %v357_v8 = vor.u32 %v356_v47, %v355_v27  ;;  %vm755_vm6 = vc.u32 %v14048_v44, %v14031_v23 }
 0x453   :  { %v4228_v49 = vsel %vm4226_vm1, %v9962_v62, %v4227_v45  ;;  %v360_v30 = vshll.u32 %v359_v33, 23  ;;  %v5052_v39 = vsel %vm5050_vm10, %v9962_v62, %v4227_v45  ;;  %v14880_v17 = vxor.u32 2147483648, %v12542_v11  ;;  %v14083_v45 = vpop.trf.xlu1 }
 0x454   :  { %v4232_v3 = vsel %vm4225_vm15, %v4228_v49, %v4231_v37  ;;  %v14881_v63 = vxor.u32 2147483648, %v12536_v18  ;;  %v369_v51 = vsel %vm284_vm14, %v368_v31, %v13973_v48  ;;  %v753_v24 = vmul.u32 %v14011_v5, %v737_v57 }
 0x455   :  { %v5476_v2 = vsel %vm5474_vm0, %v12536_v18, %v14880_v17  ;;  %v4233_v62 = vsel %vm4222_vm7, nan, %v4232_v3  ;;  %v361_v56 = vor.u32 4788187, %v360_v30  ;;  %v364_v27 = vcvt.s32.f32 %v357_v8  ;;  %v14105_v8 = vpop.trf.xlu0 }
 0x456   :  { %v5479_v28 = vsel %vm5477_vm9, %v14881_v63, %v12542_v11  ;;  %8532 = vxpose.xlu0.b32.cont [12/16] (narrow) %v4233_v62, 16  ;;  %v5056_v18 = vsel %vm5049_vm2, %v5052_v39, %v5055_v34  ;;  %v757_v11 = vsel %vm755_vm6, %v756_v21, %v14032_v60  ;;  %v5888_v47 = vand.u32 3, %v5887_v19 }
 0x457   :  { %v362_v33 = vand.u32 2147483647, %v361_v56  ;;  %v758_v37 = vadd.s32 %v757_v11, %v753_v24  ;;  %v9656_v49 = vunpack.i.h.bf16 %v13963_v9  ;;  %v4645_v48 = vsel %vm3806_vm13, nan, %v14004_v16  ;;  %v14107_v30 = vpop.trf.xlu1 }
 0x458   :  { %v14094_v5 = vsel %vm14037_vm5, 0, %v369_v51  ;;  %v5480_v31 = vsel %vm5473_vm11, %v5476_v2, %v5479_v28  ;;  %v5057_v60 = vsel %vm4222_vm7, nan, %v5056_v18  ;;  %vm5890_vm2 = vcmp.eq.s32.totalorder %v5888_v47, 0 }
 0x459   :  { %v365_v25 = vmul.f32 %v364_v27, %v362_v33  ;;  %v759_v57 = vadd.s32 536870912, %v758_v37  ;;  %8760 = vmatprep.mubr.f32.mxu0 %v9656_v49  ;;  %vm5893_vm12 = vcmp.eq.s32.totalorder %v5888_v47, 2  ;;  %v9768_v34 = vunpack.i.h.bf16 %v13975_v14  ;;  %v14132_v33 = vpop.trf.xlu0 }
 0x45a   :  { %8533 = vxpose.xlu0.b32.cont [13/16] (narrow) %v4645_v48, 16  ;;  %v14882_v21 = vxor.u32 2147483648, %v12632_v22  ;;  %v9661_v50 = vunpack.i.h.bf16 %v14043_v15  ;;  %v9773_v55 = vunpack.i.h.bf16 %v14081_v12  ;;  %v14883_v17 = vxor.u32 2147483648, %v12628_v52 }
 0x45b   :  { %v366_v20 = vxor.u32 2147483648, %v365_v25  ;;  %v760_v16 = vshrl.u32 %v759_v57, 30  ;;  %8761 = vmatmul.mubr.f32.gmra.mxu0 %v9768_v34  ;;  %v14119_v28 = vmul.f32 2.0, %v12293_v54  ;;  %v9666_v62 = vunpack.i.h.bf16 %v14083_v45  ;;  %v14137_v48 = vpop.trf.xlu1 }
 0x45c   :  { %v5892_v19 = vsel %vm5890_vm2, %v12628_v52, %v14882_v21  ;;  %v5895_v2 = vsel %vm5893_vm12, %v14883_v17, %v12632_v22  ;;  %8765 = vmatprep.mubr.f32.mxu0 %v9661_v50  ;;  %v375_v24 = vadd.s32 3, %v14094_v5  ;;  %vm14884_vm13 = vweird.f32 %v12104_v7 }
 0x45d   :  { %v367_v39 = vsel %vm284_vm14, %v366_v20, %v365_v25  ;;  %v761_v3 = vshll.u32 %v760_v16, 30  ;;  %v784_v51 = vsub.s32 4, %v760_v16  ;;  %v5481_v22 = vsel %vm14884_vm13, nan, %v5480_v31 }
 0x45e   :  { %v370_v63 = vsel %vm14037_vm5, %v12293_v54, %v367_v39  ;;  %8534 = vxpose.xlu0.b32.cont [14/16] (narrow) %v5057_v60, 16  ;;  %vm5889_vm1 = vcmp.lt.s32.totalorder %v5888_v47, 2  ;;  %v1949_v6 = vand.u32 2139095040, %v14119_v28  ;;  %vm700_vm10 = vcmp.lt.s32.totalorder %v12515_v13, 0  ;;  %v14155_v39 = vpop.trf.xlu0 }
 0x45f   :  { %9965 = vcosq.f32 %v370_v63  ;;  %v14122_v56 = vsub.s32 %v758_v37, %v761_v3  ;;  %8766 = vmatmul.mubr.f32.gmra.mxu0 %v9773_v55  ;;  %v5896_v27 = vsel %vm5889_vm1, %v5892_v19, %v5895_v2  ;;  %v14759_v18 = vand.u32 2147483647, %v14119_v28  ;;  %14889 = vst [vmem:[#allocation18_spill] sm:$0xff] %v14155_v39 }
 0x460   :  { %9967 = vsinq.f32 %v370_v63  ;;  %8770 = vmatprep.mubr.f32.mxu0 %v9666_v62  ;;  %v9778_v11 = vunpack.i.h.bf16 %v14105_v8  ;;  %v785_v7 = vsel %vm700_vm10, %v784_v51, %v760_v16  ;;  %v376_v49 = vand.u32 3, %v375_v24 }
 0x461   :  { %v764_v52 = vsub.s32 0, %v14122_v56  ;;  %v1950_v47 = vshrl.u32 %v1949_v6, 23  ;;  %v14885_v31 = vand.u32 2147483647, %v12515_v13  ;;  %vm14888_vm4 = vweird.f32 %v12226_v26 }
 0x462   :  { %8535 = vxpose.xlu0.b32.cont [15/16] (narrow) %v5481_v22, 16  ;;  %v5897_v57 = vsel %vm14888_vm4, nan, %v5896_v27  ;;  %v1953_v16 = vand.u32 8388607, %v14759_v18  ;;  %v9671_v19 = vunpack.i.h.bf16 %v14107_v30  ;;  %vm377_vm0 = vcmp.lt.s32.totalorder %v376_v49, 2 }
 0x463   :  { %v9089_v37 = vmin.u32 %v764_v52, %v14122_v56  ;;  %8771 = vmatmul.mubr.f32.gmra.mxu0 %v9778_v11  ;;  %vm14141_vm15 = vcmp.le.f32.partialorder %v14885_v31, 0.7853982  ;;  %v9136_v20 = vadd.s32 4294967169, %v1950_v47  ;;  %vm378_vm9 = vcmp.eq.s32.totalorder %v376_v49, 0 }
 0x464   :  { %v787_v34 = vsel %vm14141_vm15, 0, %v785_v7  ;;  %v14153_v55 = vmul.f32 2.0, %v12515_v13  ;;  %vm374_vm7 = vweird.f32 %v12293_v54  ;;  %vm381_vm14 = vcmp.eq.s32.totalorder %v376_v49, 2  ;;  %8775 = vmatprep.mubr.f32.mxu0 %v9671_v19 }
 0x465   :  { %v766_v60 = vclz %v9089_v37  ;;  %v1956_v50 = vadd.s32 1, %v9136_v20  ;;  %v9783_v26 = vunpack.i.h.bf16 %v14132_v33  ;;  %v754_v3 = vadd.s32 %v14031_v23, %v14048_v44 }
 0x466   :  { %8536 = vxpose.xlu0.b32.end [16/16] (narrow) %v5897_v57, 16  ;;  %v791_v2 = vadd.s32 3, %v787_v34  ;;  %v1954_v51 = vor.u32 8388608, %v1953_v16  ;;  %v14165_v6 = vand.u32 3, %v14094_v5  ;;  %v2365_v11 = vand.u32 2139095040, %v14153_v55 }
 0x467   :  { %v9090_v21 = vadd.s32 4294967294, %v766_v60  ;;  %vm1957_vm3 = vcmp.gt.s32.totalorder %v1956_v50, 0  ;;  %8776 = vmatmul.mubr.f32.gmra.mxu0 %v9783_v26  ;;  %v14174_v60 = vand.u32 3, %v787_v34 }
 0x468   :  { %v1958_v24 = vsel %vm1957_vm3, %v1956_v50, 0  ;;  %v14172_v31 = vand.u32 3, %v791_v2  ;;  %v14180_v16 = vshll.u32 %v1954_v51, 8  ;;  %v2366_v50 = vshrl.u32 %v2365_v11, 23 }
 0x469   :  { %vm9091_vm8 = vcmp.lt.s32.totalorder %v9090_v21, 0  ;;  %v1960_v27 = vand.u32 31, %v1958_v24  ;;  %vm1207_vm12 = vcmp.eq.s32.totalorder %v14165_v6, 0  ;;  %vm1210_vm13 = vcmp.eq.s32.totalorder %v14165_v6, 2 }
 0x46a   :  { %v769_v17 = vsel %vm9091_vm8, 0, %v9090_v21  ;;  %vm793_vm4 = vcmp.lt.s32.totalorder %v14172_v31, 2  ;;  %vm1619_vm8 = vcmp.eq.s32.totalorder %v14174_v60, 0  ;;  %vm797_vm3 = vcmp.eq.s32.totalorder %v14172_v31, 2 }
 0x46b   :  { %v770_v63 = vsub.s32 32, %v769_v17  ;;  %v774_v62 = vsub.s32 4294967266, %v769_v17  ;;  %v771_v22 = vshll.u32 %v14122_v56, %v769_v17  ;;  %v1961_v57 = vsub.s32 32, %v1960_v27 }
 0x46c   :  { %v14161_v52 = vpop.eup %9965  ;;  %v1963_v19 = vshll.u32 %v14867_v43, %v1960_v27  ;;  %v1959_v17 = vshrl.u32 %v1958_v24, 5  ;;  %v1966_v2 = vshll.u32 %v14848_v1, %v1960_v27  ;;  %v1972_v49 = vshll.u32 %v14819_v10, %v1960_v27 }
 0x46d   :  { %v14168_v37 = vpop.eup %9967  ;;  %v14760_v23 = vxor.u32 2147483648, %v14161_v52  ;;  %v772_v44 = vshrl.u32 %v754_v3, %v770_v63  ;;  %v775_v7 = vadd.s32 127, %v774_v62  ;;  %v1964_v34 = vshrl.u32 %v14848_v1, %v1961_v57 }
 0x46e   :  { %v14761_v47 = vxor.u32 2147483648, %v14168_v37  ;;  %v1970_v18 = vshrl.u32 %v14819_v10, %v1961_v57  ;;  %v1973_v24 = vshrl.u32 %v14866_v46, %v1961_v57  ;;  %vm1978_vm5 = vcmp.lt.s32.totalorder %v1959_v17, 1 }
 0x46f   :  { %v383_v5 = vsel %vm381_vm14, %v14760_v23, %v14168_v37  ;;  %v773_v56 = vor.u32 %v772_v44, %v771_v22  ;;  %v776_v20 = vshll.u32 %v775_v7, 23  ;;  %v1965_v51 = vor.u32 %v1964_v34, %v1963_v19 }
 0x470   :  { %v380_v21 = vsel %vm378_vm9, %v14161_v52, %v14761_v47  ;;  %v1967_v22 = vshrl.u32 %v14849_v36, %v1961_v57  ;;  %v1969_v7 = vshll.u32 %v14849_v36, %v1960_v27  ;;  %v9152_v34 = vadd.s32 4294967169, %v2366_v50 }
 0x471   :  { %v384_v26 = vsel %vm377_vm0, %v380_v21, %v383_v5  ;;  %v777_v3 = vor.u32 4788187, %v776_v20  ;;  %v780_v62 = vcvt.s32.f32 %v773_v56  ;;  %v1975_v5 = vshll.u32 %v14866_v46, %v1960_v27 }
 0x472   :  { %v385_v63 = vsel %vm374_vm7, nan, %v384_v26  ;;  %v1968_v11 = vor.u32 %v1967_v22, %v1966_v2  ;;  %v1976_v20 = vshrl.u32 %v14820_v41, %v1961_v57  ;;  %v1962_v56 = vshrl.u32 %v14867_v43, %v1961_v57  ;;  %v14200_v2 = vpop.trf.xlu1 }
 0x473   :  { %8491 = vxpose.xlu1.b32.cont [3/16] %v385_v63, 128  ;;  %v778_v44 = vand.u32 2147483647, %v777_v3  ;;  %v1971_v19 = vor.u32 %v1970_v18, %v1969_v7  ;;  %v1974_v26 = vor.u32 %v1973_v24, %v1972_v49  ;;  %vm1981_vm11 = vcmp.lt.s32.totalorder %v1959_v17, 4  ;;  %14890 = vst [vmem:[#allocation19_spill] sm:$0xff] %v14200_v2 }
 0x474   :  { %v1977_v3 = vor.u32 %v1976_v20, %v1975_v5  ;;  %vm1979_vm6 = vcmp.lt.s32.totalorder %v1959_v17, 2  ;;  %v1986_v47 = vsel %vm1978_vm5, %v1965_v51, %v1968_v11  ;;  %vm1980_vm2 = vcmp.lt.s32.totalorder %v1959_v17, 3  ;;  %v14211_v5 = vpop.trf.xlu0 }
 0x475   :  { %v781_v21 = vmul.f32 %v780_v62, %v778_v44  ;;  %v1983_v23 = vsel %vm1981_vm11, %v1971_v19, 2102212464  ;;  %v1987_v22 = vsel %vm1981_vm11, %v1974_v26, 920167782  ;;  %v1990_v27 = vsel %vm1978_vm5, %v1968_v11, %v1971_v19  ;;  %14891 = vst [vmem:[#allocation20_spill] sm:$0xff] %v14211_v5 }
 0x476   :  { %v1991_v0 = vsel %vm1981_vm11, %v1977_v3, 1326507024  ;;  %v1982_v18 = vsel %vm1978_vm5, %v1962_v56, %v1965_v51  ;;  %v1988_v57 = vsel %vm1980_vm2, %v1971_v19, %v1987_v22  ;;  %v1984_v7 = vsel %vm1980_vm2, %v1968_v11, %v1983_v23  ;;  %v14225_v11 = vpop.trf.xlu1 }
 0x477   :  { %v782_v63 = vxor.u32 2147483648, %v781_v21  ;;  %v1992_v50 = vsel %vm1980_vm2, %v1974_v26, %v1991_v0  ;;  %v1989_v49 = vsel %vm1979_vm6, %v1986_v47, %v1988_v57  ;;  %v14764_v51 = vand.u32 2147483647, %v14153_v55 }
 0x478   :  { %v1993_v24 = vsel %vm1979_vm6, %v1990_v27, %v1992_v50  ;;  %v14219_v0 = vmul.u32.u64.low %v14180_v16, %v1989_v49  ;;  %v14220_v56 = vmul.u32.u64.high %v14180_v16, %v1989_v49, %v14219_v0  ;;  %v2372_v25 = vadd.s32 1, %v9152_v34  ;;  %v14236_v27 = vpop.trf.xlu0 }
 0x479   :  { %v783_v62 = vsel %vm700_vm10, %v782_v63, %v781_v21  ;;  %v14214_v20 = vmul.u32.u64.low %v14180_v16, %v1993_v24  ;;  %v14215_v21 = vmul.u32.u64.high %v14180_v16, %v1993_v24, %v14214_v20  ;;  %v1985_v23 = vsel %vm1979_vm6, %v1982_v18, %v1984_v7 }
 0x47a   :  { %v786_v44 = vsel %vm14141_vm15, %v12515_v13, %v783_v62  ;;  %v9676_v47 = vunpack.i.h.bf16 %v14137_v48  ;;  %vm2373_vm1 = vcmp.gt.s32.totalorder %v2372_v25, 0  ;;  %v9788_v19 = vunpack.i.h.bf16 %v14155_v39 }
 0x47b   :  { %9969 = vcosq.f32 %v786_v44  ;;  %vm1206_vm10 = vcmp.lt.s32.totalorder %v14165_v6, 2  ;;  %vm2003_vm15 = vc.u32 %v14215_v21, %v14219_v0  ;;  %v2369_v26 = vand.u32 8388607, %v14764_v51 }
 0x47c   :  { %9971 = vsinq.f32 %v786_v44  ;;  %v2374_v3 = vsel %vm2373_vm1, %v2372_v25, 0  ;;  %8780 = vmatprep.mubr.f32.mxu0 %v9676_v47  ;;  %v9681_v17 = vunpack.i.h.bf16 %v14200_v2  ;;  %v2001_v34 = vmul.u32 %v14180_v16, %v1985_v23 }
 0x47d   :  { %v2004_v63 = vadd.s32 1, %v14220_v56  ;;  %v2376_v22 = vand.u32 31, %v2374_v3  ;;  %8781 = vmatmul.mubr.f32.gmra.mxu0 %v9788_v19  ;;  %v9793_v62 = vunpack.i.h.bf16 %v14211_v5  ;;  %v14892_v18 = vxor.u32 2147483648, %v14168_v37 }
 0x47e   :  { %8785 = vmatprep.mubr.f32.mxu0 %v9681_v17  ;;  %v14893_v50 = vxor.u32 2147483648, %v14161_v52  ;;  %v2370_v24 = vor.u32 8388608, %v2369_v26  ;;  %v14250_v20 = vshrl.u32 %v2374_v3, 5  ;;  %vm790_vm0 = vweird.f32 %v12515_v13 }
 0x47f   :  { %v1209_v57 = vsel %vm1207_vm12, %v14161_v52, %v14892_v18  ;;  %v2005_v44 = vsel %vm2003_vm15, %v2004_v63, %v14220_v56  ;;  %v2377_v7 = vsub.s32 32, %v2376_v22  ;;  %v2385_v25 = vshll.u32 %v14849_v36, %v2376_v22 }
 0x480   :  { %v1212_v16 = vsel %vm1210_vm13, %v14893_v50, %v14168_v37  ;;  %v2006_v49 = vadd.s32 %v2005_v44, %v2001_v34  ;;  %v2388_v19 = vshll.u32 %v14819_v10, %v2376_v22  ;;  %vm1622_vm9 = vcmp.eq.s32.totalorder %v14174_v60, 2 }
 0x481   :  { %v2380_v23 = vshrl.u32 %v14848_v1, %v2377_v7  ;;  %v2383_v47 = vshrl.u32 %v14849_v36, %v2377_v7  ;;  %v2386_v52 = vshrl.u32 %v14819_v10, %v2377_v7  ;;  %8786 = vmatmul.mubr.f32.gmra.mxu0 %v9793_v62  ;;  %v2389_v56 = vshrl.u32 %v14866_v46, %v2377_v7 }
 0x482   :  { %v2007_v37 = vadd.s32 536870912, %v2006_v49  ;;  %v2391_v26 = vshll.u32 %v14866_v46, %v2376_v22  ;;  %v2392_v3 = vshrl.u32 %v14820_v41, %v2377_v7  ;;  %vm794_vm14 = vcmp.eq.s32.totalorder %v14172_v31, 0 }
 0x483   :  { %v2379_v17 = vshll.u32 %v14867_v43, %v2376_v22  ;;  %v2382_v34 = vshll.u32 %v14848_v1, %v2376_v22  ;;  %v2387_v63 = vor.u32 %v2386_v52, %v2385_v25  ;;  %v2390_v18 = vor.u32 %v2389_v56, %v2388_v19 }
 0x484   :  { %v2008_v62 = vshrl.u32 %v2007_v37, 30  ;;  %v2393_v50 = vor.u32 %v2392_v3, %v2391_v26  ;;  %v1213_v51 = vsel %vm1206_vm10, %v1209_v57, %v1212_v16  ;;  %v14270_v29 = vshll.u32 %v2370_v24, 8 }
 0x485   :  { %v2381_v35 = vor.u32 %v2380_v23, %v2379_v17  ;;  %v2384_v61 = vor.u32 %v2383_v47, %v2382_v34  ;;  %v2378_v39 = vshrl.u32 %v14867_v43, %v2377_v7  ;;  %vm2397_vm5 = vcmp.lt.s32.totalorder %v14250_v20, 4 }
 0x486   :  { %v2009_v2 = vshll.u32 %v2008_v62, 30  ;;  %vm2394_vm11 = vcmp.lt.s32.totalorder %v14250_v20, 1  ;;  %vm2395_vm6 = vcmp.lt.s32.totalorder %v14250_v20, 2  ;;  %v2399_v25 = vsel %vm2397_vm5, %v2387_v63, 2102212464 }
 0x487   :  { %v2403_v16 = vsel %vm2397_vm5, %v2390_v18, 920167782  ;;  %v2407_v24 = vsel %vm2397_vm5, %v2393_v50, 1326507024  ;;  %vm2396_vm2 = vcmp.lt.s32.totalorder %v14250_v20, 3  ;;  %v2402_v7 = vsel %vm2394_vm11, %v2381_v35, %v2384_v61 }
 0x488   :  { %v9970_v44 = vpop.eup %9969  ;;  %v14278_v57 = vsub.s32 %v2006_v49, %v2009_v2  ;;  %v2406_v47 = vsel %vm2394_vm11, %v2384_v61, %v2387_v63  ;;  %v2398_v37 = vsel %vm2394_vm11, %v2378_v39, %v2381_v35  ;;  %v2400_v56 = vsel %vm2396_vm2, %v2384_v61, %v2399_v25 }
 0x489   :  { %v9972_v5 = vpop.eup %9971  ;;  %v798_v40 = vxor.u32 2147483648, %v9970_v44  ;;  %v2404_v26 = vsel %vm2396_vm2, %v2387_v63, %v2403_v16  ;;  %v2408_v3 = vsel %vm2396_vm2, %v2390_v18, %v2407_v24  ;;  %v14306_v63 = vpop.trf.xlu1  ;;  %v1214_v18 = vsel %vm374_vm7, nan, %v1213_v51 }
 0x48a   :  { %v795_v22 = vxor.u32 2147483648, %v9972_v5  ;;  %v2012_v19 = vsub.s32 0, %v14278_v57  ;;  %v2405_v31 = vsel %vm2395_vm6, %v2402_v7, %v2404_v26  ;;  %v2409_v61 = vsel %vm2395_vm6, %v2406_v47, %v2408_v3 }
 0x48b   :  { %v799_v6 = vsel %vm797_vm3, %v798_v40, %v9972_v5  ;;  %v1624_v49 = vsel %vm1622_vm9, %v798_v40, %v9972_v5  ;;  %v14298_v35 = vmul.u32.u64.low %v14270_v29, %v2409_v61  ;;  %v14299_v39 = vmul.u32.u64.high %v14270_v29, %v2409_v61, %v14298_v35 }
 0x48c   :  { %v796_v23 = vsel %vm794_vm14, %v9970_v44, %v795_v22  ;;  %v1621_v17 = vsel %vm1619_vm8, %v9970_v44, %v795_v22  ;;  %v9137_v34 = vmin.u32 %v2012_v19, %v14278_v57  ;;  %vm1618_vm12 = vcmp.lt.s32.totalorder %v14174_v60, 2  ;;  %v14344_v35 = vpop.trf.xlu0 }
 0x48d   :  { %v800_v52 = vsel %vm793_vm4, %v796_v23, %v799_v6  ;;  %v14302_v40 = vmul.u32.u64.low %v14270_v29, %v2405_v31  ;;  %v14303_v5 = vmul.u32.u64.high %v14270_v29, %v2405_v31, %v14302_v40  ;;  %v2032_v44 = vsub.s32 4, %v2008_v62 }
 0x48e   :  { %v801_v2 = vsel %vm790_vm0, nan, %v800_v52  ;;  %v2014_v50 = vclz %v9137_v34  ;;  %v1625_v22 = vsel %vm1618_vm12, %v1621_v17, %v1624_v49  ;;  %v2401_v25 = vsel %vm2395_vm6, %v2398_v37, %v2400_v56 }
 0x48f   :  { %8492 = vxpose.xlu1.b32.cont [4/16] %v801_v2, 128  ;;  %v14314_v6 = vmul.f32 4.0, %v12293_v54  ;;  %v9686_v16 = vunpack.i.h.bf16 %v14225_v11  ;;  %v9683_v23 = vunpack.i.l.bf16 %v14225_v11  ;;  %v14894_v7 = vand.u32 2147483647, %v14119_v28 }
 0x490   :  { %v9138_v24 = vadd.s32 4294967294, %v2014_v50  ;;  %vm1948_vm13 = vcmp.lt.s32.totalorder %v14119_v28, 0  ;;  %vm2419_vm1 = vc.u32 %v14299_v39, %v14302_v40  ;;  %v2420_v54 = vadd.s32 1, %v14303_v5 }
 0x491   :  { %vm14320_vm7 = vcmp.le.f32.partialorder %v14894_v7, 0.7853982  ;;  %8790 = vmatprep.mubr.f32.mxu0 %v9686_v16  ;;  %v1626_v60 = vsel %vm790_vm0, nan, %v1625_v22  ;;  %v2033_v11 = vsel %vm1948_vm13, %v2032_v44, %v2008_v62  ;;  %v2417_v20 = vmul.u32 %v14270_v29, %v2401_v25  ;;  %8870 = vmatprep.mubr.f32.mxu1 %v9683_v23 }
 0x492   :  { %vm9139_vm10 = vcmp.lt.s32.totalorder %v9138_v24, 0  ;;  %v2421_v52 = vsel %vm2419_vm1, %v2420_v54, %v14303_v5  ;;  %v3610_v19 = vand.u32 2147483647, %v14314_v6  ;;  %v3613_v37 = vand.u32 2139095040, %v14314_v6 }
 0x493   :  { %8493 = vxpose.xlu1.b32.cont [5/16] %v1214_v18, 128  ;;  %v2017_v47 = vsel %vm9139_vm10, 0, %v9138_v24  ;;  %v2002_v56 = vadd.s32 %v14219_v0, %v14215_v21  ;;  %v2422_v26 = vadd.s32 %v2421_v52, %v2417_v20  ;;  %v14341_v29 = vsel %vm14320_vm7, 0, %v2033_v11 }
 0x494   :  { %v2018_v2 = vsub.s32 32, %v2017_v47  ;;  %v2022_v49 = vsub.s32 4294967266, %v2017_v47  ;;  %v2019_v3 = vshll.u32 %v14278_v57, %v2017_v47  ;;  %v3614_v62 = vshrl.u32 %v3613_v37, 23 }
 0x495   :  { %v2423_v31 = vadd.s32 536870912, %v2422_v26  ;;  %v9798_v61 = vunpack.i.h.bf16 %v14236_v27  ;;  %v3617_v21 = vand.u32 8388607, %v3610_v19  ;;  %v9795_v0 = vunpack.i.l.bf16 %v14236_v27 }
 0x496   :  { %v2020_v17 = vshrl.u32 %v2002_v56, %v2018_v2  ;;  %v2023_v34 = vadd.s32 127, %v2022_v49  ;;  %v9200_v5 = vadd.s32 4294967169, %v3614_v62  ;;  %v9691_v22 = vunpack.i.h.bf16 %v14306_v63 }
 0x497   :  { %8494 = vxpose.xlu1.b32.cont [6/16] %v1626_v60, 128  ;;  %v2424_v50 = vshrl.u32 %v2423_v31, 30  ;;  %8791 = vmatmul.mubr.f32.gmra.mxu0 %v9798_v61  ;;  %v2039_v24 = vadd.s32 3, %v14341_v29  ;;  %v3618_v23 = vor.u32 8388608, %v3617_v21  ;;  %v14352_v47 = vmul.f32 4.0, %v12515_v13 }
 0x498   :  { %v2021_v18 = vor.u32 %v2020_v17, %v2019_v3  ;;  %v2024_v57 = vshll.u32 %v2023_v34, 23  ;;  %v3620_v44 = vadd.s32 1, %v9200_v5  ;;  %8871 = vmatmul.mubr.f32.vlgmr.msra.gmra.mxu1 %v9795_v0  ;;  %8795 = vmatprep.mubr.f32.mxu0 %v9691_v22  ;;  %vm2364_vm4 = vcmp.lt.s32.totalorder %v14153_v55, 0 }
 0x499   :  { %v2425_v16 = vshll.u32 %v2424_v50, 30  ;;  %v2448_v27 = vsub.s32 4, %v2424_v50  ;;  %v14354_v56 = vand.u32 3, %v2039_v24  ;;  %v2418_v3 = vadd.s32 %v14302_v40, %v14299_v39 }
 0x49a   :  { %v2025_v25 = vor.u32 4788187, %v2024_v57  ;;  %vm3621_vm15 = vcmp.gt.s32.totalorder %v3620_v44, 0  ;;  %v2028_v54 = vcvt.s32.f32 %v2021_v18  ;;  %v14359_v17 = vshll.u32 %v3618_v23, 8 }
 0x49b   :  { %v2426_v60 = vsub.s32 %v2422_v26, %v2425_v16  ;;  %v3622_v11 = vsel %vm3621_vm15, %v3620_v44, 0  ;;  %v2449_v26 = vsel %vm2364_vm4, %v2448_v27, %v2424_v50  ;;  %v4029_v31 = vand.u32 2139095040, %v14352_v47 }
 0x49c   :  { %v2026_v7 = vand.u32 2147483647, %v2025_v25  ;;  %v3624_v20 = vand.u32 31, %v3622_v11  ;;  %v3623_v34 = vshrl.u32 %v3622_v11, 5  ;;  %v14897_v25 = vand.u32 2147483647, %v14153_v55 }
 0x49d   :  { %v2428_v37 = vsub.s32 0, %v2426_v60  ;;  %vm2042_vm11 = vcmp.eq.s32.totalorder %v14354_v56, 0  ;;  %vm2045_vm6 = vcmp.eq.s32.totalorder %v14354_v56, 2 }
 0x49e   :  { %v2029_v52 = vmul.f32 %v2028_v54, %v2026_v7  ;;  %v3625_v2 = vsub.s32 32, %v3624_v20  ;;  %v3627_v21 = vshll.u32 %v14867_v43, %v3624_v20  ;;  %v3630_v0 = vshll.u32 %v14848_v1, %v3624_v20 }
 0x49f   :  { %v9153_v62 = vmin.u32 %v2428_v37, %v2426_v60  ;;  %v3633_v57 = vshll.u32 %v14849_v36, %v3624_v20  ;;  %vm14378_vm0 = vcmp.le.f32.partialorder %v14897_v25, 0.7853982  ;;  %v3636_v24 = vshll.u32 %v14819_v10, %v3624_v20 }
 0x4a0   :  { %v2030_v49 = vxor.u32 2147483648, %v2029_v52  ;;  %v3628_v13 = vshrl.u32 %v14848_v1, %v3625_v2  ;;  %v3626_v40 = vshrl.u32 %v14867_v43, %v3625_v2  ;;  %v3631_v18 = vshrl.u32 %v14849_v36, %v3625_v2 }
 0x4a1   :  { %v2430_v5 = vclz %v9153_v62  ;;  %v3634_v22 = vshrl.u32 %v14819_v10, %v3625_v2  ;;  %v3637_v23 = vshrl.u32 %v14866_v46, %v3625_v2  ;;  %v3639_v54 = vshll.u32 %v14866_v46, %v3624_v20 }
 0x4a2   :  { %v2031_v61 = vsel %vm1948_vm13, %v2030_v49, %v2029_v52  ;;  %v3629_v44 = vor.u32 %v3628_v13, %v3627_v21  ;;  %v3632_v51 = vor.u32 %v3631_v18, %v3630_v0  ;;  %v3640_v11 = vshrl.u32 %v14820_v41, %v3625_v2 }
 0x4a3   :  { %v2034_v39 = vsel %vm14320_vm7, %v14119_v28, %v2031_v61  ;;  %v9154_v50 = vadd.s32 4294967294, %v2430_v5  ;;  %v3635_v7 = vor.u32 %v3634_v22, %v3633_v57  ;;  %v3638_v52 = vor.u32 %v3637_v23, %v3636_v24  ;;  %v14397_v23 = vpop.trf.xlu1 }
 0x4a4   :  { %9973 = vcosq.f32 %v2034_v39  ;;  %vm3642_vm14 = vcmp.lt.s32.totalorder %v3623_v34, 1  ;;  %vm3643_vm8 = vcmp.lt.s32.totalorder %v3623_v34, 2  ;;  %v3641_v62 = vor.u32 %v3640_v11, %v3639_v54 }
 0x4a5   :  { %9975 = vsinq.f32 %v2034_v39  ;;  %vm9155_vm9 = vcmp.lt.s32.totalorder %v9154_v50, 0  ;;  %vm3644_vm3 = vcmp.lt.s32.totalorder %v3623_v34, 3  ;;  %vm3645_vm5 = vcmp.lt.s32.totalorder %v3623_v34, 4 }
 0x4a6   :  { %v2433_v27 = vsel %vm9155_vm9, 0, %v9154_v50  ;;  %v3646_v61 = vsel %vm3642_vm14, %v3626_v40, %v3629_v44  ;;  %v3650_v5 = vsel %vm3642_vm14, %v3629_v44, %v3632_v51  ;;  %v3647_v39 = vsel %vm3645_vm5, %v3635_v7, 2102212464 }
 0x4a7   :  { %v2434_v37 = vsub.s32 32, %v2433_v27  ;;  %v2438_v49 = vsub.s32 4294967266, %v2433_v27  ;;  %v2435_v13 = vshll.u32 %v2426_v60, %v2433_v27  ;;  %v3651_v18 = vsel %vm3645_vm5, %v3638_v52, 920167782 }
 0x4a8   :  { %v3652_v20 = vsel %vm3644_vm3, %v3635_v7, %v3651_v18  ;;  %v3654_v57 = vsel %vm3642_vm14, %v3632_v51, %v3635_v7  ;;  %v3655_v2 = vsel %vm3645_vm5, %v3641_v62, 1326507024  ;;  %v4030_v50 = vshrl.u32 %v4029_v31, 23 }
 0x4a9   :  { %v2436_v21 = vshrl.u32 %v2418_v3, %v2434_v37  ;;  %v2439_v0 = vadd.s32 127, %v2438_v49  ;;  %v3648_v24 = vsel %vm3644_vm3, %v3632_v51, %v3647_v39  ;;  %v3653_v60 = vsel %vm3643_vm8, %v3650_v5, %v3652_v20 }
 0x4aa   :  { %v3656_v3 = vsel %vm3644_vm3, %v3638_v52, %v3655_v2  ;;  %v14393_v40 = vmul.u32.u64.low %v14359_v17, %v3653_v60  ;;  %v14394_v44 = vmul.u32.u64.high %v14359_v17, %v3653_v60, %v14393_v40  ;;  %v14401_v7 = vsel %vm14378_vm0, 0, %v2449_v26 }
 0x4ab   :  { %v2437_v22 = vor.u32 %v2436_v21, %v2435_v13  ;;  %v2440_v25 = vshll.u32 %v2439_v0, 23  ;;  %v3657_v51 = vsel %vm3643_vm8, %v3654_v57, %v3656_v3  ;;  %v9216_v54 = vadd.s32 4294967169, %v4030_v50 }
 0x4ac   :  { %v3649_v27 = vsel %vm3643_vm8, %v3646_v61, %v3648_v24  ;;  %v14406_v52 = vmul.u32.u64.low %v14359_v17, %v3657_v51  ;;  %v14407_v37 = vmul.u32.u64.high %v14359_v17, %v3657_v51, %v14406_v52  ;;  %v9688_v13 = vunpack.i.l.bf16 %v14306_v63 }
 0x4ad   :  { %v2441_v31 = vor.u32 4788187, %v2440_v25  ;;  %v2444_v11 = vcvt.s32.f32 %v2437_v22  ;;  %v4036_v62 = vadd.s32 1, %v9216_v54  ;;  %v2455_v21 = vadd.s32 3, %v14401_v7 }
 0x4ae   :  { %v3668_v26 = vadd.s32 1, %v14394_v44  ;;  %v9803_v0 = vunpack.i.h.bf16 %v14344_v35  ;;  %8875 = vmatprep.mubr.f32.mxu1 %v9688_v13  ;;  %v9800_v18 = vunpack.i.l.bf16 %v14344_v35  ;;  %v3665_v63 = vmul.u32 %v14359_v17, %v3649_v27 }
 0x4af   :  { %v2442_v49 = vand.u32 2147483647, %v2441_v31  ;;  %vm4037_vm2 = vcmp.gt.s32.totalorder %v4036_v62, 0  ;;  %vm3667_vm12 = vc.u32 %v14407_v37, %v14393_v40  ;;  %v4026_v35 = vand.u32 2147483647, %v14352_v47 }
 0x4b0   :  { %v4038_v57 = vsel %vm4037_vm2, %v4036_v62, 0  ;;  %8796 = vmatmul.mubr.f32.gmra.mxu0 %v9803_v0  ;;  %v3669_v22 = vsel %vm3667_vm12, %v3668_v26, %v14394_v44  ;;  %8876 = vmatmul.mubr.f32.gmra.mxu1 %v9800_v18  ;;  %vm2038_vm7 = vweird.f32 %v14119_v28  ;;  %vm2041_vm13 = vcmp.lt.s32.totalorder %v14354_v56, 2 }
 0x4b1   :  { %v14410_v5 = vpop.eup %9973  ;;  %v2445_v61 = vmul.f32 %v2444_v11, %v2442_v49  ;;  %v3670_v25 = vadd.s32 %v3669_v22, %v3665_v63  ;;  %v14440_v3 = vand.u32 3, %v14341_v29  ;;  %v4040_v44 = vand.u32 31, %v4038_v57 }
 0x4b2   :  { %v14415_v39 = vpop.eup %9975  ;;  %v2046_v34 = vxor.u32 2147483648, %v14410_v5  ;;  %v14447_v54 = vand.u32 3, %v2455_v21  ;;  %v4033_v11 = vand.u32 8388607, %v4026_v35  ;;  %v4039_v27 = vshrl.u32 %v4038_v57, 5 }
 0x4b3   :  { %v2043_v20 = vxor.u32 2147483648, %v14415_v39  ;;  %v2446_v50 = vxor.u32 2147483648, %v2445_v61  ;;  %v3671_v56 = vadd.s32 536870912, %v3670_v25  ;;  %v4041_v52 = vsub.s32 32, %v4040_v44 }
 0x4b4   :  { %v2047_v2 = vsel %vm2045_vm6, %v2046_v34, %v14415_v39  ;;  %v4043_v49 = vshll.u32 %v14867_v43, %v4040_v44  ;;  %v4046_v62 = vshll.u32 %v14848_v1, %v4040_v44  ;;  %v4049_v21 = vshll.u32 %v14849_v36, %v4040_v44 }
 0x4b5   :  { %v2044_v17 = vsel %vm2042_vm11, %v14410_v5, %v2043_v20  ;;  %v2447_v60 = vsel %vm2364_vm4, %v2446_v50, %v2445_v61  ;;  %v14451_v29 = vshrl.u32 %v3671_v56, 30  ;;  %v4044_v16 = vshrl.u32 %v14848_v1, %v4041_v52 }
 0x4b6   :  { %v2048_v24 = vsel %vm2041_vm13, %v2044_v17, %v2047_v2  ;;  %v2450_v51 = vsel %vm14378_vm0, %v14153_v55, %v2447_v60  ;;  %v4047_v13 = vshrl.u32 %v14849_v36, %v4041_v52  ;;  %v4050_v26 = vshrl.u32 %v14819_v10, %v4041_v52 }
 0x4b7   :  { %v2049_v31 = vsel %vm2038_vm7, nan, %v2048_v24  ;;  %9977 = vcosq.f32 %v2450_v51  ;;  %v3673_v0 = vshll.u32 %v14451_v29, 30  ;;  %v4052_v61 = vshll.u32 %v14819_v10, %v4040_v44 }
 0x4b8   :  { %8495 = vxpose.xlu1.b32.cont [7/16] %v2049_v31, 128  ;;  %9979 = vsinq.f32 %v2450_v51  ;;  %v4053_v18 = vshrl.u32 %v14866_v46, %v4041_v52  ;;  %v4055_v63 = vshll.u32 %v14866_v46, %v4040_v44  ;;  %v4045_v57 = vor.u32 %v4044_v16, %v4043_v49 }
 0x4b9   :  { %v4048_v2 = vor.u32 %v4047_v13, %v4046_v62  ;;  %v4051_v50 = vor.u32 %v4050_v26, %v4049_v21  ;;  %v4056_v22 = vshrl.u32 %v14820_v41, %v4041_v52  ;;  %vm2871_vm1 = vcmp.eq.s32.totalorder %v14440_v3, 0 }
 0x4ba   :  { %v14465_v1 = vsub.s32 %v3670_v25, %v3673_v0  ;;  %v4054_v36 = vor.u32 %v4053_v18, %v4052_v61  ;;  %vm2874_vm10 = vcmp.eq.s32.totalorder %v14440_v3, 2  ;;  %v14469_v17 = vand.u32 3, %v14401_v7 }
 0x4bb   :  { %v4034_v10 = vor.u32 8388608, %v4033_v11  ;;  %v4057_v24 = vor.u32 %v4056_v22, %v4055_v63  ;;  %vm2461_vm15 = vcmp.eq.s32.totalorder %v14447_v54, 2  ;;  %vm4058_vm4 = vcmp.lt.s32.totalorder %v4039_v27, 1 }
 0x4bc   :  { %v3676_v46 = vsub.s32 0, %v14465_v1  ;;  %vm4061_vm0 = vcmp.lt.s32.totalorder %v4039_v27, 4  ;;  %vm4060_vm9 = vcmp.lt.s32.totalorder %v4039_v27, 3  ;;  %v4066_v60 = vsel %vm4058_vm4, %v4045_v57, %v4048_v2 }
 0x4bd   :  { %v4063_v41 = vsel %vm4061_vm0, %v4051_v50, 2102212464  ;;  %v4067_v25 = vsel %vm4061_vm0, %v4054_v36, 920167782  ;;  %vm2870_vm14 = vcmp.lt.s32.totalorder %v14440_v3, 2  ;;  %v4042_v7 = vshrl.u32 %v14867_v43, %v4041_v52 }
 0x4be   :  { %v9201_v44 = vmin.u32 %v3676_v46, %v14465_v1  ;;  %vm4059_vm8 = vcmp.lt.s32.totalorder %v4039_v27, 2  ;;  %v4068_v31 = vsel %vm4060_vm9, %v4051_v50, %v4067_v25  ;;  %vm2454_vm3 = vweird.f32 %v14153_v55 }
 0x4bf   :  { %v4069_v51 = vsel %vm4059_vm8, %v4066_v60, %v4068_v31  ;;  %v4070_v56 = vsel %vm4058_vm4, %v4048_v2, %v4051_v50  ;;  %v4071_v11 = vsel %vm4061_vm0, %v4057_v24, 1326507024  ;;  %v4074_v49 = vshll.u32 %v4034_v10, 8 }
 0x4c0   :  { %v2876_v62 = vsel %vm2874_vm10, %v2046_v34, %v14415_v39  ;;  %vm3283_vm5 = vcmp.eq.s32.totalorder %v14469_v17, 0  ;;  %vm3286_vm11 = vcmp.eq.s32.totalorder %v14469_v17, 2  ;;  %v3678_v43 = vclz %v9201_v44  ;;  %v9804_v34 = vpop.trf.xlu0 }
 0x4c1   :  { %v4062_v52 = vsel %vm4058_vm4, %v4042_v7, %v4045_v57  ;;  %v4064_v16 = vsel %vm4060_vm9, %v4048_v2, %v4063_v41  ;;  %v2873_v13 = vsel %vm2871_vm1, %v14410_v5, %v2043_v20  ;;  %v4072_v21 = vsel %vm4060_vm9, %v4054_v36, %v4071_v11  ;;  %v9697_v57 = vpop.trf.xlu1 }
 0x4c2   :  { %v14496_v26 = vmul.u32.u64.low %v4074_v49, %v4069_v51  ;;  %v14497_v0 = vmul.u32.u64.high %v4074_v49, %v4069_v51, %v14496_v26  ;;  %v9202_v18 = vadd.s32 4294967294, %v3678_v43  ;;  %v4073_v63 = vsel %vm4059_vm8, %v4070_v56, %v4072_v21 }
 0x4c3   :  { %vm3282_vm6 = vcmp.lt.s32.totalorder %v14469_v17, 2  ;;  %v4065_v39 = vsel %vm4059_vm8, %v4062_v52, %v4064_v16  ;;  %v14503_v22 = vmul.u32.u64.low %v4074_v49, %v4073_v63  ;;  %v14504_v5 = vmul.u32.u64.high %v4074_v49, %v4073_v63, %v14503_v22 }
 0x4c4   :  { %v9978_v61 = vpop.eup %9977  ;;  %vm9203_vm2 = vcmp.lt.s32.totalorder %v9202_v18, 0  ;;  %v9696_v36 = vunpack.i.h.bf16 %v14397_v23  ;;  %v9693_v10 = vunpack.i.l.bf16 %v14397_v23  ;;  %vm2458_vm12 = vcmp.eq.s32.totalorder %v14447_v54, 0 }
 0x4c5   :  { %v9980_v50 = vpop.eup %9979  ;;  %v2462_v2 = vxor.u32 2147483648, %v9978_v61  ;;  %v3681_v46 = vsel %vm9203_vm2, 0, %v9202_v18  ;;  %v4084_v41 = vadd.s32 1, %v14497_v0  ;;  %vm2457_vm13 = vcmp.lt.s32.totalorder %v14447_v54, 2  ;;  %v9809_v54 = vpop.trf.xlu0 }
 0x4c6   :  { %v2459_v20 = vxor.u32 2147483648, %v9980_v50  ;;  %v3666_v60 = vadd.s32 %v14393_v40, %v14407_v37  ;;  %v3682_v25 = vsub.s32 32, %v3681_v46  ;;  %8800 = vmatprep.mubr.f32.mxu0 %v9696_v36  ;;  %8880 = vmatprep.mubr.f32.mxu1 %v9693_v10  ;;  %v2877_v23 = vsel %vm2870_vm14, %v2873_v13, %v2876_v62  ;;  %v9702_v40 = vpop.trf.xlu1 }
 0x4c7   :  { %v2463_v24 = vsel %vm2461_vm15, %v2462_v2, %v9980_v50  ;;  %v3686_v7 = vsub.s32 4294967266, %v3681_v46  ;;  %v4081_v31 = vmul.u32 %v4074_v49, %v4065_v39  ;;  %v3683_v56 = vshll.u32 %v14465_v1, %v3681_v46 }
 0x4c8   :  { %v2460_v27 = vsel %vm2458_vm12, %v9978_v61, %v2459_v20  ;;  %v3684_v11 = vshrl.u32 %v3666_v60, %v3682_v25  ;;  %vm4083_vm1 = vc.u32 %v14504_v5, %v14496_v26  ;;  %v3285_v37 = vsel %vm3283_vm5, %v9978_v61, %v2459_v20 }
 0x4c9   :  { %v2464_v44 = vsel %vm2457_vm13, %v2460_v27, %v2463_v24  ;;  %v3288_v3 = vsel %vm3286_vm11, %v2462_v2, %v9980_v50  ;;  %v3687_v62 = vadd.s32 127, %v3686_v7  ;;  %v4085_v49 = vsel %vm4083_vm1, %v4084_v41, %v14497_v0  ;;  %v9814_v22 = vpop.trf.xlu0 }
 0x4ca   :  { %v2465_v51 = vsel %vm2454_vm3, nan, %v2464_v44  ;;  %v2878_v43 = vsel %vm2038_vm7, nan, %v2877_v23  ;;  %v3685_v1 = vor.u32 %v3684_v11, %v3683_v56  ;;  %v4086_v52 = vadd.s32 %v4085_v49, %v4081_v31  ;;  %v9707_v20 = vpop.trf.xlu1 }
 0x4cb   :  { %8496 = vxpose.xlu1.b32.cont [8/16] %v2465_v51, 128  ;;  %v3688_v16 = vshll.u32 %v3687_v62, 23  ;;  %v9808_v13 = vunpack.i.h.bf16 %v9804_v34  ;;  %v9805_v21 = vunpack.i.l.bf16 %v9804_v34  ;;  %v3289_v18 = vsel %vm3282_vm6, %v3285_v37, %v3288_v3 }
 0x4cc   :  { %v4087_v63 = vadd.s32 536870912, %v4086_v52  ;;  %v9701_v39 = vunpack.i.h.bf16 %v9697_v57  ;;  %v9698_v50 = vunpack.i.l.bf16 %v9697_v57  ;;  %v9813_v0 = vunpack.i.h.bf16 %v9809_v54 }
 0x4cd   :  { %v3689_v61 = vor.u32 4788187, %v3688_v16  ;;  %8801 = vmatmul.mubr.f32.gmra.mxu0 %v9808_v13  ;;  %8881 = vmatmul.mubr.f32.gmra.mxu1 %v9805_v21  ;;  %v9810_v28 = vunpack.i.l.bf16 %v9809_v54  ;;  %v3692_v10 = vcvt.s32.f32 %v3685_v1  ;;  %v3290_v17 = vsel %vm2454_vm3, nan, %v3289_v18  ;;  %v9819_v23 = vpop.trf.xlu0 }
 0x4ce   :  { %v14531_v2 = vshrl.u32 %v4087_v63, 30  ;;  %8805 = vmatprep.mubr.f32.mxu0 %v9701_v39  ;;  %8885 = vmatprep.mubr.f32.mxu1 %v9698_v50  ;;  %v9706_v24 = vunpack.i.h.bf16 %v9702_v40  ;;  %v9703_v46 = vunpack.i.l.bf16 %v9702_v40  ;;  %v9818_v27 = vunpack.i.h.bf16 %v9814_v22  ;;  %v9712_v56 = vpop.trf.xlu1 }
 0x4cf   :  { %8497 = vxpose.xlu1.b32.cont [9/16] %v2878_v43, 128  ;;  %v3690_v36 = vand.u32 2147483647, %v3689_v61  ;;  %v9815_v60 = vunpack.i.l.bf16 %v9814_v22  ;;  %vm3612_vm7 = vcmp.lt.s32.totalorder %v14314_v6, 0  ;;  %v3696_v44 = vsub.s32 4, %v14451_v29 }
 0x4d0   :  { %v4089_v34 = vshll.u32 %v14531_v2, 30  ;;  %vm3611_vm10 = vcmp.le.f32.partialorder %v3610_v19, 0.7853982  ;;  %v9711_v40 = vunpack.i.h.bf16 %v9707_v20  ;;  %v9708_v3 = vunpack.i.l.bf16 %v9707_v20 }
 0x4d1   :  { %v3693_v57 = vmul.f32 %v3692_v10, %v3690_v36  ;;  %8806 = vmatmul.mubr.f32.gmra.mxu0 %v9813_v0  ;;  %8886 = vmatmul.mubr.f32.gmra.mxu1 %v9810_v28  ;;  %v3697_v11 = vsel %vm3612_vm7, %v3696_v44, %v14451_v29  ;;  %v9823_v49 = vunpack.i.h.bf16 %v9819_v23  ;;  %v9820_v19 = vunpack.i.l.bf16 %v9819_v23  ;;  %v9824_v43 = vpop.trf.xlu0 }
 0x4d2   :  { %v4090_v41 = vsub.s32 %v4086_v52, %v4089_v34  ;;  %8810 = vmatprep.mubr.f32.mxu0 %v9706_v24  ;;  %8890 = vmatprep.mubr.f32.mxu1 %v9703_v46  ;;  %v14542_v62 = vsel %vm3611_vm10, 0, %v3697_v11  ;;  %v9716_v1 = vunpack.i.h.bf16 %v9712_v56  ;;  %v4082_v29 = vadd.s32 %v14496_v26, %v14504_v5  ;;  %v8633_v28 = vpop.trf.xlu1 }
 0x4d3   :  { %8498 = vxpose.xlu1.b32.cont [10/16] %v3290_v17, 128  ;;  %v3694_v25 = vxor.u32 2147483648, %v3693_v57  ;;  %v3703_v16 = vadd.s32 3, %v14542_v62  ;;  %v9713_v18 = vunpack.i.l.bf16 %v9712_v56  ;;  %v9828_v63 = vunpack.i.h.bf16 %v9824_v43 }
 0x4d4   :  { %v4092_v55 = vsub.s32 0, %v4090_v41  ;;  %v9825_v61 = vunpack.i.l.bf16 %v9824_v43  ;;  %v9638_v22 = vunpack.i.l.bf16 %v13585_v4  ;;  %v9750_v26 = vunpack.i.l.bf16 %v13616_v53 }
 0x4d5   :  { %v3695_v7 = vsel %vm3612_vm7, %v3694_v25, %v3693_v57  ;;  %8811 = vmatmul.mubr.f32.gmra.mxu0 %v9818_v27  ;;  %8891 = vmatmul.mubr.f32.gmra.mxu1 %v9815_v60  ;;  %v3704_v20 = vand.u32 3, %v3703_v16  ;;  %v9643_v34 = vunpack.i.l.bf16 %v13696_v38  ;;  %v9755_v27 = vunpack.i.l.bf16 %v13716_v58 }
 0x4d6   :  { %v3698_v31 = vsel %vm3611_vm10, %v14314_v6, %v3695_v7  ;;  %v9217_v51 = vmin.u32 %v4092_v55, %v4090_v41  ;;  %8815 = vmatprep.mubr.f32.mxu0 %v9711_v40  ;;  %8895 = vmatprep.mubr.f32.mxu1 %v9708_v3  ;;  %v9648_v25 = vunpack.i.l.bf16 %v13856_v42  ;;  %vm3702_vm14 = vweird.f32 %v14314_v6 }
 0x4d7   :  { %9981 = vcosq.f32 %v3698_v31  ;;  %vm3709_vm4 = vcmp.eq.s32.totalorder %v3704_v20, 2  ;;  %vm3706_vm0 = vcmp.eq.s32.totalorder %v3704_v20, 0  ;;  %vm3705_vm9 = vcmp.lt.s32.totalorder %v3704_v20, 2  ;;  %v14903_v20 = vld [vmem:[#allocation20_spill] sm:$0xff] }
 0x4d8   :  { %9983 = vsinq.f32 %v3698_v31  ;;  %v4094_v54 = vclz %v9217_v51  ;;  %vm4028_vm8 = vcmp.lt.s32.totalorder %v14352_v47, 0  ;;  %v4112_v58 = vsub.s32 4, %v14531_v2 }
 0x4d9   :  { %8816 = vmatmul.mubr.f32.gmra.mxu0 %v9823_v49  ;;  %8896 = vmatmul.mubr.f32.gmra.mxu1 %v9820_v19  ;;  %v9760_v7 = vunpack.i.l.bf16 %v13867_v32  ;;  %vm4027_vm3 = vcmp.le.f32.partialorder %v4026_v35, 0.7853982  ;;  %v9653_v31 = vunpack.i.l.bf16 %v13963_v9  ;;  %v9765_v11 = vunpack.i.l.bf16 %v13975_v14 }
 0x4da   :  { %v9218_v37 = vadd.s32 4294967294, %v4094_v54  ;;  %8820 = vmatprep.mubr.f32.mxu0 %v9716_v1  ;;  %8900 = vmatprep.mubr.f32.mxu1 %v9713_v18  ;;  %v4113_v56 = vsel %vm4028_vm8, %v4112_v58, %v14531_v2  ;;  %v9658_v54 = vunpack.i.l.bf16 %v14043_v15  ;;  %v9770_v35 = vunpack.i.l.bf16 %v14081_v12  ;;  %v14581_v2 = vpop.trf.xlu1  ;;  %v14912_v58 = vld [vmem:[#allocation11_spill] sm:$0xff] }
 0x4db   :  { %v4115_v32 = vsel %vm4027_vm3, 0, %v4113_v56  ;;  %v9663_v40 = vunpack.i.l.bf16 %v14083_v45  ;;  %v4533_v3 = vand.u32 3, %v14542_v62  ;;  %v9668_v14 = vunpack.i.l.bf16 %v14107_v30  ;;  %v14631_v56 = vld [vmem:[%s14705_s2] ss:$0 sm:$0xff]  ;;  %s10073_s2 = smov [#allocation7]  }
 0x4dc   :  { %vm9219_vm15 = vcmp.lt.s32.totalorder %v9218_v37, 0  ;;  %v4119_v9 = vadd.s32 3, %v4115_v32  ;;  %v9780_v19 = vunpack.i.l.bf16 %v14132_v33  ;;  %v9673_v45 = vunpack.i.l.bf16 %v14137_v48  ;;  %s9051_s6 = sshll.u32 %s10073_s2, 4  ;;  %s9052_s6 = int_to_ptr.vmem [resolvable:$true] %s9051_s6 }
 0x4dd   :  { %v4097_v52 = vsel %vm9219_vm15, 0, %v9218_v37  ;;  %8821 = vmatmul.mubr.f32.gmra.mxu0 %v9828_v63  ;;  %8901 = vmatmul.mubr.f32.gmra.mxu1 %v9825_v61  ;;  %v9775_v37 = vunpack.i.l.bf16 %v14105_v8  ;;  %vm4535_vm5 = vcmp.eq.s32.totalorder %v4533_v3, 0  ;;  %vm4538_vm6 = vcmp.eq.s32.totalorder %v4533_v3, 2  ;;  %s10033_s7 = scalar_lea.vmem %s9052_s6, 6400  ;;  %p10038_p11 = scmp.lt.s32.totalorder %s9052_s6, %s9052_s6 }
 0x4de   :  { %v4098_v13 = vsub.s32 32, %v4097_v52  ;;  %v4102_v21 = vsub.s32 4294967266, %v4097_v52  ;;  %v4099_v39 = vshll.u32 %v4090_v41, %v4097_v52  ;;  %8825 = vmatprep.mubr.f32.mxu0 %v9638_v22  ;;  %8905 = vmatprep.mubr.f32.mxu1 %v8633_v28  ;;  %v4120_v49 = vand.u32 3, %v4119_v9  ;;  %v14587_v52 = vpop.trf.xlu1  ;;  %p10034_p10 = scmp.ne.s32.totalorder %s9052_s6, %s10033_s7  ;;  %p10039_p12 = scmp.lt.s32.totalorder %s10033_s7, %s10033_s7 }
 0x4df   :  { %v5367_v8 = vadd.s32 3, %v12674_v59  ;;  %v4945_v62 = vand.u32 3, %v4115_v32  ;;  %vm4118_vm13 = vweird.f32 %v14352_v47  ;;  %vm4534_vm1 = vcmp.lt.s32.totalorder %v4533_v3, 2 }
 0x4e0   :  { %v4100_v50 = vshrl.u32 %v4082_v29, %v4098_v13  ;;  %v4103_v0 = vadd.s32 127, %v4102_v21  ;;  %vm4125_vm11 = vcmp.eq.s32.totalorder %v4120_v49, 2  ;;  %vm4121_vm2 = vcmp.lt.s32.totalorder %v4120_v49, 2  ;;  %v14900_v29 = vld [vmem:[#allocation18_spill] sm:$0xff]  ;;  %v14901_v21 = vld [vmem:[#allocation19_spill] sm:$0xff]  ;;  %p10040_p13 = por %p10039_p12, %p10038_p11 }
 0x4e1   :  { %8826 = vmatmul.mubr.f32.gmra.mxu0 %v9750_v26  ;;  %vm4122_vm12 = vcmp.eq.s32.totalorder %v4120_v49, 0  ;;  %v9785_v13 = vunpack.i.l.bf16 %v14900_v29  ;;  %v9678_v18 = vunpack.i.l.bf16 %v14901_v21  ;;  %v5368_v61 = vand.u32 3, %v5367_v8 }
 0x4e2   :  { %v4101_v36 = vor.u32 %v4100_v50, %v4099_v39  ;;  %v4104_v10 = vshll.u32 %v4103_v0, 23  ;;  %8830 = vmatprep.mubr.f32.mxu0 %v9643_v34  ;;  %vm4947_vm7 = vcmp.eq.s32.totalorder %v4945_v62, 0  ;;  %vm4950_vm10 = vcmp.eq.s32.totalorder %v4945_v62, 2  ;;  %v14902_v50 = vld [vmem:[#allocation15_spill] sm:$0xff]  ;;  %v14904_v34 = vld [vmem:[#allocation14_spill] sm:$0xff]  ;;  %p10041_p0 = pnand %p10040_p13, %p10034_p10 }
 0x4e3   :  { %v5783_v0 = vadd.s32 3, %v14902_v50  ;;  %vm4946_vm15 = vcmp.lt.s32.totalorder %v4945_v62, 2 }
 0x4e4   :  { %v14549_v5 = vpop.eup %9981  ;;  %v4105_v17 = vor.u32 4788187, %v4104_v10  ;;  %v4108_v41 = vcvt.s32.f32 %v4101_v36  ;;  %v9790_v36 = vunpack.i.l.bf16 %v14903_v20  ;;  %v14602_v10 = vpop.trf.xlu1 }
 0x4e5   :  { %v14552_v24 = vpop.eup %9983  ;;  %v3710_v46 = vxor.u32 2147483648, %v14549_v5  ;;  %8831 = vmatmul.mubr.f32.gmra.mxu0 %v9755_v27 }
 0x4e6   :  { %v3707_v4 = vxor.u32 2147483648, %v14552_v24  ;;  %v4106_v57 = vand.u32 2147483647, %v4105_v17  ;;  %8835 = vmatprep.mubr.f32.mxu0 %v9648_v25  ;;  %v5784_v17 = vand.u32 3, %v5783_v0  ;;  %v14910_v25 = vld [vmem:[#allocation16_spill] sm:$0xff] }
 0x4e7   :  { %v3711_v53 = vsel %vm3709_vm4, %v3710_v46, %v14552_v24  ;;  %v4540_v48 = vsel %vm4538_vm6, %v3710_v46, %v14552_v24  ;;  %vm5370_vm4 = vcmp.eq.s32.totalorder %v5368_v61, 0  ;;  %v14905_v24 = vxor.u32 2147483648, %v14904_v34  ;;  %v14906_v46 = vld [vmem:[#allocation13_spill] sm:$0xff] }
 0x4e8   :  { %v3708_v38 = vsel %vm3706_vm0, %v14549_v5, %v3707_v4  ;;  %v4109_v60 = vmul.f32 %v4108_v41, %v4106_v57  ;;  %v4537_v33 = vsel %vm4535_vm5, %v14549_v5, %v3707_v4  ;;  %vm5373_vm0 = vcmp.eq.s32.totalorder %v5368_v61, 2  ;;  %v14614_v27 = vpop.trf.xlu1 }
 0x4e9   :  { %v3712_v44 = vsel %vm3705_vm9, %v3708_v38, %v3711_v53  ;;  %8836 = vmatmul.mubr.f32.gmra.mxu0 %v9760_v7  ;;  %v4541_v39 = vsel %vm4534_vm1, %v4537_v33, %v4540_v48  ;;  %v5372_v4 = vsel %vm5370_vm4, %v14906_v46, %v14905_v24  ;;  %v14907_v57 = vxor.u32 2147483648, %v14906_v46  ;;  %v14908_v38 = vld [vmem:[#allocation17_spill] sm:$0xff] }
 0x4ea   :  { %v3713_v55 = vsel %vm3702_vm14, nan, %v3712_v44  ;;  %v4110_v23 = vxor.u32 2147483648, %v4109_v60  ;;  %8840 = vmatprep.mubr.f32.mxu0 %v9653_v31  ;;  %v4542_v26 = vsel %vm3702_vm14, nan, %v4541_v39  ;;  %vm5369_vm9 = vcmp.lt.s32.totalorder %v5368_v61, 2  ;;  %v14914_v31 = vld [vmem:[#allocation12_spill] sm:$0xff] }
 0x4eb   :  { %8499 = vxpose.xlu1.b32.cont [11/16] %v3713_v55, 128  ;;  %v5375_v41 = vsel %vm5373_vm0, %v14907_v57, %v14904_v34  ;;  %vm5786_vm14 = vcmp.eq.s32.totalorder %v5784_v17, 0  ;;  %v14911_v55 = vxor.u32 2147483648, %v14910_v25  ;;  %vm5785_vm5 = vcmp.lt.s32.totalorder %v5784_v17, 2 }
 0x4ec   :  { %v4111_v42 = vsel %vm4028_vm8, %v4110_v23, %v4109_v60  ;;  %v5376_v6 = vsel %vm5369_vm9, %v5372_v4, %v5375_v41  ;;  %vm5789_vm8 = vcmp.eq.s32.totalorder %v5784_v17, 2  ;;  %v14909_v60 = vxor.u32 2147483648, %v14908_v38 }
 0x4ed   :  { %v4114_v51 = vsel %vm4027_vm3, %v14352_v47, %v4111_v42  ;;  %8841 = vmatmul.mubr.f32.gmra.mxu0 %v9765_v11  ;;  %v5791_v23 = vsel %vm5789_vm8, %v14911_v55, %v14908_v38  ;;  %vm14913_vm3 = vweird.f32 %v14912_v58  ;;  %v14624_v42 = vpop.trf.xlu1  ;;  %v8747_v11 = vpop.f32.mrf.mxu0 }
 0x4ee   :  { %9985 = vcosq.f32 %v4114_v51  ;;  %8845 = vmatprep.mubr.f32.mxu0 %v9658_v54  ;;  %v5788_v44 = vsel %vm5786_vm14, %v14910_v25, %v14909_v60  ;;  %v5377_v7 = vsel %vm14913_vm3, nan, %v5376_v6  ;;  %v8748_v54 = vadd.f32 %v14631_v56, %v8747_v11 }
 0x4ef   :  { %9987 = vsinq.f32 %v4114_v51  ;;  %v5792_v47 = vsel %vm5785_vm5, %v5788_v44, %v5791_v23 }
 0x4f0   :  { %8996 = vst [vmem:[#allocation7] sm:$0xff] %v8748_v54 }
 0x4f1   :  { %8846 = vmatmul.mubr.f32.gmra.mxu0 %v9770_v35  ;;  %v14634_v32 = vpop.trf.xlu1  ;;  %v8749_v35 = vpop.f32.mrf.mxu0 }
 0x4f2   :  { %8850 = vmatprep.mubr.f32.mxu0 %v9663_v40 }
 0x4f3   :  { %v8752_v40 = vpop.f32.mrf.mxu0 }
 0x4f4   :  { %v8753_v9 = vadd.f32 %v14631_v56, %v8752_v40 }
 0x4f5   :  { %8851 = vmatmul.mubr.f32.gmra.mxu0 %v9775_v37  ;;  %v8754_v37 = vpop.f32.mrf.mxu0  ;;  %v14637_v3 = vpop.trf.xlu1 }
 0x4f6   :  { %8855 = vmatprep.mubr.f32.mxu0 %v9668_v14  ;;  %8997 = vst [vmem:[#allocation7 + $0x8] sm:$0xff] %v8753_v9 }
 0x4f9   :  { %8856 = vmatmul.mubr.f32.gmra.mxu0 %v9780_v19 }
 0x4fa   :  { %8860 = vmatprep.mubr.f32.mxu0 %v9673_v45 }
 0x4fb   :  { %v9986_v15 = vpop.eup %9985 }
 0x4fc   :  { %v9988_v12 = vpop.eup %9987  ;;  %v4126_v43 = vxor.u32 2147483648, %v9986_v15 }
 0x4fd   :  { %v4123_v1 = vxor.u32 2147483648, %v9988_v12  ;;  %8861 = vmatmul.mubr.f32.gmra.mxu0 %v9785_v13 }
 0x4fe   :  { %v4127_v30 = vsel %vm4125_vm11, %v4126_v43, %v9988_v12  ;;  %8865 = vmatprep.mubr.f32.mxu0 %v9678_v18  ;;  %v4952_v22 = vsel %vm4950_vm10, %v4126_v43, %v9988_v12  ;;  %vm14915_vm11 = vweird.f32 %v14914_v31  ;;  %v8757_v14 = vpop.f32.mrf.mxu0  ;;  %v8641_v43 = vpop.trf.xlu1 }
 0x4ff   :  { %v4124_v16 = vsel %vm4122_vm12, %v9986_v15, %v4123_v1  ;;  %v4949_v28 = vsel %vm4947_vm7, %v9986_v15, %v4123_v1  ;;  %v5793_v51 = vsel %vm14915_vm11, nan, %v5792_v47  ;;  %v8758_v49 = vadd.f32 %v14631_v56, %v8757_v14  ;;  %v8665_v31 = vpop.trf.xlu0 }
 0x500   :  { %v4128_v59 = vsel %vm4121_vm2, %v4124_v16, %v4127_v30  ;;  %v4953_v5 = vsel %vm4946_vm15, %v4949_v28, %v4952_v22  ;;  %v8759_v15 = vpop.f32.mrf.mxu0 }
 0x501   :  { %v4129_v63 = vsel %vm4118_vm13, nan, %v4128_v59  ;;  %8866 = vmatmul.mubr.f32.gmra.mxu0 %v9790_v36  ;;  %v4954_v53 = vsel %vm4118_vm13, nan, %v4953_v5  ;;  %8998 = vst [vmem:[#allocation7 + $0x10] sm:$0xff] %v8758_v49 }
 0x502   :  { %8500 = vxpose.xlu1.b32.cont [12/16] %v4129_v63, 128  ;;  %v14642_v62 = vpop.trf.xlu1 }
 0x503   :  { %v8666_v54 = vpop.trf.xlu0 }
 0x506   :  { %8501 = vxpose.xlu1.b32.cont [13/16] %v4542_v26, 128  ;;  %v8643_v59 = vpop.trf.xlu1 }
 0x507   :  { %v8537_v35 = vpop.trf.xlu0 }
 0x50a   :  { %8502 = vxpose.xlu1.b32.cont [14/16] %v4954_v53, 128  ;;  %v8644_v18 = vpop.trf.xlu1 }
 0x50e   :  { %8503 = vxpose.xlu1.b32.cont [15/16] %v5377_v7, 128  ;;  %v8645_v63 = vpop.trf.xlu1 }
 0x512   :  { %8504 = vxpose.xlu1.b32.end [16/16] %v5793_v51, 128  ;;  %v8646_v22 = vpop.trf.xlu1 }
 0x516   :  { %v8647_v36 = vpop.trf.xlu1 }
 0x51a   :  { %v8648_v26 = vpop.trf.xlu1 }
 0x51b   :  { %v8762_v19 = vpop.f32.mrf.mxu0 }
 0x51c   :  { %v8763_v12 = vadd.f32 %v14631_v56, %v8762_v19 }
 0x51d   :  { %v8764_v45 = vpop.f32.mrf.mxu0 }
 0x51e   :  { %8999 = vst [vmem:[#allocation7 + $0x18] sm:$0xff] %v8763_v12 }
 0x51f   :  { %v8767_v1 = vpop.f32.mrf.mxu0 }
 0x520   :  { %v8768_v8 = vadd.f32 %v14631_v56, %v8767_v1 }
 0x521   :  { %v8769_v30 = vpop.f32.mrf.mxu0 }
 0x522   :  { %9000 = vst [vmem:[#allocation7 + $0x20] sm:$0xff] %v8768_v8  ;;  %v8538_v8 = vpop.trf.xlu0 }
 0x523   :  { %v8772_v16 = vpop.f32.mrf.mxu0 }
 0x524   :  { %v8773_v33 = vadd.f32 %v14631_v56, %v8772_v16 }
 0x525   :  { %v8774_v48 = vpop.f32.mrf.mxu0 }
 0x526   :  { %9001 = vst [vmem:[#allocation7 + $0x28] sm:$0xff] %v8773_v33 }
 0x527   :  { %v8777_v29 = vpop.f32.mrf.mxu0 }
 0x528   :  { %v8778_v13 = vadd.f32 %v14631_v56, %v8777_v29 }
 0x529   :  { %v8779_v21 = vpop.f32.mrf.mxu0 }
 0x52a   :  { %9002 = vst [vmem:[#allocation7 + $0x30] sm:$0xff] %v8778_v13 }
 0x53d   :  { %v8782_v61 = vpop.f32.mrf.mxu0 }
 0x53e   :  { %v8783_v39 = vadd.f32 %v14631_v56, %v8782_v61 }
 0x53f   :  { %v8784_v50 = vpop.f32.mrf.mxu0 }
 0x540   :  { %9003 = vst [vmem:[#allocation7 + $0x38] sm:$0xff] %v8783_v39 }
 0x541   :  { %v8787_v0 = vpop.f32.mrf.mxu0 }
 0x542   :  { %v8788_v28 = vadd.f32 %v14631_v56, %v8787_v0 }
 0x543   :  { %v8789_v20 = vpop.f32.mrf.mxu0 }
 0x544   :  { %9004 = vst [vmem:[#allocation7 + $0x40] sm:$0xff] %v8788_v28 }
 0x552   :  { %v8505_v5 = vpop.trf.xlu1 }
 0x553   :  { %8906 = vmatmul.mubr.f32.gmra.mxu1 %v8505_v5 }
 0x554   :  { %8910 = vmatprep.mubr.f32.mxu1 %v14581_v2 }
 0x556   :  { %v8506_v34 = vpop.trf.xlu1 }
 0x557   :  { %v8792_v17 = vpop.f32.mrf.mxu0  ;;  %8911 = vmatmul.mubr.f32.gmra.mxu1 %v8506_v34 }
 0x558   :  { %v8793_v24 = vadd.f32 %v14631_v56, %v8792_v17  ;;  %v8872_v46 = vpop.f32.mrf.mxu1  ;;  %8915 = vmatprep.mubr.f32.mxu1 %v14587_v52 }
 0x559   :  { %v8794_v4 = vpop.f32.mrf.mxu0  ;;  %v8873_v57 = vadd.f32 %v14631_v56, %v8872_v46 }
 0x55a   :  { %9005 = vst [vmem:[#allocation7 + $0x48] sm:$0xff] %v8793_v24  ;;  %v8874_v41 = vpop.f32.mrf.mxu1  ;;  %v8507_v53 = vpop.trf.xlu1 }
 0x55b   :  { %9021 = vst [vmem:[#allocation7 + $0xc8] sm:$0xff] %v8873_v57  ;;  %8916 = vmatmul.mubr.f32.gmra.mxu1 %v8507_v53 }
 0x55c   :  { %8920 = vmatprep.mubr.f32.mxu1 %v14602_v10 }
 0x55e   :  { %v8508_v6 = vpop.trf.xlu1 }
 0x55f   :  { %8921 = vmatmul.mubr.f32.gmra.mxu1 %v8508_v6 }
 0x560   :  { %8925 = vmatprep.mubr.f32.mxu1 %v14614_v27 }
 0x562   :  { %v8509_v2 = vpop.trf.xlu1 }
 0x563   :  { %8926 = vmatmul.mubr.f32.gmra.mxu1 %v8509_v2 }
 0x564   :  { %8930 = vmatprep.mubr.f32.mxu1 %v14624_v42 }
 0x566   :  { %v8510_v38 = vpop.trf.xlu1 }
 0x567   :  { %8931 = vmatmul.mubr.f32.gmra.mxu1 %v8510_v38 }
 0x568   :  { %8935 = vmatprep.mubr.f32.mxu1 %v14634_v32 }
 0x56a   :  { %v8511_v52 = vpop.trf.xlu1 }
 0x56b   :  { %8936 = vmatmul.mubr.f32.gmra.mxu1 %v8511_v52 }
 0x56c   :  { %8940 = vmatprep.mubr.f32.mxu1 %v14637_v3 }
 0x56e   :  { %v8512_v60 = vpop.trf.xlu1 }
 0x56f   :  { %8941 = vmatmul.mubr.f32.gmra.mxu1 %v8512_v60 }
 0x570   :  { %8945 = vmatprep.mubr.f32.mxu1 %v8641_v43  ;;  %v8797_v10 = vpop.f32.mrf.mxu0  ;;  %v8877_v44 = vpop.f32.mrf.mxu1 }
 0x571   :  { %v8798_v25 = vadd.f32 %v14631_v56, %v8797_v10  ;;  %v8878_v23 = vadd.f32 %v14631_v56, %v8877_v44 }
 0x572   :  { %v8513_v27 = vpop.trf.xlu1  ;;  %v8799_v55 = vpop.f32.mrf.mxu0 }
 0x573   :  { %8946 = vmatmul.mubr.f32.gmra.mxu1 %v8513_v27  ;;  %9006 = vst [vmem:[#allocation7 + $0x50] sm:$0xff] %v8798_v25  ;;  %v8879_v58 = vpop.f32.mrf.mxu1  ;;  %9022 = vst [vmem:[#allocation7 + $0xd0] sm:$0xff] %v8878_v23 }
 0x574   :  { %8950 = vmatprep.mubr.f32.mxu1 %v14642_v62 }
 0x576   :  { %v8514_v7 = vpop.trf.xlu1 }
 0x577   :  { %8951 = vmatmul.mubr.f32.gmra.mxu1 %v8514_v7 }
 0x578   :  { %8955 = vmatprep.mubr.f32.mxu1 %v8643_v59 }
 0x57a   :  { %v8515_v47 = vpop.trf.xlu1 }
 0x57b   :  { %8956 = vmatmul.mubr.f32.gmra.mxu1 %v8515_v47 }
 0x57c   :  { %8960 = vmatprep.mubr.f32.mxu1 %v8644_v18 }
 0x57e   :  { %v8516_v42 = vpop.trf.xlu1 }
 0x57f   :  { %8961 = vmatmul.mubr.f32.gmra.mxu1 %v8516_v42 }
 0x580   :  { %8965 = vmatprep.mubr.f32.mxu1 %v8645_v63 }
 0x582   :  { %v8517_v51 = vpop.trf.xlu1 }
 0x583   :  { %8966 = vmatmul.mubr.f32.gmra.mxu1 %v8517_v51 }
 0x584   :  { %8970 = vmatprep.mubr.f32.mxu1 %v8646_v22 }
 0x586   :  { %v8518_v11 = vpop.trf.xlu1 }
 0x587   :  { %8971 = vmatmul.mubr.f32.gmra.mxu1 %v8518_v11 }
 0x588   :  { %8975 = vmatprep.mubr.f32.mxu1 %v8647_v36 }
 0x58a   :  { %v8519_v32 = vpop.trf.xlu1 }
 0x58b   :  { %8976 = vmatmul.mubr.f32.gmra.mxu1 %v8519_v32 }
 0x58c   :  { %8980 = vmatprep.mubr.f32.mxu1 %v8648_v26 }
 0x58d   :  { %v8802_v40 = vpop.f32.mrf.mxu0  ;;  %v8882_v3 = vpop.f32.mrf.mxu1 }
 0x58e   :  { %v8520_v9 = vpop.trf.xlu1  ;;  %v8803_v37 = vadd.f32 %v14631_v56, %v8802_v40  ;;  %v8883_v49 = vadd.f32 %v14631_v56, %v8882_v3 }
 0x58f   :  { %8981 = vmatmul.mubr.f32.gmra.mxu1 %v8520_v9  ;;  %v8804_v14 = vpop.f32.mrf.mxu0  ;;  %v8884_v15 = vpop.f32.mrf.mxu1 }
 0x590   :  { %8985 = vmatprep.mubr.f32.mxu1 %v8665_v31  ;;  %9007 = vst [vmem:[#allocation7 + $0x58] sm:$0xff] %v8803_v37  ;;  %9023 = vst [vmem:[#allocation7 + $0xd8] sm:$0xff] %v8883_v49 }
 0x591   :  { %v8807_v19 = vpop.f32.mrf.mxu0  ;;  %v8887_v43 = vpop.f32.mrf.mxu1 }
 0x592   :  { %v8808_v12 = vadd.f32 %v14631_v56, %v8807_v19  ;;  %v8888_v1 = vadd.f32 %v14631_v56, %v8887_v43 }
 0x593   :  { %8986 = vmatmul.mubr.f32.gmra.mxu1 %v8537_v35  ;;  %v8809_v45 = vpop.f32.mrf.mxu0  ;;  %v8889_v30 = vpop.f32.mrf.mxu1 }
 0x594   :  { %8990 = vmatprep.mubr.f32.mxu1 %v8666_v54  ;;  %9008 = vst [vmem:[#allocation7 + $0x60] sm:$0xff] %v8808_v12  ;;  %9024 = vst [vmem:[#allocation7 + $0xe0] sm:$0xff] %v8888_v1 }
 0x595   :  { %v8812_v62 = vpop.f32.mrf.mxu0  ;;  %v8892_v33 = vpop.f32.mrf.mxu1 }
 0x596   :  { %v8813_v16 = vadd.f32 %v14631_v56, %v8812_v62  ;;  %v8893_v29 = vadd.f32 %v14631_v56, %v8892_v33 }
 0x597   :  { %8991 = vmatmul.mubr.f32.gmra.mxu1 %v8538_v8  ;;  %v8814_v48 = vpop.f32.mrf.mxu0  ;;  %v8894_v13 = vpop.f32.mrf.mxu1 }
 0x598   :  { %9009 = vst [vmem:[#allocation7 + $0x68] sm:$0xff] %v8813_v16  ;;  %9025 = vst [vmem:[#allocation7 + $0xe8] sm:$0xff] %v8893_v29 }
 0x599   :  { %v8817_v59 = vpop.f32.mrf.mxu0  ;;  %v8897_v21 = vpop.f32.mrf.mxu1 }
 0x59a   :  { %v8818_v18 = vadd.f32 %v14631_v56, %v8817_v59  ;;  %v8898_v63 = vadd.f32 %v14631_v56, %v8897_v21 }
 0x59b   :  { %v8819_v61 = vpop.f32.mrf.mxu0  ;;  %v8899_v39 = vpop.f32.mrf.mxu1 }
 0x59c   :  { %9010 = vst [vmem:[#allocation7 + $0x70] sm:$0xff] %v8818_v18  ;;  %9026 = vst [vmem:[#allocation7 + $0xf0] sm:$0xff] %v8898_v63 }
 0x59d   :  { %v8822_v50 = vpop.f32.mrf.mxu0  ;;  %v8902_v28 = vpop.f32.mrf.mxu1 }
 0x59e   :  { %v8823_v0 = vadd.f32 %v14631_v56, %v8822_v50  ;;  %v8903_v20 = vadd.f32 %v14631_v56, %v8902_v28 }
 0x59f   :  { %v8824_v22 = vpop.f32.mrf.mxu0  ;;  %v8904_v36 = vpop.f32.mrf.mxu1 }
 0x5a0   :  { %9011 = vst [vmem:[#allocation7 + $0x78] sm:$0xff] %v8823_v0  ;;  %9027 = vst [vmem:[#allocation7 + $0xf8] sm:$0xff] %v8903_v20 }
 0x5a1   :  { %v8827_v26 = vpop.f32.mrf.mxu0 }
 0x5a2   :  { %v8828_v5 = vadd.f32 %v14631_v56, %v8827_v26 }
 0x5a3   :  { %v8829_v17 = vpop.f32.mrf.mxu0 }
 0x5a4   :  { %9012 = vst [vmem:[#allocation7 + $0x80] sm:$0xff] %v8828_v5 }
 0x5a5   :  { %v8832_v34 = vpop.f32.mrf.mxu0 }
 0x5a6   :  { %v8833_v24 = vadd.f32 %v14631_v56, %v8832_v34 }
 0x5a7   :  { %v8834_v46 = vpop.f32.mrf.mxu0 }
 0x5a8   :  { %9013 = vst [vmem:[#allocation7 + $0x88] sm:$0xff] %v8833_v24 }
 0x5a9   :  { %v8837_v4 = vpop.f32.mrf.mxu0 }
 0x5aa   :  { %v8838_v57 = vadd.f32 %v14631_v56, %v8837_v4 }
 0x5ab   :  { %v8839_v41 = vpop.f32.mrf.mxu0 }
 0x5ac   :  { %9014 = vst [vmem:[#allocation7 + $0x90] sm:$0xff] %v8838_v57 }
 0x5ad   :  { %v8842_v53 = vpop.f32.mrf.mxu0 }
 0x5ae   :  { %v8843_v6 = vadd.f32 %v14631_v56, %v8842_v53 }
 0x5af   :  { %v8844_v2 = vpop.f32.mrf.mxu0 }
 0x5b0   :  { %9015 = vst [vmem:[#allocation7 + $0x98] sm:$0xff] %v8843_v6 }
 0x5b1   :  { %v8847_v38 = vpop.f32.mrf.mxu0 }
 0x5b2   :  { %v8848_v52 = vadd.f32 %v14631_v56, %v8847_v38 }
 0x5b3   :  { %v8849_v60 = vpop.f32.mrf.mxu0 }
 0x5b4   :  { %9016 = vst [vmem:[#allocation7 + $0xa0] sm:$0xff] %v8848_v52 }
 0x5b5   :  { %v8852_v10 = vpop.f32.mrf.mxu0 }
 0x5b6   :  { %v8853_v25 = vadd.f32 %v14631_v56, %v8852_v10 }
 0x5b7   :  { %v8854_v44 = vpop.f32.mrf.mxu0 }
 0x5b8   :  { %9017 = vst [vmem:[#allocation7 + $0xa8] sm:$0xff] %v8853_v25 }
 0x5b9   :  { %v8857_v27 = vpop.f32.mrf.mxu0 }
 0x5ba   :  { %v8858_v55 = vadd.f32 %v14631_v56, %v8857_v27 }
 0x5bb   :  { %v8859_v23 = vpop.f32.mrf.mxu0 }
 0x5bc   :  { %9018 = vst [vmem:[#allocation7 + $0xb0] sm:$0xff] %v8858_v55 }
 0x5bd   :  { %v8862_v58 = vpop.f32.mrf.mxu0 }
 0x5be   :  { %v8863_v7 = vadd.f32 %v14631_v56, %v8862_v58 }
 0x5bf   :  { %v8864_v47 = vpop.f32.mrf.mxu0 }
 0x5c0   :  { %9019 = vst [vmem:[#allocation7 + $0xb8] sm:$0xff] %v8863_v7 }
 0x5c1   :  { %v8867_v42 = vpop.f32.mrf.mxu0 }
 0x5c2   :  { %v8868_v31 = vadd.f32 %v14631_v56, %v8867_v42 }
 0x5c3   :  { %v8869_v51 = vpop.f32.mrf.mxu0 }
 0x5c4   :  { %9020 = vst [vmem:[#allocation7 + $0xc0] sm:$0xff] %v8868_v31 }
 0x613   :  { %v8907_v11 = vpop.f32.mrf.mxu1 }
 0x614   :  { %v8908_v54 = vadd.f32 %v14631_v56, %v8907_v11 }
 0x615   :  { %v8909_v32 = vpop.f32.mrf.mxu1 }
 0x616   :  { %9028 = vst [vmem:[#allocation7 + $0x100] sm:$0xff] %v8908_v54 }
 0x617   :  { %v8912_v35 = vpop.f32.mrf.mxu1 }
 0x618   :  { %v8913_v40 = vadd.f32 %v14631_v56, %v8912_v35 }
 0x619   :  { %v8914_v9 = vpop.f32.mrf.mxu1 }
 0x61a   :  { %9029 = vst [vmem:[#allocation7 + $0x108] sm:$0xff] %v8913_v40 }
 0x61b   :  { %v8917_v37 = vpop.f32.mrf.mxu1 }
 0x61c   :  { %v8918_v3 = vadd.f32 %v14631_v56, %v8917_v37 }
 0x61d   :  { %v8919_v14 = vpop.f32.mrf.mxu1 }
 0x61e   :  { %9030 = vst [vmem:[#allocation7 + $0x110] sm:$0xff] %v8918_v3 }
 0x61f   :  { %v8922_v49 = vpop.f32.mrf.mxu1 }
 0x620   :  { %v8923_v15 = vadd.f32 %v14631_v56, %v8922_v49 }
 0x621   :  { %v8924_v19 = vpop.f32.mrf.mxu1 }
 0x622   :  { %9031 = vst [vmem:[#allocation7 + $0x118] sm:$0xff] %v8923_v15 }
 0x623   :  { %v8927_v12 = vpop.f32.mrf.mxu1 }
 0x624   :  { %v8928_v43 = vadd.f32 %v14631_v56, %v8927_v12 }
 0x625   :  { %v8929_v45 = vpop.f32.mrf.mxu1 }
 0x626   :  { %9032 = vst [vmem:[#allocation7 + $0x120] sm:$0xff] %v8928_v43 }
 0x627   :  { %v8932_v1 = vpop.f32.mrf.mxu1 }
 0x628   :  { %v8933_v8 = vadd.f32 %v14631_v56, %v8932_v1 }
 0x629   :  { %v8934_v30 = vpop.f32.mrf.mxu1 }
 0x62a   :  { %9033 = vst [vmem:[#allocation7 + $0x128] sm:$0xff] %v8933_v8 }
 0x62b   :  { %v8937_v62 = vpop.f32.mrf.mxu1 }
 0x62c   :  { %v8938_v16 = vadd.f32 %v14631_v56, %v8937_v62 }
 0x62d   :  { %v8939_v33 = vpop.f32.mrf.mxu1 }
 0x62e   :  { %9034 = vst [vmem:[#allocation7 + $0x130] sm:$0xff] %v8938_v16 }
 0x62f   :  { %v8942_v48 = vpop.f32.mrf.mxu1 }
 0x630   :  { %v8943_v29 = vadd.f32 %v14631_v56, %v8942_v48 }
 0x631   :  { %v8944_v13 = vpop.f32.mrf.mxu1 }
 0x632   :  { %9035 = vst [vmem:[#allocation7 + $0x138] sm:$0xff] %v8943_v29 }
 0x633   :  { %v8947_v59 = vpop.f32.mrf.mxu1 }
 0x634   :  { %v8948_v21 = vadd.f32 %v14631_v56, %v8947_v59 }
 0x635   :  { %v8949_v18 = vpop.f32.mrf.mxu1 }
 0x636   :  { %9036 = vst [vmem:[#allocation7 + $0x140] sm:$0xff] %v8948_v21 }
 0x637   :  { %v8952_v63 = vpop.f32.mrf.mxu1 }
 0x638   :  { %v8953_v61 = vadd.f32 %v14631_v56, %v8952_v63 }
 0x639   :  { %v8954_v39 = vpop.f32.mrf.mxu1 }
 0x63a   :  { %9037 = vst [vmem:[#allocation7 + $0x148] sm:$0xff] %v8953_v61 }
 0x63b   :  { %v8957_v50 = vpop.f32.mrf.mxu1 }
 0x63c   :  { %v8958_v0 = vadd.f32 %v14631_v56, %v8957_v50 }
 0x63d   :  { %v8959_v28 = vpop.f32.mrf.mxu1 }
 0x63e   :  { %9038 = vst [vmem:[#allocation7 + $0x150] sm:$0xff] %v8958_v0 }
 0x63f   :  { %v8962_v22 = vpop.f32.mrf.mxu1 }
 0x640   :  { %v8963_v20 = vadd.f32 %v14631_v56, %v8962_v22 }
 0x641   :  { %v8964_v36 = vpop.f32.mrf.mxu1 }
 0x642   :  { %9039 = vst [vmem:[#allocation7 + $0x158] sm:$0xff] %v8963_v20 }
 0x643   :  { %v8967_v26 = vpop.f32.mrf.mxu1 }
 0x644   :  { %v8968_v5 = vadd.f32 %v14631_v56, %v8967_v26 }
 0x645   :  { %v8969_v17 = vpop.f32.mrf.mxu1 }
 0x646   :  { %9040 = vst [vmem:[#allocation7 + $0x160] sm:$0xff] %v8968_v5 }
 0x647   :  { %v8972_v34 = vpop.f32.mrf.mxu1 }
 0x648   :  { %v8973_v24 = vadd.f32 %v14631_v56, %v8972_v34 }
 0x649   :  { %v8974_v46 = vpop.f32.mrf.mxu1 }
 0x64a   :  { %9041 = vst [vmem:[#allocation7 + $0x168] sm:$0xff] %v8973_v24 }
 0x64b   :  { %v8977_v4 = vpop.f32.mrf.mxu1 }
 0x64c   :  { %v8978_v57 = vadd.f32 %v14631_v56, %v8977_v4 }
 0x64d   :  { %v8979_v41 = vpop.f32.mrf.mxu1 }
 0x64e   :  { %9042 = vst [vmem:[#allocation7 + $0x170] sm:$0xff] %v8978_v57 }
 0x64f   :  { %v8982_v53 = vpop.f32.mrf.mxu1 }
 0x650   :  { %v8983_v6 = vadd.f32 %v14631_v56, %v8982_v53 }
 0x651   :  { %v8984_v2 = vpop.f32.mrf.mxu1 }
 0x652   :  { %9043 = vst [vmem:[#allocation7 + $0x178] sm:$0xff] %v8983_v6 }
 0x653   :  { %v8987_v38 = vpop.f32.mrf.mxu1 }
 0x654   :  { %v8988_v52 = vadd.f32 %v14631_v56, %v8987_v38 }
 0x655   :  { %v8989_v60 = vpop.f32.mrf.mxu1 }
 0x656   :  { %9044 = vst [vmem:[#allocation7 + $0x180] sm:$0xff] %v8988_v52 }
 0x657   :  { %v8992_v10 = vpop.f32.mrf.mxu1 }
 0x658   :  { %v8993_v25 = vadd.f32 %v14631_v56, %v8992_v10 }
 0x659   :  { %v8994_v44 = vpop.f32.mrf.mxu1 }
 0x65a   :  { %9045 = vst [vmem:[#allocation7 + $0x188] sm:$0xff] %v8993_v25 }
 0x65b   :  { %10044 = shalt.err (!%p10041_p0)
}
 0x65c   :  { %9057 = dma.vmem_to_hbm [thread:$0]  %s9052_s6, 6400, %s14707_s4, [#allocation4], %s10063_s25, %s10063_s25, %s10064_s26  }
 0x65d   :  { %10057 = dma.done.wait [#allocation4], 6400  }
 0x65e   :  { %10058 = vsyncadd [#allocation4], 4294960896 }
 0x65f   :  { %9061 = vsyncpa [#allocation3], 1 }
 0x660   :  { %9062 = vsyncpa [#allocation6], 1 }
 0x661   :  { %9063 = vsyncpa [#allocation4], 1 }

</bundles_post_ra>
